<compile_context>
chip_gen: v5e
topology: v5e:2x2
jax: 0.10.0
libtpu: 0.0.40
codegen_flags: <defaults>
</compile_context>

<pallas_src>
import math
import jax
import jax.numpy as jnp
from jax.experimental import pallas as pl

# ---- small configuration consistent with the LMDA module ----
B = 2            # batch
DEPTH = 4        # 'depth' (virtual channels produced by channel_weight)
CHANS = 16       # EEG channels (<= 62, so x[:, :, :62, :] is a no-op)
SAMPLES = 64     # time samples
KERNEL = 15      # temporal depthwise kernel length
CH1 = 8          # channel_depth1
CH2 = 8          # channel_depth2
AVEPOOL = 4
NUM_CLASSES = 2
KATT = 7         # EEGDepthAttention conv kernel
BN_EPS = 1e-5

WOUT = SAMPLES - KERNEL + 1   # width after 'valid' temporal conv         = 50
WP = WOUT // AVEPOOL          # width after AvgPool3d((1,1,avepool))      = 12
FEAT = CH2 * WP               # flattened feature size for the classifier = 96


def _erf(x):
    # Abramowitz & Stegun 7.1.26, max abs error ~1.5e-7 (basic VPU/EUP ops only).
    a1, a2, a3, a4, a5 = 0.254829592, -0.284496736, 1.421413741, -1.453152027, 1.061405429
    p = 0.3275911
    ax = jnp.abs(x)
    t = 1.0 / (1.0 + p * ax)
    poly = ((((a5 * t + a4) * t + a3) * t + a2) * t + a1) * t
    y = 1.0 - poly * jnp.exp(-ax * ax)
    return jnp.where(x >= 0.0, y, -y)


def _gelu(x):
    # exact (erf-based) GELU, matching PyTorch nn.GELU() default
    return 0.5 * x * (1.0 + _erf(x * (1.0 / math.sqrt(2.0))))


def _lmda_kernel(x_ref, m_ref, wdt_ref, attp_ref, wcc_ref, wce_ref, bc_ref, out_ref):
    """Single invocation over the full batch; all weights pre-fused on host."""
    x = x_ref[...]            # (B, CHANS, SAMPLES)
    m = m_ref[...]            # (CH1, CHANS)  : BN1 . 1x1-conv . channel_weight
    wdt = wdt_ref[...]        # (CH1, KERNEL) : BN2 . depthwise temporal kernel

    # ---- time_conv: depthwise 'valid' temporal conv.  The pointwise channel
    # mix m[o, c] commutes with the conv over W, so it is applied once after. ----
    y = jnp.zeros((B, CH1, CHANS, WOUT), jnp.float32)
    for k in range(KERNEL):                                  # static unroll (15)
        xs = x[:, :, k:k + WOUT]                             # (B, CHANS, WOUT), shared over CH1
        y = y + wdt[:, k:k + 1][None, :, :, None] * xs[:, None, :, :]
    t2 = _gelu(m[None, :, :, None] * y)                      # (B, CH1, CHANS, WOUT)

    # ---- EEGDepthAttention: mean over EEG chans, k=7 'same' conv along W,
    # softmax along W (== torch Softmax(dim=-2) on the permuted (N,1,W,C)) ----
    xpool = jnp.mean(t2, axis=2)                             # (B, CH1, WOUT)
    zpad = jnp.zeros((B, CH1, KATT // 2), jnp.float32)
    padded = jnp.concatenate([zpad, xpool, zpad], axis=2)    # (B, CH1, WOUT+6)
    attp = attp_ref[...]                                     # (1, KATT+1): taps + bias
    att = jnp.zeros((B, CH1, WOUT), jnp.float32) + attp[0:1, KATT:KATT + 1]
    for j in range(KATT):                                    # static unroll (7)
        att = att + attp[0:1, j:j + 1] * padded[:, :, j:j + WOUT]
    att = att - jnp.max(att, axis=2, keepdims=True)
    e = jnp.exp(att)
    sm = e * pl.reciprocal(jnp.sum(e, axis=2, keepdims=True), approx=True)
    res = (float(CH1) * sm)[:, :, None, :] * t2              # (B, CH1, CHANS, WOUT)

    # ---- chanel_conv: (1x1 conv . BN3 . depthwise-(CHANS,1) conv . BN4) was
    # fused host-side into one (CH2, CH1*CHANS) weight -> one MXU matmul/sample ----
    wcc = wcc_ref[...]                                       # (CH2, CH1*CHANS) == (8, 128)
    res2 = res.reshape(B, CH1 * CHANS, WOUT)                 # layout-preserving merge (16 % 8 == 0)
    u2 = jnp.stack(
        [_gelu(jnp.dot(wcc, res2[b], preferred_element_type=jnp.float32))
         for b in range(B)], axis=0)                         # (B, CH2, WOUT)

    # ---- AvgPool + flatten + Linear folded into wce on the host ----
    wce = wce_ref[...]                                       # (NUM_CLASSES, CH2, WOUT)
    prod = wce[None, :, :, :] * u2[:, None, :, :]            # (B, NUM_CLASSES, CH2, WOUT)
    logits = jnp.sum(jnp.sum(prod, axis=3), axis=2) + bc_ref[...]   # (B, NUM_CLASSES)
    out_ref[...] = logits.astype(out_ref.dtype)


def _fuse_params(p):
    """Host-side, input-independent folding: BN scales into conv weights, the
    1x1 convs into their neighbours, avg-pool + flatten into the classifier.
    Assumes eval-mode BN with zero shift (fresh running stats, beta=0)."""
    m_f = p['s1'] * jnp.dot(p['wpt1'], p['cw'])                      # (CH1, CHANS)
    wdt_f = p['s2'] * p['wdt']                                       # (CH1, KERNEL)
    attp = jnp.concatenate([p['attw'], p['attb']], axis=1)           # (1, KATT+1)
    wcc = (p['s3'] * p['s4'])[:, :, None] * p['wpt2'][:, :, None] * p['wds'][:, None, :]
    wcc = wcc.reshape(CH2, CH1 * CHANS)                              # (CH2, CH1*CHANS)
    wce = jnp.repeat(p['wc'].reshape(NUM_CLASSES, CH2, WP), AVEPOOL, axis=2) / AVEPOOL
    wce = jnp.pad(wce, ((0, 0), (0, 0), (0, WOUT - WP * AVEPOOL)))   # (N, CH2, WOUT)
    bc = p['bc'].reshape(1, NUM_CLASSES)
    return m_f, wdt_f, attp, wcc, wce, bc


@jax.jit
def lmda_forward(x, p):
    """x: (B, 1, CHANS, SAMPLES) NCHW float32 -> (B, NUM_CLASSES) logits."""
    x = x[:, :, :62, :]               # matches the PyTorch forward slice (no-op here)
    x2 = x[:, 0, :, :]                # squeeze singleton depth axis -> (B, CHANS, SAMPLES)
    m_f, wdt_f, attp, wcc, wce, bc = _fuse_params(p)
    return pl.pallas_call(
        _lmda_kernel,
        out_shape=jax.ShapeDtypeStruct((B, NUM_CLASSES), jnp.float32),
        # No grid: the whole batch is processed in one invocation; every operand
        # fits comfortably in VMEM as a full-array block (default BlockSpecs).
    )(x2, m_f, wdt_f, attp, wcc, wce, bc)


def init_params(key):
    ks = jax.random.split(key, 7)

    def xavier(k, shape, fan_in, fan_out):
        bound = math.sqrt(6.0 / (fan_in + fan_out))
        return jax.random.uniform(k, shape, jnp.float32, -bound, bound)

    cw3 = xavier(ks[0], (DEPTH, 1, CHANS), CHANS, DEPTH * CHANS)      # channel_weight
    wpt1 = xavier(ks[1], (CH1, DEPTH), DEPTH, CH1)                    # Conv2d(depth, ch1, 1x1)
    wdt = xavier(ks[2], (CH1, KERNEL), KERNEL, CH1 * KERNEL)          # depthwise (1, kernel)
    attw = xavier(ks[3], (1, KATT), KATT, KATT)                       # Conv2d(1,1,(7,1))
    attb = jnp.zeros((1, 1), jnp.float32)                             # zero-init bias
    wpt2 = xavier(ks[4], (CH2, CH1), CH1, CH2)                        # Conv2d(ch1, ch2, 1x1)
    wds = xavier(ks[5], (CH2, CHANS), CHANS, CH2 * CHANS)             # depthwise (chans, 1)
    wc = xavier(ks[6], (NUM_CLASSES, FEAT), FEAT, NUM_CLASSES)        # Linear
    bc = jnp.zeros((NUM_CLASSES,), jnp.float32)

    bn_scale = 1.0 / math.sqrt(1.0 + BN_EPS)   # eval BN: gamma=1, beta=0, mean=0, var=1
    s = lambda n: jnp.full((n, 1), bn_scale, jnp.float32)
    z = lambda n: jnp.zeros((n, 1), jnp.float32)

    return dict(cw3=cw3, cw=cw3[:, 0, :], wpt1=wpt1, wdt=wdt, attw=attw, attb=attb,
                wpt2=wpt2, wds=wds, wc=wc, bc=bc,
                s1=s(CH1), b1=z(CH1), s2=s(CH1), b2=z(CH1),
                s3=s(CH2), b3=z(CH2), s4=s(CH2), b4=z(CH2))


def lmda_reference(x, p):
    """Pure-JAX, un-fused reference of the same forward pass (for validation)."""
    n = x.shape[0]
    x = x[:, :, :62, :]
    xe = jnp.einsum('bdcw,hdc->bhcw', x, p['cw3'])                    # (B, DEPTH, CHANS, SAMPLES)
    t = jnp.einsum('oh,bhcw->bocw', p['wpt1'], xe)                    # 1x1 conv
    t = t * p['s1'].reshape(1, -1, 1, 1) + p['b1'].reshape(1, -1, 1, 1)
    acc = jnp.zeros((n, CH1, CHANS, WOUT), jnp.float32)
    for k in range(KERNEL):
        acc = acc + t[:, :, :, k:k + WOUT] * p['wdt'][None, :, None, k:k + 1]
    t2 = _gelu(acc * p['s2'].reshape(1, -1, 1, 1) + p['b2'].reshape(1, -1, 1, 1))
    xpool = jnp.mean(t2, axis=2)                                      # (B, CH1, WOUT)
    padded = jnp.pad(xpool, ((0, 0), (0, 0), (KATT // 2, KATT // 2)))
    att = p['attb'].reshape(()) + sum(padded[:, :, j:j + WOUT] * p['attw'][0, j]
                                      for j in range(KATT))
    sm = jax.nn.softmax(att, axis=-1)
    res = sm[:, :, None, :] * float(CH1) * t2
    u1 = jnp.einsum('po,bocw->bpcw', p['wpt2'], res)
    u1 = u1 * p['s3'].reshape(1, -1, 1, 1) + p['b3'].reshape(1, -1, 1, 1)
    u2 = jnp.einsum('bpcw,pc->bpw', u1, p['wds'])
    u2 = _gelu(u2 * p['s4'].reshape(1, -1, 1) + p['b4'].reshape(1, -1, 1))
    pooled = u2[:, :, :WP * AVEPOOL].reshape(n, CH2, WP, AVEPOOL).mean(-1)
    feats = pooled.reshape(n, -1)
    return feats @ p['wc'].T + p['bc'][None, :]


if __name__ == "__main__":
    key = jax.random.PRNGKey(0)
    kx, kp = jax.random.split(key)
    x = jax.random.normal(kx, (B, 1, CHANS, SAMPLES), jnp.float32)
    params = init_params(kp)

    out = jax.block_until_ready(lmda_forward(x, params))
    ref = jax.block_until_ready(lmda_reference(x, params))

    assert out.shape == (B, NUM_CLASSES), out.shape
    # 2e-3 tolerance: covers the approx EUP reciprocal in the softmax plus the
    # (tiny) rounding differences from host-side weight fusion.
    if not bool(jnp.allclose(out, ref, rtol=2e-3, atol=2e-3)):
        raise AssertionError(f"Pallas vs reference mismatch:\n{out}\n{ref}")
    print("KERNEL_OK")
</pallas_src>

<mosaic_0001>
module attributes {stable_mosaic.version = 11 : i64} {
  func.func @_lmda_kernel(%arg0: memref<2x16x64xf32, #tpu.memory_space<vmem>>, %arg1: memref<8x16xf32, #tpu.memory_space<vmem>>, %arg2: memref<8x15xf32, #tpu.memory_space<vmem>>, %arg3: memref<1x8xf32, #tpu.memory_space<vmem>>, %arg4: memref<8x128xf32, #tpu.memory_space<vmem>>, %arg5: memref<2x8x50xf32, #tpu.memory_space<vmem>>, %arg6: memref<1x2xf32, #tpu.memory_space<vmem>>, %arg7: memref<2x2xf32, #tpu.memory_space<vmem>>) attributes {dimension_semantics = [], scalar_prefetch = 0 : i64, scratch_operands = 0 : i64, tpu.core_type = #tpu.core_type<tc>} {
    %c0 = arith.constant 0 : index
    %c0_0 = arith.constant 0 : index
    %c0_1 = arith.constant 0 : index
    %0 = vector.load %arg0[%c0, %c0_0, %c0_1] : memref<2x16x64xf32, #tpu.memory_space<vmem>>, vector<2x16x64xf32>
    %c0_2 = arith.constant 0 : index
    %c0_3 = arith.constant 0 : index
    %1 = vector.load %arg1[%c0_2, %c0_3] : memref<8x16xf32, #tpu.memory_space<vmem>>, vector<8x16xf32>
    %c0_4 = arith.constant 0 : index
    %c0_5 = arith.constant 0 : index
    %2 = vector.load %arg2[%c0_4, %c0_5] : memref<8x15xf32, #tpu.memory_space<vmem>>, vector<8x15xf32>
    %cst = arith.constant 0.000000e+00 : f32
    %3 = vector.broadcast %cst : f32 to vector<2x8x16x50xf32>
    %4 = vector.extract_strided_slice %0 {offsets = [0, 0, 0], sizes = [2, 16, 50], strides = [1, 1, 1]} : vector<2x16x64xf32> to vector<2x16x50xf32>
    %5 = vector.extract_strided_slice %2 {offsets = [0, 0], sizes = [8, 1], strides = [1, 1]} : vector<8x15xf32> to vector<8x1xf32>
    %6 = vector.shape_cast %5 : vector<8x1xf32> to vector<1x8x1x1xf32>
    %7 = vector.shape_cast %4 : vector<2x16x50xf32> to vector<2x1x16x50xf32>
    %8 = vector.broadcast %6 : vector<1x8x1x1xf32> to vector<2x8x16x50xf32>
    %9 = vector.broadcast %7 : vector<2x1x16x50xf32> to vector<2x8x16x50xf32>
    %10 = arith.mulf %8, %9 : vector<2x8x16x50xf32>
    %11 = arith.addf %3, %10 : vector<2x8x16x50xf32>
    %12 = vector.extract_strided_slice %0 {offsets = [0, 0, 1], sizes = [2, 16, 50], strides = [1, 1, 1]} : vector<2x16x64xf32> to vector<2x16x50xf32>
    %13 = vector.extract_strided_slice %2 {offsets = [0, 1], sizes = [8, 1], strides = [1, 1]} : vector<8x15xf32> to vector<8x1xf32>
    %14 = vector.shape_cast %13 : vector<8x1xf32> to vector<1x8x1x1xf32>
    %15 = vector.shape_cast %12 : vector<2x16x50xf32> to vector<2x1x16x50xf32>
    %16 = vector.broadcast %14 : vector<1x8x1x1xf32> to vector<2x8x16x50xf32>
    %17 = vector.broadcast %15 : vector<2x1x16x50xf32> to vector<2x8x16x50xf32>
    %18 = arith.mulf %16, %17 : vector<2x8x16x50xf32>
    %19 = arith.addf %11, %18 : vector<2x8x16x50xf32>
    %20 = vector.extract_strided_slice %0 {offsets = [0, 0, 2], sizes = [2, 16, 50], strides = [1, 1, 1]} : vector<2x16x64xf32> to vector<2x16x50xf32>
    %21 = vector.extract_strided_slice %2 {offsets = [0, 2], sizes = [8, 1], strides = [1, 1]} : vector<8x15xf32> to vector<8x1xf32>
    %22 = vector.shape_cast %21 : vector<8x1xf32> to vector<1x8x1x1xf32>
    %23 = vector.shape_cast %20 : vector<2x16x50xf32> to vector<2x1x16x50xf32>
    %24 = vector.broadcast %22 : vector<1x8x1x1xf32> to vector<2x8x16x50xf32>
    %25 = vector.broadcast %23 : vector<2x1x16x50xf32> to vector<2x8x16x50xf32>
    %26 = arith.mulf %24, %25 : vector<2x8x16x50xf32>
    %27 = arith.addf %19, %26 : vector<2x8x16x50xf32>
    %28 = vector.extract_strided_slice %0 {offsets = [0, 0, 3], sizes = [2, 16, 50], strides = [1, 1, 1]} : vector<2x16x64xf32> to vector<2x16x50xf32>
    %29 = vector.extract_strided_slice %2 {offsets = [0, 3], sizes = [8, 1], strides = [1, 1]} : vector<8x15xf32> to vector<8x1xf32>
    %30 = vector.shape_cast %29 : vector<8x1xf32> to vector<1x8x1x1xf32>
    %31 = vector.shape_cast %28 : vector<2x16x50xf32> to vector<2x1x16x50xf32>
    %32 = vector.broadcast %30 : vector<1x8x1x1xf32> to vector<2x8x16x50xf32>
    %33 = vector.broadcast %31 : vector<2x1x16x50xf32> to vector<2x8x16x50xf32>
    %34 = arith.mulf %32, %33 : vector<2x8x16x50xf32>
    %35 = arith.addf %27, %34 : vector<2x8x16x50xf32>
    %36 = vector.extract_strided_slice %0 {offsets = [0, 0, 4], sizes = [2, 16, 50], strides = [1, 1, 1]} : vector<2x16x64xf32> to vector<2x16x50xf32>
    %37 = vector.extract_strided_slice %2 {offsets = [0, 4], sizes = [8, 1], strides = [1, 1]} : vector<8x15xf32> to vector<8x1xf32>
    %38 = vector.shape_cast %37 : vector<8x1xf32> to vector<1x8x1x1xf32>
    %39 = vector.shape_cast %36 : vector<2x16x50xf32> to vector<2x1x16x50xf32>
    %40 = vector.broadcast %38 : vector<1x8x1x1xf32> to vector<2x8x16x50xf32>
    %41 = vector.broadcast %39 : vector<2x1x16x50xf32> to vector<2x8x16x50xf32>
    %42 = arith.mulf %40, %41 : vector<2x8x16x50xf32>
    %43 = arith.addf %35, %42 : vector<2x8x16x50xf32>
    %44 = vector.extract_strided_slice %0 {offsets = [0, 0, 5], sizes = [2, 16, 50], strides = [1, 1, 1]} : vector<2x16x64xf32> to vector<2x16x50xf32>
    %45 = vector.extract_strided_slice %2 {offsets = [0, 5], sizes = [8, 1], strides = [1, 1]} : vector<8x15xf32> to vector<8x1xf32>
    %46 = vector.shape_cast %45 : vector<8x1xf32> to vector<1x8x1x1xf32>
    %47 = vector.shape_cast %44 : vector<2x16x50xf32> to vector<2x1x16x50xf32>
    %48 = vector.broadcast %46 : vector<1x8x1x1xf32> to vector<2x8x16x50xf32>
    %49 = vector.broadcast %47 : vector<2x1x16x50xf32> to vector<2x8x16x50xf32>
    %50 = arith.mulf %48, %49 : vector<2x8x16x50xf32>
    %51 = arith.addf %43, %50 : vector<2x8x16x50xf32>
    %52 = vector.extract_strided_slice %0 {offsets = [0, 0, 6], sizes = [2, 16, 50], strides = [1, 1, 1]} : vector<2x16x64xf32> to vector<2x16x50xf32>
    %53 = vector.extract_strided_slice %2 {offsets = [0, 6], sizes = [8, 1], strides = [1, 1]} : vector<8x15xf32> to vector<8x1xf32>
    %54 = vector.shape_cast %53 : vector<8x1xf32> to vector<1x8x1x1xf32>
    %55 = vector.shape_cast %52 : vector<2x16x50xf32> to vector<2x1x16x50xf32>
    %56 = vector.broadcast %54 : vector<1x8x1x1xf32> to vector<2x8x16x50xf32>
    %57 = vector.broadcast %55 : vector<2x1x16x50xf32> to vector<2x8x16x50xf32>
    %58 = arith.mulf %56, %57 : vector<2x8x16x50xf32>
    %59 = arith.addf %51, %58 : vector<2x8x16x50xf32>
    %60 = vector.extract_strided_slice %0 {offsets = [0, 0, 7], sizes = [2, 16, 50], strides = [1, 1, 1]} : vector<2x16x64xf32> to vector<2x16x50xf32>
    %61 = vector.extract_strided_slice %2 {offsets = [0, 7], sizes = [8, 1], strides = [1, 1]} : vector<8x15xf32> to vector<8x1xf32>
    %62 = vector.shape_cast %61 : vector<8x1xf32> to vector<1x8x1x1xf32>
    %63 = vector.shape_cast %60 : vector<2x16x50xf32> to vector<2x1x16x50xf32>
    %64 = vector.broadcast %62 : vector<1x8x1x1xf32> to vector<2x8x16x50xf32>
    %65 = vector.broadcast %63 : vector<2x1x16x50xf32> to vector<2x8x16x50xf32>
    %66 = arith.mulf %64, %65 : vector<2x8x16x50xf32>
    %67 = arith.addf %59, %66 : vector<2x8x16x50xf32>
    %68 = vector.extract_strided_slice %0 {offsets = [0, 0, 8], sizes = [2, 16, 50], strides = [1, 1, 1]} : vector<2x16x64xf32> to vector<2x16x50xf32>
    %69 = vector.extract_strided_slice %2 {offsets = [0, 8], sizes = [8, 1], strides = [1, 1]} : vector<8x15xf32> to vector<8x1xf32>
    %70 = vector.shape_cast %69 : vector<8x1xf32> to vector<1x8x1x1xf32>
    %71 = vector.shape_cast %68 : vector<2x16x50xf32> to vector<2x1x16x50xf32>
    %72 = vector.broadcast %70 : vector<1x8x1x1xf32> to vector<2x8x16x50xf32>
    %73 = vector.broadcast %71 : vector<2x1x16x50xf32> to vector<2x8x16x50xf32>
    %74 = arith.mulf %72, %73 : vector<2x8x16x50xf32>
    %75 = arith.addf %67, %74 : vector<2x8x16x50xf32>
    %76 = vector.extract_strided_slice %0 {offsets = [0, 0, 9], sizes = [2, 16, 50], strides = [1, 1, 1]} : vector<2x16x64xf32> to vector<2x16x50xf32>
    %77 = vector.extract_strided_slice %2 {offsets = [0, 9], sizes = [8, 1], strides = [1, 1]} : vector<8x15xf32> to vector<8x1xf32>
    %78 = vector.shape_cast %77 : vector<8x1xf32> to vector<1x8x1x1xf32>
    %79 = vector.shape_cast %76 : vector<2x16x50xf32> to vector<2x1x16x50xf32>
    %80 = vector.broadcast %78 : vector<1x8x1x1xf32> to vector<2x8x16x50xf32>
    %81 = vector.broadcast %79 : vector<2x1x16x50xf32> to vector<2x8x16x50xf32>
    %82 = arith.mulf %80, %81 : vector<2x8x16x50xf32>
    %83 = arith.addf %75, %82 : vector<2x8x16x50xf32>
    %84 = vector.extract_strided_slice %0 {offsets = [0, 0, 10], sizes = [2, 16, 50], strides = [1, 1, 1]} : vector<2x16x64xf32> to vector<2x16x50xf32>
    %85 = vector.extract_strided_slice %2 {offsets = [0, 10], sizes = [8, 1], strides = [1, 1]} : vector<8x15xf32> to vector<8x1xf32>
    %86 = vector.shape_cast %85 : vector<8x1xf32> to vector<1x8x1x1xf32>
    %87 = vector.shape_cast %84 : vector<2x16x50xf32> to vector<2x1x16x50xf32>
    %88 = vector.broadcast %86 : vector<1x8x1x1xf32> to vector<2x8x16x50xf32>
    %89 = vector.broadcast %87 : vector<2x1x16x50xf32> to vector<2x8x16x50xf32>
    %90 = arith.mulf %88, %89 : vector<2x8x16x50xf32>
    %91 = arith.addf %83, %90 : vector<2x8x16x50xf32>
    %92 = vector.extract_strided_slice %0 {offsets = [0, 0, 11], sizes = [2, 16, 50], strides = [1, 1, 1]} : vector<2x16x64xf32> to vector<2x16x50xf32>
    %93 = vector.extract_strided_slice %2 {offsets = [0, 11], sizes = [8, 1], strides = [1, 1]} : vector<8x15xf32> to vector<8x1xf32>
    %94 = vector.shape_cast %93 : vector<8x1xf32> to vector<1x8x1x1xf32>
    %95 = vector.shape_cast %92 : vector<2x16x50xf32> to vector<2x1x16x50xf32>
    %96 = vector.broadcast %94 : vector<1x8x1x1xf32> to vector<2x8x16x50xf32>
    %97 = vector.broadcast %95 : vector<2x1x16x50xf32> to vector<2x8x16x50xf32>
    %98 = arith.mulf %96, %97 : vector<2x8x16x50xf32>
    %99 = arith.addf %91, %98 : vector<2x8x16x50xf32>
    %100 = vector.extract_strided_slice %0 {offsets = [0, 0, 12], sizes = [2, 16, 50], strides = [1, 1, 1]} : vector<2x16x64xf32> to vector<2x16x50xf32>
    %101 = vector.extract_strided_slice %2 {offsets = [0, 12], sizes = [8, 1], strides = [1, 1]} : vector<8x15xf32> to vector<8x1xf32>
    %102 = vector.shape_cast %101 : vector<8x1xf32> to vector<1x8x1x1xf32>
    %103 = vector.shape_cast %100 : vector<2x16x50xf32> to vector<2x1x16x50xf32>
    %104 = vector.broadcast %102 : vector<1x8x1x1xf32> to vector<2x8x16x50xf32>
    %105 = vector.broadcast %103 : vector<2x1x16x50xf32> to vector<2x8x16x50xf32>
    %106 = arith.mulf %104, %105 : vector<2x8x16x50xf32>
    %107 = arith.addf %99, %106 : vector<2x8x16x50xf32>
    %108 = vector.extract_strided_slice %0 {offsets = [0, 0, 13], sizes = [2, 16, 50], strides = [1, 1, 1]} : vector<2x16x64xf32> to vector<2x16x50xf32>
    %109 = vector.extract_strided_slice %2 {offsets = [0, 13], sizes = [8, 1], strides = [1, 1]} : vector<8x15xf32> to vector<8x1xf32>
    %110 = vector.shape_cast %109 : vector<8x1xf32> to vector<1x8x1x1xf32>
    %111 = vector.shape_cast %108 : vector<2x16x50xf32> to vector<2x1x16x50xf32>
    %112 = vector.broadcast %110 : vector<1x8x1x1xf32> to vector<2x8x16x50xf32>
    %113 = vector.broadcast %111 : vector<2x1x16x50xf32> to vector<2x8x16x50xf32>
    %114 = arith.mulf %112, %113 : vector<2x8x16x50xf32>
    %115 = arith.addf %107, %114 : vector<2x8x16x50xf32>
    %116 = vector.extract_strided_slice %0 {offsets = [0, 0, 14], sizes = [2, 16, 50], strides = [1, 1, 1]} : vector<2x16x64xf32> to vector<2x16x50xf32>
    %117 = vector.extract_strided_slice %2 {offsets = [0, 14], sizes = [8, 1], strides = [1, 1]} : vector<8x15xf32> to vector<8x1xf32>
    %118 = vector.shape_cast %117 : vector<8x1xf32> to vector<1x8x1x1xf32>
    %119 = vector.shape_cast %116 : vector<2x16x50xf32> to vector<2x1x16x50xf32>
    %120 = vector.broadcast %118 : vector<1x8x1x1xf32> to vector<2x8x16x50xf32>
    %121 = vector.broadcast %119 : vector<2x1x16x50xf32> to vector<2x8x16x50xf32>
    %122 = arith.mulf %120, %121 : vector<2x8x16x50xf32>
    %123 = arith.addf %115, %122 : vector<2x8x16x50xf32>
    %124 = vector.shape_cast %1 : vector<8x16xf32> to vector<1x8x16x1xf32>
    %125 = vector.broadcast %124 : vector<1x8x16x1xf32> to vector<2x8x16x50xf32>
    %126 = arith.mulf %125, %123 : vector<2x8x16x50xf32>
    %cst_6 = arith.constant 5.000000e-01 : f32
    %127 = vector.broadcast %cst_6 : f32 to vector<2x8x16x50xf32>
    %128 = arith.mulf %127, %126 : vector<2x8x16x50xf32>
    %cst_7 = arith.constant 0.707106769 : f32
    %129 = vector.broadcast %cst_7 : f32 to vector<2x8x16x50xf32>
    %130 = arith.mulf %126, %129 : vector<2x8x16x50xf32>
    %131 = math.absf %130 : vector<2x8x16x50xf32>
    %cst_8 = arith.constant 0.327591091 : f32
    %132 = vector.broadcast %cst_8 : f32 to vector<2x8x16x50xf32>
    %133 = arith.mulf %132, %131 : vector<2x8x16x50xf32>
    %cst_9 = arith.constant 1.000000e+00 : f32
    %134 = vector.broadcast %cst_9 : f32 to vector<2x8x16x50xf32>
    %135 = arith.addf %134, %133 : vector<2x8x16x50xf32>
    %cst_10 = arith.constant 1.000000e+00 : f32
    %136 = vector.broadcast %cst_10 : f32 to vector<2x8x16x50xf32>
    %137 = arith.divf %136, %135 : vector<2x8x16x50xf32>
    %cst_11 = arith.constant 1.06140542 : f32
    %138 = vector.broadcast %cst_11 : f32 to vector<2x8x16x50xf32>
    %139 = arith.mulf %138, %137 : vector<2x8x16x50xf32>
    %cst_12 = arith.constant -1.45315206 : f32
    %140 = vector.broadcast %cst_12 : f32 to vector<2x8x16x50xf32>
    %141 = arith.addf %139, %140 : vector<2x8x16x50xf32>
    %142 = arith.mulf %141, %137 : vector<2x8x16x50xf32>
    %cst_13 = arith.constant 1.42141378 : f32
    %143 = vector.broadcast %cst_13 : f32 to vector<2x8x16x50xf32>
    %144 = arith.addf %142, %143 : vector<2x8x16x50xf32>
    %145 = arith.mulf %144, %137 : vector<2x8x16x50xf32>
    %cst_14 = arith.constant -0.284496725 : f32
    %146 = vector.broadcast %cst_14 : f32 to vector<2x8x16x50xf32>
    %147 = arith.addf %145, %146 : vector<2x8x16x50xf32>
    %148 = arith.mulf %147, %137 : vector<2x8x16x50xf32>
    %cst_15 = arith.constant 0.254829586 : f32
    %149 = vector.broadcast %cst_15 : f32 to vector<2x8x16x50xf32>
    %150 = arith.addf %148, %149 : vector<2x8x16x50xf32>
    %151 = arith.mulf %150, %137 : vector<2x8x16x50xf32>
    %cst_16 = arith.constant 0.000000e+00 : f32
    %152 = vector.broadcast %cst_16 : f32 to vector<2x8x16x50xf32>
    %153 = arith.subf %152, %131 : vector<2x8x16x50xf32>
    %154 = arith.mulf %153, %131 : vector<2x8x16x50xf32>
    %155 = math.exp %154 : vector<2x8x16x50xf32>
    %156 = arith.mulf %151, %155 : vector<2x8x16x50xf32>
    %cst_17 = arith.constant 1.000000e+00 : f32
    %157 = vector.broadcast %cst_17 : f32 to vector<2x8x16x50xf32>
    %158 = arith.subf %157, %156 : vector<2x8x16x50xf32>
    %cst_18 = arith.constant 0.000000e+00 : f32
    %159 = vector.broadcast %cst_18 : f32 to vector<2x8x16x50xf32>
    %160 = arith.cmpf oge, %130, %159 : vector<2x8x16x50xf32>
    %cst_19 = arith.constant 0.000000e+00 : f32
    %161 = vector.broadcast %cst_19 : f32 to vector<2x8x16x50xf32>
    %162 = arith.subf %161, %158 : vector<2x8x16x50xf32>
    %163 = arith.select %160, %158, %162 : vector<2x8x16x50xi1>, vector<2x8x16x50xf32>
    %cst_20 = arith.constant 1.000000e+00 : f32
    %164 = vector.broadcast %cst_20 : f32 to vector<2x8x16x50xf32>
    %165 = arith.addf %164, %163 : vector<2x8x16x50xf32>
    %166 = arith.mulf %128, %165 : vector<2x8x16x50xf32>
    %cst_21 = arith.constant dense<0.000000e+00> : vector<2x8x50xf32>
    %167 = vector.multi_reduction <add>, %166, %cst_21 [2] : vector<2x8x16x50xf32> to vector<2x8x50xf32>
    %cst_22 = arith.constant 1.600000e+01 : f32
    %168 = vector.broadcast %cst_22 : f32 to vector<2x8x50xf32>
    %169 = arith.divf %167, %168 : vector<2x8x50xf32>
    %cst_23 = arith.constant 0.000000e+00 : f32
    %170 = vector.broadcast %cst_23 : f32 to vector<2x8x3xf32>
    %171 = tpu.concatenate %170, %169, %170 in 2 : vector<2x8x3xf32>, vector<2x8x50xf32>, vector<2x8x3xf32> -> vector<2x8x56xf32>
    %c0_24 = arith.constant 0 : index
    %c0_25 = arith.constant 0 : index
    %172 = vector.load %arg3[%c0_24, %c0_25] : memref<1x8xf32, #tpu.memory_space<vmem>>, vector<1x8xf32>
    %cst_26 = arith.constant 0.000000e+00 : f32
    %173 = vector.broadcast %cst_26 : f32 to vector<2x8x50xf32>
    %174 = vector.extract_strided_slice %172 {offsets = [0, 7], sizes = [1, 1], strides = [1, 1]} : vector<1x8xf32> to vector<1x1xf32>
    %175 = vector.shape_cast %174 : vector<1x1xf32> to vector<1x1x1xf32>
    %176 = vector.broadcast %175 : vector<1x1x1xf32> to vector<2x8x50xf32>
    %177 = arith.addf %173, %176 : vector<2x8x50xf32>
    %178 = vector.extract_strided_slice %172 {offsets = [0, 0], sizes = [1, 1], strides = [1, 1]} : vector<1x8xf32> to vector<1x1xf32>
    %179 = vector.extract_strided_slice %171 {offsets = [0, 0, 0], sizes = [2, 8, 50], strides = [1, 1, 1]} : vector<2x8x56xf32> to vector<2x8x50xf32>
    %180 = vector.shape_cast %178 : vector<1x1xf32> to vector<1x1x1xf32>
    %181 = vector.broadcast %180 : vector<1x1x1xf32> to vector<2x8x50xf32>
    %182 = arith.mulf %181, %179 : vector<2x8x50xf32>
    %183 = arith.addf %177, %182 : vector<2x8x50xf32>
    %184 = vector.extract_strided_slice %172 {offsets = [0, 1], sizes = [1, 1], strides = [1, 1]} : vector<1x8xf32> to vector<1x1xf32>
    %185 = vector.extract_strided_slice %171 {offsets = [0, 0, 1], sizes = [2, 8, 50], strides = [1, 1, 1]} : vector<2x8x56xf32> to vector<2x8x50xf32>
    %186 = vector.shape_cast %184 : vector<1x1xf32> to vector<1x1x1xf32>
    %187 = vector.broadcast %186 : vector<1x1x1xf32> to vector<2x8x50xf32>
    %188 = arith.mulf %187, %185 : vector<2x8x50xf32>
    %189 = arith.addf %183, %188 : vector<2x8x50xf32>
    %190 = vector.extract_strided_slice %172 {offsets = [0, 2], sizes = [1, 1], strides = [1, 1]} : vector<1x8xf32> to vector<1x1xf32>
    %191 = vector.extract_strided_slice %171 {offsets = [0, 0, 2], sizes = [2, 8, 50], strides = [1, 1, 1]} : vector<2x8x56xf32> to vector<2x8x50xf32>
    %192 = vector.shape_cast %190 : vector<1x1xf32> to vector<1x1x1xf32>
    %193 = vector.broadcast %192 : vector<1x1x1xf32> to vector<2x8x50xf32>
    %194 = arith.mulf %193, %191 : vector<2x8x50xf32>
    %195 = arith.addf %189, %194 : vector<2x8x50xf32>
    %196 = vector.extract_strided_slice %172 {offsets = [0, 3], sizes = [1, 1], strides = [1, 1]} : vector<1x8xf32> to vector<1x1xf32>
    %197 = vector.extract_strided_slice %171 {offsets = [0, 0, 3], sizes = [2, 8, 50], strides = [1, 1, 1]} : vector<2x8x56xf32> to vector<2x8x50xf32>
    %198 = vector.shape_cast %196 : vector<1x1xf32> to vector<1x1x1xf32>
    %199 = vector.broadcast %198 : vector<1x1x1xf32> to vector<2x8x50xf32>
    %200 = arith.mulf %199, %197 : vector<2x8x50xf32>
    %201 = arith.addf %195, %200 : vector<2x8x50xf32>
    %202 = vector.extract_strided_slice %172 {offsets = [0, 4], sizes = [1, 1], strides = [1, 1]} : vector<1x8xf32> to vector<1x1xf32>
    %203 = vector.extract_strided_slice %171 {offsets = [0, 0, 4], sizes = [2, 8, 50], strides = [1, 1, 1]} : vector<2x8x56xf32> to vector<2x8x50xf32>
    %204 = vector.shape_cast %202 : vector<1x1xf32> to vector<1x1x1xf32>
    %205 = vector.broadcast %204 : vector<1x1x1xf32> to vector<2x8x50xf32>
    %206 = arith.mulf %205, %203 : vector<2x8x50xf32>
    %207 = arith.addf %201, %206 : vector<2x8x50xf32>
    %208 = vector.extract_strided_slice %172 {offsets = [0, 5], sizes = [1, 1], strides = [1, 1]} : vector<1x8xf32> to vector<1x1xf32>
    %209 = vector.extract_strided_slice %171 {offsets = [0, 0, 5], sizes = [2, 8, 50], strides = [1, 1, 1]} : vector<2x8x56xf32> to vector<2x8x50xf32>
    %210 = vector.shape_cast %208 : vector<1x1xf32> to vector<1x1x1xf32>
    %211 = vector.broadcast %210 : vector<1x1x1xf32> to vector<2x8x50xf32>
    %212 = arith.mulf %211, %209 : vector<2x8x50xf32>
    %213 = arith.addf %207, %212 : vector<2x8x50xf32>
    %214 = vector.extract_strided_slice %172 {offsets = [0, 6], sizes = [1, 1], strides = [1, 1]} : vector<1x8xf32> to vector<1x1xf32>
    %215 = vector.extract_strided_slice %171 {offsets = [0, 0, 6], sizes = [2, 8, 50], strides = [1, 1, 1]} : vector<2x8x56xf32> to vector<2x8x50xf32>
    %216 = vector.shape_cast %214 : vector<1x1xf32> to vector<1x1x1xf32>
    %217 = vector.broadcast %216 : vector<1x1x1xf32> to vector<2x8x50xf32>
    %218 = arith.mulf %217, %215 : vector<2x8x50xf32>
    %219 = arith.addf %213, %218 : vector<2x8x50xf32>
    %cst_27 = arith.constant dense<0xFF800000> : vector<2x8xf32>
    %220 = vector.multi_reduction <maximumf>, %219, %cst_27 [2] : vector<2x8x50xf32> to vector<2x8xf32>
    %221 = vector.shape_cast %220 : vector<2x8xf32> to vector<2x8x1xf32>
    %222 = vector.broadcast %221 : vector<2x8x1xf32> to vector<2x8x50xf32>
    %223 = arith.subf %219, %222 : vector<2x8x50xf32>
    %224 = math.exp %223 : vector<2x8x50xf32>
    %cst_28 = arith.constant dense<0.000000e+00> : vector<2x8xf32>
    %225 = vector.multi_reduction <add>, %224, %cst_28 [2] : vector<2x8x50xf32> to vector<2x8xf32>
    %226 = vector.shape_cast %225 : vector<2x8xf32> to vector<2x8x1xf32>
    %227 = tpu.reciprocal %226 {approx = true} : vector<2x8x1xf32> -> vector<2x8x1xf32>
    %228 = vector.broadcast %227 : vector<2x8x1xf32> to vector<2x8x50xf32>
    %229 = arith.mulf %224, %228 : vector<2x8x50xf32>
    %cst_29 = arith.constant 8.000000e+00 : f32
    %230 = vector.broadcast %cst_29 : f32 to vector<2x8x50xf32>
    %231 = arith.mulf %230, %229 : vector<2x8x50xf32>
    %232 = vector.shape_cast %231 : vector<2x8x50xf32> to vector<2x8x1x50xf32>
    %233 = vector.broadcast %232 : vector<2x8x1x50xf32> to vector<2x8x16x50xf32>
    %234 = arith.mulf %233, %166 : vector<2x8x16x50xf32>
    %c0_30 = arith.constant 0 : index
    %c0_31 = arith.constant 0 : index
    %235 = vector.load %arg4[%c0_30, %c0_31] : memref<8x128xf32, #tpu.memory_space<vmem>>, vector<8x128xf32>
    %236 = vector.shape_cast %234 : vector<2x8x16x50xf32> to vector<2x128x50xf32>
    %237 = vector.extract_strided_slice %236 {offsets = [0, 0, 0], sizes = [1, 128, 50], strides = [1, 1, 1]} : vector<2x128x50xf32> to vector<1x128x50xf32>
    %238 = vector.shape_cast %237 : vector<1x128x50xf32> to vector<128x50xf32>
    %cst_32 = arith.constant dense<0.000000e+00> : vector<8x50xf32>
    %239 = tpu.matmul %235, %238, %cst_32 {dimension_numbers = #tpu.dot_dimension_numbers<[1], [0], [0], [1], [0, 0, 1, 1], [], []>} : vector<8x128xf32>, vector<128x50xf32>, vector<8x50xf32> -> vector<8x50xf32>
    %cst_33 = arith.constant 5.000000e-01 : f32
    %240 = vector.broadcast %cst_33 : f32 to vector<8x50xf32>
    %241 = arith.mulf %240, %239 : vector<8x50xf32>
    %cst_34 = arith.constant 0.707106769 : f32
    %242 = vector.broadcast %cst_34 : f32 to vector<8x50xf32>
    %243 = arith.mulf %239, %242 : vector<8x50xf32>
    %244 = math.absf %243 : vector<8x50xf32>
    %cst_35 = arith.constant 0.327591091 : f32
    %245 = vector.broadcast %cst_35 : f32 to vector<8x50xf32>
    %246 = arith.mulf %245, %244 : vector<8x50xf32>
    %cst_36 = arith.constant 1.000000e+00 : f32
    %247 = vector.broadcast %cst_36 : f32 to vector<8x50xf32>
    %248 = arith.addf %247, %246 : vector<8x50xf32>
    %cst_37 = arith.constant 1.000000e+00 : f32
    %249 = vector.broadcast %cst_37 : f32 to vector<8x50xf32>
    %250 = arith.divf %249, %248 : vector<8x50xf32>
    %cst_38 = arith.constant 1.06140542 : f32
    %251 = vector.broadcast %cst_38 : f32 to vector<8x50xf32>
    %252 = arith.mulf %251, %250 : vector<8x50xf32>
    %cst_39 = arith.constant -1.45315206 : f32
    %253 = vector.broadcast %cst_39 : f32 to vector<8x50xf32>
    %254 = arith.addf %252, %253 : vector<8x50xf32>
    %255 = arith.mulf %254, %250 : vector<8x50xf32>
    %cst_40 = arith.constant 1.42141378 : f32
    %256 = vector.broadcast %cst_40 : f32 to vector<8x50xf32>
    %257 = arith.addf %255, %256 : vector<8x50xf32>
    %258 = arith.mulf %257, %250 : vector<8x50xf32>
    %cst_41 = arith.constant -0.284496725 : f32
    %259 = vector.broadcast %cst_41 : f32 to vector<8x50xf32>
    %260 = arith.addf %258, %259 : vector<8x50xf32>
    %261 = arith.mulf %260, %250 : vector<8x50xf32>
    %cst_42 = arith.constant 0.254829586 : f32
    %262 = vector.broadcast %cst_42 : f32 to vector<8x50xf32>
    %263 = arith.addf %261, %262 : vector<8x50xf32>
    %264 = arith.mulf %263, %250 : vector<8x50xf32>
    %cst_43 = arith.constant 0.000000e+00 : f32
    %265 = vector.broadcast %cst_43 : f32 to vector<8x50xf32>
    %266 = arith.subf %265, %244 : vector<8x50xf32>
    %267 = arith.mulf %266, %244 : vector<8x50xf32>
    %268 = math.exp %267 : vector<8x50xf32>
    %269 = arith.mulf %264, %268 : vector<8x50xf32>
    %cst_44 = arith.constant 1.000000e+00 : f32
    %270 = vector.broadcast %cst_44 : f32 to vector<8x50xf32>
    %271 = arith.subf %270, %269 : vector<8x50xf32>
    %cst_45 = arith.constant 0.000000e+00 : f32
    %272 = vector.broadcast %cst_45 : f32 to vector<8x50xf32>
    %273 = arith.cmpf oge, %243, %272 : vector<8x50xf32>
    %cst_46 = arith.constant 0.000000e+00 : f32
    %274 = vector.broadcast %cst_46 : f32 to vector<8x50xf32>
    %275 = arith.subf %274, %271 : vector<8x50xf32>
    %276 = arith.select %273, %271, %275 : vector<8x50xi1>, vector<8x50xf32>
    %cst_47 = arith.constant 1.000000e+00 : f32
    %277 = vector.broadcast %cst_47 : f32 to vector<8x50xf32>
    %278 = arith.addf %277, %276 : vector<8x50xf32>
    %279 = arith.mulf %241, %278 : vector<8x50xf32>
    %280 = vector.extract_strided_slice %236 {offsets = [1, 0, 0], sizes = [1, 128, 50], strides = [1, 1, 1]} : vector<2x128x50xf32> to vector<1x128x50xf32>
    %281 = vector.shape_cast %280 : vector<1x128x50xf32> to vector<128x50xf32>
    %cst_48 = arith.constant dense<0.000000e+00> : vector<8x50xf32>
    %282 = tpu.matmul %235, %281, %cst_48 {dimension_numbers = #tpu.dot_dimension_numbers<[1], [0], [0], [1], [0, 0, 1, 1], [], []>} : vector<8x128xf32>, vector<128x50xf32>, vector<8x50xf32> -> vector<8x50xf32>
    %cst_49 = arith.constant 5.000000e-01 : f32
    %283 = vector.broadcast %cst_49 : f32 to vector<8x50xf32>
    %284 = arith.mulf %283, %282 : vector<8x50xf32>
    %cst_50 = arith.constant 0.707106769 : f32
    %285 = vector.broadcast %cst_50 : f32 to vector<8x50xf32>
    %286 = arith.mulf %282, %285 : vector<8x50xf32>
    %287 = math.absf %286 : vector<8x50xf32>
    %cst_51 = arith.constant 0.327591091 : f32
    %288 = vector.broadcast %cst_51 : f32 to vector<8x50xf32>
    %289 = arith.mulf %288, %287 : vector<8x50xf32>
    %cst_52 = arith.constant 1.000000e+00 : f32
    %290 = vector.broadcast %cst_52 : f32 to vector<8x50xf32>
    %291 = arith.addf %290, %289 : vector<8x50xf32>
    %cst_53 = arith.constant 1.000000e+00 : f32
    %292 = vector.broadcast %cst_53 : f32 to vector<8x50xf32>
    %293 = arith.divf %292, %291 : vector<8x50xf32>
    %cst_54 = arith.constant 1.06140542 : f32
    %294 = vector.broadcast %cst_54 : f32 to vector<8x50xf32>
    %295 = arith.mulf %294, %293 : vector<8x50xf32>
    %cst_55 = arith.constant -1.45315206 : f32
    %296 = vector.broadcast %cst_55 : f32 to vector<8x50xf32>
    %297 = arith.addf %295, %296 : vector<8x50xf32>
    %298 = arith.mulf %297, %293 : vector<8x50xf32>
    %cst_56 = arith.constant 1.42141378 : f32
    %299 = vector.broadcast %cst_56 : f32 to vector<8x50xf32>
    %300 = arith.addf %298, %299 : vector<8x50xf32>
    %301 = arith.mulf %300, %293 : vector<8x50xf32>
    %cst_57 = arith.constant -0.284496725 : f32
    %302 = vector.broadcast %cst_57 : f32 to vector<8x50xf32>
    %303 = arith.addf %301, %302 : vector<8x50xf32>
    %304 = arith.mulf %303, %293 : vector<8x50xf32>
    %cst_58 = arith.constant 0.254829586 : f32
    %305 = vector.broadcast %cst_58 : f32 to vector<8x50xf32>
    %306 = arith.addf %304, %305 : vector<8x50xf32>
    %307 = arith.mulf %306, %293 : vector<8x50xf32>
    %cst_59 = arith.constant 0.000000e+00 : f32
    %308 = vector.broadcast %cst_59 : f32 to vector<8x50xf32>
    %309 = arith.subf %308, %287 : vector<8x50xf32>
    %310 = arith.mulf %309, %287 : vector<8x50xf32>
    %311 = math.exp %310 : vector<8x50xf32>
    %312 = arith.mulf %307, %311 : vector<8x50xf32>
    %cst_60 = arith.constant 1.000000e+00 : f32
    %313 = vector.broadcast %cst_60 : f32 to vector<8x50xf32>
    %314 = arith.subf %313, %312 : vector<8x50xf32>
    %cst_61 = arith.constant 0.000000e+00 : f32
    %315 = vector.broadcast %cst_61 : f32 to vector<8x50xf32>
    %316 = arith.cmpf oge, %286, %315 : vector<8x50xf32>
    %cst_62 = arith.constant 0.000000e+00 : f32
    %317 = vector.broadcast %cst_62 : f32 to vector<8x50xf32>
    %318 = arith.subf %317, %314 : vector<8x50xf32>
    %319 = arith.select %316, %314, %318 : vector<8x50xi1>, vector<8x50xf32>
    %cst_63 = arith.constant 1.000000e+00 : f32
    %320 = vector.broadcast %cst_63 : f32 to vector<8x50xf32>
    %321 = arith.addf %320, %319 : vector<8x50xf32>
    %322 = arith.mulf %284, %321 : vector<8x50xf32>
    %323 = vector.shape_cast %279 : vector<8x50xf32> to vector<1x8x50xf32>
    %324 = vector.shape_cast %322 : vector<8x50xf32> to vector<1x8x50xf32>
    %325 = tpu.concatenate %323, %324 in 0 : vector<1x8x50xf32>, vector<1x8x50xf32> -> vector<2x8x50xf32>
    %c0_64 = arith.constant 0 : index
    %c0_65 = arith.constant 0 : index
    %c0_66 = arith.constant 0 : index
    %326 = vector.load %arg5[%c0_64, %c0_65, %c0_66] : memref<2x8x50xf32, #tpu.memory_space<vmem>>, vector<2x8x50xf32>
    %327 = vector.shape_cast %326 : vector<2x8x50xf32> to vector<1x2x8x50xf32>
    %328 = vector.shape_cast %325 : vector<2x8x50xf32> to vector<2x1x8x50xf32>
    %329 = vector.broadcast %327 : vector<1x2x8x50xf32> to vector<2x2x8x50xf32>
    %330 = vector.broadcast %328 : vector<2x1x8x50xf32> to vector<2x2x8x50xf32>
    %331 = arith.mulf %329, %330 : vector<2x2x8x50xf32>
    %cst_67 = arith.constant dense<0.000000e+00> : vector<2x2x8xf32>
    %332 = vector.multi_reduction <add>, %331, %cst_67 [3] : vector<2x2x8x50xf32> to vector<2x2x8xf32>
    %cst_68 = arith.constant dense<0.000000e+00> : vector<2x2xf32>
    %333 = vector.multi_reduction <add>, %332, %cst_68 [2] : vector<2x2x8xf32> to vector<2x2xf32>
    %c0_69 = arith.constant 0 : index
    %c0_70 = arith.constant 0 : index
    %334 = vector.load %arg6[%c0_69, %c0_70] : memref<1x2xf32, #tpu.memory_space<vmem>>, vector<1x2xf32>
    %335 = vector.broadcast %334 : vector<1x2xf32> to vector<2x2xf32>
    %336 = arith.addf %333, %335 : vector<2x2xf32>
    %c0_71 = arith.constant 0 : index
    %c0_72 = arith.constant 0 : index
    %337 = vector.load %arg7[%c0_71, %c0_72] : memref<2x2xf32, #tpu.memory_space<vmem>>, vector<2x2xf32>
    tpu.vector_store %arg7[%c0_71, %c0_72], %336 {strides = array<i32>} : memref<2x2xf32, #tpu.memory_space<vmem>>, vector<2x2xf32>,
    return
  }
}

</mosaic_0001>

<bundles_post_ra>
// kernel: lmda_forward.1
= control target key start
LH: loop header
LB: loop body
LE: loop exit
PB: predicated region body
PF: predicated region fallthrough
CT: control target
= control target key end

     0   :  { %v10196_v1 = vmov 0   ;;  %s10188_s0 = inlined_call_operand.vmem [shape: f32[2,16,64], index: 0, kind: input, shape index: {}]   ;;  %s10189_s1 = inlined_call_operand.vmem [shape: f32[8,16], index: 1, kind: input, shape index: {}]   ;;  %s10190_s2 = inlined_call_operand.vmem [shape: f32[8,15], index: 2, kind: input, shape index: {}]   ;;  %s10191_s3 = inlined_call_operand.vmem [shape: f32[1,8], index: 3, kind: input, shape index: {}]   ;;  %s10192_s4 = inlined_call_operand.vmem [shape: f32[8,128], index: 4, kind: input, shape index: {}]   ;;  %s10193_s5 = inlined_call_operand.vmem [shape: f32[2,8,50], index: 5, kind: input, shape index: {}]   ;;  %s10194_s6 = inlined_call_operand.vmem [shape: f32[1,2], index: 6, kind: input, shape index: {}]   ;;  %s10195_s7 = inlined_call_operand.hbm [shape: f32[2,2], index: 7, kind: output, shape index: {}]  }
   0x1   :  { %v32_v0 = vld [vmem:[%s10190_s2] sm:$0xff]  ;;  %5364 = vset.pattern.permute.xlu0 %v10196_v1  ;;  %5366 = vset.pattern.permute.xlu2 %v10196_v1 }
   0x2   :  { %v5697_v2 = vperm.slane %v32_v0, 0  ;;  %v37_v3 = vrot.slane %v32_v0, 4  ;;  %v35_v4 = vrot.slane %v32_v0, 2  ;;  %5365 = vset.pattern.permute.xlu1 %v10196_v1 }
   0x3   :  { %12 = vsyncpa [#allocation3], 0  ;;  %v34_v7 = vrot.slane %v32_v0, 1  ;;  %v38_v8 = vrot.slane %v32_v0, 5  ;;  %v36_v9 = vrot.slane %v32_v0, 3  ;;  %v39_v13 = vrot.slane %v32_v0, 6 }
   0x4   :  { %50 = vperm.xlu0 %5364, %v5697_v2   ;;  %v5702_v5 = vperm.slane %v37_v3, 0  ;;  %v5704_v6 = vperm.slane %v35_v4, 0  ;;  %v40_v14 = vrot.slane %v32_v0, 7  ;;  %v10199_v17 = vmov 1   ;;  %v5741_v20 = vld [vmem:[%s10188_s0 + $0x18] sm:$0xff]  ;;  %v5746_v21 = vld [vmem:[%s10188_s0 + $0x8] sm:$0xff] }
   0x5   :  { %v5708_v10 = vperm.slane %v34_v7, 0  ;;  %v5710_v11 = vperm.slane %v38_v8, 0  ;;  %v5712_v12 = vperm.slane %v36_v9, 0  ;;  %v5717_v15 = vperm.slane %v39_v13, 0  ;;  %v5751_v22 = vld [vmem:[%s10188_s0] sm:$0xff]  ;;  %s5623_s8 = smov 127  }
   0x6   :  { %66 = vperm.xlu2 %5366, %v5702_v5   ;;  %58 = vperm.xlu1 %5365, %v5704_v6   ;;  %v5719_v16 = vperm.slane %v40_v14, 0  ;;  %v5764_v28 = vld [vmem:[%s10188_s0 + $0x10] sm:$0xff]  ;;  %v10198_v57 = vmov 2   ;;  %s5625_s11 = smov 126   ;;  %s5627_s12 = smov 125  }
   0x7   :  { %s5629_s13 = smov 124   ;;  %s5631_s14 = smov 123  }
   0x8   :  { %s5633_s23 = smov 122   ;;  %s5635_s24 = smov 121  }
   0x9   :  { %s5637_s25 = smov 120   ;;  %s5639_s2 = smov 119  }
   0xa   :  { %s5641_s30 = smov 118   ;;  %s5643_s17 = smov 117  }
   0xb   :  { %s5647_s18 = smov 116   ;;  %s5648_s19 = smov 115  }
   0xc   :  { %54 = vperm.xlu0 %5364, %v5708_v10   ;;  %s5649_s20 = smov 114  }
   0xe   :  { %70 = vperm.xlu2 %5366, %v5710_v11   ;;  %62 = vperm.xlu1 %5365, %v5712_v12  }
  0x14   :  { %74 = vperm.xlu0 %5364, %v5717_v15  }
  0x16   :  { %5367 = vset.pattern.permute.xlu2 %v10199_v17  ;;  %78 = vperm.xlu1 %5365, %v5719_v16  }
  0x17   :  { %146 = vperm.xlu2 %5367, %v5697_v2  }
  0x1c   :  { %5368 = vset.pattern.permute.xlu0 %v10199_v17 }
  0x1d   :  { %150 = vperm.xlu0 %5368, %v5708_v10  }
  0x1e   :  { %5369 = vset.pattern.permute.xlu1 %v10199_v17 }
  0x1f   :  { %154 = vperm.xlu1 %5369, %v5704_v6   ;;  %158 = vperm.xlu2 %5367, %v5712_v12  }
  0x25   :  { %170 = vperm.xlu0 %5368, %v5717_v15  }
  0x27   :  { %162 = vperm.xlu1 %5369, %v5702_v5   ;;  %166 = vperm.xlu2 %5367, %v5710_v11  }
  0x2d   :  { %5372 = vset.pattern.permute.xlu0 %v10198_v57 }
  0x2f   :  { %174 = vperm.xlu1 %5369, %v5719_v16   ;;  %5371 = vset.pattern.permute.xlu2 %v10198_v57 }
  0x37   :  { %5370 = vset.pattern.permute.xlu1 %v10198_v57 }
  0x60   :  { %v5734_v18 = vpop.permute.xlu2 %66 }
  0x68   :  { %v5736_v19 = vpop.permute.xlu2 %70 }
  0x69   :  { %10260 = vst [vmem:[#allocation5_spill] sm:$0xff] %v5736_v19 }
  0x71   :  { %v147_v23 = vpop.permute.xlu2 %146 }
  0x72   :  { %v194_v24 = vmul.f32 %v147_v23, %v5741_v20  ;;  %v178_v25 = vmul.f32 %v147_v23, %v5746_v21  ;;  %v177_v26 = vmul.f32 %v147_v23, %v5751_v22  ;;  %v193_v30 = vmul.f32 %v147_v23, %v5764_v28 }
  0x74   :  { %275 = vrot.lane.b32.xlu1 %v194_v24, %s5623_s8  ;;  %243 = vrot.lane.b32.xlu0 %v178_v25, %s5623_s8 }
  0x75   :  { %241 = vrot.lane.b32.xlu2 %v177_v26, %s5623_s8 }
  0x76   :  { %v5759_v27 = vpop.permute.xlu0 %50 }
  0x78   :  { %v5766_v29 = vpop.permute.xlu1 %58 }
  0x79   :  { %10261 = vst [vmem:[#allocation6_spill] sm:$0xff] %v5766_v29  ;;  %v159_v40 = vpop.permute.xlu2 %158 }
  0x7a   :  { %v183_v42 = vmul.f32 %v159_v40, %v5751_v22  ;;  %v184_v43 = vmul.f32 %v159_v40, %v5746_v21  ;;  %v199_v60 = vmul.f32 %v159_v40, %v5764_v28  ;;  %v200_v61 = vmul.f32 %v159_v40, %v5741_v20 }
  0x7c   :  { %273 = vrot.lane.b32.xlu0 %v193_v30, %s5623_s8 }
  0x7e   :  { %v5770_v31 = vpop.permute.xlu0 %54 }
  0x80   :  { %v5772_v32 = vpop.permute.xlu1 %62 }
  0x81   :  { %v167_v45 = vpop.permute.xlu2 %166 }
  0x82   :  { %v187_v48 = vmul.f32 %v167_v45, %v5751_v22  ;;  %v188_v50 = vmul.f32 %v167_v45, %v5746_v21  ;;  %v203_v0 = vmul.f32 %v167_v45, %v5764_v28  ;;  %v204_v8 = vmul.f32 %v167_v45, %v5741_v20 }
  0x86   :  { %v5774_v33 = vpop.permute.xlu0 %74 }
  0x87   :  { %10262 = vst [vmem:[#allocation7_spill] sm:$0xff] %v5774_v33 }
  0x88   :  { %v5776_v34 = vpop.permute.xlu1 %78 }
  0x89   :  { %10263 = vst [vmem:[#allocation8_spill] sm:$0xff] %v5776_v34 }
  0x8f   :  { %v151_v35 = vpop.permute.xlu0 %150 }
  0x90   :  { %v179_v36 = vmul.f32 %v151_v35, %v5751_v22  ;;  %v180_v37 = vmul.f32 %v151_v35, %v5746_v21  ;;  %v196_v56 = vmul.f32 %v151_v35, %v5741_v20  ;;  %v195_v59 = vmul.f32 %v151_v35, %v5764_v28 }
  0x91   :  { %v155_v38 = vpop.permute.xlu1 %154 }
  0x92   :  { %245 = vrot.lane.b32.xlu1 %v179_v36, %s5623_s8  ;;  %247 = vrot.lane.b32.xlu2 %v180_v37, %s5623_s8  ;;  %v181_v39 = vmul.f32 %v155_v38, %v5751_v22  ;;  %v182_v41 = vmul.f32 %v155_v38, %v5746_v21  ;;  %v197_v58 = vmul.f32 %v155_v38, %v5764_v28 }
  0x93   :  { %v198_v62 = vmul.f32 %v155_v38, %v5741_v20 }
  0x94   :  { %249 = vrot.lane.b32.xlu0 %v181_v39, %s5623_s8 }
  0x97   :  { %v171_v49 = vpop.permute.xlu0 %170 }
  0x98   :  { %v189_v51 = vmul.f32 %v171_v49, %v5751_v22  ;;  %v190_v52 = vmul.f32 %v171_v49, %v5746_v21  ;;  %v205_v4 = vmul.f32 %v171_v49, %v5764_v28  ;;  %v206_v7 = vmul.f32 %v171_v49, %v5741_v20 }
  0x99   :  { %v163_v44 = vpop.permute.xlu1 %162 }
  0x9a   :  { %251 = vrot.lane.b32.xlu1 %v182_v41, %s5623_s8  ;;  %253 = vrot.lane.b32.xlu2 %v183_v42, %s5623_s8  ;;  %v185_v46 = vmul.f32 %v163_v44, %v5751_v22  ;;  %v186_v47 = vmul.f32 %v163_v44, %v5746_v21  ;;  %v202_v63 = vmul.f32 %v163_v44, %v5741_v20 }
  0x9b   :  { %v201_v3 = vmul.f32 %v163_v44, %v5764_v28 }
  0x9c   :  { %255 = vrot.lane.b32.xlu0 %v184_v43, %s5623_s8 }
  0xa1   :  { %v175_v53 = vpop.permute.xlu1 %174 }
  0xa2   :  { %257 = vrot.lane.b32.xlu1 %v185_v46, %s5623_s8  ;;  %259 = vrot.lane.b32.xlu2 %v186_v47, %s5623_s8  ;;  %v191_v54 = vmul.f32 %v175_v53, %v5751_v22  ;;  %v192_v55 = vmul.f32 %v175_v53, %v5746_v21  ;;  %v208_v9 = vmul.f32 %v175_v53, %v5741_v20 }
  0xa3   :  { %v207_v13 = vmul.f32 %v175_v53, %v5764_v28 }
  0xa4   :  { %261 = vrot.lane.b32.xlu0 %v187_v48, %s5623_s8 }
  0xaa   :  { %263 = vrot.lane.b32.xlu1 %v188_v50, %s5623_s8  ;;  %265 = vrot.lane.b32.xlu2 %v189_v51, %s5623_s8 }
  0xac   :  { %267 = vrot.lane.b32.xlu0 %v190_v52, %s5623_s8 }
  0xb2   :  { %269 = vrot.lane.b32.xlu1 %v191_v54, %s5623_s8  ;;  %271 = vrot.lane.b32.xlu2 %v192_v55, %s5623_s8 }
  0xb4   :  { %279 = vrot.lane.b32.xlu0 %v196_v56, %s5623_s8 }
  0xba   :  { %281 = vrot.lane.b32.xlu1 %v197_v58, %s5623_s8  ;;  %277 = vrot.lane.b32.xlu2 %v195_v59, %s5623_s8 }
  0xbc   :  { %285 = vrot.lane.b32.xlu0 %v199_v60, %s5623_s8 }
  0xc2   :  { %287 = vrot.lane.b32.xlu1 %v200_v61, %s5623_s8  ;;  %283 = vrot.lane.b32.xlu2 %v198_v62, %s5623_s8 }
  0xc4   :  { %291 = vrot.lane.b32.xlu0 %v202_v63, %s5623_s8 }
  0xca   :  { %293 = vrot.lane.b32.xlu1 %v203_v0, %s5623_s8  ;;  %289 = vrot.lane.b32.xlu2 %v201_v3, %s5623_s8 }
  0xcc   :  { %297 = vrot.lane.b32.xlu0 %v205_v4, %s5623_s8 }
  0xcf   :  { %v5841_v14 = vpop.permute.xlu2 %241 }
  0xd2   :  { %299 = vrot.lane.b32.xlu1 %v206_v7, %s5623_s8  ;;  %295 = vrot.lane.b32.xlu2 %v204_v8, %s5623_s8 }
  0xd4   :  { %303 = vrot.lane.b32.xlu0 %v208_v9, %s5623_s8 }
  0xda   :  { %370 = vperm.xlu1 %5370, %v5697_v2   ;;  %301 = vrot.lane.b32.xlu2 %v207_v13, %s5623_s8 }
  0xdc   :  { %378 = vperm.xlu0 %5372, %v5704_v6  }
  0xe2   :  { %382 = vperm.xlu1 %5370, %v5712_v12   ;;  %374 = vperm.xlu2 %5371, %v5708_v10  }
  0xe4   :  { %398 = vperm.xlu0 %5372, %v5719_v16  }
  0xe6   :  { %v5849_v24 = vpop.permute.xlu0 %243  ;;  %v5853_v26 = vpop.permute.xlu1 %275 }
  0xe7   :  { %10264 = vst [vmem:[#allocation9_spill] sm:$0xff] %v5849_v24 }
  0xe8   :  { %10266 = vst [vmem:[#allocation11_spill] sm:$0xff] %v5853_v26 }
  0xea   :  { %390 = vperm.xlu1 %5370, %v5710_v11   ;;  %386 = vperm.xlu2 %5371, %v5702_v5  }
  0xec   :  { %v5846_v23 = vpop.permute.xlu2 %247 }
  0xee   :  { %v5857_v35 = vpop.permute.xlu0 %273 }
  0xef   :  { %10268 = vst [vmem:[#allocation13_spill] sm:$0xff] %v5857_v35 }
  0xf2   :  { %394 = vperm.xlu2 %5371, %v5717_v15  }
  0xf4   :  { %v5851_v25 = vpop.permute.xlu2 %253 }
  0xf5   :  { %10265 = vst [vmem:[#allocation10_spill] sm:$0xff] %v5851_v25 }
  0xfc   :  { %v5855_v30 = vpop.permute.xlu2 %259 }
  0xfd   :  { %10267 = vst [vmem:[#allocation12_spill] sm:$0xff] %v5855_v30 }
 0x104   :  { %v5859_v36 = vpop.permute.xlu1 %245  ;;  %v5861_v37 = vpop.permute.xlu2 %265 }
 0x105   :  { %10269 = vst [vmem:[#allocation14_spill] sm:$0xff] %v5859_v36 }
 0x106   :  { %10270 = vst [vmem:[#allocation15_spill] sm:$0xff] %v5861_v37  ;;  %v5863_v38 = vpop.permute.xlu0 %249  ;;  %v10200_v37 = vmov 3  }
 0x107   :  { %10271 = vst [vmem:[#allocation16_spill] sm:$0xff] %v5863_v38  ;;  %5373 = vset.pattern.permute.xlu0 %v10200_v37  ;;  %5374 = vset.pattern.permute.xlu1 %v10200_v37 }
 0x108   :  { %5375 = vset.pattern.permute.xlu2 %v10200_v37 }
 0x10c   :  { %v5865_v39 = vpop.permute.xlu1 %251  ;;  %v5867_v40 = vpop.permute.xlu2 %271 }
 0x10d   :  { %10272 = vst [vmem:[#allocation17_spill] sm:$0xff] %v5865_v39 }
 0x10e   :  { %10273 = vst [vmem:[#allocation18_spill] sm:$0xff] %v5867_v40  ;;  %v5869_v41 = vpop.permute.xlu0 %255 }
 0x10f   :  { %10274 = vst [vmem:[#allocation19_spill] sm:$0xff] %v5869_v41 }
 0x114   :  { %v5871_v42 = vpop.permute.xlu1 %257  ;;  %v5873_v43 = vpop.permute.xlu2 %277 }
 0x115   :  { %10275 = vst [vmem:[#allocation20_spill] sm:$0xff] %v5871_v42 }
 0x116   :  { %v5875_v44 = vpop.permute.xlu0 %261 }
 0x117   :  { %10276 = vst [vmem:[#allocation21_spill] sm:$0xff] %v5875_v44 }
 0x11c   :  { %v5877_v45 = vpop.permute.xlu1 %263  ;;  %v5879_v46 = vpop.permute.xlu2 %283 }
 0x11d   :  { %10277 = vst [vmem:[#allocation22_spill] sm:$0xff] %v5877_v45 }
 0x11e   :  { %10278 = vst [vmem:[#allocation23_spill] sm:$0xff] %v5879_v46  ;;  %v5881_v47 = vpop.permute.xlu0 %267 }
 0x11f   :  { %10279 = vst [vmem:[#allocation24_spill] sm:$0xff] %v5881_v47 }
 0x124   :  { %v5883_v48 = vpop.permute.xlu1 %269  ;;  %v5885_v49 = vpop.permute.xlu2 %289 }
 0x125   :  { %10280 = vst [vmem:[#allocation25_spill] sm:$0xff] %v5883_v48 }
 0x126   :  { %10281 = vst [vmem:[#allocation26_spill] sm:$0xff] %v5885_v49  ;;  %v5887_v50 = vpop.permute.xlu0 %279 }
 0x127   :  { %10282 = vst [vmem:[#allocation27_spill] sm:$0xff] %v5887_v50 }
 0x12c   :  { %v5889_v51 = vpop.permute.xlu1 %281  ;;  %v5891_v52 = vpop.permute.xlu2 %295 }
 0x12d   :  { %10283 = vst [vmem:[#allocation28_spill] sm:$0xff] %v5889_v51 }
 0x12e   :  { %10284 = vst [vmem:[#allocation29_spill] sm:$0xff] %v5891_v52  ;;  %v5893_v53 = vpop.permute.xlu0 %285  ;;  %v6381_v52 = vld [vmem:[%s10188_s0 + $0x10] sm:$0xff] }
 0x12f   :  { %10285 = vst [vmem:[#allocation30_spill] sm:$0xff] %v5893_v53 }
 0x134   :  { %v5895_v54 = vpop.permute.xlu1 %287  ;;  %v5897_v55 = vpop.permute.xlu2 %301 }
 0x135   :  { %10286 = vst [vmem:[#allocation31_spill] sm:$0xff] %v5895_v54 }
 0x136   :  { %10287 = vst [vmem:[#allocation32_spill] sm:$0xff] %v5897_v55  ;;  %v5899_v56 = vpop.permute.xlu0 %291 }
 0x13c   :  { %v5901_v58 = vpop.permute.xlu1 %293  ;;  %v375_v59 = vpop.permute.xlu2 %374 }
 0x13d   :  { %10288 = vst [vmem:[#allocation33_spill] sm:$0xff] %v5901_v58  ;;  %v403_v60 = vmul.f32 %v375_v59, %v5751_v22 }
 0x13e   :  { %v5904_v61 = vpop.permute.xlu0 %297 }
 0x13f   :  { %10289 = vst [vmem:[#allocation34_spill] sm:$0xff] %v5904_v61  ;;  %469 = vrot.lane.b32.xlu0 %v403_v60, %s5625_s11  ;;  %v404_v60 = vmul.f32 %v375_v59, %v5746_v21 }
 0x144   :  { %v5907_v62 = vpop.permute.xlu1 %299  ;;  %v387_v1 = vpop.permute.xlu2 %386 }
 0x145   :  { %10290 = vst [vmem:[#allocation35_spill] sm:$0xff] %v5907_v62  ;;  %v409_v57 = vmul.f32 %v387_v1, %v5751_v22  ;;  %v410_v48 = vmul.f32 %v387_v1, %v5746_v21 }
 0x146   :  { %v5909_v63 = vpop.permute.xlu0 %303 }
 0x147   :  { %10291 = vst [vmem:[#allocation36_spill] sm:$0xff] %v5909_v63 }
 0x14c   :  { %v371_v0 = vpop.permute.xlu1 %370 }
 0x14d   :  { %v401_v3 = vmul.f32 %v371_v0, %v5751_v22  ;;  %v402_v4 = vmul.f32 %v371_v0, %v5746_v21 }
 0x14e   :  { %v379_v7 = vpop.permute.xlu0 %378 }
 0x14f   :  { %465 = vrot.lane.b32.xlu1 %v401_v3, %s5625_s11  ;;  %467 = vrot.lane.b32.xlu2 %v402_v4, %s5625_s11  ;;  %v406_v8 = vmul.f32 %v379_v7, %v5746_v21  ;;  %v405_v9 = vmul.f32 %v379_v7, %v5751_v22 }
 0x151   :  { %475 = vrot.lane.b32.xlu0 %v406_v8, %s5625_s11 }
 0x154   :  { %v383_v13 = vpop.permute.xlu1 %382 }
 0x155   :  { %v408_v4 = vmul.f32 %v383_v13, %v5746_v21  ;;  %v407_v17 = vmul.f32 %v383_v13, %v5751_v22 }
 0x157   :  { %473 = vrot.lane.b32.xlu2 %v405_v9, %s5625_s11  ;;  %471 = vrot.lane.b32.xlu1 %v404_v60, %s5625_s11  ;;  %v399_v9 = vpop.permute.xlu0 %398 }
 0x159   :  { %481 = vrot.lane.b32.xlu0 %v409_v57, %s5625_s11  ;;  %v415_v57 = vmul.f32 %v399_v9, %v5751_v22 }
 0x15c   :  { %v391_v3 = vpop.permute.xlu1 %390 }
 0x15d   :  { %v412_v8 = vmul.f32 %v391_v3, %v5746_v21  ;;  %v411_v60 = vmul.f32 %v391_v3, %v5751_v22 }
 0x15f   :  { %479 = vrot.lane.b32.xlu2 %v408_v4, %s5625_s11  ;;  %477 = vrot.lane.b32.xlu1 %v407_v17, %s5625_s11  ;;  %v395_v4 = vpop.permute.xlu2 %394 }
 0x160   :  { %v414_v17 = vmul.f32 %v395_v4, %v5746_v21  ;;  %v413_v40 = vmul.f32 %v395_v4, %v5751_v22 }
 0x161   :  { %487 = vrot.lane.b32.xlu0 %v412_v8, %s5625_s11  ;;  %v418_v8 = vmul.f32 %v371_v0, %v5741_v20 }
 0x167   :  { %485 = vrot.lane.b32.xlu2 %v411_v60, %s5625_s11  ;;  %483 = vrot.lane.b32.xlu1 %v410_v48, %s5625_s11  ;;  %v417_v60 = vmul.f32 %v371_v0, %v5764_v28  ;;  %v416_v48 = vmul.f32 %v399_v9, %v5746_v21  ;;  %v419_v0 = vmul.f32 %v375_v59, %v5764_v28 }
 0x169   :  { %493 = vrot.lane.b32.xlu0 %v415_v57, %s5625_s11  ;;  %v421_v57 = vmul.f32 %v379_v7, %v5764_v28 }
 0x16f   :  { %491 = vrot.lane.b32.xlu2 %v414_v17, %s5625_s11  ;;  %489 = vrot.lane.b32.xlu1 %v413_v40, %s5625_s11  ;;  %v420_v40 = vmul.f32 %v375_v59, %v5741_v20  ;;  %v424_v17 = vmul.f32 %v383_v13, %v5741_v20  ;;  %v426_v59 = vmul.f32 %v387_v1, %v5741_v20 }
 0x171   :  { %499 = vrot.lane.b32.xlu0 %v418_v8, %s5625_s11  ;;  %v423_v8 = vmul.f32 %v383_v13, %v5764_v28  ;;  %v430_v13 = vmul.f32 %v395_v4, %v5741_v20 }
 0x177   :  { %497 = vrot.lane.b32.xlu2 %v417_v60, %s5625_s11  ;;  %495 = vrot.lane.b32.xlu1 %v416_v48, %s5625_s11  ;;  %v422_v60 = vmul.f32 %v379_v7, %v5741_v20  ;;  %v427_v48 = vmul.f32 %v391_v3, %v5764_v28  ;;  %v429_v7 = vmul.f32 %v395_v4, %v5764_v28 }
 0x179   :  { %505 = vrot.lane.b32.xlu0 %v421_v57, %s5625_s11  ;;  %v425_v57 = vmul.f32 %v387_v1, %v5764_v28  ;;  %v432_v1 = vmul.f32 %v399_v9, %v5741_v20 }
 0x17f   :  { %503 = vrot.lane.b32.xlu2 %v420_v40, %s5625_s11  ;;  %501 = vrot.lane.b32.xlu1 %v419_v0, %s5625_s11  ;;  %v428_v40 = vmul.f32 %v391_v3, %v5741_v20  ;;  %v431_v0 = vmul.f32 %v399_v9, %v5764_v28 }
 0x181   :  { %511 = vrot.lane.b32.xlu0 %v424_v17, %s5625_s11 }
 0x187   :  { %509 = vrot.lane.b32.xlu2 %v423_v8, %s5625_s11  ;;  %507 = vrot.lane.b32.xlu1 %v422_v60, %s5625_s11 }
 0x189   :  { %517 = vrot.lane.b32.xlu0 %v427_v48, %s5625_s11 }
 0x18f   :  { %515 = vrot.lane.b32.xlu2 %v426_v59, %s5625_s11  ;;  %513 = vrot.lane.b32.xlu1 %v425_v57, %s5625_s11 }
 0x191   :  { %523 = vrot.lane.b32.xlu0 %v430_v13, %s5625_s11 }
 0x197   :  { %521 = vrot.lane.b32.xlu2 %v429_v7, %s5625_s11  ;;  %519 = vrot.lane.b32.xlu1 %v428_v40, %s5625_s11 }
 0x199   :  { %594 = vperm.xlu0 %5373, %v5697_v2  }
 0x19f   :  { %527 = vrot.lane.b32.xlu2 %v432_v1, %s5625_s11  ;;  %525 = vrot.lane.b32.xlu1 %v431_v0, %s5625_s11 }
 0x1a1   :  { %614 = vperm.xlu0 %5373, %v5710_v11  }
 0x1a7   :  { %598 = vperm.xlu1 %5374, %v5708_v10   ;;  %602 = vperm.xlu2 %5375, %v5704_v6  }
 0x1a9   :  { %v5980_v3 = vpop.permute.xlu2 %467 }
 0x1aa   :  { %10292 = vst [vmem:[#allocation37_spill] sm:$0xff] %v5980_v3 }
 0x1af   :  { %606 = vperm.xlu1 %5374, %v5712_v12   ;;  %610 = vperm.xlu2 %5375, %v5702_v5  }
 0x1b1   :  { %v5984_v4 = vpop.permute.xlu2 %473  ;;  %v5990_v17 = vpop.permute.xlu0 %469 }
 0x1b2   :  { %10293 = vst [vmem:[#allocation38_spill] sm:$0xff] %v5984_v4 }
 0x1b3   :  { %10295 = vst [vmem:[#allocation40_spill] sm:$0xff] %v5990_v17 }
 0x1b7   :  { %618 = vperm.xlu1 %5374, %v5717_v15   ;;  %622 = vperm.xlu2 %5375, %v5719_v16  }
 0x1b9   :  { %v5988_v9 = vpop.permute.xlu2 %479 }
 0x1ba   :  { %10294 = vst [vmem:[#allocation39_spill] sm:$0xff] %v5988_v9 }
 0x1c1   :  { %v5992_v8 = vpop.permute.xlu1 %465  ;;  %v5994_v60 = vpop.permute.xlu2 %485 }
 0x1c2   :  { %10296 = vst [vmem:[#allocation41_spill] sm:$0xff] %v5994_v60 }
 0x1c3   :  { %v5996_v48 = vpop.permute.xlu0 %475 }
 0x1c4   :  { %10297 = vst [vmem:[#allocation42_spill] sm:$0xff] %v5996_v48 }
 0x1c9   :  { %v5998_v59 = vpop.permute.xlu1 %471  ;;  %v6002_v13 = vpop.permute.xlu2 %491 }
 0x1ca   :  { %10299 = vst [vmem:[#allocation44_spill] sm:$0xff] %v6002_v13 }
 0x1cb   :  { %v6000_v57 = vpop.permute.xlu0 %481 }
 0x1cc   :  { %10298 = vst [vmem:[#allocation43_spill] sm:$0xff] %v6000_v57 }
 0x1d1   :  { %v6004_v7 = vpop.permute.xlu1 %477  ;;  %v6008_v1 = vpop.permute.xlu2 %497 }
 0x1d2   :  { %10300 = vst [vmem:[#allocation45_spill] sm:$0xff] %v6004_v7 }
 0x1d3   :  { %v6006_v40 = vpop.permute.xlu0 %487  ;;  %10302 = vst [vmem:[#allocation47_spill] sm:$0xff] %v6008_v1 }
 0x1d4   :  { %10301 = vst [vmem:[#allocation46_spill] sm:$0xff] %v6006_v40 }
 0x1d9   :  { %v6010_v0 = vpop.permute.xlu1 %483  ;;  %v6014_v47 = vpop.permute.xlu2 %503 }
 0x1da   :  { %10303 = vst [vmem:[#allocation48_spill] sm:$0xff] %v6010_v0 }
 0x1db   :  { %v6012_v37 = vpop.permute.xlu0 %493  ;;  %10305 = vst [vmem:[#allocation50_spill] sm:$0xff] %v6014_v47 }
 0x1dc   :  { %10304 = vst [vmem:[#allocation49_spill] sm:$0xff] %v6012_v37 }
 0x1e1   :  { %v6016_v60 = vpop.permute.xlu1 %489  ;;  %v6022_v55 = vpop.permute.xlu2 %509 }
 0x1e2   :  { %10306 = vst [vmem:[#allocation51_spill] sm:$0xff] %v6016_v60 }
 0x1e3   :  { %v6018_v45 = vpop.permute.xlu0 %499  ;;  %10309 = vst [vmem:[#allocation54_spill] sm:$0xff] %v6022_v55 }
 0x1e4   :  { %10307 = vst [vmem:[#allocation52_spill] sm:$0xff] %v6018_v45 }
 0x1e9   :  { %v6020_v44 = vpop.permute.xlu1 %495  ;;  %v6030_v46 = vpop.permute.xlu2 %515 }
 0x1ea   :  { %10308 = vst [vmem:[#allocation53_spill] sm:$0xff] %v6020_v44 }
 0x1eb   :  { %v6024_v13 = vpop.permute.xlu0 %505 }
 0x1ec   :  { %10310 = vst [vmem:[#allocation55_spill] sm:$0xff] %v6024_v13 }
 0x1f1   :  { %v6026_v58 = vpop.permute.xlu1 %501  ;;  %v6036_v63 = vpop.permute.xlu2 %521 }
 0x1f2   :  { %10314 = vst [vmem:[#allocation59_spill] sm:$0xff] %v6036_v63 }
 0x1f3   :  { %v6028_v40 = vpop.permute.xlu0 %511 }
 0x1f4   :  { %10311 = vst [vmem:[#allocation56_spill] sm:$0xff] %v6028_v40 }
 0x1f9   :  { %v6032_v4 = vpop.permute.xlu1 %507  ;;  %v6042_v44 = vpop.permute.xlu2 %527 }
 0x1fa   :  { %10312 = vst [vmem:[#allocation57_spill] sm:$0xff] %v6032_v4 }
 0x1fb   :  { %v6034_v37 = vpop.permute.xlu0 %517  ;;  %10317 = vst [vmem:[#allocation62_spill] sm:$0xff] %v6042_v44 }
 0x1fc   :  { %10313 = vst [vmem:[#allocation58_spill] sm:$0xff] %v6034_v37 }
 0x201   :  { %v6038_v60 = vpop.permute.xlu1 %513  ;;  %v603_v4 = vpop.permute.xlu2 %602 }
 0x202   :  { %10315 = vst [vmem:[#allocation60_spill] sm:$0xff] %v6038_v60  ;;  %v629_v30 = vmul.f32 %v603_v4, %v5751_v22 }
 0x203   :  { %v6040_v38 = vpop.permute.xlu0 %523 }
 0x204   :  { %10316 = vst [vmem:[#allocation61_spill] sm:$0xff] %v6040_v38 }
 0x209   :  { %v6044_v34 = vpop.permute.xlu1 %519  ;;  %v611_v39 = vpop.permute.xlu2 %610 }
 0x20a   :  { %10318 = vst [vmem:[#allocation63_spill] sm:$0xff] %v6044_v34  ;;  %v634_v60 = vmul.f32 %v611_v39, %v5746_v21 }
 0x20b   :  { %v595_v0 = vpop.permute.xlu0 %594 }
 0x20c   :  { %v625_v57 = vmul.f32 %v595_v0, %v5751_v22  ;;  %v626_v42 = vmul.f32 %v595_v0, %v5746_v21 }
 0x20e   :  { %689 = vrot.lane.b32.xlu0 %v625_v57, %s5627_s12  ;;  %691 = vrot.lane.b32.xlu1 %v626_v42, %s5627_s12  ;;  %v630_v57 = vmul.f32 %v603_v4, %v5746_v21 }
 0x211   :  { %v6050_v37 = vpop.permute.xlu1 %525  ;;  %v623_v50 = vpop.permute.xlu2 %622 }
 0x212   :  { %10319 = vst [vmem:[#allocation64_spill] sm:$0xff] %v6050_v37 }
 0x216   :  { %697 = vrot.lane.b32.xlu1 %v629_v30, %s5627_s12  ;;  %v615_v30 = vpop.permute.xlu0 %614 }
 0x219   :  { %v599_v44 = vpop.permute.xlu1 %598 }
 0x21a   :  { %v628_v63 = vmul.f32 %v599_v44, %v5746_v21  ;;  %v627_v61 = vmul.f32 %v599_v44, %v5751_v22  ;;  %v643_v49 = vmul.f32 %v599_v44, %v5764_v28 }
 0x21c   :  { %695 = vrot.lane.b32.xlu0 %v628_v63, %s5627_s12  ;;  %693 = vrot.lane.b32.xlu2 %v627_v61, %s5627_s12  ;;  %v633_v63 = vmul.f32 %v611_v39, %v5751_v22  ;;  %v635_v61 = vmul.f32 %v615_v30, %v5751_v22 }
 0x221   :  { %v607_v48 = vpop.permute.xlu1 %606 }
 0x222   :  { %v631_v42 = vmul.f32 %v607_v48, %v5751_v22  ;;  %v632_v37 = vmul.f32 %v607_v48, %v5746_v21 }
 0x224   :  { %701 = vrot.lane.b32.xlu0 %v631_v42, %s5627_s12  ;;  %699 = vrot.lane.b32.xlu2 %v630_v57, %s5627_s12  ;;  %v636_v57 = vmul.f32 %v615_v30, %v5746_v21 }
 0x225   :  { %703 = vrot.lane.b32.xlu1 %v632_v37, %s5627_s12 }
 0x229   :  { %v619_v47 = vpop.permute.xlu1 %618 }
 0x22a   :  { %v637_v42 = vmul.f32 %v619_v47, %v5751_v22  ;;  %v638_v37 = vmul.f32 %v619_v47, %v5746_v21 }
 0x22c   :  { %707 = vrot.lane.b32.xlu0 %v634_v60, %s5627_s12  ;;  %705 = vrot.lane.b32.xlu2 %v633_v63, %s5627_s12  ;;  %v640_v60 = vmul.f32 %v623_v50, %v5746_v21  ;;  %v639_v63 = vmul.f32 %v623_v50, %v5751_v22 }
 0x22d   :  { %709 = vrot.lane.b32.xlu1 %v635_v61, %s5627_s12  ;;  %v641_v61 = vmul.f32 %v595_v0, %v5764_v28 }
 0x234   :  { %713 = vrot.lane.b32.xlu0 %v637_v42, %s5627_s12  ;;  %711 = vrot.lane.b32.xlu2 %v636_v57, %s5627_s12  ;;  %v642_v42 = vmul.f32 %v595_v0, %v5741_v20  ;;  %v644_v57 = vmul.f32 %v599_v44, %v5741_v20  ;;  %v647_v0 = vmul.f32 %v607_v48, %v5764_v28 }
 0x235   :  { %715 = vrot.lane.b32.xlu1 %v638_v37, %s5627_s12  ;;  %v10202_v37 = vmov 4   ;;  %v649_v44 = vmul.f32 %v611_v39, %v5764_v28 }
 0x236   :  { %5377 = vset.pattern.permute.xlu0 %v10202_v37  ;;  %5376 = vset.pattern.permute.xlu2 %v10202_v37 }
 0x237   :  { %5378 = vset.pattern.permute.xlu1 %v10202_v37 }
 0x23c   :  { %719 = vrot.lane.b32.xlu0 %v640_v60, %s5627_s12  ;;  %717 = vrot.lane.b32.xlu2 %v639_v63, %s5627_s12  ;;  %v646_v60 = vmul.f32 %v603_v4, %v5741_v20  ;;  %v645_v63 = vmul.f32 %v603_v4, %v5764_v28  ;;  %v652_v4 = vmul.f32 %v615_v30, %v5741_v20 }
 0x23d   :  { %721 = vrot.lane.b32.xlu1 %v641_v61, %s5627_s12  ;;  %v650_v61 = vmul.f32 %v611_v39, %v5741_v20  ;;  %v655_v39 = vmul.f32 %v623_v50, %v5764_v28 }
 0x244   :  { %725 = vrot.lane.b32.xlu0 %v643_v49, %s5627_s12  ;;  %723 = vrot.lane.b32.xlu2 %v642_v42, %s5627_s12  ;;  %v648_v49 = vmul.f32 %v607_v48, %v5741_v20  ;;  %v651_v42 = vmul.f32 %v615_v30, %v5764_v28  ;;  %v654_v48 = vmul.f32 %v619_v47, %v5741_v20 }
 0x245   :  { %727 = vrot.lane.b32.xlu1 %v644_v57, %s5627_s12  ;;  %v653_v57 = vmul.f32 %v619_v47, %v5764_v28 }
 0x24c   :  { %731 = vrot.lane.b32.xlu0 %v646_v60, %s5627_s12  ;;  %729 = vrot.lane.b32.xlu2 %v645_v63, %s5627_s12  ;;  %v656_v60 = vmul.f32 %v623_v50, %v5741_v20 }
 0x24d   :  { %733 = vrot.lane.b32.xlu1 %v647_v0, %s5627_s12 }
 0x254   :  { %737 = vrot.lane.b32.xlu0 %v649_v44, %s5627_s12  ;;  %735 = vrot.lane.b32.xlu2 %v648_v49, %s5627_s12 }
 0x255   :  { %739 = vrot.lane.b32.xlu1 %v650_v61, %s5627_s12 }
 0x25c   :  { %743 = vrot.lane.b32.xlu0 %v652_v4, %s5627_s12  ;;  %741 = vrot.lane.b32.xlu2 %v651_v42, %s5627_s12 }
 0x25d   :  { %745 = vrot.lane.b32.xlu1 %v653_v57, %s5627_s12 }
 0x264   :  { %749 = vrot.lane.b32.xlu0 %v655_v39, %s5627_s12  ;;  %747 = vrot.lane.b32.xlu2 %v654_v48, %s5627_s12 }
 0x265   :  { %751 = vrot.lane.b32.xlu1 %v656_v60, %s5627_s12 }
 0x26c   :  { %822 = vperm.xlu0 %5377, %v5708_v10   ;;  %818 = vperm.xlu2 %5376, %v5697_v2  }
 0x26d   :  { %826 = vperm.xlu1 %5378, %v5704_v6  }
 0x274   :  { %842 = vperm.xlu0 %5377, %v5717_v15   ;;  %830 = vperm.xlu2 %5376, %v5712_v12  }
 0x275   :  { %834 = vperm.xlu1 %5378, %v5702_v5  }
 0x276   :  { %v6121_v47 = vpop.permute.xlu2 %693 }
 0x277   :  { %10320 = vst [vmem:[#allocation65_spill] sm:$0xff] %v6121_v47 }
 0x27c   :  { %838 = vperm.xlu2 %5376, %v5710_v11  }
 0x27d   :  { %846 = vperm.xlu1 %5378, %v5719_v16  }
 0x27e   :  { %v6125_v50 = vpop.permute.xlu2 %699 }
 0x27f   :  { %10321 = vst [vmem:[#allocation66_spill] sm:$0xff] %v6125_v50 }
 0x280   :  { %v6127_v30 = vpop.permute.xlu1 %691  ;;  %v6129_v63 = vpop.permute.xlu0 %689 }
 0x281   :  { %10322 = vst [vmem:[#allocation67_spill] sm:$0xff] %v6127_v30 }
 0x286   :  { %v6131_v0 = vpop.permute.xlu2 %705 }
 0x287   :  { %10323 = vst [vmem:[#allocation68_spill] sm:$0xff] %v6131_v0 }
 0x288   :  { %v6137_v61 = vpop.permute.xlu1 %697 }
 0x289   :  { %10325 = vst [vmem:[#allocation70_spill] sm:$0xff] %v6137_v61 }
 0x28e   :  { %v6133_v44 = vpop.permute.xlu0 %695  ;;  %v6135_v49 = vpop.permute.xlu2 %711 }
 0x28f   :  { %10324 = vst [vmem:[#allocation69_spill] sm:$0xff] %v6135_v49 }
 0x296   :  { %v6139_v4 = vpop.permute.xlu0 %701  ;;  %v6141_v42 = vpop.permute.xlu2 %717 }
 0x297   :  { %10326 = vst [vmem:[#allocation71_spill] sm:$0xff] %v6139_v4  ;;  %v6143_v57 = vpop.permute.xlu1 %703 }
 0x298   :  { %10327 = vst [vmem:[#allocation72_spill] sm:$0xff] %v6141_v42 }
 0x299   :  { %10328 = vst [vmem:[#allocation73_spill] sm:$0xff] %v6143_v57 }
 0x29e   :  { %v6145_v39 = vpop.permute.xlu0 %707  ;;  %v6147_v48 = vpop.permute.xlu2 %723 }
 0x29f   :  { %10329 = vst [vmem:[#allocation74_spill] sm:$0xff] %v6145_v39  ;;  %v6149_v60 = vpop.permute.xlu1 %709 }
 0x2a0   :  { %10330 = vst [vmem:[#allocation75_spill] sm:$0xff] %v6147_v48 }
 0x2a1   :  { %10331 = vst [vmem:[#allocation76_spill] sm:$0xff] %v6149_v60 }
 0x2a6   :  { %v6151_v37 = vpop.permute.xlu0 %713  ;;  %v6153_v0 = vpop.permute.xlu2 %729 }
 0x2a7   :  { %10332 = vst [vmem:[#allocation77_spill] sm:$0xff] %v6151_v37  ;;  %v6155_v50 = vpop.permute.xlu1 %715 }
 0x2a8   :  { %10333 = vst [vmem:[#allocation78_spill] sm:$0xff] %v6153_v0 }
 0x2a9   :  { %10334 = vst [vmem:[#allocation79_spill] sm:$0xff] %v6155_v50 }
 0x2ae   :  { %v6157_v49 = vpop.permute.xlu0 %719  ;;  %v6159_v61 = vpop.permute.xlu2 %735 }
 0x2af   :  { %10335 = vst [vmem:[#allocation80_spill] sm:$0xff] %v6157_v49  ;;  %v6161_v38 = vpop.permute.xlu1 %721 }
 0x2b0   :  { %10336 = vst [vmem:[#allocation81_spill] sm:$0xff] %v6159_v61 }
 0x2b1   :  { %10337 = vst [vmem:[#allocation82_spill] sm:$0xff] %v6161_v38 }
 0x2b6   :  { %v6163_v42 = vpop.permute.xlu0 %725  ;;  %v6165_v1 = vpop.permute.xlu2 %741 }
 0x2b7   :  { %10338 = vst [vmem:[#allocation83_spill] sm:$0xff] %v6165_v1  ;;  %v6167_v39 = vpop.permute.xlu1 %727 }
 0x2b8   :  { %10339 = vst [vmem:[#allocation84_spill] sm:$0xff] %v6167_v39 }
 0x2be   :  { %v6169_v62 = vpop.permute.xlu0 %731  ;;  %v6171_v60 = vpop.permute.xlu2 %747 }
 0x2bf   :  { %10340 = vst [vmem:[#allocation85_spill] sm:$0xff] %v6169_v62  ;;  %v6173_v37 = vpop.permute.xlu1 %733 }
 0x2c0   :  { %10341 = vst [vmem:[#allocation86_spill] sm:$0xff] %v6171_v60 }
 0x2c1   :  { %10342 = vst [vmem:[#allocation87_spill] sm:$0xff] %v6173_v37 }
 0x2c6   :  { %v6175_v35 = vpop.permute.xlu0 %737  ;;  %v819_v50 = vpop.permute.xlu2 %818 }
 0x2c7   :  { %10343 = vst [vmem:[#allocation88_spill] sm:$0xff] %v6175_v35  ;;  %v6177_v49 = vpop.permute.xlu1 %739  ;;  %v850_v30 = vmul.f32 %v819_v50, %v5746_v21  ;;  %v849_v38 = vmul.f32 %v819_v50, %v5751_v22 }
 0x2c8   :  { %10344 = vst [vmem:[#allocation89_spill] sm:$0xff] %v6177_v49 }
 0x2c9   :  { %915 = vrot.lane.b32.xlu0 %v850_v30, %s5629_s13  ;;  %913 = vrot.lane.b32.xlu2 %v849_v38, %s5629_s13 }
 0x2ce   :  { %v6183_v1 = vpop.permute.xlu0 %743  ;;  %v831_v38 = vpop.permute.xlu2 %830 }
 0x2cf   :  { %10345 = vst [vmem:[#allocation90_spill] sm:$0xff] %v6183_v1  ;;  %v6185_v62 = vpop.permute.xlu1 %745 }
 0x2d0   :  { %10346 = vst [vmem:[#allocation91_spill] sm:$0xff] %v6185_v62 }
 0x2d6   :  { %v6187_v39 = vpop.permute.xlu0 %749  ;;  %v839_v57 = vpop.permute.xlu2 %838 }
 0x2d7   :  { %10347 = vst [vmem:[#allocation92_spill] sm:$0xff] %v6187_v39  ;;  %v6189_v60 = vpop.permute.xlu1 %751  ;;  %v855_v39 = vmul.f32 %v831_v38, %v5751_v22 }
 0x2d8   :  { %10348 = vst [vmem:[#allocation93_spill] sm:$0xff] %v6189_v60  ;;  %v856_v60 = vmul.f32 %v831_v38, %v5746_v21 }
 0x2de   :  { %v823_v35 = vpop.permute.xlu0 %822 }
 0x2df   :  { %v827_v33 = vpop.permute.xlu1 %826  ;;  %v851_v3 = vmul.f32 %v823_v35, %v5751_v22  ;;  %v852_v24 = vmul.f32 %v823_v35, %v5746_v21  ;;  %v867_v48 = vmul.f32 %v823_v35, %v5764_v28 }
 0x2e0   :  { %v853_v37 = vmul.f32 %v827_v33, %v5751_v22  ;;  %v854_v30 = vmul.f32 %v827_v33, %v5746_v21 }
 0x2e1   :  { %917 = vrot.lane.b32.xlu1 %v851_v3, %s5629_s13  ;;  %919 = vrot.lane.b32.xlu2 %v852_v24, %s5629_s13 }
 0x2e2   :  { %921 = vrot.lane.b32.xlu0 %v853_v37, %s5629_s13  ;;  %v859_v37 = vmul.f32 %v839_v57, %v5751_v22 }
 0x2e6   :  { %v843_v55 = vpop.permute.xlu0 %842 }
 0x2e7   :  { %v835_v62 = vpop.permute.xlu1 %834 }
 0x2e8   :  { %v857_v3 = vmul.f32 %v835_v62, %v5751_v22  ;;  %v858_v24 = vmul.f32 %v835_v62, %v5746_v21 }
 0x2e9   :  { %923 = vrot.lane.b32.xlu1 %v854_v30, %s5629_s13  ;;  %925 = vrot.lane.b32.xlu2 %v855_v39, %s5629_s13  ;;  %v861_v30 = vmul.f32 %v843_v55, %v5751_v22  ;;  %v860_v39 = vmul.f32 %v839_v57, %v5746_v21 }
 0x2ea   :  { %927 = vrot.lane.b32.xlu0 %v856_v60, %s5629_s13  ;;  %v862_v60 = vmul.f32 %v843_v55, %v5746_v21 }
 0x2ef   :  { %v847_v9 = vpop.permute.xlu1 %846 }
 0x2f1   :  { %929 = vrot.lane.b32.xlu1 %v857_v3, %s5629_s13  ;;  %931 = vrot.lane.b32.xlu2 %v858_v24, %s5629_s13  ;;  %v864_v3 = vmul.f32 %v847_v9, %v5746_v21  ;;  %v863_v24 = vmul.f32 %v847_v9, %v5751_v22 }
 0x2f2   :  { %933 = vrot.lane.b32.xlu0 %v859_v37, %s5629_s13  ;;  %v865_v37 = vmul.f32 %v819_v50, %v5764_v28 }
 0x2f9   :  { %937 = vrot.lane.b32.xlu2 %v861_v30, %s5629_s13  ;;  %935 = vrot.lane.b32.xlu1 %v860_v39, %s5629_s13  ;;  %v866_v30 = vmul.f32 %v819_v50, %v5741_v20  ;;  %v868_v39 = vmul.f32 %v823_v35, %v5741_v20  ;;  %v871_v50 = vmul.f32 %v831_v38, %v5764_v28 }
 0x2fa   :  { %939 = vrot.lane.b32.xlu0 %v862_v60, %s5629_s13  ;;  %v10204_v60 = vmov 5   ;;  %v873_v35 = vmul.f32 %v835_v62, %v5764_v28 }
 0x2fb   :  { %5379 = vset.pattern.permute.xlu1 %v10204_v60  ;;  %5381 = vset.pattern.permute.xlu0 %v10204_v60 }
 0x2fc   :  { %5380 = vset.pattern.permute.xlu2 %v10204_v60 }
 0x301   :  { %943 = vrot.lane.b32.xlu2 %v864_v3, %s5629_s13  ;;  %941 = vrot.lane.b32.xlu1 %v863_v24, %s5629_s13  ;;  %v870_v3 = vmul.f32 %v827_v33, %v5741_v20  ;;  %v869_v24 = vmul.f32 %v827_v33, %v5764_v28  ;;  %v876_v33 = vmul.f32 %v839_v57, %v5741_v20 }
 0x302   :  { %945 = vrot.lane.b32.xlu0 %v865_v37, %s5629_s13  ;;  %v874_v37 = vmul.f32 %v835_v62, %v5741_v20  ;;  %v879_v62 = vmul.f32 %v847_v9, %v5764_v28 }
 0x309   :  { %949 = vrot.lane.b32.xlu2 %v867_v48, %s5629_s13  ;;  %947 = vrot.lane.b32.xlu1 %v866_v30, %s5629_s13  ;;  %v872_v48 = vmul.f32 %v831_v38, %v5741_v20  ;;  %v875_v30 = vmul.f32 %v839_v57, %v5764_v28  ;;  %v878_v38 = vmul.f32 %v843_v55, %v5741_v20 }
 0x30a   :  { %951 = vrot.lane.b32.xlu0 %v868_v39, %s5629_s13  ;;  %v877_v39 = vmul.f32 %v843_v55, %v5764_v28 }
 0x311   :  { %955 = vrot.lane.b32.xlu2 %v870_v3, %s5629_s13  ;;  %953 = vrot.lane.b32.xlu1 %v869_v24, %s5629_s13  ;;  %v880_v3 = vmul.f32 %v847_v9, %v5741_v20 }
 0x312   :  { %957 = vrot.lane.b32.xlu0 %v871_v50, %s5629_s13 }
 0x319   :  { %961 = vrot.lane.b32.xlu2 %v873_v35, %s5629_s13  ;;  %959 = vrot.lane.b32.xlu1 %v872_v48, %s5629_s13 }
 0x31a   :  { %963 = vrot.lane.b32.xlu0 %v874_v37, %s5629_s13 }
 0x321   :  { %967 = vrot.lane.b32.xlu2 %v876_v33, %s5629_s13  ;;  %965 = vrot.lane.b32.xlu1 %v875_v30, %s5629_s13 }
 0x322   :  { %969 = vrot.lane.b32.xlu0 %v877_v39, %s5629_s13 }
 0x323   :  { %v6257_v57 = vpop.permute.xlu2 %913 }
 0x329   :  { %973 = vrot.lane.b32.xlu2 %v879_v62, %s5629_s13  ;;  %971 = vrot.lane.b32.xlu1 %v878_v38, %s5629_s13 }
 0x32a   :  { %975 = vrot.lane.b32.xlu0 %v880_v3, %s5629_s13 }
 0x331   :  { %1046 = vperm.xlu2 %5380, %v5708_v10   ;;  %1042 = vperm.xlu1 %5379, %v5697_v2  }
 0x332   :  { %1050 = vperm.xlu0 %5381, %v5704_v6  }
 0x339   :  { %1054 = vperm.xlu1 %5379, %v5712_v12   ;;  %1058 = vperm.xlu2 %5380, %v5702_v5  }
 0x33a   :  { %1070 = vperm.xlu0 %5381, %v5719_v16  }
 0x33b   :  { %v6262_v20 = vpop.permute.xlu2 %919  ;;  %v6270_v24 = vpop.permute.xlu0 %915 }
 0x33c   :  { %10351 = vst [vmem:[#allocation96_spill] sm:$0xff] %v6270_v24 }
 0x341   :  { %1062 = vperm.xlu1 %5379, %v5710_v11   ;;  %1066 = vperm.xlu2 %5380, %v5717_v15  }
 0x343   :  { %v6266_v55 = vpop.permute.xlu2 %925 }
 0x344   :  { %10349 = vst [vmem:[#allocation94_spill] sm:$0xff] %v6266_v55  ;;  %v5638_v55 = vmov 9  }
 0x34b   :  { %v6268_v9 = vpop.permute.xlu2 %931 }
 0x34c   :  { %10350 = vst [vmem:[#allocation95_spill] sm:$0xff] %v6268_v9 }
 0x353   :  { %v6272_v50 = vpop.permute.xlu1 %917  ;;  %v6274_v35 = vpop.permute.xlu2 %937 }
 0x354   :  { %10352 = vst [vmem:[#allocation97_spill] sm:$0xff] %v6272_v50  ;;  %v6276_v48 = vpop.permute.xlu0 %921 }
 0x355   :  { %10353 = vst [vmem:[#allocation98_spill] sm:$0xff] %v6274_v35 }
 0x356   :  { %10354 = vst [vmem:[#allocation99_spill] sm:$0xff] %v6276_v48 }
 0x35b   :  { %v6278_v37 = vpop.permute.xlu1 %923  ;;  %v6280_v33 = vpop.permute.xlu2 %943 }
 0x35c   :  { %10355 = vst [vmem:[#allocation100_spill] sm:$0xff] %v6278_v37  ;;  %v6282_v30 = vpop.permute.xlu0 %927 }
 0x35d   :  { %10356 = vst [vmem:[#allocation101_spill] sm:$0xff] %v6280_v33 }
 0x35e   :  { %10357 = vst [vmem:[#allocation102_spill] sm:$0xff] %v6282_v30 }
 0x363   :  { %v6284_v39 = vpop.permute.xlu1 %929  ;;  %v6286_v62 = vpop.permute.xlu2 %949 }
 0x364   :  { %10358 = vst [vmem:[#allocation103_spill] sm:$0xff] %v6284_v39  ;;  %v6288_v38 = vpop.permute.xlu0 %933 }
 0x365   :  { %10359 = vst [vmem:[#allocation104_spill] sm:$0xff] %v6288_v38 }
 0x36b   :  { %v6290_v3 = vpop.permute.xlu1 %935  ;;  %v6292_v60 = vpop.permute.xlu2 %955 }
 0x36c   :  { %10360 = vst [vmem:[#allocation105_spill] sm:$0xff] %v6290_v3  ;;  %v6294_v9 = vpop.permute.xlu0 %939 }
 0x36d   :  { %10361 = vst [vmem:[#allocation106_spill] sm:$0xff] %v6292_v60 }
 0x36e   :  { %10362 = vst [vmem:[#allocation107_spill] sm:$0xff] %v6294_v9 }
 0x373   :  { %v6296_v35 = vpop.permute.xlu1 %941  ;;  %v6298_v48 = vpop.permute.xlu2 %961 }
 0x374   :  { %10363 = vst [vmem:[#allocation108_spill] sm:$0xff] %v6296_v35  ;;  %v6300_v37 = vpop.permute.xlu0 %945 }
 0x375   :  { %10364 = vst [vmem:[#allocation109_spill] sm:$0xff] %v6298_v48 }
 0x376   :  { %10365 = vst [vmem:[#allocation110_spill] sm:$0xff] %v6300_v37 }
 0x37b   :  { %v6302_v33 = vpop.permute.xlu1 %947  ;;  %v6304_v24 = vpop.permute.xlu2 %967 }
 0x37c   :  { %10366 = vst [vmem:[#allocation111_spill] sm:$0xff] %v6302_v33  ;;  %v6306_v39 = vpop.permute.xlu0 %951 }
 0x37d   :  { %10367 = vst [vmem:[#allocation112_spill] sm:$0xff] %v6304_v24 }
 0x37e   :  { %10368 = vst [vmem:[#allocation113_spill] sm:$0xff] %v6306_v39 }
 0x383   :  { %v6308_v30 = vpop.permute.xlu1 %953  ;;  %v6310_v38 = vpop.permute.xlu2 %973 }
 0x384   :  { %10369 = vst [vmem:[#allocation114_spill] sm:$0xff] %v6308_v30  ;;  %v6312_v3 = vpop.permute.xlu0 %957 }
 0x385   :  { %10370 = vst [vmem:[#allocation115_spill] sm:$0xff] %v6310_v38 }
 0x386   :  { %10371 = vst [vmem:[#allocation116_spill] sm:$0xff] %v6312_v3 }
 0x38b   :  { %v6314_v60 = vpop.permute.xlu1 %959  ;;  %v1047_v9 = vpop.permute.xlu2 %1046 }
 0x38c   :  { %10372 = vst [vmem:[#allocation117_spill] sm:$0xff] %v6314_v60  ;;  %v6316_v35 = vpop.permute.xlu0 %963  ;;  %v1075_v48 = vmul.f32 %v1047_v9, %v5751_v22 }
 0x38d   :  { %10373 = vst [vmem:[#allocation118_spill] sm:$0xff] %v6316_v35 }
 0x38e   :  { %1141 = vrot.lane.b32.xlu0 %v1075_v48, %s5631_s14 }
 0x393   :  { %v6320_v37 = vpop.permute.xlu1 %965 }
 0x394   :  { %10374 = vst [vmem:[#allocation119_spill] sm:$0xff] %v6320_v37  ;;  %v6322_v33 = vpop.permute.xlu0 %969 }
 0x395   :  { %10375 = vst [vmem:[#allocation120_spill] sm:$0xff] %v6322_v33  ;;  %v1059_v33 = vpop.permute.xlu2 %1058 }
 0x39b   :  { %v6324_v39 = vpop.permute.xlu1 %971 }
 0x39c   :  { %10376 = vst [vmem:[#allocation121_spill] sm:$0xff] %v6324_v39  ;;  %v6326_v24 = vpop.permute.xlu0 %975  ;;  %v1081_v39 = vmul.f32 %v1059_v33, %v5751_v22 }
 0x39d   :  { %10377 = vst [vmem:[#allocation122_spill] sm:$0xff] %v6326_v24  ;;  %v1076_v24 = vmul.f32 %v1047_v9, %v5746_v21  ;;  %v1067_v26 = vpop.permute.xlu2 %1066 }
 0x3a3   :  { %v1043_v38 = vpop.permute.xlu1 %1042 }
 0x3a4   :  { %v1051_v3 = vpop.permute.xlu0 %1050  ;;  %v1074_v53 = vmul.f32 %v1043_v38, %v5746_v21  ;;  %v1073_v41 = vmul.f32 %v1043_v38, %v5751_v22 }
 0x3a5   :  { %v1078_v1 = vmul.f32 %v1051_v3, %v5746_v21  ;;  %v1077_v48 = vmul.f32 %v1051_v3, %v5751_v22 }
 0x3a6   :  { %1139 = vrot.lane.b32.xlu2 %v1074_v53, %s5631_s14  ;;  %1137 = vrot.lane.b32.xlu1 %v1073_v41, %s5631_s14 }
 0x3a7   :  { %1147 = vrot.lane.b32.xlu0 %v1078_v1, %s5631_s14 }
 0x3ab   :  { %v1055_v37 = vpop.permute.xlu1 %1054 }
 0x3ac   :  { %v1080_v53 = vmul.f32 %v1055_v37, %v5746_v21  ;;  %v1079_v41 = vmul.f32 %v1055_v37, %v5751_v22  ;;  %v1071_v34 = vpop.permute.xlu0 %1070 }
 0x3ae   :  { %1145 = vrot.lane.b32.xlu2 %v1077_v48, %s5631_s14  ;;  %1143 = vrot.lane.b32.xlu1 %v1076_v24, %s5631_s14  ;;  %v1082_v24 = vmul.f32 %v1059_v33, %v5746_v21 }
 0x3af   :  { %1153 = vrot.lane.b32.xlu0 %v1081_v39, %s5631_s14  ;;  %v1087_v39 = vmul.f32 %v1071_v34, %v5751_v22 }
 0x3b3   :  { %v1063_v45 = vpop.permute.xlu1 %1062 }
 0x3b4   :  { %v1084_v1 = vmul.f32 %v1063_v45, %v5746_v21  ;;  %v1083_v48 = vmul.f32 %v1063_v45, %v5751_v22  ;;  %v6361_v21 = vld [vmem:[%s10188_s0] sm:$0xff] }
 0x3b5   :  { %v1085_v22 = vmul.f32 %v6361_v21, %v1067_v26 }
 0x3b6   :  { %1151 = vrot.lane.b32.xlu2 %v1080_v53, %s5631_s14  ;;  %1149 = vrot.lane.b32.xlu1 %v1079_v41, %s5631_s14  ;;  %v6355_v53 = vld [vmem:[%s10188_s0 + $0x8] sm:$0xff] }
 0x3b7   :  { %1159 = vrot.lane.b32.xlu0 %v1084_v1, %s5631_s14  ;;  %v1086_v41 = vmul.f32 %v6355_v53, %v1067_v26  ;;  %v6367_v1 = vld [vmem:[%s10188_s0 + $0x18] sm:$0xff]  ;;  %v1088_v50 = vmul.f32 %v6355_v53, %v1071_v34 }
 0x3be   :  { %1157 = vrot.lane.b32.xlu2 %v1083_v48, %s5631_s14  ;;  %1155 = vrot.lane.b32.xlu1 %v1082_v24, %s5631_s14  ;;  %v1090_v48 = vmul.f32 %v6367_v1, %v1043_v38  ;;  %v10205_v24 = vmov 6  }
 0x3bf   :  { %1165 = vrot.lane.b32.xlu0 %v1087_v39, %s5631_s14  ;;  %5383 = vset.pattern.permute.xlu1 %v10205_v24  ;;  %v1089_v39 = vmul.f32 %v1043_v38, %v5764_v28  ;;  %v1096_v28 = vmul.f32 %v6367_v1, %v1055_v37  ;;  %v1095_v38 = vmul.f32 %v6381_v52, %v1055_v37 }
 0x3c0   :  { %5382 = vset.pattern.permute.xlu0 %v10205_v24  ;;  %5384 = vset.pattern.permute.xlu2 %v10205_v24  ;;  %v1101_v37 = vmul.f32 %v6381_v52, %v1067_v26 }
 0x3c6   :  { %1163 = vrot.lane.b32.xlu2 %v1086_v41, %s5631_s14  ;;  %1161 = vrot.lane.b32.xlu1 %v1085_v22, %s5631_s14  ;;  %v1093_v41 = vmul.f32 %v6381_v52, %v1051_v3  ;;  %v1092_v22 = vmul.f32 %v6367_v1, %v1047_v9 }
 0x3c7   :  { %1171 = vrot.lane.b32.xlu0 %v1090_v48, %s5631_s14  ;;  %v1091_v48 = vmul.f32 %v6381_v52, %v1047_v9  ;;  %v1098_v9 = vmul.f32 %v6367_v1, %v1059_v33 }
 0x3ce   :  { %1169 = vrot.lane.b32.xlu2 %v1089_v39, %s5631_s14  ;;  %1167 = vrot.lane.b32.xlu1 %v1088_v50, %s5631_s14  ;;  %v1094_v39 = vmul.f32 %v6367_v1, %v1051_v3  ;;  %v1099_v50 = vmul.f32 %v6381_v52, %v1063_v45  ;;  %v1100_v3 = vmul.f32 %v6367_v1, %v1063_v45 }
 0x3cf   :  { %1177 = vrot.lane.b32.xlu0 %v1093_v41, %s5631_s14  ;;  %v1097_v41 = vmul.f32 %v6381_v52, %v1059_v33  ;;  %v1104_v33 = vmul.f32 %v6367_v1, %v1071_v34 }
 0x3d6   :  { %1175 = vrot.lane.b32.xlu2 %v1092_v22, %s5631_s14  ;;  %1173 = vrot.lane.b32.xlu1 %v1091_v48, %s5631_s14  ;;  %v1102_v22 = vmul.f32 %v6367_v1, %v1067_v26  ;;  %v1103_v48 = vmul.f32 %v6381_v52, %v1071_v34 }
 0x3d7   :  { %1183 = vrot.lane.b32.xlu0 %v1096_v28, %s5631_s14 }
 0x3de   :  { %1181 = vrot.lane.b32.xlu2 %v1095_v38, %s5631_s14  ;;  %1179 = vrot.lane.b32.xlu1 %v1094_v39, %s5631_s14 }
 0x3df   :  { %1189 = vrot.lane.b32.xlu0 %v1099_v50, %s5631_s14 }
 0x3e6   :  { %1187 = vrot.lane.b32.xlu2 %v1098_v9, %s5631_s14  ;;  %1185 = vrot.lane.b32.xlu1 %v1097_v41, %s5631_s14 }
 0x3e7   :  { %1195 = vrot.lane.b32.xlu0 %v1102_v22, %s5631_s14 }
 0x3ee   :  { %1193 = vrot.lane.b32.xlu2 %v1101_v37, %s5631_s14  ;;  %1191 = vrot.lane.b32.xlu1 %v1100_v3, %s5631_s14 }
 0x3ef   :  { %1266 = vperm.xlu0 %5382, %v5697_v2  }
 0x3f6   :  { %1199 = vrot.lane.b32.xlu2 %v1104_v33, %s5631_s14  ;;  %1197 = vrot.lane.b32.xlu1 %v1103_v48, %s5631_s14 }
 0x3f7   :  { %1286 = vperm.xlu0 %5382, %v5710_v11  }
 0x3fe   :  { %1270 = vperm.xlu1 %5383, %v5708_v10   ;;  %1274 = vperm.xlu2 %5384, %v5704_v6  }
 0x400   :  { %v6417_v26 = vpop.permute.xlu2 %1139  ;;  %v6427_v28 = vpop.permute.xlu0 %1141 }
 0x401   :  { %10378 = vst [vmem:[#allocation123_spill] sm:$0xff] %v6417_v26 }
 0x402   :  { %10381 = vst [vmem:[#allocation126_spill] sm:$0xff] %v6427_v28 }
 0x406   :  { %1278 = vperm.xlu1 %5383, %v5712_v12   ;;  %1282 = vperm.xlu2 %5384, %v5702_v5  }
 0x408   :  { %v6421_v45 = vpop.permute.xlu2 %1145 }
 0x409   :  { %10379 = vst [vmem:[#allocation124_spill] sm:$0xff] %v6421_v45 }
 0x40e   :  { %1290 = vperm.xlu1 %5383, %v5717_v15   ;;  %1294 = vperm.xlu2 %5384, %v5719_v16  }
 0x410   :  { %v6425_v34 = vpop.permute.xlu2 %1151 }
 0x411   :  { %10380 = vst [vmem:[#allocation125_spill] sm:$0xff] %v6425_v34 }
 0x418   :  { %v6429_v38 = vpop.permute.xlu1 %1137  ;;  %v6431_v39 = vpop.permute.xlu2 %1157 }
 0x419   :  { %10382 = vst [vmem:[#allocation127_spill] sm:$0xff] %v6431_v39  ;;  %v6433_v50 = vpop.permute.xlu0 %1147 }
 0x41a   :  { %10383 = vst [vmem:[#allocation128_spill] sm:$0xff] %v6433_v50 }
 0x420   :  { %v6435_v9 = vpop.permute.xlu1 %1143  ;;  %v6439_v22 = vpop.permute.xlu2 %1163 }
 0x421   :  { %v6437_v41 = vpop.permute.xlu0 %1153  ;;  %10385 = vst [vmem:[#allocation130_spill] sm:$0xff] %v6439_v22 }
 0x422   :  { %10384 = vst [vmem:[#allocation129_spill] sm:$0xff] %v6437_v41 }
 0x428   :  { %v6441_v37 = vpop.permute.xlu1 %1149  ;;  %v6445_v33 = vpop.permute.xlu2 %1169 }
 0x429   :  { %10386 = vst [vmem:[#allocation131_spill] sm:$0xff] %v6441_v37  ;;  %v6443_v3 = vpop.permute.xlu0 %1159 }
 0x42a   :  { %10387 = vst [vmem:[#allocation132_spill] sm:$0xff] %v6443_v3 }
 0x42b   :  { %10388 = vst [vmem:[#allocation133_spill] sm:$0xff] %v6445_v33 }
 0x430   :  { %v6447_v48 = vpop.permute.xlu1 %1155  ;;  %v6451_v45 = vpop.permute.xlu2 %1175 }
 0x431   :  { %10389 = vst [vmem:[#allocation134_spill] sm:$0xff] %v6447_v48  ;;  %v6449_v24 = vpop.permute.xlu0 %1165 }
 0x432   :  { %10390 = vst [vmem:[#allocation135_spill] sm:$0xff] %v6449_v24 }
 0x433   :  { %10391 = vst [vmem:[#allocation136_spill] sm:$0xff] %v6451_v45 }
 0x438   :  { %v6453_v39 = vpop.permute.xlu1 %1161  ;;  %v6457_v26 = vpop.permute.xlu2 %1181 }
 0x439   :  { %10392 = vst [vmem:[#allocation137_spill] sm:$0xff] %v6453_v39  ;;  %v6455_v50 = vpop.permute.xlu0 %1171 }
 0x43a   :  { %10393 = vst [vmem:[#allocation138_spill] sm:$0xff] %v6455_v50 }
 0x43b   :  { %10394 = vst [vmem:[#allocation139_spill] sm:$0xff] %v6457_v26 }
 0x440   :  { %v6459_v41 = vpop.permute.xlu1 %1167  ;;  %v6465_v3 = vpop.permute.xlu2 %1187 }
 0x441   :  { %10395 = vst [vmem:[#allocation140_spill] sm:$0xff] %v6459_v41  ;;  %v6461_v22 = vpop.permute.xlu0 %1177 }
 0x442   :  { %10396 = vst [vmem:[#allocation141_spill] sm:$0xff] %v6461_v22 }
 0x443   :  { %10397 = vst [vmem:[#allocation142_spill] sm:$0xff] %v6465_v3 }
 0x448   :  { %v6463_v34 = vpop.permute.xlu1 %1173  ;;  %v6473_v45 = vpop.permute.xlu2 %1193 }
 0x449   :  { %v6467_v33 = vpop.permute.xlu0 %1183  ;;  %10401 = vst [vmem:[#allocation146_spill] sm:$0xff] %v6473_v45 }
 0x44a   :  { %10398 = vst [vmem:[#allocation143_spill] sm:$0xff] %v6467_v33 }
 0x450   :  { %v6469_v48 = vpop.permute.xlu1 %1179  ;;  %v6479_v26 = vpop.permute.xlu2 %1199 }
 0x451   :  { %10399 = vst [vmem:[#allocation144_spill] sm:$0xff] %v6469_v48  ;;  %v6471_v24 = vpop.permute.xlu0 %1189 }
 0x452   :  { %10400 = vst [vmem:[#allocation145_spill] sm:$0xff] %v6471_v24 }
 0x453   :  { %10404 = vst [vmem:[#allocation149_spill] sm:$0xff] %v6479_v26 }
 0x458   :  { %v6475_v39 = vpop.permute.xlu1 %1185  ;;  %v1275_v48 = vpop.permute.xlu2 %1274 }
 0x459   :  { %10402 = vst [vmem:[#allocation147_spill] sm:$0xff] %v6475_v39  ;;  %v6477_v50 = vpop.permute.xlu0 %1195  ;;  %v1301_v45 = vmul.f32 %v6361_v21, %v1275_v48 }
 0x45a   :  { %10403 = vst [vmem:[#allocation148_spill] sm:$0xff] %v6477_v50 }
 0x460   :  { %v6481_v41 = vpop.permute.xlu1 %1191  ;;  %v1283_v33 = vpop.permute.xlu2 %1282 }
 0x461   :  { %10405 = vst [vmem:[#allocation150_spill] sm:$0xff] %v6481_v41  ;;  %v1267_v28 = vpop.permute.xlu0 %1266  ;;  %v1306_v17 = vmul.f32 %v6355_v53, %v1283_v33 }
 0x462   :  { %v1297_v47 = vmul.f32 %v6361_v21, %v1267_v28  ;;  %v1298_v19 = vmul.f32 %v6355_v53, %v1267_v28 }
 0x464   :  { %1361 = vrot.lane.b32.xlu0 %v1297_v47, %s5633_s23  ;;  %1363 = vrot.lane.b32.xlu1 %v1298_v19, %s5633_s23  ;;  %v1302_v47 = vmul.f32 %v6355_v53, %v1275_v48 }
 0x468   :  { %v6487_v24 = vpop.permute.xlu1 %1197  ;;  %v1295_v36 = vpop.permute.xlu2 %1294 }
 0x469   :  { %10406 = vst [vmem:[#allocation151_spill] sm:$0xff] %v6487_v24 }
 0x46c   :  { %1369 = vrot.lane.b32.xlu1 %v1301_v45, %s5633_s23  ;;  %v1287_v45 = vpop.permute.xlu0 %1286 }
 0x470   :  { %v1271_v26 = vpop.permute.xlu1 %1270 }
 0x471   :  { %v1300_v39 = vmul.f32 %v6355_v53, %v1271_v26  ;;  %v1299_v50 = vmul.f32 %v6361_v21, %v1271_v26  ;;  %v1315_v61 = vmul.f32 %v6381_v52, %v1271_v26 }
 0x473   :  { %1367 = vrot.lane.b32.xlu0 %v1300_v39, %s5633_s23  ;;  %1365 = vrot.lane.b32.xlu2 %v1299_v50, %s5633_s23  ;;  %v1305_v39 = vmul.f32 %v6361_v21, %v1283_v33  ;;  %v1307_v50 = vmul.f32 %v6361_v21, %v1287_v45 }
 0x478   :  { %v1279_v41 = vpop.permute.xlu1 %1278 }
 0x479   :  { %v1303_v19 = vmul.f32 %v6361_v21, %v1279_v41  ;;  %v1304_v24 = vmul.f32 %v6355_v53, %v1279_v41 }
 0x47b   :  { %1373 = vrot.lane.b32.xlu0 %v1303_v19, %s5633_s23  ;;  %1371 = vrot.lane.b32.xlu2 %v1302_v47, %s5633_s23  ;;  %v1308_v47 = vmul.f32 %v6355_v53, %v1287_v45 }
 0x47c   :  { %1375 = vrot.lane.b32.xlu1 %v1304_v24, %s5633_s23 }
 0x480   :  { %v1291_v60 = vpop.permute.xlu1 %1290 }
 0x481   :  { %v1309_v19 = vmul.f32 %v6361_v21, %v1291_v60  ;;  %v1310_v24 = vmul.f32 %v6355_v53, %v1291_v60 }
 0x483   :  { %1379 = vrot.lane.b32.xlu0 %v1306_v17, %s5633_s23  ;;  %1377 = vrot.lane.b32.xlu2 %v1305_v39, %s5633_s23  ;;  %v1312_v17 = vmul.f32 %v6355_v53, %v1295_v36  ;;  %v1311_v39 = vmul.f32 %v6361_v21, %v1295_v36 }
 0x484   :  { %1381 = vrot.lane.b32.xlu1 %v1307_v50, %s5633_s23  ;;  %v1313_v50 = vmul.f32 %v6381_v52, %v1267_v28 }
 0x48b   :  { %1385 = vrot.lane.b32.xlu0 %v1309_v19, %s5633_s23  ;;  %1383 = vrot.lane.b32.xlu2 %v1308_v47, %s5633_s23  ;;  %v1314_v19 = vmul.f32 %v6367_v1, %v1267_v28  ;;  %v1316_v47 = vmul.f32 %v6367_v1, %v1271_v26  ;;  %v1319_v28 = vmul.f32 %v6381_v52, %v1279_v41 }
 0x48c   :  { %1387 = vrot.lane.b32.xlu1 %v1310_v24, %s5633_s23  ;;  %v10207_v24 = vmov 7   ;;  %v1320_v26 = vmul.f32 %v6367_v1, %v1279_v41  ;;  %v1327_v41 = vmul.f32 %v6381_v52, %v1295_v36 }
 0x48d   :  { %5386 = vset.pattern.permute.xlu0 %v10207_v24  ;;  %5385 = vset.pattern.permute.xlu2 %v10207_v24 }
 0x48e   :  { %5387 = vset.pattern.permute.xlu1 %v10207_v24 }
 0x493   :  { %1391 = vrot.lane.b32.xlu0 %v1312_v17, %s5633_s23  ;;  %1389 = vrot.lane.b32.xlu2 %v1311_v39, %s5633_s23  ;;  %v1318_v17 = vmul.f32 %v6367_v1, %v1275_v48  ;;  %v1317_v39 = vmul.f32 %v6381_v52, %v1275_v48  ;;  %v1324_v48 = vmul.f32 %v6367_v1, %v1287_v45 }
 0x494   :  { %1393 = vrot.lane.b32.xlu1 %v1313_v50, %s5633_s23  ;;  %v1322_v50 = vmul.f32 %v6367_v1, %v1283_v33 }
 0x49b   :  { %1397 = vrot.lane.b32.xlu0 %v1315_v61, %s5633_s23  ;;  %1395 = vrot.lane.b32.xlu2 %v1314_v19, %s5633_s23  ;;  %v1321_v61 = vmul.f32 %v6381_v52, %v1283_v33  ;;  %v1323_v19 = vmul.f32 %v6381_v52, %v1287_v45  ;;  %v1326_v33 = vmul.f32 %v6367_v1, %v1291_v60 }
 0x49c   :  { %1399 = vrot.lane.b32.xlu1 %v1316_v47, %s5633_s23  ;;  %v1325_v47 = vmul.f32 %v6381_v52, %v1291_v60 }
 0x4a3   :  { %1403 = vrot.lane.b32.xlu0 %v1318_v17, %s5633_s23  ;;  %1401 = vrot.lane.b32.xlu2 %v1317_v39, %s5633_s23  ;;  %v1328_v17 = vmul.f32 %v6367_v1, %v1295_v36 }
 0x4a4   :  { %1405 = vrot.lane.b32.xlu1 %v1319_v28, %s5633_s23 }
 0x4ab   :  { %1409 = vrot.lane.b32.xlu0 %v1321_v61, %s5633_s23  ;;  %1407 = vrot.lane.b32.xlu2 %v1320_v26, %s5633_s23 }
 0x4ac   :  { %1411 = vrot.lane.b32.xlu1 %v1322_v50, %s5633_s23 }
 0x4b3   :  { %1415 = vrot.lane.b32.xlu0 %v1324_v48, %s5633_s23  ;;  %1413 = vrot.lane.b32.xlu2 %v1323_v19, %s5633_s23 }
 0x4b4   :  { %1417 = vrot.lane.b32.xlu1 %v1325_v47, %s5633_s23 }
 0x4bb   :  { %1421 = vrot.lane.b32.xlu0 %v1327_v41, %s5633_s23  ;;  %1419 = vrot.lane.b32.xlu2 %v1326_v33, %s5633_s23 }
 0x4bc   :  { %1423 = vrot.lane.b32.xlu1 %v1328_v17, %s5633_s23 }
 0x4c3   :  { %1494 = vperm.xlu0 %5386, %v5708_v10   ;;  %1490 = vperm.xlu2 %5385, %v5697_v2  }
 0x4c4   :  { %1498 = vperm.xlu1 %5387, %v5704_v6  }
 0x4cb   :  { %1514 = vperm.xlu0 %5386, %v5717_v15   ;;  %1502 = vperm.xlu2 %5385, %v5712_v12  }
 0x4cc   :  { %1506 = vperm.xlu1 %5387, %v5702_v5  }
 0x4cd   :  { %v6558_v60 = vpop.permute.xlu2 %1365 }
 0x4ce   :  { %10407 = vst [vmem:[#allocation152_spill] sm:$0xff] %v6558_v60 }
 0x4d3   :  { %1510 = vperm.xlu2 %5385, %v5710_v11  }
 0x4d4   :  { %1518 = vperm.xlu1 %5387, %v5719_v16  }
 0x4d5   :  { %v6562_v36 = vpop.permute.xlu2 %1371 }
 0x4d6   :  { %10408 = vst [vmem:[#allocation153_spill] sm:$0xff] %v6562_v36  ;;  %v6564_v45 = vpop.permute.xlu1 %1363  ;;  %v6566_v39 = vpop.permute.xlu0 %1361 }
 0x4d7   :  { %10409 = vst [vmem:[#allocation154_spill] sm:$0xff] %v6564_v45 }
 0x4dd   :  { %v6568_v28 = vpop.permute.xlu2 %1377 }
 0x4de   :  { %10410 = vst [vmem:[#allocation155_spill] sm:$0xff] %v6568_v28  ;;  %v6574_v50 = vpop.permute.xlu1 %1369 }
 0x4df   :  { %10412 = vst [vmem:[#allocation157_spill] sm:$0xff] %v6574_v50 }
 0x4e5   :  { %v6570_v61 = vpop.permute.xlu0 %1367  ;;  %v6572_v26 = vpop.permute.xlu2 %1383 }
 0x4e6   :  { %10411 = vst [vmem:[#allocation156_spill] sm:$0xff] %v6572_v26 }
 0x4ed   :  { %v6576_v48 = vpop.permute.xlu0 %1373  ;;  %v6578_v19 = vpop.permute.xlu2 %1389 }
 0x4ee   :  { %10413 = vst [vmem:[#allocation158_spill] sm:$0xff] %v6576_v48  ;;  %v6580_v47 = vpop.permute.xlu1 %1375 }
 0x4ef   :  { %10414 = vst [vmem:[#allocation159_spill] sm:$0xff] %v6578_v19 }
 0x4f0   :  { %10415 = vst [vmem:[#allocation160_spill] sm:$0xff] %v6580_v47 }
 0x4f5   :  { %v6582_v41 = vpop.permute.xlu0 %1379  ;;  %v6584_v33 = vpop.permute.xlu2 %1395 }
 0x4f6   :  { %10416 = vst [vmem:[#allocation161_spill] sm:$0xff] %v6582_v41  ;;  %v6586_v17 = vpop.permute.xlu1 %1381 }
 0x4f7   :  { %10417 = vst [vmem:[#allocation162_spill] sm:$0xff] %v6584_v33 }
 0x4f8   :  { %10418 = vst [vmem:[#allocation163_spill] sm:$0xff] %v6586_v17 }
 0x4fd   :  { %v6588_v24 = vpop.permute.xlu0 %1385  ;;  %v6590_v28 = vpop.permute.xlu2 %1401 }
 0x4fe   :  { %10419 = vst [vmem:[#allocation164_spill] sm:$0xff] %v6588_v24  ;;  %v6592_v36 = vpop.permute.xlu1 %1387 }
 0x4ff   :  { %10420 = vst [vmem:[#allocation165_spill] sm:$0xff] %v6590_v28 }
 0x500   :  { %10421 = vst [vmem:[#allocation166_spill] sm:$0xff] %v6592_v36 }
 0x505   :  { %v6594_v26 = vpop.permute.xlu0 %1391  ;;  %v6596_v50 = vpop.permute.xlu2 %1407 }
 0x506   :  { %10422 = vst [vmem:[#allocation167_spill] sm:$0xff] %v6594_v26  ;;  %v6598_v45 = vpop.permute.xlu1 %1393 }
 0x507   :  { %10423 = vst [vmem:[#allocation168_spill] sm:$0xff] %v6596_v50 }
 0x508   :  { %10424 = vst [vmem:[#allocation169_spill] sm:$0xff] %v6598_v45 }
 0x50d   :  { %v6600_v19 = vpop.permute.xlu0 %1397  ;;  %v6602_v47 = vpop.permute.xlu2 %1413 }
 0x50e   :  { %10425 = vst [vmem:[#allocation170_spill] sm:$0xff] %v6602_v47  ;;  %v6604_v41 = vpop.permute.xlu1 %1399 }
 0x50f   :  { %10426 = vst [vmem:[#allocation171_spill] sm:$0xff] %v6604_v41 }
 0x515   :  { %v6606_v33 = vpop.permute.xlu0 %1403  ;;  %v6608_v17 = vpop.permute.xlu2 %1419 }
 0x516   :  { %10427 = vst [vmem:[#allocation172_spill] sm:$0xff] %v6606_v33  ;;  %v6610_v24 = vpop.permute.xlu1 %1405 }
 0x517   :  { %10428 = vst [vmem:[#allocation173_spill] sm:$0xff] %v6608_v17 }
 0x518   :  { %10429 = vst [vmem:[#allocation174_spill] sm:$0xff] %v6610_v24 }
 0x51d   :  { %v6612_v60 = vpop.permute.xlu0 %1409  ;;  %v1491_v36 = vpop.permute.xlu2 %1490 }
 0x51e   :  { %10430 = vst [vmem:[#allocation175_spill] sm:$0xff] %v6612_v60  ;;  %v6614_v26 = vpop.permute.xlu1 %1411  ;;  %v1522_v50 = vmul.f32 %v6355_v53, %v1491_v36  ;;  %v1521_v45 = vmul.f32 %v6361_v21, %v1491_v36 }
 0x51f   :  { %10431 = vst [vmem:[#allocation176_spill] sm:$0xff] %v6614_v26 }
 0x520   :  { %1587 = vrot.lane.b32.xlu0 %v1522_v50, %s5635_s24  ;;  %1585 = vrot.lane.b32.xlu2 %v1521_v45, %s5635_s24 }
 0x525   :  { %v6620_v47 = vpop.permute.xlu0 %1415  ;;  %v1503_v45 = vpop.permute.xlu2 %1502 }
 0x526   :  { %10432 = vst [vmem:[#allocation177_spill] sm:$0xff] %v6620_v47  ;;  %v6622_v33 = vpop.permute.xlu1 %1417 }
 0x527   :  { %10433 = vst [vmem:[#allocation178_spill] sm:$0xff] %v6622_v33 }
 0x52d   :  { %v6624_v41 = vpop.permute.xlu0 %1421  ;;  %v1511_v47 = vpop.permute.xlu2 %1510 }
 0x52e   :  { %10434 = vst [vmem:[#allocation179_spill] sm:$0xff] %v6624_v41  ;;  %v6626_v17 = vpop.permute.xlu1 %1423  ;;  %v1527_v41 = vmul.f32 %v6361_v21, %v1503_v45 }
 0x52f   :  { %10435 = vst [vmem:[#allocation180_spill] sm:$0xff] %v6626_v17  ;;  %v1528_v17 = vmul.f32 %v6355_v53, %v1503_v45 }
 0x535   :  { %v1495_v60 = vpop.permute.xlu0 %1494 }
 0x536   :  { %v1499_v24 = vpop.permute.xlu1 %1498  ;;  %v1523_v28 = vmul.f32 %v6361_v21, %v1495_v60  ;;  %v1524_v48 = vmul.f32 %v6355_v53, %v1495_v60  ;;  %v1539_v30 = vmul.f32 %v6381_v52, %v1495_v60 }
 0x537   :  { %v1525_v22 = vmul.f32 %v6361_v21, %v1499_v24  ;;  %v1526_v50 = vmul.f32 %v6355_v53, %v1499_v24 }
 0x538   :  { %1589 = vrot.lane.b32.xlu1 %v1523_v28, %s5635_s24  ;;  %1591 = vrot.lane.b32.xlu2 %v1524_v48, %s5635_s24 }
 0x539   :  { %1593 = vrot.lane.b32.xlu0 %v1525_v22, %s5635_s24  ;;  %v1531_v22 = vmul.f32 %v6361_v21, %v1511_v47 }
 0x53d   :  { %v1515_v40 = vpop.permute.xlu0 %1514 }
 0x53e   :  { %v1507_v33 = vpop.permute.xlu1 %1506 }
 0x53f   :  { %v1529_v28 = vmul.f32 %v6361_v21, %v1507_v33  ;;  %v1530_v48 = vmul.f32 %v6355_v53, %v1507_v33 }
 0x540   :  { %1595 = vrot.lane.b32.xlu1 %v1526_v50, %s5635_s24  ;;  %1597 = vrot.lane.b32.xlu2 %v1527_v41, %s5635_s24  ;;  %v1533_v50 = vmul.f32 %v6361_v21, %v1515_v40  ;;  %v1532_v41 = vmul.f32 %v6355_v53, %v1511_v47 }
 0x541   :  { %1599 = vrot.lane.b32.xlu0 %v1528_v17, %s5635_s24  ;;  %v1534_v17 = vmul.f32 %v6355_v53, %v1515_v40 }
 0x546   :  { %v1519_v37 = vpop.permute.xlu1 %1518 }
 0x548   :  { %1601 = vrot.lane.b32.xlu1 %v1529_v28, %s5635_s24  ;;  %1603 = vrot.lane.b32.xlu2 %v1530_v48, %s5635_s24  ;;  %v1536_v28 = vmul.f32 %v6355_v53, %v1519_v37  ;;  %v1535_v48 = vmul.f32 %v6361_v21, %v1519_v37 }
 0x549   :  { %1605 = vrot.lane.b32.xlu0 %v1531_v22, %s5635_s24  ;;  %v1537_v22 = vmul.f32 %v6381_v52, %v1491_v36 }
 0x550   :  { %1609 = vrot.lane.b32.xlu2 %v1533_v50, %s5635_s24  ;;  %1607 = vrot.lane.b32.xlu1 %v1532_v41, %s5635_s24  ;;  %v1538_v50 = vmul.f32 %v6367_v1, %v1491_v36  ;;  %v1540_v41 = vmul.f32 %v6367_v1, %v1495_v60  ;;  %v1544_v60 = vmul.f32 %v6367_v1, %v1503_v45 }
 0x551   :  { %1611 = vrot.lane.b32.xlu0 %v1534_v17, %s5635_s24  ;;  %v5636_v17 = vmov 8   ;;  %v1546_v36 = vmul.f32 %v6367_v1, %v1507_v33 }
 0x552   :  { %5388 = vset.pattern.permute.xlu1 %v5636_v17  ;;  %5390 = vset.pattern.permute.xlu0 %v5636_v17 }
 0x553   :  { %5389 = vset.pattern.permute.xlu2 %v5636_v17  ;;  %v1552_v17 = vmul.f32 %v6367_v1, %v1519_v37 }
 0x558   :  { %1615 = vrot.lane.b32.xlu2 %v1536_v28, %s5635_s24  ;;  %1613 = vrot.lane.b32.xlu1 %v1535_v48, %s5635_s24  ;;  %v1542_v28 = vmul.f32 %v6367_v1, %v1499_v24  ;;  %v1541_v48 = vmul.f32 %v6381_v52, %v1499_v24  ;;  %v1548_v24 = vmul.f32 %v6367_v1, %v1511_v47 }
 0x559   :  { %1617 = vrot.lane.b32.xlu0 %v1537_v22, %s5635_s24  ;;  %v1543_v22 = vmul.f32 %v6381_v52, %v1503_v45  ;;  %v1550_v45 = vmul.f32 %v6367_v1, %v1515_v40 }
 0x560   :  { %1621 = vrot.lane.b32.xlu2 %v1539_v30, %s5635_s24  ;;  %1619 = vrot.lane.b32.xlu1 %v1538_v50, %s5635_s24  ;;  %v1545_v30 = vmul.f32 %v6381_v52, %v1507_v33  ;;  %v1547_v50 = vmul.f32 %v6381_v52, %v1511_v47  ;;  %v1551_v33 = vmul.f32 %v6381_v52, %v1519_v37 }
 0x561   :  { %1623 = vrot.lane.b32.xlu0 %v1540_v41, %s5635_s24  ;;  %v1549_v41 = vmul.f32 %v6381_v52, %v1515_v40 }
 0x568   :  { %1627 = vrot.lane.b32.xlu2 %v1542_v28, %s5635_s24  ;;  %1625 = vrot.lane.b32.xlu1 %v1541_v48, %s5635_s24 }
 0x569   :  { %1629 = vrot.lane.b32.xlu0 %v1543_v22, %s5635_s24 }
 0x570   :  { %1633 = vrot.lane.b32.xlu2 %v1545_v30, %s5635_s24  ;;  %1631 = vrot.lane.b32.xlu1 %v1544_v60, %s5635_s24 }
 0x571   :  { %1635 = vrot.lane.b32.xlu0 %v1546_v36, %s5635_s24 }
 0x578   :  { %1639 = vrot.lane.b32.xlu2 %v1548_v24, %s5635_s24  ;;  %1637 = vrot.lane.b32.xlu1 %v1547_v50, %s5635_s24 }
 0x579   :  { %1641 = vrot.lane.b32.xlu0 %v1549_v41, %s5635_s24 }
 0x57a   :  { %v6691_v47 = vpop.permute.xlu2 %1585 }
 0x580   :  { %1645 = vrot.lane.b32.xlu2 %v1551_v33, %s5635_s24  ;;  %1643 = vrot.lane.b32.xlu1 %v1550_v45, %s5635_s24 }
 0x581   :  { %1647 = vrot.lane.b32.xlu0 %v1552_v17, %s5635_s24 }
 0x588   :  { %1718 = vperm.xlu2 %5389, %v5708_v10   ;;  %1714 = vperm.xlu1 %5388, %v5697_v2  }
 0x589   :  { %1722 = vperm.xlu0 %5390, %v5704_v6  }
 0x590   :  { %1726 = vperm.xlu1 %5388, %v5712_v12   ;;  %1730 = vperm.xlu2 %5389, %v5702_v5  }
 0x591   :  { %1742 = vperm.xlu0 %5390, %v5719_v16  }
 0x592   :  { %v6696_v40 = vpop.permute.xlu2 %1591  ;;  %v6704_v48 = vpop.permute.xlu0 %1587 }
 0x593   :  { %10438 = vst [vmem:[#allocation183_spill] sm:$0xff] %v6704_v48 }
 0x598   :  { %1734 = vperm.xlu1 %5388, %v5710_v11   ;;  %1738 = vperm.xlu2 %5389, %v5717_v15  }
 0x599   :  { %5391 = vset.pattern.permute.xlu0 %v5638_v55 }
 0x59a   :  { %v6700_v37 = vpop.permute.xlu2 %1597 }
 0x59b   :  { %10436 = vst [vmem:[#allocation181_spill] sm:$0xff] %v6700_v37 }
 0x5a0   :  { %5392 = vset.pattern.permute.xlu1 %v5638_v55  ;;  %5393 = vset.pattern.permute.xlu2 %v5638_v55 }
 0x5a2   :  { %v6702_v28 = vpop.permute.xlu2 %1603 }
 0x5a3   :  { %10437 = vst [vmem:[#allocation182_spill] sm:$0xff] %v6702_v28 }
 0x5aa   :  { %v6706_v22 = vpop.permute.xlu1 %1589  ;;  %v6708_v30 = vpop.permute.xlu2 %1609 }
 0x5ab   :  { %10439 = vst [vmem:[#allocation184_spill] sm:$0xff] %v6706_v22  ;;  %v6710_v60 = vpop.permute.xlu0 %1593 }
 0x5ac   :  { %10440 = vst [vmem:[#allocation185_spill] sm:$0xff] %v6708_v30 }
 0x5ad   :  { %10441 = vst [vmem:[#allocation186_spill] sm:$0xff] %v6710_v60 }
 0x5b2   :  { %v6712_v36 = vpop.permute.xlu1 %1595  ;;  %v6714_v24 = vpop.permute.xlu2 %1615 }
 0x5b3   :  { %10442 = vst [vmem:[#allocation187_spill] sm:$0xff] %v6712_v36  ;;  %v6716_v50 = vpop.permute.xlu0 %1599 }
 0x5b4   :  { %10443 = vst [vmem:[#allocation188_spill] sm:$0xff] %v6714_v24 }
 0x5b5   :  { %10444 = vst [vmem:[#allocation189_spill] sm:$0xff] %v6716_v50 }
 0x5ba   :  { %v6718_v41 = vpop.permute.xlu1 %1601  ;;  %v6720_v33 = vpop.permute.xlu2 %1621 }
 0x5bb   :  { %10445 = vst [vmem:[#allocation190_spill] sm:$0xff] %v6718_v41  ;;  %v6722_v45 = vpop.permute.xlu0 %1605 }
 0x5bc   :  { %10446 = vst [vmem:[#allocation191_spill] sm:$0xff] %v6722_v45 }
 0x5c2   :  { %v6724_v17 = vpop.permute.xlu1 %1607  ;;  %v6726_v28 = vpop.permute.xlu2 %1627 }
 0x5c3   :  { %10447 = vst [vmem:[#allocation192_spill] sm:$0xff] %v6724_v17  ;;  %v6728_v48 = vpop.permute.xlu0 %1611 }
 0x5c4   :  { %10448 = vst [vmem:[#allocation193_spill] sm:$0xff] %v6726_v28 }
 0x5c5   :  { %10449 = vst [vmem:[#allocation194_spill] sm:$0xff] %v6728_v48 }
 0x5ca   :  { %v6730_v30 = vpop.permute.xlu1 %1613  ;;  %v6732_v60 = vpop.permute.xlu2 %1633 }
 0x5cb   :  { %10450 = vst [vmem:[#allocation195_spill] sm:$0xff] %v6730_v30  ;;  %v6734_v36 = vpop.permute.xlu0 %1617 }
 0x5cc   :  { %10451 = vst [vmem:[#allocation196_spill] sm:$0xff] %v6732_v60 }
 0x5cd   :  { %10452 = vst [vmem:[#allocation197_spill] sm:$0xff] %v6734_v36 }
 0x5d2   :  { %v6736_v24 = vpop.permute.xlu1 %1619  ;;  %v6738_v50 = vpop.permute.xlu2 %1639 }
 0x5d3   :  { %10453 = vst [vmem:[#allocation198_spill] sm:$0xff] %v6736_v24  ;;  %v6740_v41 = vpop.permute.xlu0 %1623 }
 0x5d4   :  { %10454 = vst [vmem:[#allocation199_spill] sm:$0xff] %v6738_v50 }
 0x5d5   :  { %10455 = vst [vmem:[#allocation200_spill] sm:$0xff] %v6740_v41 }
 0x5da   :  { %v6742_v22 = vpop.permute.xlu1 %1625  ;;  %v6744_v45 = vpop.permute.xlu2 %1645 }
 0x5db   :  { %10456 = vst [vmem:[#allocation201_spill] sm:$0xff] %v6742_v22  ;;  %v6746_v17 = vpop.permute.xlu0 %1629 }
 0x5dc   :  { %10457 = vst [vmem:[#allocation202_spill] sm:$0xff] %v6744_v45 }
 0x5dd   :  { %10458 = vst [vmem:[#allocation203_spill] sm:$0xff] %v6746_v17 }
 0x5e2   :  { %v6748_v28 = vpop.permute.xlu1 %1631  ;;  %v1719_v48 = vpop.permute.xlu2 %1718 }
 0x5e3   :  { %10459 = vst [vmem:[#allocation204_spill] sm:$0xff] %v6748_v28  ;;  %v6750_v30 = vpop.permute.xlu0 %1635  ;;  %v1747_v60 = vmul.f32 %v6361_v21, %v1719_v48 }
 0x5e4   :  { %10460 = vst [vmem:[#allocation205_spill] sm:$0xff] %v6750_v30 }
 0x5e5   :  { %1813 = vrot.lane.b32.xlu0 %v1747_v60, %s5637_s25 }
 0x5ea   :  { %v6754_v36 = vpop.permute.xlu1 %1637 }
 0x5eb   :  { %10461 = vst [vmem:[#allocation206_spill] sm:$0xff] %v6754_v36  ;;  %v6756_v24 = vpop.permute.xlu0 %1641 }
 0x5ec   :  { %10462 = vst [vmem:[#allocation207_spill] sm:$0xff] %v6756_v24  ;;  %v1731_v24 = vpop.permute.xlu2 %1730 }
 0x5f2   :  { %v6758_v41 = vpop.permute.xlu1 %1643 }
 0x5f3   :  { %10463 = vst [vmem:[#allocation208_spill] sm:$0xff] %v6758_v41  ;;  %v6760_v50 = vpop.permute.xlu0 %1647  ;;  %v1753_v41 = vmul.f32 %v6361_v21, %v1731_v24 }
 0x5f4   :  { %10464 = vst [vmem:[#allocation209_spill] sm:$0xff] %v6760_v50  ;;  %v1748_v50 = vmul.f32 %v6355_v53, %v1719_v48  ;;  %v1739_v26 = vpop.permute.xlu2 %1738 }
 0x5fa   :  { %v1715_v45 = vpop.permute.xlu1 %1714 }
 0x5fb   :  { %v1723_v17 = vpop.permute.xlu0 %1722  ;;  %v1746_v28 = vmul.f32 %v6355_v53, %v1715_v45  ;;  %v1745_v22 = vmul.f32 %v6361_v21, %v1715_v45 }
 0x5fc   :  { %v1750_v37 = vmul.f32 %v6355_v53, %v1723_v17  ;;  %v1749_v60 = vmul.f32 %v6361_v21, %v1723_v17 }
 0x5fd   :  { %1811 = vrot.lane.b32.xlu2 %v1746_v28, %s5637_s25  ;;  %1809 = vrot.lane.b32.xlu1 %v1745_v22, %s5637_s25 }
 0x5fe   :  { %1819 = vrot.lane.b32.xlu0 %v1750_v37, %s5637_s25 }
 0x602   :  { %v1727_v36 = vpop.permute.xlu1 %1726 }
 0x603   :  { %v1752_v28 = vmul.f32 %v6355_v53, %v1727_v36  ;;  %v1751_v22 = vmul.f32 %v6361_v21, %v1727_v36  ;;  %v1743_v54 = vpop.permute.xlu0 %1742  ;;  %v1767_v55 = vmul.f32 %v6381_v52, %v1727_v36 }
 0x605   :  { %1817 = vrot.lane.b32.xlu2 %v1749_v60, %s5637_s25  ;;  %1815 = vrot.lane.b32.xlu1 %v1748_v50, %s5637_s25  ;;  %v1754_v50 = vmul.f32 %v6355_v53, %v1731_v24 }
 0x606   :  { %1825 = vrot.lane.b32.xlu0 %v1753_v41, %s5637_s25  ;;  %v1759_v41 = vmul.f32 %v6361_v21, %v1743_v54 }
 0x60a   :  { %v1735_v30 = vpop.permute.xlu1 %1734 }
 0x60b   :  { %v1756_v37 = vmul.f32 %v6355_v53, %v1735_v30  ;;  %v1755_v60 = vmul.f32 %v6361_v21, %v1735_v30 }
 0x60d   :  { %1823 = vrot.lane.b32.xlu2 %v1752_v28, %s5637_s25  ;;  %1821 = vrot.lane.b32.xlu1 %v1751_v22, %s5637_s25  ;;  %v1758_v28 = vmul.f32 %v6355_v53, %v1739_v26  ;;  %v1757_v22 = vmul.f32 %v6361_v21, %v1739_v26 }
 0x60e   :  { %1831 = vrot.lane.b32.xlu0 %v1756_v37, %s5637_s25  ;;  %v1762_v37 = vmul.f32 %v6367_v1, %v1715_v45 }
 0x615   :  { %1829 = vrot.lane.b32.xlu2 %v1755_v60, %s5637_s25  ;;  %1827 = vrot.lane.b32.xlu1 %v1754_v50, %s5637_s25  ;;  %v1761_v60 = vmul.f32 %v6381_v52, %v1715_v45  ;;  %v1760_v50 = vmul.f32 %v6355_v53, %v1743_v54  ;;  %v1766_v45 = vmul.f32 %v6367_v1, %v1723_v17 }
 0x616   :  { %1837 = vrot.lane.b32.xlu0 %v1759_v41, %s5637_s25  ;;  %v1765_v41 = vmul.f32 %v6381_v52, %v1723_v17  ;;  %v1772_v17 = vmul.f32 %v6367_v1, %v1735_v30 }
 0x61d   :  { %1835 = vrot.lane.b32.xlu2 %v1758_v28, %s5637_s25  ;;  %1833 = vrot.lane.b32.xlu1 %v1757_v22, %s5637_s25  ;;  %v1764_v28 = vmul.f32 %v6367_v1, %v1719_v48  ;;  %v1763_v22 = vmul.f32 %v6381_v52, %v1719_v48  ;;  %v1770_v48 = vmul.f32 %v6367_v1, %v1731_v24 }
 0x61e   :  { %1843 = vrot.lane.b32.xlu0 %v1762_v37, %s5637_s25  ;;  %v1768_v37 = vmul.f32 %v6367_v1, %v1727_v36  ;;  %v1773_v36 = vmul.f32 %v6381_v52, %v1739_v26 }
 0x625   :  { %1841 = vrot.lane.b32.xlu2 %v1761_v60, %s5637_s25  ;;  %1839 = vrot.lane.b32.xlu1 %v1760_v50, %s5637_s25  ;;  %v1771_v60 = vmul.f32 %v6381_v52, %v1735_v30  ;;  %v1769_v50 = vmul.f32 %v6381_v52, %v1731_v24  ;;  %v1776_v24 = vmul.f32 %v6367_v1, %v1743_v54 }
 0x626   :  { %1849 = vrot.lane.b32.xlu0 %v1765_v41, %s5637_s25  ;;  %v1774_v41 = vmul.f32 %v6367_v1, %v1739_v26 }
 0x62d   :  { %1847 = vrot.lane.b32.xlu2 %v1764_v28, %s5637_s25  ;;  %1845 = vrot.lane.b32.xlu1 %v1763_v22, %s5637_s25  ;;  %v1775_v28 = vmul.f32 %v6381_v52, %v1743_v54 }
 0x62e   :  { %1855 = vrot.lane.b32.xlu0 %v1768_v37, %s5637_s25 }
 0x635   :  { %1853 = vrot.lane.b32.xlu2 %v1767_v55, %s5637_s25  ;;  %1851 = vrot.lane.b32.xlu1 %v1766_v45, %s5637_s25 }
 0x636   :  { %1861 = vrot.lane.b32.xlu0 %v1771_v60, %s5637_s25 }
 0x63d   :  { %1859 = vrot.lane.b32.xlu2 %v1770_v48, %s5637_s25  ;;  %1857 = vrot.lane.b32.xlu1 %v1769_v50, %s5637_s25 }
 0x63e   :  { %1867 = vrot.lane.b32.xlu0 %v1774_v41, %s5637_s25 }
 0x645   :  { %1865 = vrot.lane.b32.xlu2 %v1773_v36, %s5637_s25  ;;  %1863 = vrot.lane.b32.xlu1 %v1772_v17, %s5637_s25 }
 0x646   :  { %1938 = vperm.xlu0 %5391, %v5697_v2  }
 0x64d   :  { %1871 = vrot.lane.b32.xlu2 %v1776_v24, %s5637_s25  ;;  %1869 = vrot.lane.b32.xlu1 %v1775_v28, %s5637_s25 }
 0x64e   :  { %1958 = vperm.xlu0 %5391, %v5710_v11  }
 0x655   :  { %1942 = vperm.xlu1 %5392, %v5708_v10   ;;  %1946 = vperm.xlu2 %5393, %v5704_v6  }
 0x657   :  { %v6828_v26 = vpop.permute.xlu2 %1811  ;;  %v6838_v22 = vpop.permute.xlu0 %1813 }
 0x658   :  { %10465 = vst [vmem:[#allocation210_spill] sm:$0xff] %v6828_v26 }
 0x659   :  { %10468 = vst [vmem:[#allocation213_spill] sm:$0xff] %v6838_v22 }
 0x65d   :  { %1950 = vperm.xlu1 %5392, %v5712_v12   ;;  %1954 = vperm.xlu2 %5393, %v5702_v5  }
 0x65f   :  { %v6832_v30 = vpop.permute.xlu2 %1817 }
 0x660   :  { %10466 = vst [vmem:[#allocation211_spill] sm:$0xff] %v6832_v30 }
 0x665   :  { %1962 = vperm.xlu1 %5392, %v5717_v15   ;;  %1966 = vperm.xlu2 %5393, %v5719_v16  }
 0x667   :  { %v6836_v54 = vpop.permute.xlu2 %1823 }
 0x668   :  { %10467 = vst [vmem:[#allocation212_spill] sm:$0xff] %v6836_v54 }
 0x66f   :  { %v6840_v37 = vpop.permute.xlu1 %1809  ;;  %v6844_v45 = vpop.permute.xlu2 %1829 }
 0x670   :  { %v6842_v55 = vpop.permute.xlu0 %1819  ;;  %10470 = vst [vmem:[#allocation215_spill] sm:$0xff] %v6844_v45 }
 0x671   :  { %10469 = vst [vmem:[#allocation214_spill] sm:$0xff] %v6842_v55 }
 0x677   :  { %v6846_v60 = vpop.permute.xlu1 %1815  ;;  %v6850_v50 = vpop.permute.xlu2 %1835 }
 0x678   :  { %v6848_v48 = vpop.permute.xlu0 %1825  ;;  %10472 = vst [vmem:[#allocation217_spill] sm:$0xff] %v6850_v50 }
 0x679   :  { %10471 = vst [vmem:[#allocation216_spill] sm:$0xff] %v6848_v48 }
 0x67f   :  { %v6852_v41 = vpop.permute.xlu1 %1821  ;;  %v6856_v17 = vpop.permute.xlu2 %1841 }
 0x680   :  { %10473 = vst [vmem:[#allocation218_spill] sm:$0xff] %v6852_v41  ;;  %v6854_v36 = vpop.permute.xlu0 %1831 }
 0x681   :  { %10474 = vst [vmem:[#allocation219_spill] sm:$0xff] %v6854_v36 }
 0x682   :  { %10475 = vst [vmem:[#allocation220_spill] sm:$0xff] %v6856_v17 }
 0x687   :  { %v6858_v24 = vpop.permute.xlu1 %1827  ;;  %v6862_v30 = vpop.permute.xlu2 %1847 }
 0x688   :  { %10476 = vst [vmem:[#allocation221_spill] sm:$0xff] %v6858_v24  ;;  %v6860_v28 = vpop.permute.xlu0 %1837 }
 0x689   :  { %10477 = vst [vmem:[#allocation222_spill] sm:$0xff] %v6860_v28 }
 0x68a   :  { %10478 = vst [vmem:[#allocation223_spill] sm:$0xff] %v6862_v30 }
 0x68f   :  { %v6864_v55 = vpop.permute.xlu1 %1833  ;;  %v6870_v48 = vpop.permute.xlu2 %1853 }
 0x690   :  { %10479 = vst [vmem:[#allocation224_spill] sm:$0xff] %v6864_v55  ;;  %v6866_v45 = vpop.permute.xlu0 %1843 }
 0x691   :  { %10480 = vst [vmem:[#allocation225_spill] sm:$0xff] %v6866_v45 }
 0x692   :  { %10482 = vst [vmem:[#allocation227_spill] sm:$0xff] %v6870_v48 }
 0x697   :  { %v6868_v26 = vpop.permute.xlu1 %1839  ;;  %v6878_v17 = vpop.permute.xlu2 %1859 }
 0x698   :  { %10481 = vst [vmem:[#allocation226_spill] sm:$0xff] %v6868_v26  ;;  %v6872_v50 = vpop.permute.xlu0 %1849 }
 0x699   :  { %10483 = vst [vmem:[#allocation228_spill] sm:$0xff] %v6872_v50 }
 0x69a   :  { %10485 = vst [vmem:[#allocation230_spill] sm:$0xff] %v6878_v17 }
 0x69f   :  { %v6874_v54 = vpop.permute.xlu1 %1845  ;;  %v6884_v30 = vpop.permute.xlu2 %1865 }
 0x6a0   :  { %v6876_v36 = vpop.permute.xlu0 %1855  ;;  %10488 = vst [vmem:[#allocation233_spill] sm:$0xff] %v6884_v30 }
 0x6a1   :  { %10484 = vst [vmem:[#allocation229_spill] sm:$0xff] %v6876_v36 }
 0x6a7   :  { %v6880_v24 = vpop.permute.xlu1 %1851  ;;  %v6890_v26 = vpop.permute.xlu2 %1871 }
 0x6a8   :  { %10486 = vst [vmem:[#allocation231_spill] sm:$0xff] %v6880_v24  ;;  %v6882_v28 = vpop.permute.xlu0 %1861 }
 0x6a9   :  { %10487 = vst [vmem:[#allocation232_spill] sm:$0xff] %v6882_v28 }
 0x6aa   :  { %10491 = vst [vmem:[#allocation236_spill] sm:$0xff] %v6890_v26 }
 0x6af   :  { %v6886_v55 = vpop.permute.xlu1 %1857  ;;  %v1947_v24 = vpop.permute.xlu2 %1946 }
 0x6b0   :  { %10489 = vst [vmem:[#allocation234_spill] sm:$0xff] %v6886_v55  ;;  %v6888_v45 = vpop.permute.xlu0 %1867  ;;  %v1973_v30 = vmul.f32 %v6361_v21, %v1947_v24 }
 0x6b1   :  { %10490 = vst [vmem:[#allocation235_spill] sm:$0xff] %v6888_v45 }
 0x6b7   :  { %v6892_v48 = vpop.permute.xlu1 %1863  ;;  %v1955_v41 = vpop.permute.xlu2 %1954 }
 0x6b8   :  { %10492 = vst [vmem:[#allocation237_spill] sm:$0xff] %v6892_v48  ;;  %v1939_v22 = vpop.permute.xlu0 %1938  ;;  %v1978_v17 = vmul.f32 %v6355_v53, %v1955_v41 }
 0x6b9   :  { %v1969_v50 = vmul.f32 %v6361_v21, %v1939_v22  ;;  %v1970_v36 = vmul.f32 %v6355_v53, %v1939_v22 }
 0x6bb   :  { %2033 = vrot.lane.b32.xlu0 %v1969_v50, %s5639_s2  ;;  %2035 = vrot.lane.b32.xlu1 %v1970_v36, %s5639_s2  ;;  %v1974_v36 = vmul.f32 %v6355_v53, %v1947_v24 }
 0x6bf   :  { %v6898_v28 = vpop.permute.xlu1 %1869  ;;  %v1967_v3 = vpop.permute.xlu2 %1966 }
 0x6c0   :  { %10493 = vst [vmem:[#allocation238_spill] sm:$0xff] %v6898_v28 }
 0x6c3   :  { %2041 = vrot.lane.b32.xlu1 %v1973_v30, %s5639_s2  ;;  %v1959_v30 = vpop.permute.xlu0 %1958 }
 0x6c7   :  { %v1943_v26 = vpop.permute.xlu1 %1942 }
 0x6c8   :  { %v1972_v55 = vmul.f32 %v6355_v53, %v1943_v26  ;;  %v1971_v45 = vmul.f32 %v6361_v21, %v1943_v26  ;;  %v1987_v4 = vmul.f32 %v6381_v52, %v1943_v26 }
 0x6ca   :  { %2039 = vrot.lane.b32.xlu0 %v1972_v55, %s5639_s2  ;;  %2037 = vrot.lane.b32.xlu2 %v1971_v45, %s5639_s2  ;;  %v1977_v55 = vmul.f32 %v6361_v21, %v1955_v41  ;;  %v1979_v45 = vmul.f32 %v6361_v21, %v1959_v30 }
 0x6cf   :  { %v1951_v48 = vpop.permute.xlu1 %1950 }
 0x6d0   :  { %v1975_v50 = vmul.f32 %v6361_v21, %v1951_v48  ;;  %v1976_v28 = vmul.f32 %v6355_v53, %v1951_v48 }
 0x6d2   :  { %2045 = vrot.lane.b32.xlu0 %v1975_v50, %s5639_s2  ;;  %2043 = vrot.lane.b32.xlu2 %v1974_v36, %s5639_s2  ;;  %v1980_v36 = vmul.f32 %v6355_v53, %v1959_v30 }
 0x6d3   :  { %2047 = vrot.lane.b32.xlu1 %v1976_v28, %s5639_s2 }
 0x6d7   :  { %v1963_v0 = vpop.permute.xlu1 %1962 }
 0x6d8   :  { %v1981_v50 = vmul.f32 %v6361_v21, %v1963_v0  ;;  %v1982_v28 = vmul.f32 %v6355_v53, %v1963_v0 }
 0x6da   :  { %2051 = vrot.lane.b32.xlu0 %v1978_v17, %s5639_s2  ;;  %2049 = vrot.lane.b32.xlu2 %v1977_v55, %s5639_s2  ;;  %v1984_v17 = vmul.f32 %v6355_v53, %v1967_v3  ;;  %v1983_v55 = vmul.f32 %v6361_v21, %v1967_v3  ;;  %v5640_v53 = vmov 10   ;;  %v1990_v21 = vmul.f32 %v6367_v1, %v1947_v24 }
 0x6db   :  { %2053 = vrot.lane.b32.xlu1 %v1979_v45, %s5639_s2  ;;  %v1985_v45 = vmul.f32 %v6381_v52, %v1939_v22  ;;  %5395 = vset.pattern.permute.xlu0 %v5640_v53 }
 0x6dc   :  { %5394 = vset.pattern.permute.xlu2 %v5640_v53  ;;  %5396 = vset.pattern.permute.xlu1 %v5640_v53 }
 0x6e2   :  { %2057 = vrot.lane.b32.xlu0 %v1981_v50, %s5639_s2  ;;  %2055 = vrot.lane.b32.xlu2 %v1980_v36, %s5639_s2  ;;  %v1986_v50 = vmul.f32 %v6367_v1, %v1939_v22  ;;  %v1988_v36 = vmul.f32 %v6367_v1, %v1943_v26  ;;  %v1992_v26 = vmul.f32 %v6367_v1, %v1951_v48 }
 0x6e3   :  { %2059 = vrot.lane.b32.xlu1 %v1982_v28, %s5639_s2  ;;  %v1989_v28 = vmul.f32 %v6381_v52, %v1947_v24  ;;  %v1994_v22 = vmul.f32 %v6367_v1, %v1955_v41  ;;  %v1996_v24 = vmul.f32 %v6367_v1, %v1959_v30 }
 0x6ea   :  { %2063 = vrot.lane.b32.xlu0 %v1984_v17, %s5639_s2  ;;  %2061 = vrot.lane.b32.xlu2 %v1983_v55, %s5639_s2  ;;  %v1991_v17 = vmul.f32 %v6381_v52, %v1951_v48  ;;  %v1995_v55 = vmul.f32 %v6381_v52, %v1959_v30  ;;  %v1999_v48 = vmul.f32 %v6381_v52, %v1967_v3 }
 0x6eb   :  { %2065 = vrot.lane.b32.xlu1 %v1985_v45, %s5639_s2  ;;  %v1997_v45 = vmul.f32 %v6381_v52, %v1963_v0 }
 0x6f2   :  { %2069 = vrot.lane.b32.xlu0 %v1987_v4, %s5639_s2  ;;  %2067 = vrot.lane.b32.xlu2 %v1986_v50, %s5639_s2  ;;  %v1993_v4 = vmul.f32 %v6381_v52, %v1955_v41  ;;  %v1998_v41 = vmul.f32 %v6367_v1, %v1963_v0  ;;  %v2000_v50 = vmul.f32 %v6367_v1, %v1967_v3 }
 0x6f3   :  { %2071 = vrot.lane.b32.xlu1 %v1988_v36, %s5639_s2 }
 0x6fa   :  { %2075 = vrot.lane.b32.xlu0 %v1990_v21, %s5639_s2  ;;  %2073 = vrot.lane.b32.xlu2 %v1989_v28, %s5639_s2 }
 0x6fb   :  { %2077 = vrot.lane.b32.xlu1 %v1991_v17, %s5639_s2 }
 0x702   :  { %2081 = vrot.lane.b32.xlu0 %v1993_v4, %s5639_s2  ;;  %2079 = vrot.lane.b32.xlu2 %v1992_v26, %s5639_s2 }
 0x703   :  { %2083 = vrot.lane.b32.xlu1 %v1994_v22, %s5639_s2 }
 0x70a   :  { %2087 = vrot.lane.b32.xlu0 %v1996_v24, %s5639_s2  ;;  %2085 = vrot.lane.b32.xlu2 %v1995_v55, %s5639_s2 }
 0x70b   :  { %2089 = vrot.lane.b32.xlu1 %v1997_v45, %s5639_s2 }
 0x712   :  { %2093 = vrot.lane.b32.xlu0 %v1999_v48, %s5639_s2  ;;  %2091 = vrot.lane.b32.xlu2 %v1998_v41, %s5639_s2 }
 0x713   :  { %2095 = vrot.lane.b32.xlu1 %v2000_v50, %s5639_s2 }
 0x71a   :  { %2166 = vperm.xlu0 %5395, %v5708_v10   ;;  %2162 = vperm.xlu2 %5394, %v5697_v2  }
 0x71b   :  { %2170 = vperm.xlu1 %5396, %v5704_v6  }
 0x722   :  { %2186 = vperm.xlu0 %5395, %v5717_v15   ;;  %2174 = vperm.xlu2 %5394, %v5712_v12  }
 0x723   :  { %2178 = vperm.xlu1 %5396, %v5702_v5  }
 0x724   :  { %v6966_v52 = vpop.permute.xlu2 %2037 }
 0x725   :  { %10494 = vst [vmem:[#allocation239_spill] sm:$0xff] %v6966_v52 }
 0x72a   :  { %2182 = vperm.xlu2 %5394, %v5710_v11  }
 0x72b   :  { %2190 = vperm.xlu1 %5396, %v5719_v16  }
 0x72c   :  { %v6970_v0 = vpop.permute.xlu2 %2043 }
 0x72d   :  { %10495 = vst [vmem:[#allocation240_spill] sm:$0xff] %v6970_v0  ;;  %v6972_v1 = vpop.permute.xlu1 %2035  ;;  %v6974_v3 = vpop.permute.xlu0 %2033 }
 0x72e   :  { %10496 = vst [vmem:[#allocation241_spill] sm:$0xff] %v6972_v1 }
 0x734   :  { %v6976_v30 = vpop.permute.xlu2 %2049 }
 0x735   :  { %10497 = vst [vmem:[#allocation242_spill] sm:$0xff] %v6976_v30  ;;  %v6982_v21 = vpop.permute.xlu1 %2041 }
 0x736   :  { %10499 = vst [vmem:[#allocation244_spill] sm:$0xff] %v6982_v21 }
 0x73c   :  { %v6978_v36 = vpop.permute.xlu0 %2039  ;;  %v6980_v53 = vpop.permute.xlu2 %2055 }
 0x73d   :  { %10498 = vst [vmem:[#allocation243_spill] sm:$0xff] %v6980_v53 }
 0x744   :  { %v6984_v28 = vpop.permute.xlu0 %2045  ;;  %v6986_v17 = vpop.permute.xlu2 %2061 }
 0x745   :  { %10500 = vst [vmem:[#allocation245_spill] sm:$0xff] %v6984_v28  ;;  %v6988_v4 = vpop.permute.xlu1 %2047 }
 0x746   :  { %10501 = vst [vmem:[#allocation246_spill] sm:$0xff] %v6986_v17 }
 0x747   :  { %10502 = vst [vmem:[#allocation247_spill] sm:$0xff] %v6988_v4 }
 0x74c   :  { %v6990_v26 = vpop.permute.xlu0 %2051  ;;  %v6992_v22 = vpop.permute.xlu2 %2067 }
 0x74d   :  { %10503 = vst [vmem:[#allocation248_spill] sm:$0xff] %v6990_v26  ;;  %v6994_v24 = vpop.permute.xlu1 %2053 }
 0x74e   :  { %10504 = vst [vmem:[#allocation249_spill] sm:$0xff] %v6992_v22 }
 0x74f   :  { %10505 = vst [vmem:[#allocation250_spill] sm:$0xff] %v6994_v24 }
 0x754   :  { %v6996_v55 = vpop.permute.xlu0 %2057  ;;  %v6998_v45 = vpop.permute.xlu2 %2073 }
 0x755   :  { %10506 = vst [vmem:[#allocation251_spill] sm:$0xff] %v6996_v55  ;;  %v7000_v48 = vpop.permute.xlu1 %2059 }
 0x756   :  { %10507 = vst [vmem:[#allocation252_spill] sm:$0xff] %v6998_v45 }
 0x757   :  { %10508 = vst [vmem:[#allocation253_spill] sm:$0xff] %v7000_v48 }
 0x75c   :  { %v7002_v41 = vpop.permute.xlu0 %2063  ;;  %v7004_v50 = vpop.permute.xlu2 %2079 }
 0x75d   :  { %10509 = vst [vmem:[#allocation254_spill] sm:$0xff] %v7002_v41  ;;  %v7006_v53 = vpop.permute.xlu1 %2065 }
 0x75e   :  { %10510 = vst [vmem:[#allocation255_spill] sm:$0xff] %v7004_v50 }
 0x75f   :  { %10511 = vst [vmem:[#allocation256_spill] sm:$0xff] %v7006_v53  ;;  %v7027_v53 = vld [vmem:[%s10188_s0 + $0x8] sm:$0xff] }
 0x764   :  { %v7008_v17 = vpop.permute.xlu0 %2069  ;;  %v7010_v21 = vpop.permute.xlu2 %2085 }
 0x765   :  { %10512 = vst [vmem:[#allocation257_spill] sm:$0xff] %v7010_v21  ;;  %v7012_v26 = vpop.permute.xlu1 %2071 }
 0x766   :  { %10513 = vst [vmem:[#allocation258_spill] sm:$0xff] %v7012_v26 }
 0x76c   :  { %v7014_v30 = vpop.permute.xlu0 %2075  ;;  %v7016_v24 = vpop.permute.xlu2 %2091 }
 0x76d   :  { %10514 = vst [vmem:[#allocation259_spill] sm:$0xff] %v7014_v30  ;;  %v7018_v55 = vpop.permute.xlu1 %2077  ;;  %v7033_v30 = vld [vmem:[%s10188_s0] sm:$0xff] }
 0x76e   :  { %10515 = vst [vmem:[#allocation260_spill] sm:$0xff] %v7016_v24 }
 0x76f   :  { %10516 = vst [vmem:[#allocation261_spill] sm:$0xff] %v7018_v55 }
 0x774   :  { %v7020_v0 = vpop.permute.xlu0 %2081  ;;  %v2163_v48 = vpop.permute.xlu2 %2162 }
 0x775   :  { %10517 = vst [vmem:[#allocation262_spill] sm:$0xff] %v7020_v0  ;;  %v7022_v41 = vpop.permute.xlu1 %2083  ;;  %v2194_v21 = vmul.f32 %v7027_v53, %v2163_v48  ;;  %v2193_v26 = vmul.f32 %v7033_v30, %v2163_v48 }
 0x776   :  { %10518 = vst [vmem:[#allocation263_spill] sm:$0xff] %v7022_v41 }
 0x777   :  { %2259 = vrot.lane.b32.xlu0 %v2194_v21, %s5641_s30  ;;  %2257 = vrot.lane.b32.xlu2 %v2193_v26, %s5641_s30 }
 0x77c   :  { %v7038_v0 = vpop.permute.xlu0 %2087  ;;  %v2175_v21 = vpop.permute.xlu2 %2174 }
 0x77d   :  { %10519 = vst [vmem:[#allocation264_spill] sm:$0xff] %v7038_v0  ;;  %v7040_v24 = vpop.permute.xlu1 %2089 }
 0x77e   :  { %10520 = vst [vmem:[#allocation265_spill] sm:$0xff] %v7040_v24 }
 0x784   :  { %v7042_v1 = vpop.permute.xlu0 %2093  ;;  %v2183_v0 = vpop.permute.xlu2 %2182 }
 0x785   :  { %10521 = vst [vmem:[#allocation266_spill] sm:$0xff] %v7042_v1  ;;  %v7044_v55 = vpop.permute.xlu1 %2095  ;;  %v2199_v1 = vmul.f32 %v7033_v30, %v2175_v21 }
 0x786   :  { %10522 = vst [vmem:[#allocation267_spill] sm:$0xff] %v7044_v55  ;;  %v2200_v55 = vmul.f32 %v7027_v53, %v2175_v21 }
 0x78c   :  { %v2167_v4 = vpop.permute.xlu0 %2166 }
 0x78d   :  { %v2171_v22 = vpop.permute.xlu1 %2170  ;;  %v2195_v52 = vmul.f32 %v7033_v30, %v2167_v4  ;;  %v2196_v50 = vmul.f32 %v7027_v53, %v2167_v4 }
 0x78e   :  { %v2197_v45 = vmul.f32 %v7033_v30, %v2171_v22  ;;  %v2198_v26 = vmul.f32 %v7027_v53, %v2171_v22 }
 0x78f   :  { %2261 = vrot.lane.b32.xlu1 %v2195_v52, %s5641_s30  ;;  %2263 = vrot.lane.b32.xlu2 %v2196_v50, %s5641_s30 }
 0x790   :  { %2265 = vrot.lane.b32.xlu0 %v2197_v45, %s5641_s30  ;;  %v2203_v45 = vmul.f32 %v7033_v30, %v2183_v0 }
 0x794   :  { %v2187_v28 = vpop.permute.xlu0 %2186 }
 0x795   :  { %v2179_v24 = vpop.permute.xlu1 %2178 }
 0x796   :  { %v2201_v52 = vmul.f32 %v7033_v30, %v2179_v24  ;;  %v2202_v50 = vmul.f32 %v7027_v53, %v2179_v24 }
 0x797   :  { %2267 = vrot.lane.b32.xlu1 %v2198_v26, %s5641_s30  ;;  %2269 = vrot.lane.b32.xlu2 %v2199_v1, %s5641_s30  ;;  %v2205_v26 = vmul.f32 %v7033_v30, %v2187_v28  ;;  %v2204_v1 = vmul.f32 %v7027_v53, %v2183_v0 }
 0x798   :  { %2271 = vrot.lane.b32.xlu0 %v2200_v55, %s5641_s30  ;;  %v2206_v55 = vmul.f32 %v7027_v53, %v2187_v28 }
 0x79d   :  { %v2191_v41 = vpop.permute.xlu1 %2190 }
 0x79f   :  { %2273 = vrot.lane.b32.xlu1 %v2201_v52, %s5641_s30  ;;  %2275 = vrot.lane.b32.xlu2 %v2202_v50, %s5641_s30  ;;  %v2208_v52 = vmul.f32 %v7027_v53, %v2191_v41  ;;  %v2207_v50 = vmul.f32 %v7033_v30, %v2191_v41 }
 0x7a0   :  { %2277 = vrot.lane.b32.xlu0 %v2203_v45, %s5641_s30  ;;  %v7075_v45 = vld [vmem:[%s10188_s0 + $0x10] sm:$0xff] }
 0x7a1   :  { %v2209_v13 = vmul.f32 %v7075_v45, %v2163_v48  ;;  %v2215_v7 = vmul.f32 %v7075_v45, %v2175_v21 }
 0x7a7   :  { %2281 = vrot.lane.b32.xlu2 %v2205_v26, %s5641_s30  ;;  %2279 = vrot.lane.b32.xlu1 %v2204_v1, %s5641_s30  ;;  %v2211_v26 = vmul.f32 %v7075_v45, %v2167_v4  ;;  %v7085_v1 = vld [vmem:[%s10188_s0 + $0x18] sm:$0xff] }
 0x7a8   :  { %2283 = vrot.lane.b32.xlu0 %v2206_v55, %s5641_s30  ;;  %v2210_v55 = vmul.f32 %v7085_v1, %v2163_v48  ;;  %v2212_v35 = vmul.f32 %v7085_v1, %v2167_v4  ;;  %v2217_v4 = vmul.f32 %v7075_v45, %v2179_v24  ;;  %v2218_v48 = vmul.f32 %v7085_v1, %v2179_v24 }
 0x7a9   :  { %v2222_v24 = vmul.f32 %v7085_v1, %v2187_v28 }
 0x7af   :  { %2287 = vrot.lane.b32.xlu2 %v2208_v52, %s5641_s30  ;;  %2285 = vrot.lane.b32.xlu1 %v2207_v50, %s5641_s30  ;;  %v5642_v52 = vmov 11   ;;  %v2213_v50 = vmul.f32 %v7075_v45, %v2171_v22 }
 0x7b0   :  { %2289 = vrot.lane.b32.xlu0 %v2209_v13, %s5641_s30  ;;  %5397 = vset.pattern.permute.xlu1 %v5642_v52  ;;  %v2214_v13 = vmul.f32 %v7085_v1, %v2171_v22  ;;  %v2220_v22 = vmul.f32 %v7085_v1, %v2183_v0 }
 0x7b1   :  { %5399 = vset.pattern.permute.xlu0 %v5642_v52  ;;  %5398 = vset.pattern.permute.xlu2 %v5642_v52 }
 0x7b7   :  { %2293 = vrot.lane.b32.xlu2 %v2211_v26, %s5641_s30  ;;  %2291 = vrot.lane.b32.xlu1 %v2210_v55, %s5641_s30  ;;  %v2219_v26 = vmul.f32 %v7075_v45, %v2183_v0  ;;  %v2221_v55 = vmul.f32 %v7075_v45, %v2187_v28 }
 0x7b8   :  { %2295 = vrot.lane.b32.xlu0 %v2212_v35, %s5641_s30  ;;  %v2216_v35 = vmul.f32 %v7085_v1, %v2175_v21  ;;  %v2224_v21 = vmul.f32 %v7085_v1, %v2191_v41 }
 0x7bf   :  { %2299 = vrot.lane.b32.xlu2 %v2214_v13, %s5641_s30  ;;  %2297 = vrot.lane.b32.xlu1 %v2213_v50, %s5641_s30 }
 0x7c0   :  { %2301 = vrot.lane.b32.xlu0 %v2215_v7, %s5641_s30  ;;  %v2223_v7 = vmul.f32 %v7075_v45, %v2191_v41 }
 0x7c7   :  { %2305 = vrot.lane.b32.xlu2 %v2217_v4, %s5641_s30  ;;  %2303 = vrot.lane.b32.xlu1 %v2216_v35, %s5641_s30 }
 0x7c8   :  { %2307 = vrot.lane.b32.xlu0 %v2218_v48, %s5641_s30 }
 0x7cf   :  { %2311 = vrot.lane.b32.xlu2 %v2220_v22, %s5641_s30  ;;  %2309 = vrot.lane.b32.xlu1 %v2219_v26, %s5641_s30 }
 0x7d0   :  { %2313 = vrot.lane.b32.xlu0 %v2221_v55, %s5641_s30 }
 0x7d1   :  { %v7119_v0 = vpop.permute.xlu2 %2257 }
 0x7d7   :  { %2317 = vrot.lane.b32.xlu2 %v2223_v7, %s5641_s30  ;;  %2315 = vrot.lane.b32.xlu1 %v2222_v24, %s5641_s30 }
 0x7d8   :  { %2319 = vrot.lane.b32.xlu0 %v2224_v21, %s5641_s30 }
 0x7df   :  { %2390 = vperm.xlu2 %5398, %v5708_v10   ;;  %2386 = vperm.xlu1 %5397, %v5697_v2  }
 0x7e0   :  { %2394 = vperm.xlu0 %5399, %v5704_v6  }
 0x7e7   :  { %2402 = vperm.xlu2 %5398, %v5702_v5   ;;  %2398 = vperm.xlu1 %5397, %v5712_v12  }
 0x7e8   :  { %2414 = vperm.xlu0 %5399, %v5719_v16  }
 0x7e9   :  { %v7124_v28 = vpop.permute.xlu2 %2263  ;;  %v7132_v13 = vpop.permute.xlu0 %2259 }
 0x7ea   :  { %10525 = vst [vmem:[#allocation270_spill] sm:$0xff] %v7132_v13 }
 0x7ef   :  { %2410 = vperm.xlu2 %5398, %v5717_v15   ;;  %2406 = vperm.xlu1 %5397, %v5710_v11  }
 0x7f1   :  { %v7128_v41 = vpop.permute.xlu2 %2269 }
 0x7f2   :  { %10523 = vst [vmem:[#allocation268_spill] sm:$0xff] %v7128_v41 }
 0x7f9   :  { %v7130_v52 = vpop.permute.xlu2 %2275 }
 0x7fa   :  { %10524 = vst [vmem:[#allocation269_spill] sm:$0xff] %v7130_v52 }
 0x801   :  { %v7134_v50 = vpop.permute.xlu1 %2261  ;;  %v7136_v4 = vpop.permute.xlu2 %2281 }
 0x802   :  { %10526 = vst [vmem:[#allocation271_spill] sm:$0xff] %v7134_v50  ;;  %v7138_v35 = vpop.permute.xlu0 %2265 }
 0x803   :  { %10527 = vst [vmem:[#allocation272_spill] sm:$0xff] %v7136_v4 }
 0x804   :  { %10528 = vst [vmem:[#allocation273_spill] sm:$0xff] %v7138_v35 }
 0x809   :  { %v7140_v48 = vpop.permute.xlu1 %2267  ;;  %v7142_v22 = vpop.permute.xlu2 %2287 }
 0x80a   :  { %10529 = vst [vmem:[#allocation274_spill] sm:$0xff] %v7140_v48  ;;  %v7144_v26 = vpop.permute.xlu0 %2271 }
 0x80b   :  { %10530 = vst [vmem:[#allocation275_spill] sm:$0xff] %v7142_v22 }
 0x80c   :  { %10531 = vst [vmem:[#allocation276_spill] sm:$0xff] %v7144_v26 }
 0x811   :  { %v7146_v55 = vpop.permute.xlu1 %2273  ;;  %v7148_v7 = vpop.permute.xlu2 %2293 }
 0x812   :  { %10532 = vst [vmem:[#allocation277_spill] sm:$0xff] %v7146_v55  ;;  %v7150_v24 = vpop.permute.xlu0 %2277 }
 0x813   :  { %10533 = vst [vmem:[#allocation278_spill] sm:$0xff] %v7150_v24 }
 0x819   :  { %v7152_v21 = vpop.permute.xlu1 %2279  ;;  %v7154_v52 = vpop.permute.xlu2 %2299 }
 0x81a   :  { %10534 = vst [vmem:[#allocation279_spill] sm:$0xff] %v7152_v21  ;;  %v7156_v13 = vpop.permute.xlu0 %2283 }
 0x81b   :  { %10535 = vst [vmem:[#allocation280_spill] sm:$0xff] %v7154_v52 }
 0x81c   :  { %10536 = vst [vmem:[#allocation281_spill] sm:$0xff] %v7156_v13 }
 0x821   :  { %v7158_v4 = vpop.permute.xlu1 %2285  ;;  %v7160_v35 = vpop.permute.xlu2 %2305 }
 0x822   :  { %10537 = vst [vmem:[#allocation282_spill] sm:$0xff] %v7158_v4  ;;  %v7162_v48 = vpop.permute.xlu0 %2289 }
 0x823   :  { %10538 = vst [vmem:[#allocation283_spill] sm:$0xff] %v7160_v35 }
 0x824   :  { %10539 = vst [vmem:[#allocation284_spill] sm:$0xff] %v7162_v48 }
 0x829   :  { %v7164_v22 = vpop.permute.xlu1 %2291  ;;  %v7166_v26 = vpop.permute.xlu2 %2311 }
 0x82a   :  { %10540 = vst [vmem:[#allocation285_spill] sm:$0xff] %v7164_v22  ;;  %v7168_v55 = vpop.permute.xlu0 %2295 }
 0x82b   :  { %10541 = vst [vmem:[#allocation286_spill] sm:$0xff] %v7166_v26 }
 0x82c   :  { %10542 = vst [vmem:[#allocation287_spill] sm:$0xff] %v7168_v55 }
 0x831   :  { %v7170_v50 = vpop.permute.xlu1 %2297  ;;  %v7172_v24 = vpop.permute.xlu2 %2317 }
 0x832   :  { %10543 = vst [vmem:[#allocation288_spill] sm:$0xff] %v7170_v50  ;;  %v7174_v21 = vpop.permute.xlu0 %2301 }
 0x833   :  { %10544 = vst [vmem:[#allocation289_spill] sm:$0xff] %v7172_v24 }
 0x834   :  { %10545 = vst [vmem:[#allocation290_spill] sm:$0xff] %v7174_v21 }
 0x839   :  { %v7176_v52 = vpop.permute.xlu1 %2303  ;;  %v2391_v13 = vpop.permute.xlu2 %2390 }
 0x83a   :  { %10546 = vst [vmem:[#allocation291_spill] sm:$0xff] %v7176_v52  ;;  %v7178_v4 = vpop.permute.xlu0 %2307  ;;  %v2419_v35 = vmul.f32 %v7033_v30, %v2391_v13  ;;  %v2436_v25 = vmul.f32 %v7085_v1, %v2391_v13 }
 0x83b   :  { %10547 = vst [vmem:[#allocation292_spill] sm:$0xff] %v7178_v4 }
 0x83c   :  { %2485 = vrot.lane.b32.xlu0 %v2419_v35, %s5643_s17 }
 0x841   :  { %v7182_v48 = vpop.permute.xlu1 %2309 }
 0x842   :  { %10548 = vst [vmem:[#allocation293_spill] sm:$0xff] %v7182_v48  ;;  %v7184_v22 = vpop.permute.xlu0 %2313  ;;  %v7198_v48 = vpop.permute.xlu2 %2402 }
 0x843   :  { %10549 = vst [vmem:[#allocation294_spill] sm:$0xff] %v7184_v22  ;;  %v2420_v22 = vmul.f32 %v7027_v53, %v2391_v13 }
 0x849   :  { %v7186_v55 = vpop.permute.xlu1 %2315 }
 0x84a   :  { %10550 = vst [vmem:[#allocation295_spill] sm:$0xff] %v7186_v55  ;;  %v7188_v26 = vpop.permute.xlu0 %2319  ;;  %v2425_v55 = vmul.f32 %v7033_v30, %v7198_v48 }
 0x84b   :  { %10551 = vst [vmem:[#allocation296_spill] sm:$0xff] %v7188_v26 }
 0x851   :  { %v2387_v24 = vpop.permute.xlu1 %2386 }
 0x852   :  { %v2395_v21 = vpop.permute.xlu0 %2394  ;;  %v2418_v52 = vmul.f32 %v7027_v53, %v2387_v24  ;;  %v2417_v50 = vmul.f32 %v7033_v30, %v2387_v24  ;;  %v2434_v29 = vmul.f32 %v7085_v1, %v2387_v24 }
 0x853   :  { %v2422_v41 = vmul.f32 %v7027_v53, %v2395_v21  ;;  %v2421_v26 = vmul.f32 %v7033_v30, %v2395_v21 }
 0x854   :  { %2483 = vrot.lane.b32.xlu2 %v2418_v52, %s5643_s17  ;;  %2481 = vrot.lane.b32.xlu1 %v2417_v50, %s5643_s17  ;;  %v10208_v52 = vmov 14  }
 0x855   :  { %2491 = vrot.lane.b32.xlu0 %v2422_v41, %s5643_s17 }
 0x856   :  { %5403 = vset.pattern.permute.xlu0 %v10208_v52  ;;  %v2426_v52 = vmul.f32 %v7027_v53, %v7198_v48 }
 0x859   :  { %v7196_v35 = vpop.permute.xlu1 %2398 }
 0x85a   :  { %v2424_v50 = vmul.f32 %v7027_v53, %v7196_v35  ;;  %v2423_v4 = vmul.f32 %v7033_v30, %v7196_v35 }
 0x85c   :  { %2489 = vrot.lane.b32.xlu2 %v2421_v26, %s5643_s17  ;;  %2487 = vrot.lane.b32.xlu1 %v2420_v22, %s5643_s17  ;;  %v5645_v22 = vmov 12   ;;  %v7219_v26 = vpop.permute.xlu0 %2414 }
 0x85d   :  { %2497 = vrot.lane.b32.xlu0 %v2425_v55, %s5643_s17  ;;  %5401 = vset.pattern.permute.xlu2 %v5645_v22  ;;  %v2431_v49 = vmul.f32 %v7033_v30, %v7219_v26 }
 0x85e   :  { %5400 = vset.pattern.permute.xlu1 %v5645_v22 }
 0x861   :  { %v7208_v41 = vpop.permute.xlu1 %2406 }
 0x862   :  { %v2428_v51 = vmul.f32 %v7027_v53, %v7208_v41  ;;  %v2427_v55 = vmul.f32 %v7033_v30, %v7208_v41 }
 0x864   :  { %2495 = vrot.lane.b32.xlu2 %v2424_v50, %s5643_s17  ;;  %2493 = vrot.lane.b32.xlu1 %v2423_v4, %s5643_s17 }
 0x865   :  { %2503 = vrot.lane.b32.xlu0 %v2428_v51, %s5643_s17  ;;  %v7230_v51 = vpop.permute.xlu2 %2410 }
 0x866   :  { %v2430_v4 = vmul.f32 %v7027_v53, %v7230_v51  ;;  %v2429_v50 = vmul.f32 %v7033_v30, %v7230_v51 }
 0x86c   :  { %2501 = vrot.lane.b32.xlu2 %v2427_v55, %s5643_s17  ;;  %2499 = vrot.lane.b32.xlu1 %v2426_v52, %s5643_s17  ;;  %v2433_v52 = vmul.f32 %v7075_v45, %v2387_v24  ;;  %v2437_v55 = vmul.f32 %v7075_v45, %v2395_v21  ;;  %v2438_v24 = vmul.f32 %v7085_v1, %v2395_v21  ;;  %v10553_v21 = vmov 14  }
 0x86d   :  { %2509 = vrot.lane.b32.xlu0 %v2431_v49, %s5643_s17  ;;  %v2432_v49 = vmul.f32 %v7027_v53, %v7219_v26 }
 0x874   :  { %2507 = vrot.lane.b32.xlu2 %v2430_v4, %s5643_s17  ;;  %2505 = vrot.lane.b32.xlu1 %v2429_v50, %s5643_s17  ;;  %v2435_v4 = vmul.f32 %v7075_v45, %v2391_v13 }
 0x875   :  { %2515 = vrot.lane.b32.xlu0 %v2434_v29, %s5643_s17  ;;  %v2439_v29 = vmul.f32 %v7075_v45, %v7196_v35 }
 0x87c   :  { %2513 = vrot.lane.b32.xlu2 %v2433_v52, %s5643_s17  ;;  %2511 = vrot.lane.b32.xlu1 %v2432_v49, %s5643_s17 }
 0x87d   :  { %2521 = vrot.lane.b32.xlu0 %v2437_v55, %s5643_s17 }
 0x884   :  { %2519 = vrot.lane.b32.xlu2 %v2436_v25, %s5643_s17  ;;  %2517 = vrot.lane.b32.xlu1 %v2435_v4, %s5643_s17  ;;  %v5646_v25 = vmov 13  }
 0x885   :  { %3058 = vperm.xlu0 %5403, %v5697_v2  }
 0x88c   :  { %2525 = vrot.lane.b32.xlu2 %v2439_v29, %s5643_s17  ;;  %2523 = vrot.lane.b32.xlu1 %v2438_v24, %s5643_s17  ;;  %v2440_v24 = vmul.f32 %v7085_v1, %v7196_v35 }
 0x88d   :  { %5404 = vset.pattern.permute.xlu0 %v5645_v22 }
 0x88e   :  { %2610 = vperm.xlu0 %5404, %v5697_v2  }
 0x894   :  { %2618 = vperm.xlu2 %5401, %v5704_v6   ;;  %2614 = vperm.xlu1 %5400, %v5708_v10  }
 0x896   :  { %2638 = vperm.xlu0 %5404, %v5719_v16  }
 0x89c   :  { %5402 = vset.pattern.permute.xlu2 %v5646_v25  ;;  %2622 = vperm.xlu1 %5400, %v5712_v12  }
 0x89d   :  { %2834 = vperm.xlu2 %5402, %v5697_v2  }
 0x89e   :  { %5409 = vset.pattern.permute.xlu0 %v5646_v25 }
 0x89f   :  { %2838 = vperm.xlu0 %5409, %v5708_v10  }
 0x8a4   :  { %2626 = vperm.xlu1 %5400, %v5702_v5  }
 0x8a5   :  { %2842 = vperm.xlu2 %5402, %v5704_v6  }
 0x8a7   :  { %2862 = vperm.xlu0 %5409, %v5719_v16  }
 0x8ac   :  { %2630 = vperm.xlu1 %5400, %v5710_v11  }
 0x8ad   :  { %2846 = vperm.xlu2 %5402, %v5712_v12  }
 0x8ae   :  { %v7269_v13 = vpop.permute.xlu2 %2483  ;;  %v7278_v50 = vpop.permute.xlu0 %2485 }
 0x8af   :  { %10552 = vst [vmem:[#allocation297_spill] sm:$0xff] %v7269_v13 }
 0x8b0   :  { %10555 = vst [vmem:[#allocation299_spill] sm:$0xff] %v7278_v50 }
 0x8b4   :  { %5405 = vset.pattern.permute.xlu1 %v10553_v21 }
 0x8b5   :  { %5406 = vset.pattern.permute.xlu2 %v5645_v22  ;;  %3062 = vperm.xlu1 %5405, %v5708_v10  }
 0x8b6   :  { %2634 = vperm.xlu2 %5406, %v5717_v15   ;;  %v7274_v2 = vpop.permute.xlu2 %2489 }
 0x8b7   :  { %10554 = vst [vmem:[#allocation298_spill] sm:$0xff] %v7274_v2 }
 0x8bd   :  { %5407 = vset.pattern.permute.xlu1 %v5646_v25 }
 0x8be   :  { %5408 = vset.pattern.permute.xlu2 %v10553_v21  ;;  %2850 = vperm.xlu1 %5407, %v5702_v5   ;;  %v7284_v22 = vpop.permute.xlu2 %2495 }
 0x8bf   :  { %3066 = vperm.xlu2 %5408, %v5704_v6   ;;  %10556 = vst [vmem:[#allocation300_spill] sm:$0xff] %v7284_v22 }
 0x8c6   :  { %v7281_v52 = vpop.permute.xlu1 %2481  ;;  %2854 = vperm.xlu1 %5407, %v5710_v11   ;;  %v7295_v4 = vpop.permute.xlu2 %2501 }
 0x8c7   :  { %v7286_v10 = vpop.permute.xlu0 %2491  ;;  %3070 = vperm.xlu2 %5408, %v5712_v12   ;;  %10559 = vst [vmem:[#allocation303_spill] sm:$0xff] %v7295_v4 }
 0x8c8   :  { %10557 = vst [vmem:[#allocation301_spill] sm:$0xff] %v7286_v10 }
 0x8ce   :  { %v7289_v49 = vpop.permute.xlu1 %2487  ;;  %2858 = vperm.xlu1 %5407, %v5717_v15   ;;  %v7304_v12 = vpop.permute.xlu2 %2507 }
 0x8cf   :  { %v7292_v55 = vpop.permute.xlu0 %2497  ;;  %3074 = vperm.xlu2 %5408, %v5702_v5   ;;  %10562 = vst [vmem:[#allocation306_spill] sm:$0xff] %v7304_v12 }
 0x8d0   :  { %10558 = vst [vmem:[#allocation302_spill] sm:$0xff] %v7292_v55 }
 0x8d6   :  { %v7297_v6 = vpop.permute.xlu1 %2493  ;;  %5410 = vset.pattern.permute.xlu1 %v10553_v21  ;;  %v7314_v21 = vpop.permute.xlu2 %2513 }
 0x8d7   :  { %10560 = vst [vmem:[#allocation304_spill] sm:$0xff] %v7297_v6  ;;  %v7300_v29 = vpop.permute.xlu0 %2503  ;;  %3082 = vperm.xlu2 %5408, %v5717_v15   ;;  %3078 = vperm.xlu1 %5410, %v5710_v11  }
 0x8d8   :  { %10561 = vst [vmem:[#allocation305_spill] sm:$0xff] %v7300_v29 }
 0x8d9   :  { %10565 = vst [vmem:[#allocation309_spill] sm:$0xff] %v7314_v21 }
 0x8de   :  { %v7308_v25 = vpop.permute.xlu1 %2499  ;;  %v7322_v12 = vpop.permute.xlu2 %2519 }
 0x8df   :  { %10563 = vst [vmem:[#allocation307_spill] sm:$0xff] %v7308_v25  ;;  %v7310_v5 = vpop.permute.xlu0 %2509  ;;  %2527 = vrot.lane.b32.xlu2 %v2440_v24, %s5643_s17  ;;  %3086 = vperm.xlu1 %5410, %v5719_v16  }
 0x8e0   :  { %10564 = vst [vmem:[#allocation308_spill] sm:$0xff] %v7310_v5 }
 0x8e1   :  { %10569 = vst [vmem:[#allocation313_spill] sm:$0xff] %v7322_v12 }
 0x8e6   :  { %v7316_v29 = vpop.permute.xlu1 %2505  ;;  %v7330_v5 = vpop.permute.xlu2 %2525 }
 0x8e7   :  { %10566 = vst [vmem:[#allocation310_spill] sm:$0xff] %v7316_v29  ;;  %v7318_v15 = vpop.permute.xlu0 %2515 }
 0x8e8   :  { %10567 = vst [vmem:[#allocation311_spill] sm:$0xff] %v7318_v15 }
 0x8e9   :  { %10571 = vst [vmem:[#allocation315_spill] sm:$0xff] %v7330_v5  ;;  %v2441_v5 = vmul.f32 %v7075_v45, %v7198_v48 }
 0x8ee   :  { %v7320_v11 = vpop.permute.xlu1 %2511  ;;  %v2619_v25 = vpop.permute.xlu2 %2618 }
 0x8ef   :  { %10568 = vst [vmem:[#allocation312_spill] sm:$0xff] %v7320_v11  ;;  %v7324_v4 = vpop.permute.xlu0 %2521 }
 0x8f0   :  { %10570 = vst [vmem:[#allocation314_spill] sm:$0xff] %v7324_v4 }
 0x8f6   :  { %v7326_v35 = vpop.permute.xlu1 %2517 }
 0x8f7   :  { %v7328_v2 = vpop.permute.xlu0 %3058  ;;  %v2835_v21 = vpop.permute.xlu2 %2834 }
 0x8f8   :  { %v2865_v15 = vmul.f32 %v7033_v30, %v2835_v21  ;;  %v2882_v50 = vmul.f32 %v7085_v1, %v2835_v21  ;;  %v2881_v4 = vmul.f32 %v7075_v45, %v2835_v21 }
 0x8fe   :  { %v7332_v24 = vpop.permute.xlu1 %2523 }
 0x8ff   :  { %10572 = vst [vmem:[#allocation316_spill] sm:$0xff] %v7332_v24 }
 0x900   :  { %v2611_v16 = vpop.permute.xlu0 %2610 }
 0x901   :  { %v2641_v29 = vmul.f32 %v7033_v30, %v2611_v16  ;;  %v2642_v55 = vmul.f32 %v7027_v53, %v2611_v16  ;;  %v2657_v24 = vmul.f32 %v7075_v45, %v2611_v16  ;;  %v2658_v13 = vmul.f32 %v7085_v1, %v2611_v16 }
 0x903   :  { %2705 = vrot.lane.b32.xlu0 %v2641_v29, %s5647_s18  ;;  %2707 = vrot.lane.b32.xlu1 %v2642_v55, %s5647_s18 }
 0x906   :  { %v2615_v11 = vpop.permute.xlu1 %2614 }
 0x907   :  { %v2643_v10 = vmul.f32 %v7033_v30, %v2615_v11  ;;  %v2644_v12 = vmul.f32 %v7027_v53, %v2615_v11  ;;  %v2660_v29 = vmul.f32 %v7085_v1, %v2615_v11  ;;  %v2659_v55 = vmul.f32 %v7075_v45, %v2615_v11 }
 0x908   :  { %v2646_v11 = vmul.f32 %v7027_v53, %v2619_v25 }
 0x909   :  { %2709 = vrot.lane.b32.xlu2 %v2643_v10, %s5647_s18  ;;  %v7350_v10 = vpop.permute.xlu2 %2842 }
 0x90b   :  { %2737 = vrot.lane.b32.xlu1 %v2657_v24, %s5647_s18  ;;  %2711 = vrot.lane.b32.xlu0 %v2644_v12, %s5647_s18  ;;  %v2645_v24 = vmul.f32 %v7033_v30, %v2619_v25  ;;  %v2442_v12 = vmul.f32 %v7085_v1, %v7198_v48  ;;  %v2443_v48 = vmul.f32 %v7075_v45, %v7208_v41 }
 0x90e   :  { %v2623_v16 = vpop.permute.xlu1 %2622 }
 0x911   :  { %2739 = vrot.lane.b32.xlu2 %v2658_v13, %s5647_s18  ;;  %v7360_v13 = vpop.permute.xlu2 %2846 }
 0x913   :  { %2743 = vrot.lane.b32.xlu1 %v2660_v29, %s5647_s18  ;;  %2741 = vrot.lane.b32.xlu0 %v2659_v55, %s5647_s18  ;;  %v2661_v29 = vmul.f32 %v7075_v45, %v2619_v25  ;;  %v2662_v55 = vmul.f32 %v7085_v1, %v2619_v25  ;;  %v7378_v25 = vpop.permute.xlu0 %2638 }
 0x919   :  { %2529 = vrot.lane.b32.xlu2 %v2441_v5, %s5643_s17  ;;  %v7370_v5 = vpop.permute.xlu2 %2634 }
 0x91b   :  { %2531 = vrot.lane.b32.xlu0 %v2442_v12, %s5643_s17  ;;  %2713 = vrot.lane.b32.xlu1 %v2645_v24, %s5647_s18  ;;  %v2444_v24 = vmul.f32 %v7085_v1, %v7208_v41  ;;  %v2647_v12 = vmul.f32 %v7033_v30, %v2623_v16 }
 0x921   :  { %2715 = vrot.lane.b32.xlu2 %v2646_v11, %s5647_s18  ;;  %v2627_v11 = vpop.permute.xlu1 %2626  ;;  %v7384_v22 = vpop.permute.xlu2 %3066 }
 0x923   :  { %2745 = vrot.lane.b32.xlu0 %v2661_v29, %s5647_s18  ;;  %2747 = vrot.lane.b32.xlu1 %v2662_v55, %s5647_s18  ;;  %v2648_v29 = vmul.f32 %v7027_v53, %v2623_v16  ;;  %v2663_v55 = vmul.f32 %v7075_v45, %v2623_v16 }
 0x929   :  { %2533 = vrot.lane.b32.xlu2 %v2443_v48, %s5643_s17  ;;  %v2664_v48 = vmul.f32 %v7085_v1, %v2623_v16  ;;  %v2631_v41 = vpop.permute.xlu1 %2630  ;;  %v7394_v16 = vpop.permute.xlu2 %3070 }
 0x92b   :  { %2535 = vrot.lane.b32.xlu0 %v2444_v24, %s5643_s17  ;;  %2717 = vrot.lane.b32.xlu1 %v2647_v12, %s5647_s18  ;;  %v2839_v24 = vpop.permute.xlu0 %2838 }
 0x92c   :  { %v2867_v12 = vmul.f32 %v7033_v30, %v2839_v24  ;;  %v2884_v6 = vmul.f32 %v7085_v1, %v2839_v24 }
 0x931   :  { %2719 = vrot.lane.b32.xlu2 %v2648_v29, %s5647_s18  ;;  %v2866_v29 = vmul.f32 %v7027_v53, %v2835_v21 }
 0x933   :  { %2749 = vrot.lane.b32.xlu0 %v2663_v55, %s5647_s18  ;;  %2751 = vrot.lane.b32.xlu1 %v2664_v48, %s5647_s18  ;;  %v7396_v55 = vpop.permute.xlu1 %3062  ;;  %v2868_v48 = vmul.f32 %v7027_v53, %v2839_v24 }
 0x939   :  { %2929 = vrot.lane.b32.xlu2 %v2865_v15, %s5648_s19  ;;  %v7404_v15 = vpop.permute.xlu2 %3074 }
 0x93a   :  { %10573 = vst [vmem:[#allocation317_spill] sm:$0xff] %v7404_v15  ;;  %v2651_v15 = vmul.f32 %v7033_v30, %v2631_v41 }
 0x93b   :  { %2933 = vrot.lane.b32.xlu1 %v2867_v12, %s5648_s19  ;;  %2931 = vrot.lane.b32.xlu0 %v2866_v29, %s5648_s19  ;;  %v2883_v12 = vmul.f32 %v7075_v45, %v2839_v24  ;;  %v7407_v29 = vpop.permute.xlu1 %2850  ;;  %v2650_v24 = vmul.f32 %v7027_v53, %v2627_v11 }
 0x941   :  { %2935 = vrot.lane.b32.xlu2 %v2868_v48, %s5648_s19  ;;  %v2445_v48 = vmul.f32 %v7075_v45, %v7230_v51 }
 0x943   :  { %2963 = vrot.lane.b32.xlu1 %v2882_v50, %s5648_s19  ;;  %2961 = vrot.lane.b32.xlu0 %v2881_v4, %s5648_s19  ;;  %v2446_v50 = vmul.f32 %v7085_v1, %v7230_v51  ;;  %v7417_v4 = vpop.permute.xlu2 %3082  ;;  %v7419_v21 = vpop.permute.xlu1 %2854  ;;  %v2666_v51 = vmul.f32 %v7085_v1, %v2627_v11 }
 0x944   :  { %10574 = vst [vmem:[#allocation318_spill] sm:$0xff] %v7417_v4 }
 0x949   :  { %2965 = vrot.lane.b32.xlu2 %v2883_v12, %s5648_s19  ;;  %v2649_v12 = vmul.f32 %v7033_v30, %v2627_v11 }
 0x94b   :  { %2537 = vrot.lane.b32.xlu1 %v2445_v48, %s5643_s17  ;;  %2967 = vrot.lane.b32.xlu0 %v2884_v6, %s5648_s19  ;;  %v2665_v48 = vmul.f32 %v7075_v45, %v2627_v11  ;;  %v2869_v6 = vmul.f32 %v7033_v30, %v7350_v10  ;;  %v7431_v4 = vpop.permute.xlu2 %2527  ;;  %v2886_v11 = vmul.f32 %v7085_v1, %v7350_v10 }
 0x951   :  { %2539 = vrot.lane.b32.xlu2 %v2446_v50, %s5643_s17  ;;  %v7433_v50 = vpop.permute.xlu1 %2858 }
 0x952   :  { %10575 = vst [vmem:[#allocation319_spill] sm:$0xff] %v7433_v50 }
 0x953   :  { %2723 = vrot.lane.b32.xlu1 %v2650_v24, %s5647_s18  ;;  %2721 = vrot.lane.b32.xlu0 %v2649_v12, %s5647_s18  ;;  %v2870_v24 = vmul.f32 %v7027_v53, %v7350_v10  ;;  %v2885_v12 = vmul.f32 %v7075_v45, %v7350_v10 }
 0x959   :  { %2753 = vrot.lane.b32.xlu2 %v2665_v48, %s5647_s18  ;;  %v7444_v48 = vpop.permute.xlu1 %3078 }
 0x95a   :  { %10576 = vst [vmem:[#allocation320_spill] sm:$0xff] %v7444_v48  ;;  %v2652_v48 = vmul.f32 %v7027_v53, %v2631_v41 }
 0x95b   :  { %2755 = vrot.lane.b32.xlu0 %v2666_v51, %s5647_s18  ;;  %2937 = vrot.lane.b32.xlu1 %v2869_v6, %s5648_s19  ;;  %v2447_v6 = vmul.f32 %v7075_v45, %v7219_v26 }
 0x961   :  { %2939 = vrot.lane.b32.xlu2 %v2870_v24, %s5648_s19  ;;  %v2448_v24 = vmul.f32 %v7085_v1, %v7219_v26  ;;  %v2668_v26 = vmul.f32 %v7085_v1, %v2631_v41 }
 0x963   :  { %2969 = vrot.lane.b32.xlu0 %v2885_v12, %s5648_s19  ;;  %2971 = vrot.lane.b32.xlu1 %v2886_v11, %s5648_s19  ;;  %v7448_v51 = vpop.permute.xlu2 %2709  ;;  %v7460_v12 = vpop.permute.xlu0 %2862 }
 0x964   :  { %10577 = vst [vmem:[#allocation321_spill] sm:$0xff] %v7448_v51  ;;  %v7462_v11 = vpop.permute.xlu1 %3086  ;;  %v2888_v51 = vmul.f32 %v7085_v1, %v7360_v13 }
 0x965   :  { %10579 = vst [vmem:[#allocation323_spill] sm:$0xff] %v7460_v12 }
 0x966   :  { %10580 = vst [vmem:[#allocation324_spill] sm:$0xff] %v7462_v11  ;;  %v2871_v11 = vmul.f32 %v7033_v30, %v7360_v13 }
 0x969   :  { %2541 = vrot.lane.b32.xlu2 %v2447_v6, %s5643_s17  ;;  %v2667_v6 = vmul.f32 %v7075_v45, %v2631_v41  ;;  %v2872_v41 = vmul.f32 %v7027_v53, %v7360_v13 }
 0x96b   :  { %2543 = vrot.lane.b32.xlu0 %v2448_v24, %s5643_s17  ;;  %2725 = vrot.lane.b32.xlu1 %v2651_v15, %s5647_s18  ;;  %v7458_v10 = vpop.permute.xlu2 %2739 }
 0x96c   :  { %10578 = vst [vmem:[#allocation322_spill] sm:$0xff] %v7458_v10 }
 0x971   :  { %2727 = vrot.lane.b32.xlu2 %v2652_v48, %s5647_s18  ;;  %v2887_v48 = vmul.f32 %v7075_v45, %v7360_v13 }
 0x973   :  { %2757 = vrot.lane.b32.xlu0 %v2667_v6, %s5647_s18  ;;  %2759 = vrot.lane.b32.xlu1 %v2668_v26, %s5647_s18  ;;  %v7470_v24 = vpop.permute.xlu2 %2529  ;;  %v81_v6 = vmul.f32 %v7033_v30, %v5759_v27 }
 0x974   :  { %10581 = vst [vmem:[#allocation325_spill] sm:$0xff] %v7470_v24 }
 0x975   :  { %v2706_v15 = vpop.permute.xlu0 %2705  ;;  %v7472_v10 = vpop.permute.xlu1 %2707  ;;  %v337_v24 = vadd.f32 %v5841_v14, %v81_v6  ;;  %v84_v14 = vmul.f32 %v7027_v53, %v5770_v31 }
 0x976   :  { %10582 = vst [vmem:[#allocation326_spill] sm:$0xff] %v7472_v10 }
 0x977   :  { %v561_v12 = vadd.f32 %v5992_v8, %v337_v24 }
 0x979   :  { %2941 = vrot.lane.b32.xlu2 %v2871_v11, %s5648_s19  ;;  %v785_v50 = vadd.f32 %v6129_v63, %v561_v12  ;;  %v340_v63 = vadd.f32 %v5846_v23, %v84_v14  ;;  %v3105_v23 = vmul.f32 %v7075_v45, %v7328_v2 }
 0x97b   :  { %2973 = vrot.lane.b32.xlu1 %v2887_v48, %s5648_s19  ;;  %2943 = vrot.lane.b32.xlu0 %v2872_v41, %s5648_s19  ;;  %v7485_v26 = vpop.permute.xlu2 %2715  ;;  %v3090_v48 = vmul.f32 %v7027_v53, %v7328_v2  ;;  %v3089_v41 = vmul.f32 %v7033_v30, %v7328_v2  ;;  %v1009_v6 = vadd.f32 %v6257_v57, %v785_v50 }
 0x97c   :  { %10583 = vst [vmem:[#allocation327_spill] sm:$0xff] %v7485_v26  ;;  %v564_v24 = vadd.f32 %v5998_v59, %v340_v63  ;;  %v3091_v57 = vmul.f32 %v7033_v30, %v7396_v55  ;;  %v99_v59 = vmul.f32 %v7075_v45, %v5770_v31 }
 0x97d   :  { %v7488_v10 = vpop.permute.xlu0 %2711  ;;  %v7490_v11 = vpop.permute.xlu1 %2737  ;;  %v1233_v13 = vadd.f32 %v6429_v38, %v1009_v6  ;;  %v3092_v38 = vmul.f32 %v7027_v53, %v7396_v55 }
 0x97e   :  { %v788_v50 = vadd.f32 %v6133_v44, %v564_v24  ;;  %v3106_v24 = vmul.f32 %v7085_v1, %v7328_v2 }
 0x97f   :  { %v1457_v26 = vadd.f32 %v6566_v39, %v1233_v13 }
 0x980   :  { %v1012_v39 = vadd.f32 %v6262_v20, %v788_v50 }
 0x981   :  { %2975 = vrot.lane.b32.xlu2 %v2888_v51, %s5648_s19 }
 0x983   :  { %3155 = vrot.lane.b32.xlu1 %v3090_v48, %s5649_s20  ;;  %3153 = vrot.lane.b32.xlu0 %v3089_v41, %s5649_s20  ;;  %v7506_v8 = vpop.permute.xlu2 %2533  ;;  %v1681_v48 = vadd.f32 %v6691_v47, %v1457_v26  ;;  %v355_v47 = vadd.f32 %v5873_v43, %v99_v59  ;;  %v1236_v26 = vadd.f32 %v6435_v9, %v1012_v39 }
 0x985   :  { %v7510_v51 = vpop.permute.xlu0 %2741  ;;  %v7512_v12 = vpop.permute.xlu1 %2743  ;;  %v1905_v41 = vadd.f32 %v6840_v37, %v1681_v48  ;;  %v579_v20 = vadd.f32 %v6026_v58, %v355_v47  ;;  %v1460_v37 = vadd.f32 %v6570_v61, %v1236_v26  ;;  %v3107_v58 = vmul.f32 %v7075_v45, %v7396_v55 }
 0x986   :  { %v2874_v26 = vmul.f32 %v7027_v53, %v7407_v29 }
 0x987   :  { %v2129_v14 = vadd.f32 %v6974_v3, %v1905_v41  ;;  %v1684_v43 = vadd.f32 %v6696_v40, %v1460_v37  ;;  %v3108_v3 = vmul.f32 %v7085_v1, %v7396_v55  ;;  %v2653_v55 = vmul.f32 %v7033_v30, %v7370_v5 }
 0x988   :  { %v2889_v37 = vmul.f32 %v7075_v45, %v7407_v29 }
 0x989   :  { %3157 = vrot.lane.b32.xlu2 %v3091_v57, %s5649_s20  ;;  %v2353_v13 = vadd.f32 %v7119_v0, %v2129_v14  ;;  %v803_v57 = vadd.f32 %v6163_v42, %v579_v20  ;;  %v1908_v0 = vadd.f32 %v6846_v60, %v1684_v43 }
 0x98b   :  { %3185 = vrot.lane.b32.xlu1 %v3105_v23, %s5649_s20  ;;  %3159 = vrot.lane.b32.xlu0 %v3092_v38, %s5649_s20  ;;  %v7531_v44 = vpop.permute.xlu2 %2719  ;;  %v2577_v9 = vadd.f32 %v7281_v52, %v2353_v13  ;;  %v1027_v61 = vadd.f32 %v6286_v62, %v803_v57  ;;  %v2132_v2 = vadd.f32 %v6978_v36, %v1908_v0 }
 0x98c   :  { %v2654_v36 = vmul.f32 %v7027_v53, %v7370_v5  ;;  %v2890_v13 = vmul.f32 %v7085_v1, %v7407_v29 }
 0x98d   :  { %v7536_v6 = vpop.permute.xlu0 %2531  ;;  %v7538_v63 = vpop.permute.xlu1 %2713  ;;  %v2801_v50 = vadd.f32 %v2706_v15, %v2577_v9  ;;  %v1251_v40 = vadd.f32 %v6463_v34, %v1027_v61  ;;  %v2356_v60 = vadd.f32 %v7124_v28, %v2132_v2  ;;  %v2669_v34 = vmul.f32 %v7075_v45, %v7370_v5 }
 0x98e   :  { %v10217_v9 = vlaneseq  ;;  %v3110_v61 = vmul.f32 %v7085_v1, %v7384_v22 }
 0x98f   :  { %v1475_v62 = vadd.f32 %v6600_v19, %v1251_v40  ;;  %v2580_v38 = vadd.f32 %v7289_v49, %v2356_v60  ;;  %v106_v40 = vmul.f32 %v7085_v1, %v5734_v18  ;;  %v2671_v60 = vmul.f32 %v7075_v45, %v7378_v25 }
 0x991   :  { %3187 = vrot.lane.b32.xlu2 %v3106_v24, %s5649_s20  ;;  %v1699_v15 = vadd.f32 %v6720_v33, %v1475_v62  ;;  %v2804_v19 = vadd.f32 %v7488_v10, %v2580_v38  ;;  %v362_v2 = vadd.f32 %v5899_v56, %v106_v40  ;;  %v2656_v62 = vmul.f32 %v7027_v53, %v7378_v25  ;;  %v10586_v56 = vld [vmem:[#allocation10_spill] sm:$0xff] }
 0x992   :  { %v2875_v40 = vmul.f32 %v7033_v30, %v7419_v21 }
 0x993   :  { %3191 = vrot.lane.b32.xlu1 %v3108_v3, %s5649_s20  ;;  %3189 = vrot.lane.b32.xlu0 %v3107_v58, %s5649_s20  ;;  %v2930_v42 = vpop.permute.xlu2 %2929  ;;  %v1923_v59 = vadd.f32 %v6874_v54, %v1699_v15  ;;  %v2670_v54 = vmul.f32 %v7085_v1, %v7370_v5  ;;  %v3094_v3 = vmul.f32 %v7027_v53, %v7384_v22  ;;  %v7623_v58 = vshrl.u32 %v10217_v9, 7 }
 0x994   :  { %v7559_v52 = vadd.f32 %v2930_v42, %v2801_v50  ;;  %v586_v15 = vadd.f32 %v6030_v46, %v362_v2  ;;  %v10590_v46 = vld [vmem:[#allocation45_spill] sm:$0xff]  ;;  %v104_v2 = vmul.f32 %v7085_v1, %v5772_v32 }
 0x995   :  { %v7561_v48 = vpop.permute.xlu0 %2745  ;;  %v7563_v23 = vpop.permute.xlu1 %2747  ;;  %v2147_v33 = vadd.f32 %v7008_v17, %v1923_v59  ;;  %v2873_v17 = vmul.f32 %v7033_v30, %v7407_v29  ;;  %10585 = vst [vmem:[#allocation329_spill] sm:$0xff] %v7623_v58  ;;  %v3109_v29 = vmul.f32 %v7075_v45, %v7384_v22  ;;  %5411 = vset.pattern.permute.xlu2 %v7623_v58 }
 0x996   :  { %10584 = vst [vmem:[#allocation328_spill] sm:$0xff] %v7563_v23  ;;  %5412 = vset.pattern.permute.xlu1 %v7623_v58  ;;  %5414 = vset.pattern.permute.xlu0 %v7623_v58 }
 0x997   :  { %v2371_v47 = vadd.f32 %v7148_v7, %v2147_v33 }
 0x999   :  { %2729 = vrot.lane.b32.xlu2 %v2653_v55, %s5647_s18  ;;  %v2595_v10 = vadd.f32 %v7326_v35, %v2371_v47  ;;  %v87_v55 = vmul.f32 %v7033_v30, %v5772_v32 }
 0x99b   :  { %2761 = vrot.lane.b32.xlu1 %v2669_v34, %s5647_s18  ;;  %2731 = vrot.lane.b32.xlu0 %v2654_v36, %s5647_s18  ;;  %v2936_v28 = vpop.permute.xlu2 %2935  ;;  %v2819_v14 = vadd.f32 %v7510_v51, %v2595_v10  ;;  %v3093_v51 = vmul.f32 %v7033_v30, %v7384_v22  ;;  %v2655_v22 = vmul.f32 %v7033_v30, %v7378_v25  ;;  %v10587_v36 = vld [vmem:[#allocation6_spill] sm:$0xff] }
 0x99c   :  { %v7581_v49 = vadd.f32 %v2936_v28, %v2804_v19  ;;  %v343_v34 = vadd.f32 %v10586_v56, %v87_v55  ;;  %v101_v59 = vmul.f32 %v7075_v45, %v10587_v36  ;;  %v10588_v19 = vld [vmem:[#allocation89_spill] sm:$0xff] }
 0x99d   :  { %v7583_v39 = vpop.permute.xlu0 %2535  ;;  %v7585_v41 = vpop.permute.xlu1 %2717  ;;  %v810_v28 = vadd.f32 %v10588_v19, %v586_v15  ;;  %v10597_v15 = vld [vmem:[#allocation176_spill] sm:$0xff]  ;;  %v10600_v19 = vld [vmem:[#allocation114_spill] sm:$0xff] }
 0x9a1   :  { %2763 = vrot.lane.b32.xlu2 %v2670_v54, %s5647_s18  ;;  %v10589_v54 = vld [vmem:[#allocation28_spill] sm:$0xff] }
 0x9a2   :  { %v357_v10 = vadd.f32 %v10589_v54, %v101_v59  ;;  %v10599_v59 = vld [vmem:[#allocation31_spill] sm:$0xff] }
 0x9a3   :  { %2947 = vrot.lane.b32.xlu1 %v2874_v26, %s5648_s19  ;;  %2945 = vrot.lane.b32.xlu0 %v2873_v17, %s5648_s19  ;;  %v2966_v7 = vpop.permute.xlu2 %2965  ;;  %v567_v26 = vadd.f32 %v10590_v46, %v343_v34  ;;  %v10591_v17 = vld [vmem:[#allocation118_spill] sm:$0xff]  ;;  %v360_v30 = vadd.f32 %v10599_v59, %v104_v2  ;;  %v2891_v2 = vmul.f32 %v7075_v45, %v7419_v21  ;;  %v10610_v59 = vld [vmem:[#allocation263_spill] sm:$0xff] }
 0x9a4   :  { %v7599_v20 = vadd.f32 %v2966_v7, %v2819_v14  ;;  %v1034_v14 = vadd.f32 %v10591_v17, %v810_v28  ;;  %v2672_v7 = vmul.f32 %v7085_v1, %v7378_v25  ;;  %v10596_v25 = vld [vmem:[#allocation94_spill] sm:$0xff] }
 0x9a5   :  { %v7601_v5 = vpop.permute.xlu0 %2749  ;;  %v7603_v35 = vpop.permute.xlu1 %2751 }
 0x9a9   :  { %2977 = vrot.lane.b32.xlu2 %v2889_v37, %s5648_s19  ;;  %v10592_v37 = vld [vmem:[#allocation55_spill] sm:$0xff] }
 0x9ab   :  { %2979 = vrot.lane.b32.xlu0 %v2890_v13, %s5648_s19  ;;  %3161 = vrot.lane.b32.xlu1 %v3093_v51, %s5649_s20  ;;  %v7614_v24 = vpop.permute.xlu2 %2539  ;;  %v581_v13 = vadd.f32 %v10592_v37, %v357_v10  ;;  %v10593_v51 = vld [vmem:[#allocation71_spill] sm:$0xff]  ;;  %v10602_v10 = vld [vmem:[#allocation205_spill] sm:$0xff] }
 0x9ac   :  { %v10604_v37 = vld [vmem:[#allocation141_spill] sm:$0xff] }
 0x9ad   :  { %v7616_v57 = vpop.permute.xlu1 %2933  ;;  %v7618_v43 = vpop.permute.xlu0 %2931 }
 0x9b1   :  { %3163 = vrot.lane.b32.xlu2 %v3094_v3, %s5649_s20  ;;  %v791_v3 = vadd.f32 %v10593_v51, %v567_v26  ;;  %v10605_v51 = vld [vmem:[#allocation158_spill] sm:$0xff] }
 0x9b3   :  { %3193 = vrot.lane.b32.xlu0 %v3109_v29, %s5649_s20  ;;  %3195 = vrot.lane.b32.xlu1 %v3110_v61, %s5649_s20  ;;  %v7634_v0 = vpop.permute.xlu2 %2753  ;;  %v10594_v29 = vld [vmem:[#allocation142_spill] sm:$0xff]  ;;  %v1015_v55 = vadd.f32 %v10596_v25, %v791_v3  ;;  %v10608_v25 = vld [vmem:[#allocation165_spill] sm:$0xff] }
 0x9b4   :  { %v1258_v61 = vadd.f32 %v10594_v29, %v1034_v14  ;;  %v10603_v14 = vld [vmem:[#allocation56_spill] sm:$0xff]  ;;  %v10606_v29 = vld [vmem:[#allocation230_spill] sm:$0xff] }
 0x9b5   :  { %v7637_v50 = vpop.permute.xlu1 %2963  ;;  %v7639_v42 = vpop.permute.xlu0 %2961 }
 0x9b6   :  { %v1482_v56 = vadd.f32 %v10597_v15, %v1258_v61  ;;  %v10609_v15 = vld [vmem:[#allocation181_spill] sm:$0xff] }
 0x9b8   :  { %v1706_v46 = vadd.f32 %v10602_v10, %v1482_v56  ;;  %v10612_v10 = vld [vmem:[#allocation117_spill] sm:$0xff] }
 0x9b9   :  { %2733 = vrot.lane.b32.xlu2 %v2655_v22, %s5647_s18  ;;  %v2876_v22 = vmul.f32 %v7027_v53, %v7419_v21  ;;  %v10601_v53 = vld [vmem:[#allocation131_spill] sm:$0xff] }
 0x9ba   :  { %v1239_v54 = vadd.f32 %v10601_v53, %v1015_v55  ;;  %v1930_v61 = vadd.f32 %v10606_v29, %v1706_v46  ;;  %v2892_v53 = vmul.f32 %v7085_v1, %v7419_v21  ;;  %v10613_v46 = vld [vmem:[#allocation201_spill] sm:$0xff]  ;;  %v10618_v21 = vld [vmem:[#allocation143_spill] sm:$0xff] }
 0x9bb   :  { %2735 = vrot.lane.b32.xlu0 %v2656_v62, %s5647_s18  ;;  %2765 = vrot.lane.b32.xlu1 %v2671_v60, %s5647_s18  ;;  %v7656_v38 = vpop.permute.xlu2 %2939  ;;  %v10595_v62 = vld [vmem:[#allocation78_spill] sm:$0xff] }
 0x9bc   :  { %v805_v60 = vadd.f32 %v10595_v62, %v581_v13  ;;  %v1463_v3 = vadd.f32 %v10605_v51, %v1239_v54  ;;  %v10607_v62 = vld [vmem:[#allocation81_spill] sm:$0xff] }
 0x9bd   :  { %v7662_v33 = vpop.permute.xlu1 %2537  ;;  %v7664_v47 = vpop.permute.xlu0 %2967 }
 0x9be   :  { %v1029_v28 = vadd.f32 %v10600_v19, %v805_v60  ;;  %v1687_v56 = vadd.f32 %v10609_v15, %v1463_v3  ;;  %v10611_v19 = vld [vmem:[#allocation14_spill] sm:$0xff]  ;;  %v10616_v3 = vld [vmem:[#allocation40_spill] sm:$0xff]  ;;  %v10621_v15 = vld [vmem:[#allocation5_spill] sm:$0xff] }
 0x9c0   :  { %v1253_v13 = vadd.f32 %v10604_v37, %v1029_v28 }
 0x9c1   :  { %2767 = vrot.lane.b32.xlu2 %v2672_v7, %s5647_s18  ;;  %v584_v7 = vadd.f32 %v10603_v14, %v360_v30  ;;  %v2154_v30 = vadd.f32 %v10610_v59, %v1930_v61  ;;  %v10622_v59 = vld [vmem:[#allocation65_spill] sm:$0xff] }
 0x9c2   :  { %v1477_v55 = vadd.f32 %v10608_v25, %v1253_v13  ;;  %v10615_v13 = vld [vmem:[#allocation292_spill] sm:$0xff]  ;;  %v10620_v25 = vld [vmem:[#allocation245_spill] sm:$0xff] }
 0x9c3   :  { %2949 = vrot.lane.b32.xlu0 %v2875_v40, %s5648_s19  ;;  %2951 = vrot.lane.b32.xlu1 %v2876_v22, %s5648_s19  ;;  %v7686_v34 = vpop.permute.xlu2 %2541  ;;  %v7703_v40 = vld [vmem:[%s10188_s0] sm:$0xff]  ;;  %v808_v60 = vadd.f32 %v10607_v62, %v584_v7  ;;  %v10614_v7 = vld [vmem:[#allocation218_spill] sm:$0xff]  ;;  %v2378_v51 = vadd.f32 %v10615_v13, %v2154_v30 }
 0x9c4   :  { %10598 = vst [vmem:[#allocation10_spill] sm:$0xff] %v7686_v34  ;;  %v83_v22 = vmul.f32 %v7703_v40, %v5770_v31  ;;  %v3095_v54 = vmul.f32 %v7703_v40, %v7394_v16  ;;  %v1701_v14 = vadd.f32 %v10613_v46, %v1477_v55  ;;  %v1911_v37 = vadd.f32 %v10614_v7, %v1687_v56  ;;  %v10625_v7 = vld [vmem:[#allocation268_spill] sm:$0xff] }
 0x9c5   :  { %v7692_v26 = vpop.permute.xlu1 %2723  ;;  %v7694_v17 = vpop.permute.xlu0 %2721  ;;  %v1032_v45 = vadd.f32 %v10612_v10, %v808_v60  ;;  %v2602_v55 = vadd.f32 %v7536_v6, %v2378_v51  ;;  %v108_v56 = vmul.f32 %v7085_v1, %v10621_v15  ;;  %v10624_v10 = vld [vmem:[#allocation252_spill] sm:$0xff]  ;;  %v7747_v6 = vld [vmem:[%s10188_s0 + $0x8] sm:$0xff] }
 0x9c6   :  { %v339_v28 = vadd.f32 %v10611_v19, %v83_v22  ;;  %v2135_v60 = vadd.f32 %v10620_v25, %v1911_v37  ;;  %v88_v37 = vmul.f32 %v7747_v6, %v5772_v32  ;;  %v10626_v51 = vld [vmem:[#allocation29_spill] sm:$0xff]  ;;  %v10629_v25 = vld [vmem:[#allocation288_spill] sm:$0xff] }
 0x9c7   :  { %v1256_v22 = vadd.f32 %v10618_v21, %v1032_v45  ;;  %v10627_v21 = vld [vmem:[#allocation97_spill] sm:$0xff] }
 0x9c8   :  { %v563_v29 = vadd.f32 %v10616_v3, %v339_v28  ;;  %v2359_v45 = vadd.f32 %v10625_v7, %v2135_v60  ;;  %v364_v3 = vadd.f32 %v10626_v51, %v108_v56  ;;  %v7764_v56 = vld [vmem:[%s10188_s0 + $0x10] sm:$0xff] }
 0x9c9   :  { %2981 = vrot.lane.b32.xlu2 %v2891_v2, %s5648_s19  ;;  %v10619_v2 = vld [vmem:[#allocation228_spill] sm:$0xff]  ;;  %v10633_v7 = vld [vmem:[#allocation126_spill] sm:$0xff] }
 0x9ca   :  { %v1925_v62 = vadd.f32 %v10619_v2, %v1701_v14  ;;  %v787_v30 = vadd.f32 %v10622_v59, %v563_v29  ;;  %v98_v14 = vmul.f32 %v7085_v1, %v5759_v27  ;;  %v3096_v29 = vmul.f32 %v7747_v6, %v7394_v16  ;;  %v10628_v2 = vld [vmem:[#allocation204_spill] sm:$0xff]  ;;  %v10631_v59 = vld [vmem:[#allocation11_spill] sm:$0xff] }
 0x9cb   :  { %2983 = vrot.lane.b32.xlu0 %v2892_v53, %s5648_s19  ;;  %3165 = vrot.lane.b32.xlu1 %v3095_v54, %s5649_s20  ;;  %v7726_v61 = vpop.permute.xlu2 %2727  ;;  %v10623_v53 = vld [vmem:[#allocation168_spill] sm:$0xff] }
 0x9cc   :  { %10617 = vst [vmem:[#allocation6_spill] sm:$0xff] %v7726_v61  ;;  %v1480_v54 = vadd.f32 %v10623_v53, %v1256_v22  ;;  %v2149_v46 = vadd.f32 %v10624_v10, %v1925_v62  ;;  %v1011_v22 = vadd.f32 %v10627_v21, %v787_v30  ;;  %v10630_v1 = vld [vmem:[#allocation304_spill] sm:$0xff]  ;;  %v10632_v53 = vld [vmem:[#allocation63_spill] sm:$0xff]  ;;  %v3111_v30 = vmul.f32 %v7764_v56, %v7394_v16 }
 0x9cd   :  { %v2756_v19 = vpop.permute.xlu0 %2755  ;;  %v7735_v28 = vpop.permute.xlu1 %2937  ;;  %v588_v10 = vadd.f32 %v10632_v53, %v364_v3  ;;  %v10635_v3 = vld [vmem:[#allocation314_spill] sm:$0xff] }
 0x9ce   :  { %v7740_v13 = vadd.f32 %v2756_v19, %v2602_v55  ;;  %v1704_v62 = vadd.f32 %v10628_v2, %v1480_v54  ;;  %v2373_v60 = vadd.f32 %v10629_v25, %v2149_v46  ;;  %v2583_v55 = vadd.f32 %v10630_v1, %v2359_v45  ;;  %v7771_v54 = vld [vmem:[%s10188_s0 + $0x18] sm:$0xff]  ;;  %v7782_v2 = vld [vmem:[%s10189_s1] sm:$0xff]  ;;  %v10637_v53 = vld [vmem:[#allocation90_spill] sm:$0xff] }
 0x9cf   :  { %v354_v19 = vadd.f32 %v10631_v59, %v98_v14  ;;  %v3112_v46 = vmul.f32 %v7771_v54, %v7394_v16  ;;  %v1235_v45 = vadd.f32 %v10633_v7, %v1011_v22  ;;  %v10634_v14 = vld [vmem:[#allocation229_spill] sm:$0xff]  ;;  %v103_v25 = vmul.f32 %v7764_v56, %v5772_v32  ;;  %v10636_v1 = vld [vmem:[#allocation52_spill] sm:$0xff]  ;;  %v10642_v32 = vld [vmem:[#allocation30_spill] sm:$0xff] }
 0x9d0   :  { %v1928_v51 = vadd.f32 %v10634_v14, %v1704_v62  ;;  %v2807_v21 = vadd.f32 %v7585_v41, %v2583_v55  ;;  %v812_v16 = vadd.f32 %v10637_v53, %v588_v10  ;;  %v10638_v62 = vld [vmem:[#allocation152_spill] sm:$0xff]  ;;  %v10639_v41 = vld [vmem:[#allocation255_spill] sm:$0xff] }
 0x9d1   :  { %3167 = vrot.lane.b32.xlu2 %v3096_v29, %s5649_s20  ;;  %v2597_v29 = vadd.f32 %v10635_v3, %v2373_v60  ;;  %v578_v59 = vadd.f32 %v10636_v1, %v354_v19  ;;  %v1459_v60 = vadd.f32 %v10638_v62, %v1235_v45  ;;  %v10641_v3 = vld [vmem:[#allocation19_spill] sm:$0xff]  ;;  %v359_v61 = vadd.f32 %v10642_v32, %v103_v25  ;;  %v10646_v45 = vld [vmem:[#allocation184_spill] sm:$0xff]  ;;  %v10652_v32 = vld [vmem:[#allocation150_spill] sm:$0xff] }
 0x9d2   :  { %v2152_v55 = vadd.f32 %v10639_v41, %v1928_v51  ;;  %v344_v9 = vadd.f32 %v10641_v3, %v88_v37  ;;  %v10643_v19 = vld [vmem:[#allocation75_spill] sm:$0xff]  ;;  %v10650_v37 = vld [vmem:[#allocation54_spill] sm:$0xff]  ;;  %v10218_v25 = vperm.slane %v7782_v2, 1 }
 0x9d3   :  { %3197 = vrot.lane.b32.xlu0 %v3111_v30, %s5649_s20  ;;  %3199 = vrot.lane.b32.xlu1 %v3112_v46, %s5649_s20  ;;  %v2942_v22 = vpop.permute.xlu2 %2941  ;;  %v2821_v7 = vadd.f32 %v7561_v48, %v2597_v29  ;;  %v802_v1 = vadd.f32 %v10643_v19, %v578_v59  ;;  %v10645_v46 = vld [vmem:[#allocation112_spill] sm:$0xff]  ;;  %v1683_v62 = vadd.f32 %v10646_v45, %v1459_v60  ;;  %v10647_v51 = vld [vmem:[#allocation291_spill] sm:$0xff] }
 0x9d4   :  { %v7793_v14 = vadd.f32 %v2942_v22, %v2807_v21  ;;  %v1036_v34 = vadd.f32 %v10645_v46, %v812_v16  ;;  %v2376_v41 = vadd.f32 %v10647_v51, %v2152_v55  ;;  %v10649_v29 = vld [vmem:[#allocation39_spill] sm:$0xff]  ;;  %v583_v22 = vadd.f32 %v10650_v37, %v359_v61  ;;  %v10654_v55 = vld [vmem:[#allocation73_spill] sm:$0xff] }
 0x9d5   :  { %v2970_v10 = vpop.permute.xlu0 %2969  ;;  %v7798_v53 = vpop.permute.xlu1 %2971  ;;  %v568_v21 = vadd.f32 %v10649_v29, %v344_v9  ;;  %v10651_v59 = vld [vmem:[#allocation111_spill] sm:$0xff]  ;;  %v82_v60 = vmul.f32 %v7747_v6, %v5759_v27  ;;  %v10656_v9 = vperm.slane %v7782_v2, 0 }
 0x9d6   :  { %10640 = vst [vmem:[#allocation89_spill] sm:$0xff] %v7793_v14  ;;  %v7804_v48 = vadd.f32 %v2970_v10, %v2821_v7  ;;  %v1026_v3 = vadd.f32 %v10651_v59, %v802_v1  ;;  %v1260_v19 = vadd.f32 %v10652_v32, %v1036_v34  ;;  %v10653_v14 = vld [vmem:[#allocation213_spill] sm:$0xff]  ;;  %v2600_v16 = vadd.f32 %v7431_v4, %v2376_v41  ;;  %v10655_v10 = vld [vmem:[#allocation87_spill] sm:$0xff]  ;;  %v10658_v1 = vld [vmem:[#allocation138_spill] sm:$0xff] }
 0x9d7   :  { %10644 = vst [vmem:[#allocation28_spill] sm:$0xff] %v7798_v53  ;;  %v1907_v30 = vadd.f32 %v10653_v14, %v1683_v62  ;;  %v792_v7 = vadd.f32 %v10654_v55, %v568_v21  ;;  %v807_v46 = vadd.f32 %v10655_v10, %v583_v22  ;;  %v10657_v61 = vld [vmem:[#allocation319_spill] sm:$0xff]  ;;  %v10659_v34 = vld [vmem:[#allocation177_spill] sm:$0xff]  ;;  %v10662_v59 = vld [vmem:[#allocation102_spill] sm:$0xff] }
 0x9d8   :  { %10648 = vst [vmem:[#allocation45_spill] sm:$0xff] %v7804_v48  ;;  %v2893_v45 = vmul.f32 %v7764_v56, %v10657_v61  ;;  %v1250_v51 = vadd.f32 %v10658_v1, %v1026_v3  ;;  %v1484_v29 = vadd.f32 %v10659_v34, %v1260_v19  ;;  %v10660_v14 = vld [vmem:[#allocation239_spill] sm:$0xff]  ;;  %v2824_v4 = vadd.f32 %v7603_v35, %v2600_v16  ;;  %v10661_v41 = vld [vmem:[#allocation9_spill] sm:$0xff]  ;;  %v10663_v32 = vld [vmem:[#allocation116_spill] sm:$0xff] }
 0x9d9   :  { %3286 = vperm.xlu2 %5411, %v10656_v9   ;;  %v2131_v62 = vadd.f32 %v10660_v14, %v1907_v30  ;;  %v338_v37 = vadd.f32 %v10661_v41, %v82_v60  ;;  %v1016_v21 = vadd.f32 %v10662_v59, %v792_v7  ;;  %v1031_v22 = vadd.f32 %v10663_v32, %v807_v46  ;;  %v10664_v10 = vld [vmem:[#allocation162_spill] sm:$0xff]  ;;  %v10665_v9 = vld [vmem:[#allocation199_spill] sm:$0xff]  ;;  %v10668_v35 = vld [vmem:[#allocation37_spill] sm:$0xff] }
 0x9da   :  { %v1474_v3 = vadd.f32 %v10664_v10, %v1250_v51  ;;  %v1708_v19 = vadd.f32 %v10665_v9, %v1484_v29  ;;  %v10666_v1 = vld [vmem:[#allocation271_spill] sm:$0xff]  ;;  %v10669_v60 = vld [vmem:[#allocation125_spill] sm:$0xff]  ;;  %v10672_v51 = vld [vmem:[#allocation198_spill] sm:$0xff] }
 0x9db   :  { %2985 = vrot.lane.b32.xlu0 %v2893_v45, %s5648_s19  ;;  %3299 = vperm.xlu1 %5412, %v10218_v25   ;;  %v2976_v55 = vpop.permute.xlu2 %2975  ;;  %v2355_v30 = vadd.f32 %v10666_v1, %v2131_v62  ;;  %v562_v16 = vadd.f32 %v10668_v35, %v338_v37  ;;  %v1240_v7 = vadd.f32 %v10669_v60, %v1016_v21  ;;  %v7843_v45 = vadd.s32 8, %v7623_v58  ;;  %v10671_v41 = vld [vmem:[#allocation139_spill] sm:$0xff]  ;;  %v10673_v29 = vld [vmem:[#allocation237_spill] sm:$0xff]  ;;  %v10677_v35 = vld [vmem:[#allocation160_spill] sm:$0xff] }
 0x9dc   :  { %v7834_v34 = vadd.f32 %v2976_v55, %v2824_v4  ;;  %v1255_v59 = vadd.f32 %v10671_v41, %v1031_v22  ;;  %v1698_v32 = vadd.f32 %v10672_v51, %v1474_v3  ;;  %v1932_v10 = vadd.f32 %v10673_v29, %v1708_v19  ;;  %v10674_v62 = vld [vmem:[#allocation299_spill] sm:$0xff]  ;;  %v10678_v25 = vld [vmem:[#allocation174_spill] sm:$0xff]  ;;  %v10680_v41 = vld [vmem:[#allocation264_spill] sm:$0xff] }
 0x9dd   :  { %v7838_v14 = vpop.permute.xlu0 %2543  ;;  %v7840_v46 = vpop.permute.xlu1 %2725  ;;  %v2579_v4 = vadd.f32 %v10674_v62, %v2355_v30  ;;  %v97_v37 = vmul.f32 %v7764_v56, %v5759_v27  ;;  %v10675_v55 = vld [vmem:[#allocation7_spill] sm:$0xff]  ;;  %v1464_v60 = vadd.f32 %v10677_v35, %v1240_v7  ;;  %v10681_v51 = vld [vmem:[#allocation321_spill] sm:$0xff]  ;;  %v10682_v29 = vld [vmem:[#allocation96_spill] sm:$0xff]  ;;  %v2877_v27 = vmul.f32 %v7703_v40, %v10657_v61 }
 0x9de   :  { %10667 = vst [vmem:[#allocation118_spill] sm:$0xff] %v7834_v34  ;;  %v110_v21 = vmul.f32 %v7771_v54, %v10675_v55  ;;  %v10676_v9 = vld [vmem:[#allocation67_spill] sm:$0xff]  ;;  %v1479_v34 = vadd.f32 %v10678_v25, %v1255_v59  ;;  %v2156_v3 = vadd.f32 %v10680_v41, %v1932_v10  ;;  %v10683_v62 = vld [vmem:[#allocation189_spill] sm:$0xff] }
 0x9df   :  { %10670 = vst [vmem:[#allocation55_spill] sm:$0xff] %v7840_v46  ;;  %v786_v1 = vadd.f32 %v10676_v9, %v562_v16  ;;  %v10679_v46 = vld [vmem:[#allocation225_spill] sm:$0xff]  ;;  %v2803_v19 = vadd.f32 %v10681_v51, %v2579_v4  ;;  %v1688_v48 = vadd.f32 %v10683_v62, %v1464_v60  ;;  %v10685_v9 = vld [vmem:[#allocation203_spill] sm:$0xff]  ;;  %v10690_v51 = vld [vmem:[#allocation212_spill] sm:$0xff] }
 0x9e0   :  { %v1922_v22 = vadd.f32 %v10679_v46, %v1698_v32  ;;  %v10684_v16 = vld [vmem:[#allocation317_spill] sm:$0xff]  ;;  %v1703_v25 = vadd.f32 %v10685_v9, %v1479_v34  ;;  %v10687_v32 = vld [vmem:[#allocation286_spill] sm:$0xff]  ;;  %v10689_v41 = vld [vmem:[#allocation123_spill] sm:$0xff] }
 0x9e1   :  { %v1010_v30 = vadd.f32 %v10682_v29, %v786_v1  ;;  %5413 = vset.pattern.permute.xlu2 %v7843_v45  ;;  %v3098_v7 = vmul.f32 %v7747_v6, %v10684_v16  ;;  %v10686_v59 = vld [vmem:[#allocation249_spill] sm:$0xff]  ;;  %v2380_v10 = vadd.f32 %v10687_v32, %v2156_v3  ;;  %v3027_v4 = vadd.f32 %v7616_v57, %v2803_v19  ;;  %v10691_v53 = vld [vmem:[#allocation227_spill] sm:$0xff] }
 0x9e2   :  { %v2146_v46 = vadd.f32 %v10686_v59, %v1922_v22  ;;  %v10688_v35 = vld [vmem:[#allocation13_spill] sm:$0xff]  ;;  %v1912_v29 = vadd.f32 %v10690_v51, %v1688_v48  ;;  %v1927_v23 = vadd.f32 %v10691_v53, %v1703_v25  ;;  %v105_v57 = vmul.f32 %v7764_v56, %v5734_v18  ;;  %v10695_v19 = vld [vmem:[#allocation47_spill] sm:$0xff] }
 0x9e3   :  { %v353_v1 = vadd.f32 %v10688_v35, %v97_v37  ;;  %v1234_v60 = vadd.f32 %v10689_v41, %v1010_v30  ;;  %2953 = vrot.lane.b32.xlu1 %v2877_v27, %s5648_s19  ;;  %3171 = vrot.lane.b32.xlu0 %v3098_v7, %s5649_s20  ;;  %v3158_v62 = vpop.permute.xlu2 %3157  ;;  %v10692_v34 = vld [vmem:[#allocation285_spill] sm:$0xff]  ;;  %v2604_v22 = vadd.f32 %v7583_v39, %v2380_v10  ;;  %v10694_v37 = vld [vmem:[#allocation35_spill] sm:$0xff]  ;;  %v10696_v27 = vld [vmem:[#allocation154_spill] sm:$0xff] }
 0x9e4   :  { %v2370_v9 = vadd.f32 %v10692_v34, %v2146_v46  ;;  %v7878_v3 = vadd.f32 %v3158_v62, %v3027_v4  ;;  %5415 = vset.pattern.permute.xlu1 %v7843_v45  ;;  %v366_v48 = vadd.f32 %v10694_v37, %v110_v21  ;;  %v10697_v25 = vld [vmem:[#allocation247_spill] sm:$0xff]  ;;  %v10698_v32 = vld [vmem:[#allocation261_spill] sm:$0xff]  ;;  %v100_v41 = vmul.f32 %v7771_v54, %v5770_v31  ;;  %v10701_v62 = vld [vmem:[#allocation82_spill] sm:$0xff] }
 0x9e5   :  { %v577_v30 = vadd.f32 %v10695_v19, %v353_v1  ;;  %v1458_v7 = vadd.f32 %v10696_v27, %v1234_v60  ;;  %v7886_v59 = vpop.permute.xlu0 %2757  ;;  %v2760_v53 = vpop.permute.xlu1 %2759  ;;  %v2136_v46 = vadd.f32 %v10697_v25, %v1912_v29  ;;  %v2151_v39 = vadd.f32 %v10698_v32, %v1927_v23  ;;  %v10699_v10 = vld [vmem:[#allocation311_spill] sm:$0xff]  ;;  %v10700_v51 = vld [vmem:[#allocation61_spill] sm:$0xff]  ;;  %v10703_v19 = vld [vmem:[#allocation276_spill] sm:$0xff] }
 0x9e6   :  { %10693 = vst [vmem:[#allocation71_spill] sm:$0xff] %v7878_v3  ;;  %v2594_v4 = vadd.f32 %v10699_v10, %v2370_v9  ;;  %v7891_v35 = vadd.f32 %v2760_v53, %v2604_v22  ;;  %v590_v21 = vadd.f32 %v10700_v51, %v366_v48  ;;  %v3307_v60 = vperm.slane %v7782_v2, 2  ;;  %v10702_v34 = vld [vmem:[#allocation183_spill] sm:$0xff]  ;;  %v10704_v29 = vld [vmem:[#allocation290_spill] sm:$0xff] }
 0x9e7   :  { %v801_v1 = vadd.f32 %v10701_v62, %v577_v30  ;;  %v1682_v37 = vadd.f32 %v10702_v34, %v1458_v7  ;;  %v2360_v27 = vadd.f32 %v10703_v19, %v2136_v46  ;;  %v2375_v25 = vadd.f32 %v10704_v29, %v2151_v39  ;;  %v10705_v23 = vld [vmem:[#allocation322_spill] sm:$0xff]  ;;  %v10711_v62 = vld [vmem:[#allocation300_spill] sm:$0xff]  ;;  %v10712_v34 = vld [vmem:[#allocation315_spill] sm:$0xff] }
 0x9e8   :  { %v2818_v32 = vadd.f32 %v10705_v23, %v2594_v4  ;;  %v10706_v9 = vld [vmem:[#allocation26_spill] sm:$0xff]  ;;  %v10709_v48 = vperm.slane %v7782_v2, 1  ;;  %v2894_v30 = vmul.f32 %v7771_v54, %v10657_v61  ;;  %v10713_v19 = vld [vmem:[#allocation27_spill] sm:$0xff]  ;;  %v10714_v29 = vld [vmem:[#allocation121_spill] sm:$0xff] }
 0x9e9   :  { %v361_v22 = vadd.f32 %v10706_v9, %v105_v57  ;;  %v10707_v53 = vld [vmem:[#allocation86_spill] sm:$0xff]  ;;  %v2584_v46 = vadd.f32 %v10711_v62, %v2360_v27  ;;  %v2599_v39 = vadd.f32 %v10712_v34, %v2375_v25  ;;  %v356_v57 = vadd.f32 %v10713_v19, %v100_v41  ;;  %v10715_v23 = vld [vmem:[#allocation133_spill] sm:$0xff] }
 0x9ea   :  { %v814_v10 = vadd.f32 %v10707_v53, %v590_v21  ;;  %v10708_v3 = vld [vmem:[#allocation110_spill] sm:$0xff]  ;;  %3305 = vperm.xlu2 %5413, %v10709_v48   ;;  %v3042_v4 = vadd.f32 %v7637_v50, %v2818_v32  ;;  %v10716_v9 = vld [vmem:[#allocation241_spill] sm:$0xff]  ;;  %v86_v50 = vmul.f32 %v7747_v6, %v10587_v36  ;;  %v10720_v48 = vld [vmem:[#allocation148_spill] sm:$0xff] }
 0x9eb   :  { %v1025_v31 = vadd.f32 %v10708_v3, %v801_v1  ;;  %v10710_v51 = vld [vmem:[#allocation210_spill] sm:$0xff]  ;;  %2987 = vrot.lane.b32.xlu1 %v2894_v30, %s5648_s19  ;;  %3312 = vperm.xlu0 %5414, %v3307_v60   ;;  %v3188_v1 = vpop.permute.xlu2 %3187  ;;  %v2808_v27 = vadd.f32 %v7531_v44, %v2584_v46  ;;  %v2823_v25 = vadd.f32 %v7601_v5, %v2599_v39  ;;  %v10721_v34 = vld [vmem:[#allocation169_spill] sm:$0xff]  ;;  %v10723_v46 = vld [vmem:[#allocation84_spill] sm:$0xff] }
 0x9ec   :  { %v1906_v7 = vadd.f32 %v10710_v51, %v1682_v37  ;;  %v1038_v21 = vadd.f32 %v10714_v29, %v814_v10  ;;  %v7922_v53 = vadd.f32 %v3188_v1, %v3042_v4  ;;  %v10718_v41 = vld [vmem:[#allocation50_spill] sm:$0xff]  ;;  %v10719_v10 = vld [vmem:[#allocation60_spill] sm:$0xff] }
 0x9ed   :  { %v1249_v3 = vadd.f32 %v10715_v23, %v1025_v31  ;;  %v580_v32 = vadd.f32 %v10718_v41, %v356_v57  ;;  %v585_v31 = vadd.f32 %v10719_v10, %v361_v22  ;;  %v2974_v51 = vpop.permute.xlu1 %2973  ;;  %v2944_v62 = vpop.permute.xlu0 %2943  ;;  %v10724_v4 = vld [vmem:[#allocation88_spill] sm:$0xff]  ;;  %v2878_v57 = vmul.f32 %v7747_v6, %v10657_v61  ;;  %v10725_v22 = vld [vmem:[#allocation17_spill] sm:$0xff] }
 0x9ee   :  { %v2130_v37 = vadd.f32 %v10716_v9, %v1906_v7  ;;  %10717 = vst [vmem:[#allocation142_spill] sm:$0xff] %v7922_v53  ;;  %v1262_v30 = vadd.f32 %v10720_v48, %v1038_v21  ;;  %v10722_v7 = vld [vmem:[#allocation270_spill] sm:$0xff]  ;;  %v7931_v44 = vadd.f32 %v2974_v51, %v2823_v25  ;;  %v7933_v5 = vadd.f32 %v2944_v62, %v2808_v27  ;;  %v10726_v21 = vld [vmem:[#allocation173_spill] sm:$0xff]  ;;  %v10731_v62 = vld [vmem:[#allocation323_spill] sm:$0xff] }
 0x9ef   :  { %v1473_v19 = vadd.f32 %v10721_v34, %v1249_v3  ;;  %v804_v39 = vadd.f32 %v10723_v46, %v580_v32  ;;  %v809_v23 = vadd.f32 %v10724_v4, %v585_v31  ;;  %v342_v1 = vadd.f32 %v10725_v22, %v86_v50  ;;  %v10727_v41 = vld [vmem:[#allocation197_spill] sm:$0xff]  ;;  %v10732_v31 = vld [vmem:[#allocation208_spill] sm:$0xff]  ;;  %v10735_v46 = vld [vmem:[#allocation42_spill] sm:$0xff] }
 0x9f0   :  { %v2354_v29 = vadd.f32 %v10722_v7, %v2130_v37  ;;  %v1486_v9 = vadd.f32 %v10726_v21, %v1262_v30  ;;  %v10728_v3 = vld [vmem:[#allocation297_spill] sm:$0xff]  ;;  %v2896_v32 = vmul.f32 %v7771_v54, %v10731_v62  ;;  %v3113_v61 = vmul.f32 %v7764_v56, %v10684_v16  ;;  %v10733_v34 = vld [vmem:[#allocation220_spill] sm:$0xff]  ;;  %v10734_v7 = vld [vmem:[#allocation326_spill] sm:$0xff] }
 0x9f1   :  { %v1697_v10 = vadd.f32 %v10727_v41, %v1473_v19  ;;  %v10729_v37 = vld [vmem:[#allocation109_spill] sm:$0xff]  ;;  %v90_v50 = vmul.f32 %v7747_v6, %v5734_v18  ;;  %v10736_v4 = vld [vmem:[#allocation136_spill] sm:$0xff]  ;;  %v10737_v22 = vld [vmem:[#allocation147_spill] sm:$0xff] }
 0x9f2   :  { %v2578_v48 = vadd.f32 %v10728_v3, %v2354_v29  ;;  %v1033_v25 = vadd.f32 %v10729_v37, %v809_v23  ;;  %v10730_v51 = vld [vmem:[#allocation113_spill] sm:$0xff]  ;;  %2955 = vrot.lane.b32.xlu2 %v2878_v57, %s5648_s19  ;;  %v1710_v30 = vadd.f32 %v10732_v31, %v1486_v9  ;;  %v89_v9 = vmul.f32 %v7703_v40, %v5734_v18  ;;  %v10738_v41 = vld [vmem:[#allocation235_spill] sm:$0xff]  ;;  %v10739_v3 = vld [vmem:[#allocation256_spill] sm:$0xff] }
 0x9f3   :  { %v1028_v27 = vadd.f32 %v10730_v51, %v804_v39  ;;  %v1921_v19 = vadd.f32 %v10733_v34, %v1697_v10  ;;  %5416 = vset.pattern.permute.xlu2 %v7623_v58  ;;  %v566_v39 = vadd.f32 %v10735_v46, %v342_v1  ;;  %3201 = vrot.lane.b32.xlu1 %v3113_v61, %s5649_s20  ;;  %v7961_v21 = vpop.permute.xlu2 %2729  ;;  %v10740_v51 = vld [vmem:[#allocation66_spill] sm:$0xff]  ;;  %v10742_v31 = vld [vmem:[#allocation175_spill] sm:$0xff]  ;;  %v10743_v46 = vld [vmem:[#allocation260_spill] sm:$0xff] }
 0x9f4   :  { %v2802_v29 = vadd.f32 %v10734_v7, %v2578_v48  ;;  %v1257_v57 = vadd.f32 %v10737_v22, %v1033_v25  ;;  %2991 = vrot.lane.b32.xlu0 %v2896_v32, %s5648_s19  ;;  %v1934_v10 = vadd.f32 %v10738_v41, %v1710_v30  ;;  %v109_v1 = vmul.f32 %v7764_v56, %v10675_v55  ;;  %v10744_v18 = vld [vmem:[#allocation284_spill] sm:$0xff] }
 0x9f5   :  { %v1252_v23 = vadd.f32 %v10736_v4, %v1028_v27  ;;  %v2145_v48 = vadd.f32 %v10739_v3, %v1921_v19  ;;  %v790_v25 = vadd.f32 %v10740_v51, %v566_v39  ;;  %v10741_v27 = vld [vmem:[#allocation171_spill] sm:$0xff]  ;;  %v3156_v34 = vpop.permute.xlu1 %3155  ;;  %v3154_v7 = vpop.permute.xlu0 %3153  ;;  %v10748_v3 = vld [vmem:[#allocation196_spill] sm:$0xff] }
 0x9f6   :  { %v3026_v37 = vadd.f32 %v7618_v43, %v2802_v29  ;;  %v1481_v32 = vadd.f32 %v10742_v31, %v1257_v57  ;;  %v2158_v4 = vadd.f32 %v10743_v46, %v1934_v10  ;;  %v7978_v19 = vadd.f32 %v3154_v7, %v7559_v52  ;;  %v10746_v29 = vld [vmem:[#allocation34_spill] sm:$0xff]  ;;  %v10749_v51 = vld [vmem:[#allocation200_spill] sm:$0xff]  ;;  %v10751_v31 = vld [vmem:[#allocation309_spill] sm:$0xff] }
 0x9f7   :  { %v1476_v61 = vadd.f32 %v10741_v27, %v1252_v23  ;;  %v2369_v22 = vadd.f32 %v10744_v18, %v2145_v48  ;;  %v7982_v43 = vmul.f32 %v7764_v56, %v10621_v15  ;;  %v365_v39 = vadd.f32 %v10746_v29, %v109_v1  ;;  %v10747_v23 = vld [vmem:[#allocation100_spill] sm:$0xff]  ;;  %v10752_v7 = vld [vmem:[#allocation59_spill] sm:$0xff] }
 0x9f8   :  { %v7975_v30 = vadd.f32 %v3156_v34, %v3026_v37  ;;  %v1014_v41 = vadd.f32 %v10747_v23, %v790_v25  ;;  %v3097_v57 = vmul.f32 %v7703_v40, %v10684_v16  ;;  %v1705_v10 = vadd.f32 %v10748_v3, %v1481_v32  ;;  %v10750_v37 = vld [vmem:[#allocation295_spill] sm:$0xff]  ;;  %v10753_v18 = vld [vmem:[#allocation128_spill] sm:$0xff]  ;;  %v10756_v3 = vld [vmem:[#allocation234_spill] sm:$0xff] }
 0x9f9   :  { %v1700_v48 = vadd.f32 %v10749_v51, %v1476_v61  ;;  %v2382_v27 = vadd.f32 %v10750_v37, %v2158_v4  ;;  %v2593_v52 = vadd.f32 %v10751_v31, %v2369_v22  ;;  %v85_v34 = vmul.f32 %v7703_v40, %v10587_v36  ;;  %v10754_v25 = vld [vmem:[#allocation320_spill] sm:$0xff]  ;;  %v10755_v23 = vld [vmem:[#allocation223_spill] sm:$0xff]  ;;  %v10758_v31 = vld [vmem:[#allocation153_spill] sm:$0xff] }
 0x9fa   :  { %10745 = vst [vmem:[#allocation78_spill] sm:$0xff] %v7975_v30  ;;  %v589_v46 = vadd.f32 %v10752_v7, %v365_v39  ;;  %v1238_v1 = vadd.f32 %v10753_v18, %v1014_v41  ;;  %3169 = vrot.lane.b32.xlu2 %v3097_v57, %s5649_s20  ;;  %v3115_v29 = vmul.f32 %v7764_v56, %v10754_v25  ;;  %v10757_v37 = vld [vmem:[#allocation91_spill] sm:$0xff] }
 0x9fb   :  { %v1924_v32 = vadd.f32 %v10755_v23, %v1700_v48  ;;  %v1929_v61 = vadd.f32 %v10756_v3, %v1705_v10  ;;  %v2817_v4 = vadd.f32 %v7490_v11, %v2593_v52  ;;  %v2606_v22 = vadd.f32 %v7614_v24, %v2382_v27  ;;  %3318 = vperm.xlu1 %5415, %v3307_v60   ;;  %v2764_v57 = vpop.permute.xlu2 %2763  ;;  %v10759_v48 = vld [vmem:[#allocation258_spill] sm:$0xff]  ;;  %v10761_v27 = vld [vmem:[#allocation12_spill] sm:$0xff]  ;;  %v10764_v3 = vld [vmem:[#allocation187_spill] sm:$0xff] }
 0x9fc   :  { %v102_v51 = vmul.f32 %v7771_v54, %v10587_v36  ;;  %v813_v39 = vadd.f32 %v10757_v37, %v589_v46  ;;  %v1462_v41 = vadd.f32 %v10758_v31, %v1238_v1  ;;  %3205 = vrot.lane.b32.xlu0 %v3115_v29, %s5649_s20  ;;  %v10760_v10 = vld [vmem:[#allocation262_spill] sm:$0xff]  ;;  %v346_v36 = vadd.f32 %v10761_v27, %v90_v50  ;;  %v10762_v52 = vld [vmem:[#allocation20_spill] sm:$0xff]  ;;  %v10765_v29 = vld [vmem:[#allocation283_spill] sm:$0xff] }
 0x9fd   :  { %v2148_v7 = vadd.f32 %v10759_v48, %v1924_v32  ;;  %v2153_v18 = vadd.f32 %v10760_v10, %v1929_v61  ;;  %v3041_v11 = vadd.f32 %v7639_v42, %v2817_v4  ;;  %v8013_v24 = vadd.f32 %v2764_v57, %v2606_v22  ;;  %v10763_v23 = vld [vmem:[#allocation120_spill] sm:$0xff]  ;;  %v3186_v60 = vpop.permute.xlu1 %3185  ;;  %v3160_v31 = vpop.permute.xlu0 %3159  ;;  %v10766_v30 = vld [vmem:[#allocation287_spill] sm:$0xff]  ;;  %v10770_v10 = vld [vmem:[#allocation214_spill] sm:$0xff] }
 0x9fe   :  { %v345_v46 = vadd.f32 %v10762_v52, %v89_v9  ;;  %v1037_v1 = vadd.f32 %v10763_v23, %v813_v39  ;;  %v1686_v37 = vadd.f32 %v10764_v3, %v1462_v41  ;;  %v8024_v42 = vadd.f32 %v3160_v31, %v7581_v49  ;;  %v10767_v61 = vld [vmem:[#allocation43_spill] sm:$0xff]  ;;  %v10768_v50 = vld [vmem:[#allocation48_spill] sm:$0xff]  ;;  %v10769_v41 = vld [vmem:[#allocation146_spill] sm:$0xff] }
 0x9ff   :  { %v2377_v53 = vadd.f32 %v10765_v29, %v2153_v18  ;;  %v2372_v32 = vadd.f32 %v10766_v30, %v2148_v7  ;;  %v8021_v48 = vadd.f32 %v3186_v60, %v3041_v11  ;;  %v570_v22 = vadd.f32 %v10768_v50, %v346_v36  ;;  %v10771_v27 = vld [vmem:[#allocation313_spill] sm:$0xff]  ;;  %v10773_v52 = vld [vmem:[#allocation8_spill] sm:$0xff]  ;;  %v10775_v3 = vld [vmem:[#allocation74_spill] sm:$0xff] }
 0xa00   :  { %v569_v4 = vadd.f32 %v10767_v61, %v345_v46  ;;  %v3114_v9 = vmul.f32 %v7771_v54, %v10684_v16  ;;  %v3333_v39 = vperm.slane %v7782_v2, 4  ;;  %v1261_v57 = vadd.f32 %v10769_v41, %v1037_v1  ;;  %v10772_v7 = vld [vmem:[#allocation325_spill] sm:$0xff]  ;;  %v10774_v23 = vld [vmem:[#allocation68_spill] sm:$0xff]  ;;  %v10776_v60 = vld [vmem:[#allocation178_spill] sm:$0xff] }
 0xa01   :  { %v1910_v18 = vadd.f32 %v10770_v10, %v1686_v37  ;;  %v2596_v30 = vadd.f32 %v10771_v27, %v2372_v32  ;;  %v2601_v11 = vadd.f32 %v10772_v7, %v2377_v53  ;;  %v112_v49 = vmul.f32 %v7771_v54, %v10773_v52  ;;  %v10777_v31 = vld [vmem:[#allocation240_spill] sm:$0xff]  ;;  %v10779_v50 = vld [vmem:[#allocation95_spill] sm:$0xff]  ;;  %v10782_v27 = vld [vmem:[#allocation274_spill] sm:$0xff] }
 0xa02   :  { %v793_v46 = vadd.f32 %v10774_v23, %v569_v4  ;;  %v794_v36 = vadd.f32 %v10775_v3, %v570_v22  ;;  %v2880_v16 = vmul.f32 %v7747_v6, %v10731_v62  ;;  %3203 = vrot.lane.b32.xlu2 %v3114_v9, %s5649_s20  ;;  %v1485_v1 = vadd.f32 %v10776_v60, %v1261_v57  ;;  %v10778_v32 = vld [vmem:[#allocation16_spill] sm:$0xff]  ;;  %v10780_v4 = vld [vmem:[#allocation103_spill] sm:$0xff]  ;;  %v10784_v7 = vld [vmem:[#allocation38_spill] sm:$0xff] }
 0xa03   :  { %v2134_v37 = vadd.f32 %v10777_v31, %v1910_v18  ;;  %v2820_v29 = vadd.f32 %v7512_v12, %v2596_v30  ;;  %v2825_v53 = vadd.f32 %v7634_v0, %v2601_v11  ;;  %v341_v61 = vadd.f32 %v10778_v32, %v85_v34  ;;  %v2978_v22 = vpop.permute.xlu2 %2977  ;;  %v10781_v9 = vld [vmem:[#allocation207_spill] sm:$0xff]  ;;  %v10783_v0 = vld [vmem:[#allocation36_spill] sm:$0xff]  ;;  %v10785_v23 = vld [vmem:[#allocation129_spill] sm:$0xff] }
 0xa04   :  { %v1018_v41 = vadd.f32 %v10779_v50, %v794_v36  ;;  %v1017_v10 = vadd.f32 %v10780_v4, %v793_v46  ;;  %2959 = vrot.lane.b32.xlu1 %v2880_v16, %s5648_s19  ;;  %3338 = vperm.xlu0 %5414, %v3333_v39   ;;  %v1709_v57 = vadd.f32 %v10781_v9, %v1485_v1  ;;  %v10786_v3 = vld [vmem:[#allocation134_spill] sm:$0xff]  ;;  %v10787_v31 = vld [vmem:[#allocation233_spill] sm:$0xff] }
 0xa05   :  { %v2358_v18 = vadd.f32 %v10782_v27, %v2134_v37  ;;  %v3044_v12 = vadd.f32 %v7664_v47, %v2820_v29  ;;  %v8055_v30 = vadd.f32 %v2978_v22, %v2825_v53  ;;  %v368_v34 = vadd.f32 %v10783_v0, %v112_v49  ;;  %v3192_v16 = vpop.permute.xlu1 %3191  ;;  %v3190_v60 = vpop.permute.xlu0 %3189  ;;  %v10788_v50 = vld [vmem:[#allocation301_spill] sm:$0xff]  ;;  %v10789_v37 = vld [vmem:[#allocation23_spill] sm:$0xff]  ;;  %v10790_v49 = vld [vmem:[#allocation62_spill] sm:$0xff] }
 0xa06   :  { %v565_v11 = vadd.f32 %v10784_v7, %v341_v61  ;;  %v1241_v46 = vadd.f32 %v10785_v23, %v1017_v10  ;;  %v1242_v36 = vadd.f32 %v10786_v3, %v1018_v41  ;;  %v1933_v32 = vadd.f32 %v10787_v31, %v1709_v57  ;;  %v10791_v61 = vld [vmem:[#allocation70_spill] sm:$0xff]  ;;  %v10792_v10 = vld [vmem:[#allocation155_spill] sm:$0xff]  ;;  %v10793_v27 = vld [vmem:[#allocation161_spill] sm:$0xff] }
 0xa07   :  { %v2582_v1 = vadd.f32 %v10788_v50, %v2358_v18  ;;  %v8063_v4 = vadd.f32 %v3192_v16, %v3044_v12  ;;  %v8066_v47 = vadd.f32 %v3190_v60, %v7599_v20  ;;  %v358_v29 = vadd.f32 %v10789_v37, %v102_v51  ;;  %v10794_v0 = vld [vmem:[#allocation265_spill] sm:$0xff]  ;;  %v10795_v12 = vld [vmem:[#allocation327_spill] sm:$0xff]  ;;  %v10799_v60 = vld [vmem:[#allocation182_spill] sm:$0xff] }
 0xa08   :  { %v592_v53 = vadd.f32 %v10790_v49, %v368_v34  ;;  %v789_v22 = vadd.f32 %v10791_v61, %v565_v11  ;;  %v2879_v41 = vmul.f32 %v7703_v40, %v10731_v62  ;;  %v1465_v9 = vadd.f32 %v10792_v10, %v1241_v46  ;;  %v10796_v23 = vld [vmem:[#allocation93_spill] sm:$0xff]  ;;  %v10797_v3 = vld [vmem:[#allocation99_spill] sm:$0xff]  ;;  %v10798_v34 = vld [vmem:[#allocation324_spill] sm:$0xff] }
 0xa09   :  { %v1466_v57 = vadd.f32 %v10793_v27, %v1242_v36  ;;  %v2157_v18 = vadd.f32 %v10794_v0, %v1933_v32  ;;  %v2806_v7 = vadd.f32 %v10795_v12, %v2582_v1  ;;  %v3099_v51 = vmul.f32 %v7703_v40, %v10754_v25  ;;  %v10800_v31 = vld [vmem:[#allocation190_spill] sm:$0xff]  ;;  %v10802_v37 = vld [vmem:[#allocation33_spill] sm:$0xff]  ;;  %v10805_v27 = vld [vmem:[#allocation216_spill] sm:$0xff] }
 0xa0a   :  { %v816_v20 = vadd.f32 %v10796_v23, %v592_v53  ;;  %v1013_v16 = vadd.f32 %v10797_v3, %v789_v22  ;;  %2957 = vrot.lane.b32.xlu2 %v2879_v41, %s5648_s19  ;;  %v3120_v11 = vmul.f32 %v7771_v54, %v10798_v34  ;;  %v1689_v36 = vadd.f32 %v10800_v31, %v1465_v9  ;;  %v10801_v50 = vld [vmem:[#allocation294_spill] sm:$0xff]  ;;  %v10804_v22 = vld [vmem:[#allocation124_spill] sm:$0xff]  ;;  %v10806_v0 = vld [vmem:[#allocation221_spill] sm:$0xff] }
 0xa0b   :  { %v1690_v46 = vadd.f32 %v10799_v60, %v1466_v57  ;;  %v2381_v32 = vadd.f32 %v10801_v50, %v2157_v18  ;;  %v3030_v1 = vadd.f32 %v7656_v38, %v2806_v7  ;;  %v363_v49 = vadd.f32 %v10802_v37, %v7982_v43  ;;  %v10803_v53 = vld [vmem:[#allocation122_spill] sm:$0xff]  ;;  %v3164_v10 = vpop.permute.xlu2 %3163  ;;  %v10807_v38 = vld [vmem:[#allocation57_spill] sm:$0xff] }
 0xa0c   :  { %v1040_v61 = vadd.f32 %v10803_v53, %v816_v20  ;;  %v1237_v41 = vadd.f32 %v10804_v22, %v1013_v16  ;;  %3173 = vrot.lane.b32.xlu1 %v3099_v51, %s5649_s20  ;;  %3215 = vrot.lane.b32.xlu0 %v3120_v11, %s5649_s20  ;;  %v1913_v57 = vadd.f32 %v10805_v27, %v1689_v36  ;;  %v10808_v43 = vld [vmem:[#allocation58_spill] sm:$0xff]  ;;  %v10809_v20 = vld [vmem:[#allocation149_spill] sm:$0xff]  ;;  %v10812_v36 = vld [vmem:[#allocation248_spill] sm:$0xff] }
 0xa0d   :  { %v1914_v9 = vadd.f32 %v10806_v0, %v1690_v46  ;;  %v2605_v18 = vadd.f32 %v7662_v33, %v2381_v32  ;;  %v8097_v12 = vadd.f32 %v3164_v10, %v3030_v1  ;;  %v582_v7 = vadd.f32 %v10807_v38, %v358_v29  ;;  %v2762_v16 = vpop.permute.xlu1 %2761  ;;  %v8102_v60 = vpop.permute.xlu0 %2731  ;;  %v10810_v51 = vld [vmem:[#allocation157_spill] sm:$0xff]  ;;  %v10811_v31 = vld [vmem:[#allocation242_spill] sm:$0xff]  ;;  %v10813_v33 = vld [vmem:[#allocation83_spill] sm:$0xff] }
 0xa0e   :  { %v587_v23 = vadd.f32 %v10808_v43, %v363_v49  ;;  %v1264_v3 = vadd.f32 %v10809_v20, %v1040_v61  ;;  %v1461_v11 = vadd.f32 %v10810_v51, %v1237_v41  ;;  %v2137_v50 = vadd.f32 %v10811_v31, %v1913_v57  ;;  %v10814_v1 = vld [vmem:[#allocation85_spill] sm:$0xff]  ;;  %v10815_v61 = vld [vmem:[#allocation180_spill] sm:$0xff]  ;;  %v10816_v10 = vld [vmem:[#allocation186_spill] sm:$0xff] }
 0xa0f   :  { %v2138_v37 = vadd.f32 %v10812_v36, %v1914_v9  ;;  %v8107_v46 = vadd.f32 %v2762_v16, %v2605_v18  ;;  %v806_v53 = vadd.f32 %v10814_v1, %v582_v7  ;;  %v2895_v29 = vmul.f32 %v7764_v56, %v10731_v62  ;;  %v10817_v41 = vld [vmem:[#allocation269_spill] sm:$0xff]  ;;  %v10819_v9 = vld [vmem:[#allocation106_spill] sm:$0xff]  ;;  %v10820_v43 = vld [vmem:[#allocation119_spill] sm:$0xff] }
 0xa10   :  { %v811_v32 = vadd.f32 %v10813_v33, %v587_v23  ;;  %v3359_v49 = vperm.slane %v7782_v2, 6  ;;  %v1488_v22 = vadd.f32 %v10815_v61, %v1264_v3  ;;  %v1685_v27 = vadd.f32 %v10816_v10, %v1461_v11  ;;  %v10818_v57 = vld [vmem:[#allocation277_spill] sm:$0xff]  ;;  %v10822_v16 = vld [vmem:[#allocation211_spill] sm:$0xff]  ;;  %v10823_v3 = vld [vmem:[#allocation302_spill] sm:$0xff] }
 0xa11   :  { %v2362_v0 = vadd.f32 %v10817_v41, %v2138_v37  ;;  %v2361_v38 = vadd.f32 %v10818_v57, %v2137_v50  ;;  %v1030_v18 = vadd.f32 %v10819_v9, %v806_v53  ;;  %v3116_v7 = vmul.f32 %v7771_v54, %v10754_v25  ;;  %v10821_v62 = vld [vmem:[#allocation209_spill] sm:$0xff]  ;;  %v10824_v11 = vld [vmem:[#allocation307_spill] sm:$0xff]  ;;  %v10826_v50 = vld [vmem:[#allocation144_spill] sm:$0xff] }
 0xa12   :  { %v1035_v20 = vadd.f32 %v10820_v43, %v811_v32  ;;  %2989 = vrot.lane.b32.xlu2 %v2895_v29, %s5648_s19  ;;  %v1712_v23 = vadd.f32 %v10821_v62, %v1488_v22  ;;  %v1909_v51 = vadd.f32 %v10822_v16, %v1685_v27  ;;  %v10825_v37 = vld [vmem:[#allocation145_spill] sm:$0xff]  ;;  %v10827_v53 = vld [vmem:[#allocation236_spill] sm:$0xff]  ;;  %v111_v41 = vmul.f32 %v7764_v56, %v10773_v52 }
 0xa13   :  { %v2585_v31 = vadd.f32 %v10823_v3, %v2361_v38  ;;  %v2586_v36 = vadd.f32 %v10824_v11, %v2362_v0  ;;  %v1254_v1 = vadd.f32 %v10826_v50, %v1030_v18  ;;  %v8132_v32 = vpop.permute.xlu2 %2733  ;;  %v10828_v61 = vld [vmem:[#allocation244_spill] sm:$0xff]  ;;  %v10829_v0 = vld [vmem:[#allocation170_spill] sm:$0xff]  ;;  %v10832_v62 = vld [vmem:[#allocation273_spill] sm:$0xff] }
 0xa14   :  { %v1259_v33 = vadd.f32 %v10825_v37, %v1035_v20  ;;  %3207 = vrot.lane.b32.xlu1 %v3116_v7, %s5649_s20  ;;  %3364 = vperm.xlu0 %5414, %v3359_v49   ;;  %v1936_v29 = vadd.f32 %v10827_v53, %v1712_v23  ;;  %v2133_v22 = vadd.f32 %v10828_v61, %v1909_v51  ;;  %v10830_v38 = vld [vmem:[#allocation172_spill] sm:$0xff]  ;;  %v10831_v20 = vld [vmem:[#allocation267_spill] sm:$0xff] }
 0xa15   :  { %v2810_v10 = vadd.f32 %v7692_v26, %v2586_v36  ;;  %v2809_v27 = vadd.f32 %v7694_v17, %v2585_v31  ;;  %v1478_v9 = vadd.f32 %v10830_v38, %v1254_v1  ;;  %v2948_v18 = vpop.permute.xlu1 %2947  ;;  %v2946_v43 = vpop.permute.xlu0 %2945  ;;  %v10833_v26 = vld [vmem:[#allocation32_spill] sm:$0xff]  ;;  %v3100_v17 = vmul.f32 %v7747_v6, %v10754_v25  ;;  %v10834_v31 = vld [vmem:[#allocation193_spill] sm:$0xff]  ;;  %v10835_v36 = vld [vmem:[#allocation206_spill] sm:$0xff] }
 0xa16   :  { %v1483_v57 = vadd.f32 %v10829_v0, %v1259_v33  ;;  %v2160_v7 = vadd.f32 %v10831_v20, %v1936_v29  ;;  %v2357_v16 = vadd.f32 %v10832_v62, %v2133_v22  ;;  %v367_v3 = vadd.f32 %v10833_v26, %v111_v41  ;;  %v10836_v33 = vld [vmem:[#allocation296_spill] sm:$0xff]  ;;  %v10837_v1 = vld [vmem:[#allocation298_spill] sm:$0xff]  ;;  %v10841_v0 = vld [vmem:[#allocation231_spill] sm:$0xff] }
 0xa17   :  { %v8144_v23 = vadd.f32 %v2948_v18, %v2810_v10  ;;  %v8146_v51 = vadd.f32 %v2946_v43, %v2809_v27  ;;  %v1702_v11 = vadd.f32 %v10834_v31, %v1478_v9  ;;  %v10838_v29 = vld [vmem:[#allocation64_spill] sm:$0xff]  ;;  %v10839_v22 = vld [vmem:[#allocation318_spill] sm:$0xff]  ;;  %v10843_v20 = vld [vmem:[#allocation257_spill] sm:$0xff] }
 0xa18   :  { %v1707_v37 = vadd.f32 %v10835_v36, %v1483_v57  ;;  %v2384_v50 = vadd.f32 %v10836_v33, %v2160_v7  ;;  %v2581_v53 = vadd.f32 %v10837_v1, %v2357_v16  ;;  %v591_v61 = vadd.f32 %v10838_v29, %v367_v3  ;;  %v10840_v27 = vld [vmem:[#allocation232_spill] sm:$0xff]  ;;  %v10844_v62 = vld [vmem:[#allocation259_spill] sm:$0xff]  ;;  %v10847_v1 = vld [vmem:[#allocation293_spill] sm:$0xff] }
 0xa19   :  { %v3101_v10 = vmul.f32 %v7703_v40, %v10839_v22  ;;  %v1926_v38 = vadd.f32 %v10841_v0, %v1702_v11  ;;  %v10842_v57 = vld [vmem:[#allocation92_spill] sm:$0xff] }
 0xa1a   :  { %3175 = vrot.lane.b32.xlu2 %v3100_v17, %s5649_s20  ;;  %v1931_v41 = vadd.f32 %v10840_v27, %v1707_v37  ;;  %v2805_v25 = vadd.f32 %v7538_v63, %v2581_v53  ;;  %v2608_v9 = vadd.f32 %v7838_v14, %v2384_v50  ;;  %v815_v18 = vadd.f32 %v10842_v57, %v591_v61  ;;  %v10845_v17 = vld [vmem:[#allocation115_spill] sm:$0xff]  ;;  %v10846_v33 = vld [vmem:[#allocation280_spill] sm:$0xff]  ;;  %v10848_v61 = vld [vmem:[#allocation21_spill] sm:$0xff] }
 0xa1b   :  { %v2768_v43 = vpop.permute.xlu2 %2767  ;;  %v2150_v16 = vadd.f32 %v10844_v62, %v1926_v38  ;;  %v91_v63 = vmul.f32 %v7703_v40, %v10621_v15  ;;  %v92_v14 = vmul.f32 %v7747_v6, %v10621_v15  ;;  %v3320_v37 = vperm.slane %v7782_v2, 3  ;;  %v10849_v27 = vld [vmem:[#allocation22_spill] sm:$0xff]  ;;  %v10850_v15 = vld [vmem:[#allocation151_spill] sm:$0xff]  ;;  %v10851_v38 = vld [vmem:[#allocation316_spill] sm:$0xff] }
 0xa1c   :  { %5419 = vset.pattern.permute.xlu0 %v7843_v45  ;;  %3177 = vrot.lane.b32.xlu1 %v3101_v10, %s5649_s20  ;;  %v2155_v7 = vadd.f32 %v10843_v20, %v1931_v41  ;;  %v3029_v26 = vadd.f32 %v7735_v28, %v2805_v25  ;;  %v8169_v3 = vadd.f32 %v2768_v43, %v2608_v9  ;;  %v10852_v57 = vld [vmem:[#allocation41_spill] sm:$0xff]  ;;  %v10853_v43 = vld [vmem:[#allocation46_spill] sm:$0xff] }
 0xa1d   :  { %v1039_v31 = vadd.f32 %v10845_v17, %v815_v18  ;;  %v2980_v11 = vpop.permute.xlu0 %2979  ;;  %v3162_v36 = vpop.permute.xlu1 %3161  ;;  %v2374_v50 = vadd.f32 %v10846_v33, %v2150_v16  ;;  %v347_v10 = vadd.f32 %v10848_v61, %v91_v63  ;;  %v348_v41 = vadd.f32 %v10849_v27, %v92_v14  ;;  %v10855_v16 = vld [vmem:[#allocation328_spill] sm:$0xff]  ;;  %v10856_v14 = vld [vmem:[#allocation69_spill] sm:$0xff]  ;;  %v10859_v33 = vld [vmem:[#allocation202_spill] sm:$0xff] }
 0xa1e   :  { %v2379_v53 = vadd.f32 %v10847_v1, %v2155_v7  ;;  %v8180_v28 = vadd.f32 %v2980_v11, %v7740_v13  ;;  %v8182_v29 = vadd.f32 %v3162_v36, %v3029_v26  ;;  %v3117_v13 = vmul.f32 %v7764_v56, %v10839_v22  ;;  %v10854_v7 = vld [vmem:[#allocation179_spill] sm:$0xff]  ;;  %v10860_v1 = vld [vmem:[#allocation28_spill] sm:$0xff] }
 0xa1f   :  { %v1263_v0 = vadd.f32 %v10850_v15, %v1039_v31  ;;  %v2598_v25 = vadd.f32 %v10851_v38, %v2374_v50  ;;  %v571_v18 = vadd.f32 %v10852_v57, %v347_v10  ;;  %v572_v20 = vadd.f32 %v10853_v43, %v348_v41  ;;  %v10857_v31 = vld [vmem:[#allocation76_spill] sm:$0xff]  ;;  %v10863_v41 = vld [vmem:[#allocation105_spill] sm:$0xff]  ;;  %v10864_v38 = vld [vmem:[#allocation238_spill] sm:$0xff] }
 0xa20   :  { %v2603_v9 = vadd.f32 %v7506_v8, %v2379_v53  ;;  %v10858_v8 = vperm.slane %v7782_v2, 0  ;;  %v10862_v10 = vld [vmem:[#allocation104_spill] sm:$0xff]  ;;  %v10866_v43 = vld [vmem:[#allocation127_spill] sm:$0xff] }
 0xa21   :  { %v1487_v62 = vadd.f32 %v10854_v7, %v1263_v0  ;;  %v2822_v26 = vadd.f32 %v10855_v16, %v2598_v25  ;;  %v796_v17 = vadd.f32 %v10856_v14, %v572_v20  ;;  %v795_v11 = vadd.f32 %v10857_v31, %v571_v18  ;;  %v10868_v16 = vld [vmem:[#allocation266_spill] sm:$0xff] }
 0xa22   :  { %3325 = vperm.xlu2 %5416, %v3320_v37   ;;  %v2827_v63 = vadd.f32 %v7886_v59, %v2603_v9  ;;  %v10865_v9 = vld [vmem:[#allocation45_spill] sm:$0xff] }
 0xa23   :  { %v2982_v36 = vpop.permute.xlu2 %2981  ;;  %v1711_v50 = vadd.f32 %v10859_v33, %v1487_v62  ;;  %v3046_v53 = vadd.f32 %v10860_v1, %v2822_v26  ;;  %v1019_v27 = vadd.f32 %v10862_v10, %v795_v11  ;;  %v1020_v59 = vadd.f32 %v10863_v41, %v796_v17  ;;  %v10870_v17 = vld [vmem:[#allocation163_spill] sm:$0xff]  ;;  %v10871_v11 = vld [vmem:[#allocation289_spill] sm:$0xff]  ;;  %v10874_v10 = vld [vmem:[#allocation10_spill] sm:$0xff] }
 0xa24   :  { %3292 = vperm.xlu0 %5419, %v10858_v8   ;;  %3209 = vrot.lane.b32.xlu1 %v3117_v13, %s5649_s20  ;;  %v8203_v61 = vadd.f32 %v2982_v36, %v2827_v63  ;;  %v10867_v13 = vld [vmem:[#allocation132_spill] sm:$0xff]  ;;  %v3102_v62 = vmul.f32 %v7747_v6, %v10839_v22  ;;  %v10872_v36 = vld [vmem:[#allocation191_spill] sm:$0xff] }
 0xa25   :  { %v3194_v15 = vpop.permute.xlu0 %3193  ;;  %v3196_v0 = vpop.permute.xlu1 %3195  ;;  %v1935_v25 = vadd.f32 %v10864_v38, %v1711_v50  ;;  %v1243_v20 = vadd.f32 %v10866_v43, %v1019_v27  ;;  %v1244_v7 = vadd.f32 %v10867_v13, %v1020_v59  ;;  %v10869_v63 = vld [vmem:[#allocation156_spill] sm:$0xff]  ;;  %v10876_v59 = vld [vmem:[#allocation215_spill] sm:$0xff]  ;;  %v10880_v13 = vld [vmem:[#allocation250_spill] sm:$0xff] }
 0xa26   :  { %10861 = vst [vmem:[#allocation94_spill] sm:$0xff] %v8203_v61  ;;  %v8209_v57 = vadd.f32 %v3194_v15, %v10865_v9  ;;  %v8211_v18 = vadd.f32 %v3196_v0, %v3046_v53  ;;  %v10873_v50 = vld [vmem:[#allocation192_spill] sm:$0xff]  ;;  %v10877_v0 = vld [vmem:[#allocation219_spill] sm:$0xff] }
 0xa27   :  { %v2159_v26 = vadd.f32 %v10868_v16, %v1935_v25  ;;  %v1468_v14 = vadd.f32 %v10869_v63, %v1244_v7  ;;  %v1467_v31 = vadd.f32 %v10870_v17, %v1243_v20  ;;  %v10879_v20 = vld [vmem:[#allocation243_spill] sm:$0xff]  ;;  %v3104_v17 = vmul.f32 %v7747_v6, %v10798_v34 }
 0xa29   :  { %v2383_v8 = vadd.f32 %v10871_v11, %v2159_v26  ;;  %v1691_v33 = vadd.f32 %v10872_v36, %v1467_v31  ;;  %v1692_v1 = vadd.f32 %v10873_v50, %v1468_v14  ;;  %v10882_v26 = vld [vmem:[#allocation279_spill] sm:$0xff]  ;;  %v94_v14 = vmul.f32 %v7747_v6, %v10675_v55  ;;  %v10886_v6 = vld [vmem:[#allocation6_spill] sm:$0xff] }
 0xa2a   :  { %3179 = vrot.lane.b32.xlu2 %v3102_v62, %s5649_s20  ;;  %v10219_v62 = vperm.slane %v7782_v2, 7  ;;  %v10883_v31 = vld [vmem:[#allocation303_spill] sm:$0xff] }
 0xa2b   :  { %5418 = vset.pattern.permute.xlu2 %v7843_v45  ;;  %v3168_v53 = vpop.permute.xlu2 %3167  ;;  %v2607_v27 = vadd.f32 %v10874_v10, %v2383_v8  ;;  %v1915_v15 = vadd.f32 %v10876_v59, %v1691_v33  ;;  %v1916_v38 = vadd.f32 %v10877_v0, %v1692_v1  ;;  %v10884_v8 = vld [vmem:[#allocation305_spill] sm:$0xff]  ;;  %v10887_v10 = vld [vmem:[#allocation55_spill] sm:$0xff]  ;;  %v10888_v0 = vld [vmem:[#allocation44_spill] sm:$0xff] }
 0xa2c   :  { %3331 = vperm.xlu0 %5419, %v3320_v37   ;;  %3344 = vperm.xlu1 %5415, %v3333_v39   ;;  %v8229_v41 = vadd.f32 %v3168_v53, %v7933_v5  ;;  %v3118_v39 = vmul.f32 %v7771_v54, %v10839_v22  ;;  %v10881_v5 = vld [vmem:[#allocation278_spill] sm:$0xff]  ;;  %v10885_v22 = vld [vmem:[#allocation24_spill] sm:$0xff] }
 0xa2d   :  { %v8233_v25 = vpop.permute.xlu0 %2735  ;;  %v2766_v9 = vpop.permute.xlu1 %2765  ;;  %v2140_v37 = vadd.f32 %v10879_v20, %v1916_v38  ;;  %v2139_v7 = vadd.f32 %v10880_v13, %v1915_v15  ;;  %v350_v33 = vadd.f32 %v10885_v22, %v94_v14  ;;  %v3119_v22 = vmul.f32 %v7764_v56, %v10798_v34  ;;  %v10901_v56 = vld [vmem:[#allocation217_spill] sm:$0xff] }
 0xa2e   :  { %10875 = vst [vmem:[#allocation176_spill] sm:$0xff] %v8229_v41  ;;  %v8235_v43 = vadd.f32 %v2766_v9, %v2607_v27 }
 0xa2f   :  { %v2363_v16 = vadd.f32 %v10881_v5, %v2139_v7  ;;  %v2364_v63 = vadd.f32 %v10882_v26, %v2140_v37  ;;  %v574_v38 = vadd.f32 %v10888_v0, %v350_v33  ;;  %v3103_v37 = vmul.f32 %v7703_v40, %v10798_v34  ;;  %v10894_v26 = vld [vmem:[#allocation130_spill] sm:$0xff]  ;;  %v10896_v33 = vld [vmem:[#allocation15_spill] sm:$0xff]  ;;  %v10899_v0 = vld [vmem:[#allocation89_spill] sm:$0xff] }
 0xa30   :  { %10878 = vst [vmem:[#allocation31_spill] sm:$0xff] %v8235_v43 }
 0xa31   :  { %v2587_v11 = vadd.f32 %v10883_v31, %v2363_v16  ;;  %v2588_v36 = vadd.f32 %v10884_v8, %v2364_v63  ;;  %v10893_v16 = vmov 3   ;;  %v93_v8 = vmul.f32 %v7703_v40, %v10675_v55  ;;  %v10900_v40 = vld [vmem:[#allocation51_spill] sm:$0xff] }
 0xa32   :  { %3211 = vrot.lane.b32.xlu2 %v3118_v39, %s5649_s20  ;;  %v10892_v39 = vld [vmem:[#allocation107_spill] sm:$0xff] }
 0xa33   :  { %v3287_v54 = vpop.permute.xlu2 %3286  ;;  %v2812_v53 = vadd.f32 %v10886_v6, %v2588_v36  ;;  %v2811_v27 = vadd.f32 %v10887_v10, %v2587_v11  ;;  %v10895_v36 = vld [vmem:[#allocation166_spill] sm:$0xff]  ;;  %v349_v6 = vadd.f32 %v10896_v33, %v93_v8 }
 0xa34   :  { %3383 = vperm.xlu0 %5419, %v10219_v62   ;;  %5417 = vset.pattern.permute.xlu1 %v7623_v58  ;;  %v8257_v50 = vmul.f32 %v3287_v54, %v7978_v19  ;;  %v8260_v1 = vmul.f32 %v3287_v54, %v8021_v48  ;;  %v10891_v19 = vld [vmem:[#allocation79_spill] sm:$0xff]  ;;  %v3346_v48 = vperm.slane %v7782_v2, 5  ;;  %v10904_v8 = vld [vmem:[#allocation98_spill] sm:$0xff] }
 0xa35   :  { %3183 = vrot.lane.b32.xlu1 %v3104_v17, %s5649_s20  ;;  %v2950_v59 = vpop.permute.xlu0 %2949  ;;  %v2952_v15 = vpop.permute.xlu1 %2951  ;;  %v798_v13 = vadd.f32 %v10891_v19, %v574_v38  ;;  %v573_v55 = vadd.f32 %v10900_v40, %v349_v6  ;;  %v10902_v19 = vld [vmem:[#allocation77_spill] sm:$0xff] }
 0xa36   :  { %v8265_v9 = vadd.f32 %v2950_v59, %v2811_v27  ;;  %v8267_v20 = vadd.f32 %v2952_v15, %v2812_v53  ;;  %v8274_v7 = vmul.f32 0.70710677, %v8257_v50  ;;  %v8281_v14 = vmul.f32 0.70710677, %v8260_v1  ;;  %v10897_v53 = vld [vmem:[#allocation194_spill] sm:$0xff] }
 0xa37   :  { %v1022_v5 = vadd.f32 %v10892_v39, %v798_v13  ;;  %v797_v13 = vadd.f32 %v10902_v19, %v573_v55  ;;  %v10903_v39 = vld [vmem:[#allocation253_spill] sm:$0xff] }
 0xa38   :  { %10889 = vst [vmem:[#allocation114_spill] sm:$0xff] %v8265_v9  ;;  %v8284_v17 = vand.u32 2147483647, %v8274_v7  ;;  %v8294_v27 = vand.u32 2147483647, %v8281_v14 }
 0xa39   :  { %10890 = vst [vmem:[#allocation131_spill] sm:$0xff] %v8267_v20  ;;  %v1246_v63 = vadd.f32 %v10894_v26, %v1022_v5 }
 0xa3a   :  { %3181 = vrot.lane.b32.xlu2 %v3103_v37, %s5649_s20  ;;  %v3513_v59 = vmul.f32 0.3275911, %v8284_v17  ;;  %v3529_v26 = vmul.f32 0.3275911, %v8294_v27 }
 0xa3b   :  { %v1470_v54 = vadd.f32 %v10895_v36, %v1246_v63  ;;  %v1021_v36 = vadd.f32 %v10904_v8, %v797_v13 }
 0xa3c   :  { %5424 = vset.pattern.permute.xlu0 %v10893_v16  ;;  %v8316_v63 = vadd.f32 1.0, %v3513_v59  ;;  %v10908_v59 = vld [vmem:[#allocation118_spill] sm:$0xff]  ;;  %v8334_v40 = vadd.f32 1.0, %v3529_v26  ;;  %v10912_v26 = vld [vmem:[#allocation185_spill] sm:$0xff] }
 0xa3d   :  { %3351 = vperm.xlu1 %5417, %v3346_v48   ;;  %v2984_v31 = vpop.permute.xlu0 %2983  ;;  %v3166_v11 = vpop.permute.xlu1 %3165  ;;  %v1694_v10 = vadd.f32 %v10897_v53, %v1470_v54  ;;  %v10905_v54 = vld [vmem:[#allocation281_spill] sm:$0xff]  ;;  %v10907_v53 = vld [vmem:[#allocation306_spill] sm:$0xff] }
 0xa3e   :  { %v8298_v15 = vadd.f32 %v2984_v31, %v7891_v35  ;;  %v8301_v38 = vadd.f32 %v3166_v11, %v10899_v0  ;;  %5435 = vrcp.f32 %v8316_v63  ;;  %vm3582_vm1 = vweird.f32 %v8316_v63 }
 0xa3f   :  { %v1918_v34 = vadd.f32 %v10901_v56, %v1694_v10  ;;  %5437 = vrcp.f32 %v8334_v40  ;;  %vm3822_vm3 = vweird.f32 %v8334_v40 }
 0xa40   :  { %10898 = vst [vmem:[#allocation205_spill] sm:$0xff] %v8298_v15 }
 0xa41   :  { %v2142_v5 = vadd.f32 %v10903_v39, %v1918_v34  ;;  %v10910_v34 = vld [vmem:[#allocation164_spill] sm:$0xff] }
 0xa42   :  { %3213 = vrot.lane.b32.xlu2 %v3119_v22, %s5649_s20  ;;  %s5323_s20 = sshll.u32 %s10195_s7, 4  ;;  %s5324_s20 = int_to_ptr.hbm [resolvable:$true] %s5323_s20 }
 0xa43   :  { %v2366_v22 = vadd.f32 %v10905_v54, %v2142_v5 }
 0xa44   :  { %v3306_v37 = vpop.permute.xlu2 %3305  ;;  %v8360_v54 = vpop.eup %5435 }
 0xa45   :  { %5420 = vset.pattern.permute.xlu1 %v7843_v45  ;;  %v8310_v16 = vmul.f32 %v3306_v37, %v8024_v42  ;;  %v8313_v35 = vmul.f32 %v3306_v37, %v8063_v4  ;;  %v3198_v31 = vpop.permute.xlu0 %3197  ;;  %v3200_v11 = vpop.permute.xlu1 %3199  ;;  %v10906_v4 = vld [vmem:[#allocation137_spill] sm:$0xff]  ;;  %v2590_v10 = vadd.f32 %v10907_v53, %v2366_v22  ;;  %v10914_v22 = vld [vmem:[#allocation224_spill] sm:$0xff]  ;;  %v3578_v53 = vmul.f32 %v8360_v54, %v8316_v63 }
 0xa46   :  { %v8327_v42 = vadd.f32 %v3198_v31, %v7931_v44  ;;  %v1245_v6 = vadd.f32 %v10906_v4, %v1021_v36  ;;  %v8332_v0 = vadd.f32 %v3200_v11, %v10908_v59  ;;  %v10916_v59 = vld [vmem:[#allocation272_spill] sm:$0xff]  ;;  %vm3583_vm0 = vweird.f32 %v8360_v54 }
 0xa47   :  { %v8321_v33 = vmul.f32 0.70710677, %v8310_v16  ;;  %v8324_v45 = vmul.f32 0.70710677, %v8313_v35  ;;  %v2814_v44 = vadd.f32 %v8102_v60, %v2590_v10  ;;  %v8369_v10 = vpop.eup %5437  ;;  %vm8444_vm2 = vmor %vm3582_vm1, %vm3583_vm0 }
 0xa48   :  { %10909 = vst [vmem:[#allocation56_spill] sm:$0xff] %v8332_v0  ;;  %v1469_v37 = vadd.f32 %v10910_v34, %v1245_v6  ;;  %v10917_v34 = vld [vmem:[#allocation71_spill] sm:$0xff]  ;;  %vm3823_vm4 = vweird.f32 %v8369_v10 }
 0xa49   :  { %v8338_v55 = vand.u32 2147483647, %v8321_v33  ;;  %v8341_v56 = vand.u32 2147483647, %v8324_v45  ;;  %vm8468_vm8 = vmor %vm3822_vm3, %vm3823_vm4 }
 0xa4a   :  { %3357 = vperm.xlu2 %5418, %v3346_v48   ;;  %v1693_v31 = vadd.f32 %v10912_v26, %v1469_v37  ;;  %v10919_v26 = vld [vmem:[#allocation310_spill] sm:$0xff] }
 0xa4b   :  { %v3516_v19 = vmul.f32 0.3275911, %v8338_v55  ;;  %v3532_v13 = vmul.f32 0.3275911, %v8341_v56 }
 0xa4c   :  { %v2956_v39 = vpop.permute.xlu2 %2955  ;;  %v1917_v4 = vadd.f32 %v10914_v22, %v1693_v31 }
 0xa4d   :  { %3370 = vperm.xlu1 %5420, %v3359_v49   ;;  %v8349_v5 = vadd.f32 %v2956_v39, %v2814_v44  ;;  %v8353_v11 = vadd.f32 1.0, %v3516_v19  ;;  %v8355_v48 = vadd.f32 1.0, %v3532_v13  ;;  %v2986_v60 = vpop.permute.xlu0 %2985  ;;  %v3300_v8 = vpop.permute.xlu1 %3299  ;;  %v10915_v49 = vld [vmem:[#allocation251_spill] sm:$0xff]  ;;  %v10918_v13 = vmov 1  }
 0xa4e   :  { %v8358_v36 = vadd.f32 %v2986_v60, %v8107_v46  ;;  %v2141_v6 = vadd.f32 %v10915_v49, %v1917_v4  ;;  %v8373_v37 = vmul.f32 %v3300_v8, %v10917_v34  ;;  %v8376_v19 = vmul.f32 %v3300_v8, %v8066_v47  ;;  %v5593_v47 = vld [vmem:[%s10188_s0 + $0x8] sm:$0xff] }
 0xa4f   :  { %10911 = vst [vmem:[#allocation141_spill] sm:$0xff] %v8349_v5  ;;  %5439 = vrcp.f32 %v8353_v11  ;;  %v3579_v4 = vsub.f32 1.0, %v3578_v53  ;;  %v3818_v49 = vmul.f32 %v8369_v10, %v8334_v40  ;;  %v96_v8 = vmul.f32 %v5593_v47, %v10773_v52  ;;  %v5594_v47 = vld [vmem:[%s10188_s0] sm:$0xff] }
 0xa50   :  { %10913 = vst [vmem:[#allocation158_spill] sm:$0xff] %v8358_v36  ;;  %5441 = vrcp.f32 %v8355_v48  ;;  %v2365_v46 = vadd.f32 %v10916_v59, %v2141_v6  ;;  %v8399_v53 = vmul.f32 0.70710677, %v8373_v37  ;;  %vm3627_vm9 = vweird.f32 %v8353_v11 }
 0xa51   :  { %v3580_v15 = vmul.f32 %v8360_v54, %v3579_v4  ;;  %v3819_v5 = vsub.f32 1.0, %v3818_v49  ;;  %v10927_v4 = vld [vmem:[#allocation80_spill] sm:$0xff]  ;;  %vm3867_vm11 = vweird.f32 %v8355_v48 }
 0xa52   :  { %5421 = vset.pattern.permute.xlu2 %v7623_v58  ;;  %v2589_v31 = vadd.f32 %v10919_v26, %v2365_v46  ;;  %v10923_v58 = vperm.slane %v7782_v2, 7  ;;  %v8418_v9 = vand.u32 2147483647, %v8399_v53 }
 0xa53   :  { %v3820_v41 = vmul.f32 %v8369_v10, %v3819_v5 }
 0xa54   :  { %v3170_v44 = vpop.permute.xlu2 %3169  ;;  %v2813_v34 = vadd.f32 %v7961_v21, %v2589_v31  ;;  %v95_v21 = vmul.f32 %v5594_v47, %v10773_v52  ;;  %v10925_v52 = vld [vmem:[#allocation53_spill] sm:$0xff] }
 0xa55   :  { %5422 = vset.pattern.permute.xlu1 %v10918_v13  ;;  %v8379_v39 = vpop.eup %5439  ;;  %v8383_v60 = vadd.f32 %v3170_v44, %v8146_v51  ;;  %v2954_v6 = vpop.permute.xlu1 %2953  ;;  %v8402_v44 = vmul.f32 0.70710677, %v8376_v19  ;;  %v10920_v13 = vld [vmem:[#allocation18_spill] sm:$0xff] }
 0xa56   :  { %v8385_v22 = vpop.eup %5441  ;;  %v3172_v59 = vpop.permute.xlu0 %3171  ;;  %v3623_v51 = vmul.f32 %v8379_v39, %v8353_v11  ;;  %v352_v26 = vadd.f32 %v10920_v13, %v96_v8  ;;  %v8409_v31 = vadd.f32 %v2954_v6, %v2813_v34  ;;  %v10924_v13 = vld [vmem:[#allocation25_spill] sm:$0xff]  ;;  %vm3628_vm5 = vweird.f32 %v8379_v39 }
 0xa57   :  { %v3863_v46 = vmul.f32 %v8385_v22, %v8355_v48  ;;  %v8412_v62 = vadd.f32 %v3172_v59, %v8144_v23  ;;  %v8421_v8 = vand.u32 2147483647, %v8402_v44  ;;  %v351_v0 = vadd.f32 %v10924_v13, %v95_v21  ;;  %v10928_v21 = vld [vmem:[#allocation72_spill] sm:$0xff]  ;;  %vm8478_vm10 = vmor %vm3627_vm9, %vm3628_vm5 }
 0xa58   :  { %10921 = vst [vmem:[#allocation230_spill] sm:$0xff] %v8409_v31  ;;  %v576_v6 = vadd.f32 %v10925_v52, %v352_v26  ;;  %v3624_v34 = vsub.f32 1.0, %v3623_v51  ;;  %v3515_v23 = vmul.f32 0.3275911, %v8418_v9  ;;  %v10929_v51 = vld [vmem:[#allocation101_spill] sm:$0xff]  ;;  %v3588_v13 = vand.u32 2147483648, %v8316_v63 }
 0xa59   :  { %10922 = vst [vmem:[#allocation81_spill] sm:$0xff] %v8412_v62  ;;  %v3864_v47 = vsub.f32 1.0, %v3863_v46  ;;  %v3531_v2 = vmul.f32 0.3275911, %v8421_v8  ;;  %v3581_v62 = vadd.f32 %v8360_v54, %v3580_v15  ;;  %vm3868_vm7 = vweird.f32 %v8385_v22 }
 0xa5a   :  { %3377 = vperm.xlu2 %5421, %v10923_v58   ;;  %v10926_v58 = vld [vmem:[#allocation49_spill] sm:$0xff]  ;;  %v800_v49 = vadd.f32 %v10927_v4, %v576_v6  ;;  %v8432_v36 = vadd.f32 1.0, %v3515_v23  ;;  %v3625_v52 = vmul.f32 %v8379_v39, %v3624_v34  ;;  %v10933_v34 = vmov 2   ;;  %v10939_v23 = vld [vmem:[#allocation140_spill] sm:$0xff]  ;;  %vm8491_vm12 = vmor %vm3867_vm11, %vm3868_vm7 }
 0xa5b   :  { %v575_v59 = vadd.f32 %v10926_v58, %v351_v0  ;;  %v3586_v0 = vand.u32 2147483647, %v8316_v63  ;;  %v3865_v15 = vmul.f32 %v8385_v22, %v3864_v47  ;;  %v8441_v6 = vadd.f32 1.0, %v3531_v2  ;;  %v10930_v58 = vld [vmem:[#allocation108_spill] sm:$0xff] }
 0xa5c   :  { %v1024_v46 = vadd.f32 %v10929_v51, %v800_v49  ;;  %5443 = vrcp.f32 %v8432_v36  ;;  %v3585_v63 = vsel %vm8444_vm2, %v8360_v54, %v3581_v62  ;;  %v3821_v47 = vadd.f32 %v8369_v10, %v3820_v41 }
 0xa5d   :  { %v799_v26 = vadd.f32 %v10928_v21, %v575_v59  ;;  %v3826_v59 = vand.u32 2147483647, %v8334_v40  ;;  %v3828_v2 = vand.u32 2147483648, %v8334_v40  ;;  %v3589_v4 = vor.u32 1.1754944e-38, %v3588_v13 }
 0xa5e   :  { %v3626_v49 = vadd.f32 %v8379_v39, %v3625_v52  ;;  %5445 = vrcp.f32 %v8441_v6  ;;  %vm3587_vm6 = vcmp.eq.f32.partialorder %v3586_v0, 8.507059e+37  ;;  %v3633_v21 = vand.u32 2147483648, %v8353_v11 }
 0xa5f   :  { %v1023_v5 = vadd.f32 %v10930_v58, %v799_v26  ;;  %v3866_v26 = vadd.f32 %v8385_v22, %v3865_v15  ;;  %v8464_v62 = vsel %vm3587_vm6, %v3589_v4, %v3585_v63  ;;  %v3631_v54 = vand.u32 2147483647, %v8353_v11  ;;  %v10938_v15 = vld [vmem:[#allocation135_spill] sm:$0xff] }
 0xa60   :  { %v3873_v51 = vand.u32 2147483648, %v8355_v48  ;;  %v3825_v13 = vsel %vm8468_vm8, %v8369_v10, %v3821_v47  ;;  %v3871_v40 = vand.u32 2147483647, %v8355_v48  ;;  %v3829_v11 = vor.u32 1.1754944e-38, %v3828_v2 }
 0xa61   :  { %v1247_v58 = vadd.f32 %v10938_v15, %v1023_v5  ;;  %v3630_v63 = vsel %vm8478_vm10, %v8379_v39, %v3626_v49  ;;  %vm3827_vm13 = vcmp.eq.f32.partialorder %v3826_v59, 8.507059e+37  ;;  %v4057_v47 = vmul.f32 1.0614054, %v8464_v62  ;;  %v10942_v59 = vld [vmem:[#allocation159_spill] sm:$0xff] }
 0xa62   :  { %5423 = vset.pattern.permute.xlu2 %v10933_v34  ;;  %v5444_v0 = vpop.eup %5443  ;;  %v1248_v34 = vadd.f32 %v10939_v23, %v1024_v46  ;;  %v3634_v48 = vor.u32 1.1754944e-38, %v3633_v21  ;;  %v3870_v5 = vsel %vm8491_vm12, %v8385_v22, %v3866_v26  ;;  %v8499_v2 = vsel %vm3827_vm13, %v3829_v11, %v3825_v13  ;;  %v10943_v15 = vld [vmem:[#allocation167_spill] sm:$0xff]  ;;  %v3204_v13 = vpop.permute.xlu2 %3203 }
 0xa63   :  { %vm3632_vm14 = vcmp.eq.f32.partialorder %v3631_v54, 8.507059e+37  ;;  %v3874_v4 = vor.u32 1.1754944e-38, %v3873_v51  ;;  %v3608_v39 = vmul.f32 %v5444_v0, %v8432_v36  ;;  %vm3872_vm15 = vcmp.eq.f32.partialorder %v3871_v40, 8.507059e+37 }
 0xa64   :  { %v5446_v46 = vpop.eup %5445  ;;  %v8502_v49 = vsel %vm3632_vm14, %v3634_v48, %v3630_v63  ;;  %v1471_v52 = vadd.f32 %v10942_v59, %v1247_v58  ;;  %v1472_v21 = vadd.f32 %v10943_v15, %v1248_v34  ;;  %v4073_v22 = vmul.f32 1.0614054, %v8499_v2  ;;  %v2988_v48 = vpop.permute.xlu1 %2987 }
 0xa65   :  { %v3848_v41 = vmul.f32 %v5446_v46, %v8441_v6  ;;  %v8507_v23 = vsel %vm3872_vm15, %v3874_v4, %v3870_v5  ;;  %v3609_v10 = vsub.f32 1.0, %v3608_v39  ;;  %v4089_v26 = vadd.f32 -1.4531521, %v4057_v47  ;;  %v3313_v4 = vpop.permute.xlu0 %3312 }
 0xa66   :  { %v3618_v54 = vand.u32 2147483648, %v8432_v36  ;;  %v4060_v11 = vmul.f32 1.0614054, %v8502_v49  ;;  %vm3613_vm0 = vweird.f32 %v5444_v0  ;;  %v3616_v40 = vand.u32 2147483647, %v8432_v36 }
 0xa67   :  { %v3849_v51 = vsub.f32 1.0, %v3848_v41  ;;  %v3610_v63 = vmul.f32 %v5444_v0, %v3609_v10  ;;  %v4076_v58 = vmul.f32 1.0614054, %v8507_v23  ;;  %vm3853_vm1 = vweird.f32 %v5446_v46 }
 0xa68   :  { %v3858_v5 = vand.u32 2147483648, %v8441_v6  ;;  %vm3612_vm2 = vweird.f32 %v8432_v36  ;;  %v3856_v47 = vand.u32 2147483647, %v8441_v6  ;;  %v8518_v41 = vadd.f32 %v3204_v13, %v8180_v28 }
 0xa69   :  { %v3850_v34 = vmul.f32 %v5446_v46, %v3849_v51  ;;  %v3611_v39 = vadd.f32 %v5444_v0, %v3610_v63  ;;  %vm3614_vm3 = vmor %vm3612_vm2, %vm3613_vm0  ;;  %v3619_v59 = vor.u32 1.1754944e-38, %v3618_v54  ;;  %vm3852_vm4 = vweird.f32 %v8441_v6  ;;  %v10946_v6 = vld [vmem:[#allocation195_spill] sm:$0xff] }
 0xa6a   :  { %10944 = vst [vmem:[#allocation165_spill] sm:$0xff] %v8518_v41  ;;  %v8522_v10 = vadd.f32 %v2988_v48, %v8013_v24  ;;  %v4105_v51 = vadd.f32 -1.4531521, %v4073_v22  ;;  %vm3617_vm5 = vcmp.eq.f32.partialorder %v3616_v40, 8.507059e+37  ;;  %vm3854_vm6 = vmor %vm3852_vm4, %vm3853_vm1  ;;  %v8526_v36 = vmul.f32 %v3313_v4, %v8182_v29  ;;  %v10949_v48 = vld [vmem:[#allocation222_spill] sm:$0xff] }
 0xa6b   :  { %v3851_v15 = vadd.f32 %v5446_v46, %v3850_v34  ;;  %v3615_v20 = vsel %vm3614_vm3, %v5444_v0, %v3611_v39  ;;  %v4092_v63 = vadd.f32 -1.4531521, %v4060_v11  ;;  %v3859_v13 = vor.u32 1.1754944e-38, %v3858_v5 }
 0xa6c   :  { %10945 = vst [vmem:[#allocation181_spill] sm:$0xff] %v8522_v10  ;;  %v8528_v61 = vsel %vm3617_vm5, %v3619_v59, %v3615_v20  ;;  %v4121_v54 = vmul.f32 %v4089_v26, %v8464_v62  ;;  %v4108_v34 = vadd.f32 -1.4531521, %v4076_v58  ;;  %vm3857_vm7 = vcmp.eq.f32.partialorder %v3856_v47, 8.507059e+37  ;;  %v10948_v26 = vld [vmem:[#allocation188_spill] sm:$0xff]  ;;  %v3202_v59 = vpop.permute.xlu1 %3201 }
 0xa6d   :  { %v3855_v28 = vsel %vm3854_vm6, %v5446_v46, %v3851_v15  ;;  %v8532_v24 = vmul.f32 %v3313_v4, %v8209_v57  ;;  %v1695_v0 = vadd.f32 %v10946_v6, %v1471_v52  ;;  %v4059_v40 = vmul.f32 1.0614054, %v8528_v61  ;;  %v10950_v15 = vld [vmem:[#allocation246_spill] sm:$0xff] }
 0xa6e   :  { %v8535_v22 = vsel %vm3857_vm7, %v3859_v13, %v3855_v28  ;;  %v8539_v29 = vmul.f32 0.70710677, %v8526_v36  ;;  %v4137_v20 = vmul.f32 %v4105_v51, %v8499_v2  ;;  %v1696_v11 = vadd.f32 %v10948_v26, %v1472_v21  ;;  %v10952_v26 = vld [vmem:[#allocation282_spill] sm:$0xff] }
 0xa6f   :  { %v8543_v46 = vmul.f32 0.70710677, %v8532_v24  ;;  %v1919_v58 = vadd.f32 %v10949_v48, %v1695_v0  ;;  %v4124_v57 = vmul.f32 %v4092_v63, %v8502_v49  ;;  %v4153_v5 = vadd.f32 1.4214138, %v4121_v54  ;;  %v10951_v0 = vld [vmem:[#allocation226_spill] sm:$0xff] }
 0xa70   :  { %v8549_v52 = vand.u32 2147483647, %v8539_v29  ;;  %v4140_v4 = vmul.f32 %v4108_v34, %v8507_v23  ;;  %v4075_v39 = vmul.f32 1.0614054, %v8535_v22  ;;  %v4345_v21 = vsub.f32 0.0, %v8284_v17 }
 0xa71   :  { %10947 = vst [vmem:[#allocation263_spill] sm:$0xff] %v8543_v46  ;;  %v8554_v47 = vand.u32 2147483647, %v8543_v46  ;;  %v2143_v51 = vadd.f32 %v10950_v15, %v1919_v58  ;;  %v4091_v28 = vadd.f32 -1.4531521, %v4059_v40  ;;  %v1920_v54 = vadd.f32 %v10951_v0, %v1696_v11  ;;  %v10953_v11 = vld [vmem:[#allocation308_spill] sm:$0xff] }
 0xa72   :  { %v3517_v13 = vmul.f32 0.3275911, %v8549_v52  ;;  %v4169_v63 = vadd.f32 1.4214138, %v4137_v20  ;;  %v4156_v48 = vadd.f32 1.4214138, %v4124_v57  ;;  %v4185_v10 = vmul.f32 %v4153_v5, %v8464_v62 }
 0xa73   :  { %v3533_v6 = vmul.f32 0.3275911, %v8554_v47  ;;  %v2367_v34 = vadd.f32 %v10952_v26, %v2143_v51  ;;  %v4361_v31 = vsub.f32 0.0, %v8294_v27  ;;  %v4172_v58 = vadd.f32 1.4214138, %v4140_v4 }
 0xa74   :  { %v8562_v41 = vadd.f32 1.0, %v3517_v13  ;;  %v4107_v15 = vadd.f32 -1.4531521, %v4075_v39  ;;  %v4377_v40 = vmul.f32 %v4345_v21, %v8284_v17  ;;  %v4123_v46 = vmul.f32 %v4091_v28, %v8528_v61  ;;  %v10954_v13 = vld [vmem:[#allocation254_spill] sm:$0xff]  ;;  %v2958_v39 = vpop.permute.xlu2 %2957 }
 0xa75   :  { %v8568_v20 = vadd.f32 1.0, %v3533_v6  ;;  %v2591_v0 = vadd.f32 %v10953_v11, %v2367_v34  ;;  %v4201_v57 = vmul.f32 %v4169_v63, %v8499_v2  ;;  %v4348_v51 = vsub.f32 0.0, %v8338_v55 }
 0xa76   :  { %5447 = vrcp.f32 %v8562_v41  ;;  %v2144_v5 = vadd.f32 %v10954_v13, %v1920_v54  ;;  %v4188_v26 = vmul.f32 %v4156_v48, %v8502_v49  ;;  %v4364_v4 = vsub.f32 0.0, %v8341_v56 }
 0xa77   :  { %v2815_v17 = vadd.f32 %v8132_v32, %v2591_v0  ;;  %v4217_v21 = vadd.f32 -0.28449672, %v4185_v10  ;;  %v4204_v28 = vmul.f32 %v4172_v58, %v8507_v23  ;;  %v4139_v6 = vmul.f32 %v4107_v15, %v8535_v22  ;;  %v3319_v32 = vpop.permute.xlu1 %3318  ;;  %v10956_v58 = vld [vmem:[#allocation275_spill] sm:$0xff] }
 0xa78   :  { %v4393_v34 = vmul.f32 %v4361_v31, %v8294_v27  ;;  %v4409_v11 = vmul.f32 1.442695, %v4377_v40  ;;  %v4155_v63 = vadd.f32 1.4214138, %v4123_v46  ;;  %5449 = vrcp.f32 %v8568_v20 }
 0xa79   :  { %v4233_v43 = vadd.f32 -0.28449672, %v4201_v57  ;;  %v4380_v54 = vmul.f32 %v4348_v51, %v8338_v55  ;;  %v8583_v48 = vadd.f32 %v2958_v39, %v2815_v17  ;;  %v8586_v13 = vadd.f32 %v3202_v59, %v8055_v30 }
 0xa7a   :  { %v8591_v0 = vadd.f32 %v10956_v58, %v2144_v5  ;;  %v8594_v27 = vmul.f32 0.5, %v8257_v50  ;;  %v4220_v31 = vadd.f32 -0.28449672, %v4188_v26  ;;  %v4396_v46 = vmul.f32 %v4364_v4, %v8341_v56 }
 0xa7b   :  { %10955 = vst [vmem:[#allocation14_spill] sm:$0xff] %v8583_v48  ;;  %v4249_v15 = vmul.f32 %v4217_v21, %v8464_v62  ;;  %v4236_v55 = vadd.f32 -0.28449672, %v4204_v28  ;;  %v4171_v40 = vadd.f32 1.4214138, %v4139_v6  ;;  %v4187_v57 = vmul.f32 %v4155_v63, %v8528_v61 }
 0xa7c   :  { %v8588_v10 = vpop.eup %5447  ;;  %v4441_v59 = vmul.f32 1.442695, %v4393_v34  ;;  %v4347_v51 = vsub.f32 0.0, %v8418_v9  ;;  %v8603_v5 = vmul.f32 %v3319_v32, %v8097_v12  ;;  %v4265_v50 = vmul.f32 %v4233_v43, %v8499_v2 }
 0xa7d   :  { %v3638_v30 = vmul.f32 %v8588_v10, %v8562_v41  ;;  %5451 = vpow2.f32 %v4409_v11  ;;  %v4415_v26 = vmul.f32 1.442695, %v4380_v54  ;;  %v4252_v39 = vmul.f32 %v4220_v31, %v8502_v49  ;;  %v8618_v11 = vpop.permute.xlu0 %2991 }
 0xa7e   :  { %v8606_v4 = vpop.eup %5449  ;;  %v4447_v17 = vmul.f32 1.442695, %v4396_v46  ;;  %v8610_v21 = vmul.f32 %v3319_v32, %v8211_v18  ;;  %v8613_v28 = vmul.f32 0.70710677, %v8603_v5  ;;  %v4281_v6 = vadd.f32 0.2548296, %v4249_v15 }
 0xa7f   :  { %v3639_v56 = vsub.f32 1.0, %v3638_v30  ;;  %v4268_v12 = vmul.f32 %v4236_v55, %v8507_v23  ;;  %v4203_v34 = vmul.f32 %v4171_v40, %v8535_v22  ;;  %v4363_v43 = vsub.f32 0.0, %v8421_v8 }
 0xa80   :  { %10957 = vst [vmem:[#allocation117_spill] sm:$0xff] %v8613_v28  ;;  %v4219_v63 = vadd.f32 -0.28449672, %v4187_v57  ;;  %v4379_v54 = vmul.f32 %v4347_v51, %v8418_v9  ;;  %v8622_v58 = vmul.f32 0.70710677, %v8610_v21  ;;  %5453 = vpow2.f32 %v4441_v59 }
 0xa81   :  { %v8625_v18 = vand.u32 2147483647, %v8613_v28  ;;  %v4297_v32 = vadd.f32 0.2548296, %v4265_v50  ;;  %v3640_v31 = vmul.f32 %v8588_v10, %v3639_v56  ;;  %v3878_v46 = vmul.f32 %v8606_v4, %v8568_v20 }
 0xa82   :  { %10958 = vst [vmem:[#allocation201_spill] sm:$0xff] %v8622_v58  ;;  %v4284_v15 = vadd.f32 0.2548296, %v4252_v39  ;;  %5455 = vpow2.f32 %v4415_v26  ;;  %v8631_v55 = vand.u32 2147483647, %v8622_v58  ;;  %v4313_v30 = vmul.f32 %v4281_v6, %v8464_v62 }
 0xa83   :  { %v3518_v9 = vmul.f32 0.3275911, %v8625_v18  ;;  %v5452_v40 = vpop.eup %5451  ;;  %5457 = vpow2.f32 %v4447_v17  ;;  %v4235_v57 = vadd.f32 -0.28449672, %v4203_v34  ;;  %v4395_v51 = vmul.f32 %v4363_v43, %v8421_v8 }
 0xa84   :  { %v4300_v59 = vadd.f32 0.2548296, %v4268_v12  ;;  %v4251_v50 = vmul.f32 %v4219_v63, %v8528_v61  ;;  %v4413_v56 = vmul.f32 1.442695, %v4379_v54  ;;  %v3534_v48 = vmul.f32 0.3275911, %v8631_v55 }
 0xa85   :  { %v3641_v26 = vadd.f32 %v8588_v10, %v3640_v31  ;;  %vm3643_vm8 = vweird.f32 %v8588_v10  ;;  %v3879_v39 = vsub.f32 1.0, %v3878_v46  ;;  %v8640_v58 = vadd.f32 1.0, %v3518_v9 }
 0xa86   :  { %v4329_v28 = vmul.f32 %v4297_v32, %v8499_v2  ;;  %v4316_v62 = vmul.f32 %v4284_v15, %v8502_v49  ;;  %v3648_v17 = vand.u32 2147483648, %v8562_v41  ;;  %v8645_v8 = vadd.f32 1.0, %v3534_v48  ;;  %v5454_v6 = vpop.eup %5453 }
 0xa87   :  { %v4267_v12 = vmul.f32 %v4235_v57, %v8535_v22  ;;  %vm3642_vm9 = vweird.f32 %v8562_v41  ;;  %v3646_v34 = vand.u32 2147483647, %v8562_v41  ;;  %5459 = vrcp.f32 %v8640_v58 }
 0xa88   :  { %v5456_v43 = vpop.eup %5455  ;;  %v8652_v63 = vmul.f32 0.5, %v8310_v16  ;;  %v4332_v2 = vmul.f32 %v4300_v59, %v8507_v23  ;;  %v4283_v49 = vadd.f32 0.2548296, %v4251_v50  ;;  %v4445_v54 = vmul.f32 1.442695, %v4395_v51  ;;  %vm8657_vm10 = vmor %vm3642_vm9, %vm3643_vm8  ;;  %v8665_v16 = vpop.permute.xlu0 %3205 }
 0xa89   :  { %v5458_v32 = vpop.eup %5457  ;;  %5461 = vpow2.f32 %v4413_v56  ;;  %v3645_v41 = vsel %vm8657_vm10, %v8588_v10, %v3641_v26  ;;  %v3880_v31 = vmul.f32 %v8606_v4, %v3879_v39  ;;  %v8667_v46 = vmul.f32 %v5452_v40, %v4313_v30 }
 0xa8a   :  { %v8669_v23 = vmul.f32 %v5456_v43, %v4316_v62  ;;  %v3649_v15 = vor.u32 1.1754944e-38, %v3648_v17  ;;  %5463 = vrcp.f32 %v8645_v8  ;;  %v8672_v9 = vmul.f32 %v5454_v6, %v4329_v28 }
 0xa8b   :  { %v8675_v57 = vmul.f32 0.5, %v8313_v35  ;;  %v4299_v51 = vadd.f32 0.2548296, %v4267_v12  ;;  %vm3647_vm11 = vcmp.eq.f32.partialorder %v3646_v34, 8.507059e+37  ;;  %v8677_v59 = vmul.f32 %v5458_v32, %v4332_v2 }
 0xa8c   :  { %v4315_v10 = vmul.f32 %v4283_v49, %v8528_v61  ;;  %5465 = vpow2.f32 %v4445_v54  ;;  %v8680_v50 = vsel %vm3647_vm11, %v3649_v15, %v3645_v41  ;;  %v5650_v30 = vmov 16.0  }
 0xa8d   :  { %v5460_v40 = vpop.eup %5459  ;;  %5467 = vrcp.f32 %v5650_v30  ;;  %v8683_v56 = vmul.f32 0.5, %v8373_v37  ;;  %v3881_v28 = vadd.f32 %v8606_v4, %v3880_v31  ;;  %vm3883_vm12 = vweird.f32 %v8606_v4 }
 0xa8e   :  { %v4508_v26 = vsub.f32 1.0, %v8669_v23  ;;  %v3888_v39 = vand.u32 2147483648, %v8568_v20  ;;  %v3653_v61 = vmul.f32 %v5460_v40, %v8640_v58  ;;  %v4331_v17 = vmul.f32 %v4299_v51, %v8535_v22  ;;  %v8706_v22 = vpop.permute.xlu2 %2989 }
 0xa8f   :  { %v5462_v62 = vpop.eup %5461  ;;  %vm3882_vm13 = vweird.f32 %v8568_v20  ;;  %v3886_v37 = vand.u32 2147483647, %v8568_v20  ;;  %v4061_v6 = vmul.f32 1.0614054, %v8680_v50  ;;  %v4524_v43 = vsub.f32 1.0, %v8677_v59 }
 0xa90   :  { %v5464_v12 = vpop.eup %5463  ;;  %vm4540_vm14 = vcmp.ge.f32.partialorder %v8321_v33, 0.0  ;;  %v8698_v2 = vmul.f32 %v5462_v62, %v4315_v10  ;;  %vm8702_vm15 = vmor %vm3882_vm13, %vm3883_vm12  ;;  %v3654_v20 = vsub.f32 1.0, %v3653_v61  ;;  %v3661_v48 = vand.u32 2147483647, %v8640_v58  ;;  %v3339_v34 = vpop.permute.xlu0 %3338 }
 0xa91   :  { %v3885_v54 = vsel %vm8702_vm15, %v8606_v4, %v3881_v28  ;;  %v3663_v32 = vand.u32 2147483648, %v8640_v58  ;;  %v3893_v41 = vmul.f32 %v5464_v12, %v8645_v8  ;;  %v4572_v23 = vsub.f32 0.0, %v4508_v26 }
 0xa92   :  { %v5466_v31 = vpop.eup %5465  ;;  %v3889_v15 = vor.u32 1.1754944e-38, %v3888_v39  ;;  %v3655_v51 = vmul.f32 %v5460_v40, %v3654_v20  ;;  %vm3658_vm0 = vweird.f32 %v5460_v40  ;;  %vm3887_vm1 = vcmp.eq.f32.partialorder %v3886_v37, 8.507059e+37 }
 0xa93   :  { %v8714_v10 = vpop.eup %5467  ;;  %v4491_v30 = vmul.f32 %v5466_v31, %v4331_v17  ;;  %v4093_v61 = vadd.f32 -1.4531521, %v4061_v6  ;;  %v3894_v62 = vsub.f32 1.0, %v3893_v41  ;;  %v4507_v4 = vsub.f32 1.0, %v8698_v2 }
 0xa94   :  { %v8717_v28 = vsel %vm3887_vm1, %v3889_v15, %v3885_v54  ;;  %v3656_v49 = vadd.f32 %v5460_v40, %v3655_v51  ;;  %vm3657_vm2 = vweird.f32 %v8640_v58  ;;  %vm3662_vm4 = vcmp.eq.f32.partialorder %v3661_v48, 8.507059e+37 }
 0xa95   :  { %vm3659_vm3 = vmor %vm3657_vm2, %vm3658_vm0  ;;  %v3664_v35 = vor.u32 1.1754944e-38, %v3663_v32  ;;  %v3895_v39 = vmul.f32 %v5464_v12, %v3894_v62  ;;  %v3903_v20 = vand.u32 2147483648, %v8645_v8  ;;  %vm4556_vm5 = vcmp.ge.f32.partialorder %v8324_v45, 0.0 }
 0xa96   :  { %v3660_v17 = vsel %vm3659_vm3, %v5460_v40, %v3656_v49  ;;  %vm3898_vm6 = vweird.f32 %v5464_v12  ;;  %v3901_v37 = vand.u32 2147483647, %v8645_v8  ;;  %v8724_v6 = vmul.f32 %v3339_v34, %v8383_v60 }
 0xa97   :  { %v4523_v2 = vsub.f32 1.0, %v4491_v30  ;;  %v4077_v54 = vmul.f32 1.0614054, %v8717_v28  ;;  %v4125_v58 = vmul.f32 %v4093_v61, %v8680_v50  ;;  %v8728_v41 = vsel %vm3662_vm4, %v3664_v35, %v3660_v17  ;;  %v8743_v61 = vpop.permute.xlu2 %3175 }
 0xa98   :  { %v3896_v48 = vadd.f32 %v5464_v12, %v3895_v39  ;;  %vm3897_vm7 = vweird.f32 %v8645_v8  ;;  %v4062_v32 = vmul.f32 1.0614054, %v8728_v41  ;;  %v8733_v40 = vmul.f32 %v3339_v34, %v8586_v13 }
 0xa99   :  { %v4588_v31 = vsub.f32 0.0, %v4524_v43  ;;  %v4604_v60 = vsel %vm4540_vm14, %v4508_v26, %v4572_v23  ;;  %vm3899_vm8 = vmor %vm3897_vm7, %vm3898_vm6  ;;  %v3904_v15 = vor.u32 1.1754944e-38, %v3903_v20  ;;  %v8740_v51 = vmul.f32 0.70710677, %v8724_v6 }
 0xa9a   :  { %vm4537_vm9 = vcmp.ge.f32.partialorder %v8274_v7, 0.0  ;;  %v4571_v35 = vsub.f32 0.0, %v4507_v4  ;;  %v3900_v8 = vsel %vm3899_vm8, %v5464_v12, %v3896_v48  ;;  %vm3902_vm10 = vcmp.eq.f32.partialorder %v3901_v37, 8.507059e+37 }
 0xa9b   :  { %v4094_v30 = vadd.f32 -1.4531521, %v4062_v32  ;;  %vm4553_vm11 = vcmp.ge.f32.partialorder %v8281_v14, 0.0  ;;  %v4587_v13 = vsub.f32 0.0, %v4523_v2  ;;  %v4109_v34 = vadd.f32 -1.4531521, %v4077_v54 }
 0xa9c   :  { %v8746_v62 = vsel %vm3902_vm10, %v3904_v15, %v3900_v8  ;;  %v8749_v33 = vmul.f32 0.70710677, %v8733_v40  ;;  %v4157_v26 = vadd.f32 1.4214138, %v4125_v58  ;;  %v8754_v12 = vand.u32 2147483647, %v8740_v51 }
 0xa9d   :  { %v4078_v23 = vmul.f32 1.0614054, %v8746_v62  ;;  %v4126_v49 = vmul.f32 %v4094_v30, %v8728_v41  ;;  %vm4697_vm12 = vcmask 408576   ;;  %v10963_v39 = vsub.f32 1.0, %v8667_v46 }
 0xa9e   :  { %vm4539_vm13 = vcmp.ge.f32.partialorder %v8399_v53, 0.0  ;;  %vm4555_vm14 = vcmp.ge.f32.partialorder %v8402_v44, 0.0  ;;  %v4349_v17 = vsub.f32 0.0, %v8549_v52  ;;  %v4636_v37 = vadd.f32 1.0, %v4604_v60 }
 0xa9f   :  { %v4569_v20 = vsub.f32 0.0, %v10963_v39  ;;  %v4603_v54 = vsel %vm4539_vm13, %v4507_v4, %v4571_v35  ;;  %v4110_v58 = vadd.f32 -1.4531521, %v4078_v23  ;;  %v4158_v48 = vadd.f32 1.4214138, %v4126_v49 }
 0xaa0   :  { %v4620_v32 = vsel %vm4556_vm5, %v4524_v43, %v4588_v31  ;;  %v4619_v15 = vsel %vm4555_vm14, %v4523_v2, %v4587_v13  ;;  %v4141_v8 = vmul.f32 %v4109_v34, %v8717_v28  ;;  %v8767_v30 = vand.u32 2147483647, %v8749_v33 }
 0xaa1   :  { %v10964_v53 = vsub.f32 1.0, %v8672_v9  ;;  %v4189_v39 = vmul.f32 %v4157_v26, %v8680_v50  ;;  %v4142_v4 = vmul.f32 %v4110_v58, %v8746_v62  ;;  %v3521_v60 = vmul.f32 0.3275911, %v8754_v12 }
 0xaa2   :  { %v4843_v59 = vmul.f32 16.0, %v8714_v10  ;;  %v3435_v45 = vmul.f32 0.5, %v8376_v19  ;;  %v4635_v43 = vadd.f32 1.0, %v4603_v54  ;;  %v4190_v2 = vmul.f32 %v4158_v48, %v8728_v41 }
 0xaa3   :  { %v4585_v44 = vsub.f32 0.0, %v10964_v53  ;;  %v4652_v31 = vadd.f32 1.0, %v4620_v32  ;;  %v8778_v35 = vmul.f32 %v4636_v37, %v8652_v63  ;;  %v4651_v13 = vadd.f32 1.0, %v4619_v15  ;;  %v8791_v32 = vpop.permute.xlu1 %2959 }
 0xaa4   :  { %v4350_v34 = vsub.f32 0.0, %v8625_v18  ;;  %v10966_v26 = vsub.f32 1.0, %v8667_v46  ;;  %v4173_v49 = vadd.f32 1.4214138, %v4141_v8  ;;  %v4381_v58 = vmul.f32 %v4349_v17, %v8549_v52  ;;  %v3326_v46 = vpop.permute.xlu2 %3325 }
 0xaa5   :  { %10965 = vst [vmem:[#allocation218_spill] sm:$0xff] %v8778_v35  ;;  %v3537_v19 = vmul.f32 0.3275911, %v8767_v30  ;;  %v10967_v54 = vmov %v10964_v53  ;;  %v4221_v63 = vadd.f32 -0.28449672, %v4189_v39  ;;  %v8793_v15 = vadd.f32 1.0, %v3521_v60 }
 0xaa6   :  { %v4601_v23 = vsel %vm4537_vm9, %v10966_v26, %v4569_v20  ;;  %v4617_v48 = vsel %vm4553_vm11, %v10967_v54, %v4585_v44  ;;  %v4174_v37 = vadd.f32 1.4214138, %v4142_v4  ;;  %v4844_v53 = vsub.f32 1.0, %v4843_v59 }
 0xaa7   :  { %v8796_v7 = vmul.f32 %v4635_v43, %v8683_v56  ;;  %v4365_v52 = vsub.f32 0.0, %v8554_v47  ;;  %v4222_v20 = vadd.f32 -0.28449672, %v4190_v2  ;;  %v8800_v17 = vmul.f32 %v4652_v31, %v8675_v57 }
 0xaa8   :  { %v4708_v14 = vsel %vm4697_vm12, %v8778_v35, 0.0  ;;  %v8804_v9 = vmul.f32 %v4651_v13, %v3435_v45  ;;  %v4382_v8 = vmul.f32 %v4350_v34, %v8625_v18  ;;  %v4205_v44 = vmul.f32 %v4173_v49, %v8717_v28  ;;  %v10985_v35 = vld [vmem:[#allocation230_spill] sm:$0xff] }
 0xaa9   :  { %10968 = vst [vmem:[#allocation292_spill] sm:$0xff] %v8796_v7  ;;  %v4417_v39 = vmul.f32 1.442695, %v4381_v58  ;;  %v8808_v4 = vadd.f32 1.0, %v3537_v19  ;;  %v8811_v56 = vmul.f32 %v3326_v46, %v8301_v38  ;;  %v4253_v60 = vmul.f32 %v4221_v63, %v8680_v50 }
 0xaaa   :  { %10969 = vst [vmem:[#allocation40_spill] sm:$0xff] %v8800_v17  ;;  %v4206_v57 = vmul.f32 %v4174_v37, %v8746_v62  ;;  %v4366_v59 = vsub.f32 0.0, %v8631_v55  ;;  %5469 = vrcp.f32 %v8793_v15  ;;  %v4707_v45 = vsel %vm4697_vm12, %v8796_v7, 0.0 }
 0xaab   :  { %10970 = vst [vmem:[#allocation143_spill] sm:$0xff] %v8804_v9  ;;  %v4254_v18 = vmul.f32 %v4222_v20, %v8728_v41  ;;  %v8821_v43 = vmul.f32 %v3326_v46, %v8327_v42  ;;  %v8824_v2 = vmul.f32 0.70710677, %v8811_v56  ;;  %v4780_v38 = vsel %vm4697_vm12, %v8800_v17, 0.0 }
 0xaac   :  { %v4779_v31 = vsel %vm4697_vm12, %v8804_v9, 0.0  ;;  %v4397_v13 = vmul.f32 %v4365_v52, %v8554_v47  ;;  %v4419_v34 = vmul.f32 1.442695, %v4382_v8  ;;  %v4237_v26 = vadd.f32 -0.28449672, %v4205_v44  ;;  %v8845_v9 = vpop.permute.xlu1 %3173 }
 0xaad   :  { %5471 = vrcp.f32 %v8808_v4  ;;  %v8833_v49 = vmul.f32 0.70710677, %v8821_v43  ;;  %v8836_v42 = vand.u32 2147483647, %v8824_v2  ;;  %v4709_v58 = vadd.f32 %v4708_v14, %v4707_v45 }
 0xaae   :  { %v4285_v19 = vadd.f32 0.2548296, %v4253_v60  ;;  %v4238_v54 = vadd.f32 -0.28449672, %v4206_v57  ;;  %v4398_v63 = vmul.f32 %v4366_v59, %v8631_v55  ;;  %5473 = vpow2.f32 %v4417_v39 }
 0xaaf   :  { %v4286_v37 = vadd.f32 0.2548296, %v4254_v18  ;;  %v8840_v46 = vand.u32 2147483647, %v8833_v49  ;;  %v3519_v47 = vmul.f32 0.3275911, %v8836_v42  ;;  %v4781_v44 = vadd.f32 %v4780_v38, %v4779_v31 }
 0xab0   :  { %v8843_v52 = vpop.eup %5469  ;;  %v4633_v20 = vadd.f32 1.0, %v4601_v23  ;;  %v4649_v8 = vadd.f32 1.0, %v4617_v48  ;;  %5475 = vpow2.f32 %v4419_v34  ;;  %v4845_v14 = vmul.f32 %v8714_v10, %v4844_v53  ;;  %v10971_v31 = vld [vmem:[#allocation312_spill] sm:$0xff] }
 0xab1   :  { %v4269_v60 = vmul.f32 %v4237_v26, %v8717_v28  ;;  %v4449_v55 = vmul.f32 1.442695, %v4397_v13  ;;  %v3535_v39 = vmul.f32 0.3275911, %v8840_v46  ;;  %v3433_v57 = vmul.f32 0.5, %v8260_v1 }
 0xab2   :  { %v4710_v59 = vrot.slane %v4709_v58, 4  ;;  %v4317_v45 = vmul.f32 %v4285_v19, %v8680_v50  ;;  %v4451_v18 = vmul.f32 1.442695, %v4398_v63  ;;  %v4270_v23 = vmul.f32 %v4238_v54, %v8746_v62  ;;  %v8870_v63 = vpop.permute.xlu0 %3215 }
 0xab3   :  { %v8852_v17 = vpop.eup %5471  ;;  %v4318_v48 = vmul.f32 %v4286_v37, %v8728_v41  ;;  %v3698_v53 = vmul.f32 %v8843_v52, %v8793_v15  ;;  %v8858_v38 = vadd.f32 1.0, %v3519_v47  ;;  %v2592_v13 = vadd.f32 %v10971_v31, %v8591_v0 }
 0xab4   :  { %v8863_v1 = vmul.f32 %v4633_v20, %v8594_v27  ;;  %v4782_v34 = vrot.slane %v4781_v44, 4  ;;  %v8865_v50 = vadd.f32 1.0, %v3535_v39  ;;  %v5474_v26 = vpop.eup %5473  ;;  %v8867_v19 = vmul.f32 %v4649_v8, %v3433_v57 }
 0xab5   :  { %v4846_v54 = vadd.f32 %v8714_v10, %v4845_v14  ;;  %v4301_v41 = vadd.f32 0.2548296, %v4269_v60  ;;  %5477 = vpow2.f32 %v4449_v55  ;;  %v4711_v47 = vadd.f32 %v4710_v59, %v4709_v58 }
 0xab6   :  { %10972 = vst [vmem:[#allocation228_spill] sm:$0xff] %v8863_v1  ;;  %v5476_v37 = vpop.eup %5475  ;;  %v4477_v7 = vmul.f32 %v5474_v26, %v4317_v45  ;;  %5479 = vpow2.f32 %v4451_v18  ;;  %v3938_v0 = vmul.f32 %v8852_v17, %v8808_v4  ;;  %v4302_v27 = vadd.f32 0.2548296, %v4270_v23  ;;  %v8889_v18 = vpop.permute.xlu1 %3207 }
 0xab7   :  { %10973 = vst [vmem:[#allocation245_spill] sm:$0xff] %v8867_v19  ;;  %v4478_v20 = vmul.f32 %v5476_v37, %v4318_v48  ;;  %v3699_v39 = vsub.f32 1.0, %v3698_v53  ;;  %5481 = vrcp.f32 %v8858_v38  ;;  %vm4847_vm15 = vweird.f32 %v8714_v10 }
 0xab8   :  { %v4783_v8 = vadd.f32 %v4782_v34, %v4781_v44  ;;  %5483 = vrcp.f32 %v8865_v50  ;;  %v8878_v14 = vadd.f32 %v8233_v25, %v2592_v13  ;;  %v8882_v58 = vsel %vm4697_vm12, %v8863_v1, 0.0 }
 0xab9   :  { %10974 = vst [vmem:[#allocation5_spill] sm:$0xff] %v8882_v58  ;;  %v4333_v60 = vmul.f32 %v4301_v41, %v8717_v28  ;;  %v8887_v55 = vsel %vm4697_vm12, %v8867_v19, 0.0  ;;  %v4712_v57 = vrot.slane %v4711_v47, 2  ;;  %v4509_v59 = vsub.f32 1.0, %v4477_v7 }
 0xaba   :  { %10975 = vst [vmem:[#allocation65_spill] sm:$0xff] %v8887_v55  ;;  %v3939_v45 = vsub.f32 1.0, %v3938_v0  ;;  %v8892_v23 = vsel %vm4847_vm15, %v8714_v10, %v4846_v54  ;;  %v4334_v25 = vmul.f32 %v4302_v27, %v8746_v62  ;;  %v4510_v48 = vsub.f32 1.0, %v4478_v20  ;;  %v10977_v62 = vld [vmem:[#allocation31_spill] sm:$0xff] }
 0xabb   :  { %v5478_v44 = vpop.eup %5477  ;;  %10976 = vst [vmem:[#allocation168_spill] sm:$0xff] %v8892_v23  ;;  %v3700_v53 = vmul.f32 %v8843_v52, %v3699_v39  ;;  %v4784_v28 = vrot.slane %v4783_v8, 2  ;;  %v8897_v13 = vmul.f32 0.5, %v8526_v36  ;;  %v8900_v34 = vmul.f32 0.5, %v8532_v24 }
 0xabc   :  { %v5480_v31 = vpop.eup %5479  ;;  %vm4541_vm0 = vcmp.ge.f32.partialorder %v8539_v29, 0.0  ;;  %v4493_v26 = vmul.f32 %v5478_v44, %v4333_v60  ;;  %v8907_v10 = vadd.f32 %v8618_v11, %v8169_v3  ;;  %v8911_v54 = vadd.f32 %v8706_v22, %v10977_v62  ;;  %v8922_v11 = vpop.permute.xlu0 %3364 }
 0xabd   :  { %v8903_v7 = vpop.eup %5481  ;;  %v3422_v41 = vmul.f32 0.5, %v8603_v5  ;;  %v4713_v37 = vadd.f32 %v4712_v57, %v4711_v47  ;;  %v4573_v24 = vsub.f32 0.0, %v4509_v59  ;;  %v8917_v0 = vmul.f32 0.5, %v8610_v21  ;;  %v10978_v5 = vld [vmem:[#allocation117_spill] sm:$0xff]  ;;  %v10979_v57 = vld [vmem:[#allocation263_spill] sm:$0xff] }
 0xabe   :  { %v8914_v36 = vpop.eup %5483  ;;  %v3940_v27 = vmul.f32 %v8852_v17, %v3939_v45  ;;  %v4494_v20 = vmul.f32 %v5480_v31, %v4334_v25  ;;  %v4574_v39 = vsub.f32 0.0, %v4510_v48  ;;  %v3701_v3 = vadd.f32 %v8843_v52, %v3700_v53  ;;  %v10980_v53 = vld [vmem:[#allocation201_spill] sm:$0xff]  ;;  %v3178_v19 = vpop.permute.xlu1 %3177 }
 0xabf   :  { %vm3703_vm1 = vweird.f32 %v8843_v52  ;;  %v8924_v22 = vadd.f32 %v4784_v28, %v4783_v8  ;;  %vm4542_vm2 = vcmp.ge.f32.partialorder %v10978_v5, 0.0  ;;  %v3708_v47 = vand.u32 2147483648, %v8793_v15 }
 0xac0   :  { %v3668_v21 = vmul.f32 %v8903_v7, %v8858_v38  ;;  %v4525_v60 = vsub.f32 1.0, %v4493_v26  ;;  %vm4557_vm3 = vcmp.ge.f32.partialorder %v10979_v57, 0.0  ;;  %vm3702_vm4 = vweird.f32 %v8793_v15 }
 0xac1   :  { %v3706_v45 = vand.u32 2147483647, %v8793_v15  ;;  %v3908_v44 = vmul.f32 %v8914_v36, %v8865_v50  ;;  %v4714_v25 = vrot.slane %v4713_v37, 1  ;;  %v4605_v8 = vsel %vm4541_vm0, %v4509_v59, %v4573_v24  ;;  %vm8938_vm6 = vmor %vm3702_vm4, %vm3703_vm1 }
 0xac2   :  { %vm4558_vm5 = vcmp.ge.f32.partialorder %v10980_v53, 0.0  ;;  %v3941_v28 = vadd.f32 %v8852_v17, %v3940_v27  ;;  %vm3943_vm7 = vweird.f32 %v8852_v17  ;;  %v4526_v26 = vsub.f32 1.0, %v4494_v20 }
 0xac3   :  { %v4606_v62 = vsel %vm4542_vm2, %v4510_v48, %v4574_v39  ;;  %v3705_v15 = vsel %vm8938_vm6, %v8843_v52, %v3701_v3  ;;  %v3948_v5 = vand.u32 2147483648, %v8808_v4  ;;  %v3709_v29 = vor.u32 1.1754944e-38, %v3708_v47 }
 0xac4   :  { %vm3942_vm8 = vweird.f32 %v8808_v4  ;;  %v3946_v59 = vand.u32 2147483647, %v8808_v4  ;;  %v3669_v24 = vsub.f32 1.0, %v3668_v21  ;;  %v4786_v1 = vrot.slane %v8924_v22, 1 }
 0xac5   :  { %v4589_v27 = vsub.f32 0.0, %v4525_v60  ;;  %vm3707_vm9 = vcmp.eq.f32.partialorder %v3706_v45, 8.507059e+37  ;;  %vm8951_vm10 = vmor %vm3942_vm8, %vm3943_vm7  ;;  %v3909_v48 = vsub.f32 1.0, %v3908_v44  ;;  %v4637_v39 = vadd.f32 1.0, %v4605_v8  ;;  %v3293_v45 = vpop.permute.xlu0 %3292 }
 0xac6   :  { %v4638_v52 = vadd.f32 1.0, %v4606_v62  ;;  %v8955_v3 = vsel %vm3707_vm9, %v3709_v29, %v3705_v15  ;;  %v3945_v47 = vsel %vm8951_vm10, %v8852_v17, %v3941_v28  ;;  %v8960_v4 = vadd.f32 %v4714_v25, %v4713_v37  ;;  %v10988_v28 = vld [vmem:[#allocation78_spill] sm:$0xff] }
 0xac7   :  { %v4590_v21 = vsub.f32 0.0, %v4526_v26  ;;  %v3949_v31 = vor.u32 1.1754944e-38, %v3948_v5  ;;  %v3261_v55 = vadd.f32 %v3178_v19, %v10985_v35  ;;  %vm3947_vm11 = vcmp.eq.f32.partialorder %v3946_v59, 8.507059e+37 }
 0xac8   :  { %v4353_v58 = vsub.f32 0.0, %v8754_v12  ;;  %v4369_v44 = vsub.f32 0.0, %v8767_v30  ;;  %v3670_v8 = vmul.f32 %v8903_v7, %v3669_v24  ;;  %v4065_v15 = vmul.f32 1.0614054, %v8955_v3 }
 0xac9   :  { %v8966_v62 = vsel %vm3947_vm11, %v3949_v31, %v3945_v47  ;;  %v3910_v17 = vmul.f32 %v8914_v36, %v3909_v48  ;;  %v8971_v37 = vmul.f32 %v8922_v11, %v3261_v55  ;;  %v4621_v35 = vsel %vm4557_vm3, %v4525_v60, %v4589_v27 }
 0xaca   :  { %v8976_v19 = vmul.f32 %v4637_v39, %v8897_v13  ;;  %v8978_v25 = vmul.f32 %v4638_v52, %v3422_v41  ;;  %v8981_v5 = vmul.f32 %v3293_v45, %v10988_v28  ;;  %v4622_v29 = vsel %vm4558_vm5, %v4526_v26, %v4590_v21  ;;  %v10990_v41 = vld [vmem:[#allocation142_spill] sm:$0xff] }
 0xacb   :  { %v3676_v59 = vand.u32 2147483647, %v8858_v38  ;;  %v3678_v24 = vand.u32 2147483648, %v8858_v38  ;;  %v8988_v55 = vmul.f32 0.70710677, %v8971_v37  ;;  %v3671_v13 = vadd.f32 %v8903_v7, %v3670_v8 }
 0xacc   :  { %10986 = vst [vmem:[#allocation252_spill] sm:$0xff] %v8976_v19  ;;  %v4081_v60 = vmul.f32 1.0614054, %v8966_v62  ;;  %vm3673_vm13 = vweird.f32 %v8903_v7  ;;  %v8994_v57 = vmul.f32 %v3293_v45, %v10990_v41  ;;  %v4097_v27 = vadd.f32 -1.4531521, %v4065_v15 }
 0xacd   :  { %10987 = vst [vmem:[#allocation268_spill] sm:$0xff] %v8978_v25  ;;  %v3911_v53 = vadd.f32 %v8914_v36, %v3910_v17  ;;  %vm3913_vm14 = vweird.f32 %v8914_v36  ;;  %v8999_v26 = vand.u32 2147483647, %v8988_v55  ;;  %v4654_v20 = vadd.f32 1.0, %v4622_v29 }
 0xace   :  { %10989 = vst [vmem:[#allocation29_spill] sm:$0xff] %v8988_v55  ;;  %vm3672_vm15 = vweird.f32 %v8858_v38  ;;  %v3918_v48 = vand.u32 2147483648, %v8865_v50  ;;  %v9004_v39 = vmul.f32 0.70710677, %v8981_v5  ;;  %v4717_v52 = vsel %vm4697_vm12, %v8978_v25, 0.0 }
 0xacf   :  { %vm9008_vm0 = vmor %vm3672_vm15, %vm3673_vm13  ;;  %vm3912_vm1 = vweird.f32 %v8865_v50  ;;  %v3916_v21 = vand.u32 2147483647, %v8865_v50  ;;  %v3525_v31 = vmul.f32 0.3275911, %v8999_v26  ;;  %vm3677_vm2 = vcmp.eq.f32.partialorder %v3676_v59, 8.507059e+37 }
 0xad0   :  { %v3675_v38 = vsel %vm9008_vm0, %v8903_v7, %v3671_v13  ;;  %vm9018_vm3 = vmor %vm3912_vm1, %vm3913_vm14  ;;  %v9023_v8 = vmul.f32 0.70710677, %v8994_v57  ;;  %v9026_v15 = vand.u32 2147483647, %v9004_v39  ;;  %v4113_v17 = vadd.f32 -1.4531521, %v4081_v60 }
 0xad1   :  { %v4129_v50 = vmul.f32 %v4097_v27, %v8955_v3  ;;  %v3679_v28 = vor.u32 1.1754944e-38, %v3678_v24  ;;  %v3915_v29 = vsel %vm9018_vm3, %v8914_v36, %v3911_v53  ;;  %v3919_v7 = vor.u32 1.1754944e-38, %v3918_v48 }
 0xad2   :  { %v9032_v59 = vadd.f32 1.0, %v3525_v31  ;;  %v9035_v13 = vand.u32 2147483647, %v9023_v8  ;;  %v3514_v41 = vmul.f32 0.3275911, %v9026_v15  ;;  %v4787_v47 = vadd.f32 %v4786_v1, %v8924_v22 }
 0xad3   :  { %v4716_v60 = vsel %vm4697_vm12, %v8976_v19, 0.0  ;;  %v9041_v25 = vsel %vm3677_vm2, %v3679_v28, %v3675_v38  ;;  %vm3917_vm4 = vcmp.eq.f32.partialorder %v3916_v21, 8.507059e+37  ;;  %v4653_v24 = vadd.f32 1.0, %v4621_v35  ;;  %v10999_v38 = vld [vmem:[#allocation131_spill] sm:$0xff] }
 0xad4   :  { %v4718_v27 = vadd.f32 %v4717_v52, %v4716_v60  ;;  %v4385_v36 = vmul.f32 %v4353_v58, %v8754_v12  ;;  %v9044_v53 = vsel %vm3917_vm4, %v3919_v7, %v3915_v29  ;;  %v4145_v48 = vmul.f32 %v4113_v17, %v8966_v62  ;;  %v10997_v52 = vld [vmem:[#allocation94_spill] sm:$0xff] }
 0xad5   :  { %v4401_v31 = vmul.f32 %v4369_v44, %v8767_v30  ;;  %v3530_v45 = vmul.f32 0.3275911, %v9035_v13  ;;  %v9049_v55 = vadd.f32 1.0, %v3514_v41  ;;  %v9052_v1 = vmul.f32 %v4654_v20, %v8917_v0 }
 0xad6   :  { %v4161_v22 = vadd.f32 1.4214138, %v4129_v50  ;;  %v4063_v21 = vmul.f32 1.0614054, %v9041_v25  ;;  %5485 = vrcp.f32 %v9032_v59  ;;  %v4079_v12 = vmul.f32 1.0614054, %v9044_v53 }
 0xad7   :  { %10995 = vst [vmem:[#allocation97_spill] sm:$0xff] %v9052_v1  ;;  %v4351_v58 = vsub.f32 0.0, %v8836_v42  ;;  %v9058_v35 = vadd.f32 1.0, %v3530_v45  ;;  %5487 = vrcp.f32 %v9049_v55  ;;  %v9062_v30 = vmul.f32 %v4653_v24, %v8900_v34 }
 0xad8   :  { %v4719_v44 = vrot.slane %v4718_v27, 4  ;;  %v9066_v0 = vadd.f32 %v8665_v16, %v10997_v52  ;;  %v4425_v20 = vmul.f32 1.442695, %v4385_v36  ;;  %v9070_v17 = vadd.f32 %v8743_v61, %v10999_v38 }
 0xad9   :  { %10996 = vst [vmem:[#allocation204_spill] sm:$0xff] %v9062_v30  ;;  %v4177_v50 = vadd.f32 1.4214138, %v4145_v48  ;;  %v4457_v28 = vmul.f32 1.442695, %v4401_v31  ;;  %5489 = vrcp.f32 %v9058_v35  ;;  %v4789_v29 = vsel %vm4697_vm12, %v9052_v1, 0.0  ;;  %v3210_v31 = vpop.permute.xlu1 %3209 }
 0xada   :  { %10998 = vst [vmem:[#allocation288_spill] sm:$0xff] %v9066_v0  ;;  %v9077_v34 = vadd.f32 %v8791_v32, %v8878_v14  ;;  %v4193_v7 = vmul.f32 %v4161_v22, %v8955_v3  ;;  %v4095_v16 = vadd.f32 -1.4531521, %v4063_v21  ;;  %v9082_v41 = vmul.f32 %v8892_v23, %v8960_v4 }
 0xadb   :  { %v9085_v61 = vmul.f32 %v8892_v23, %v4787_v47  ;;  %v4111_v60 = vadd.f32 -1.4531521, %v4079_v12  ;;  %v4383_v24 = vmul.f32 %v4351_v58, %v8836_v42  ;;  %v4788_v48 = vsel %vm4697_vm12, %v9062_v30, 0.0 }
 0xadc   :  { %11000 = vst [vmem:[#allocation304_spill] sm:$0xff] %v9077_v34  ;;  %v9088_v36 = vpop.eup %5485  ;;  %v9092_v32 = vadd.f32 %v4719_v44, %v4718_v27  ;;  %v9095_v14 = vmul.f32 0.5, %v8724_v6  ;;  %5491 = vpow2.f32 %v4425_v20  ;;  %v4790_v45 = vadd.f32 %v4789_v29, %v4788_v48 }
 0xadd   :  { %11001 = vst [vmem:[#allocation11_spill] sm:$0xff] %v9082_v41  ;;  %v5488_v4 = vpop.eup %5487  ;;  %v9098_v47 = vmul.f32 0.5, %v8733_v40  ;;  %v4209_v22 = vmul.f32 %v4177_v50, %v8966_v62  ;;  %5493 = vpow2.f32 %v4457_v28  ;;  %v4225_v42 = vadd.f32 -0.28449672, %v4193_v7  ;;  %v11003_v40 = vld [vmem:[#allocation158_spill] sm:$0xff] }
 0xade   :  { %11002 = vst [vmem:[#allocation63_spill] sm:$0xff] %v9085_v61  ;;  %v9102_v21 = vmul.f32 0.5, %v8811_v56  ;;  %v4127_v27 = vmul.f32 %v4095_v16, %v9041_v25  ;;  %v3593_v12 = vmul.f32 %v5488_v4, %v9049_v55  ;;  %v4143_v58 = vmul.f32 %v4111_v60, %v9044_v53 }
 0xadf   :  { %v5490_v6 = vpop.eup %5489  ;;  %v4367_v44 = vsub.f32 0.0, %v8840_v46  ;;  %v9108_v52 = vmul.f32 1.442695, %v4383_v24  ;;  %v3277_v20 = vadd.f32 %v3210_v31, %v11003_v40  ;;  %v3758_v50 = vmul.f32 %v9088_v36, %v9032_v59 }
 0xae0   :  { %v3594_v56 = vsub.f32 1.0, %v3593_v12  ;;  %v3601_v28 = vand.u32 2147483647, %v9049_v55  ;;  %v4791_v29 = vrot.slane %v4790_v45, 4  ;;  %v4241_v7 = vadd.f32 -0.28449672, %v4209_v22  ;;  %v3332_v22 = vpop.permute.xlu0 %3331 }
 0xae1   :  { %v3603_v16 = vand.u32 2147483648, %v9049_v55  ;;  %v3833_v60 = vmul.f32 %v5490_v6, %v9058_v35  ;;  %v4257_v24 = vmul.f32 %v4225_v42, %v8955_v3  ;;  %v4159_v30 = vadd.f32 1.4214138, %v4127_v27 }
 0xae2   :  { %v9117_v48 = vpop.eup %5491  ;;  %v3595_v31 = vmul.f32 %v5488_v4, %v3594_v56  ;;  %vm3598_vm5 = vweird.f32 %v5488_v4  ;;  %v4175_v38 = vadd.f32 1.4214138, %v4143_v58  ;;  %vm3597_vm6 = vweird.f32 %v9049_v55 }
 0xae3   :  { %v9120_v40 = vpop.eup %5493  ;;  %v3834_v12 = vsub.f32 1.0, %v3833_v60  ;;  %v9124_v1 = vmul.f32 %v8922_v11, %v3277_v20  ;;  %v3759_v19 = vsub.f32 1.0, %v3758_v50  ;;  %vm3602_vm7 = vcmp.eq.f32.partialorder %v3601_v28, 8.507059e+37  ;;  %vm3599_vm9 = vmor %vm3597_vm6, %vm3598_vm5  ;;  %v11005_v60 = vld [vmem:[#allocation176_spill] sm:$0xff] }
 0xae4   :  { %v3596_v41 = vadd.f32 %v5488_v4, %v3595_v31  ;;  %vm3837_vm8 = vweird.f32 %v9058_v35  ;;  %v3604_v42 = vor.u32 1.1754944e-38, %v3603_v16  ;;  %vm3838_vm10 = vweird.f32 %v5490_v6  ;;  %v11007_v11 = vld [vmem:[#allocation56_spill] sm:$0xff] }
 0xae5   :  { %v3835_v27 = vmul.f32 %v5490_v6, %v3834_v12  ;;  %v9128_v56 = vmul.f32 0.70710677, %v9124_v1  ;;  %v3843_v55 = vand.u32 2147483648, %v9058_v35  ;;  %v9132_v61 = vmul.f32 %v3332_v22, %v11005_v60  ;;  %vm9147_vm11 = vmor %vm3837_vm8, %vm3838_vm10 }
 0xae6   :  { %v3600_v58 = vsel %vm3599_vm9, %v5488_v4, %v3596_v41  ;;  %v9135_v20 = vmul.f32 %v3332_v22, %v11007_v11  ;;  %v3841_v31 = vand.u32 2147483647, %v9058_v35  ;;  %v4792_v12 = vadd.f32 %v4791_v29, %v4790_v45 }
 0xae7   :  { %11004 = vst [vmem:[#allocation126_spill] sm:$0xff] %v9128_v56  ;;  %v9137_v50 = vsel %vm3602_vm7, %v3604_v42, %v3600_v58  ;;  %v3836_v28 = vadd.f32 %v5490_v6, %v3835_v27  ;;  %v9141_v16 = vand.u32 2147483647, %v9128_v56  ;;  %v4191_v0 = vmul.f32 %v4159_v30, %v9041_v25 }
 0xae8   :  { %11006 = vst [vmem:[#allocation229_spill] sm:$0xff] %v9132_v61  ;;  %v3760_v41 = vmul.f32 %v9088_v36, %v3759_v19  ;;  %v4058_v22 = vmul.f32 1.0614054, %v9137_v50  ;;  %v4207_v42 = vmul.f32 %v4175_v38, %v9044_v53  ;;  %v9157_v45 = vmul.f32 0.70710677, %v9132_v61 }
 0xae9   :  { %11008 = vst [vmem:[#allocation314_spill] sm:$0xff] %v9135_v20  ;;  %v3840_v27 = vsel %vm9147_vm11, %v5490_v6, %v3836_v28  ;;  %v3541_v58 = vmul.f32 0.3275911, %v9141_v16  ;;  %v4273_v19 = vmul.f32 %v4241_v7, %v8966_v62  ;;  %v4289_v30 = vadd.f32 0.2548296, %v4257_v24 }
 0xaea   :  { %11011 = vst [vmem:[#allocation52_spill] sm:$0xff] %v9157_v45  ;;  %v3844_v35 = vor.u32 1.1754944e-38, %v3843_v55  ;;  %v9161_v29 = vmul.f32 0.70710677, %v9135_v20  ;;  %vm3763_vm13 = vweird.f32 %v9088_v36  ;;  %vm3842_vm14 = vcmp.eq.f32.partialorder %v3841_v31, 8.507059e+37 }
 0xaeb   :  { %v9164_v60 = vadd.f32 1.0, %v3541_v58  ;;  %v9167_v38 = vand.u32 2147483647, %v9157_v45  ;;  %v3761_v6 = vadd.f32 %v9088_v36, %v3760_v41  ;;  %v4090_v28 = vadd.f32 -1.4531521, %v4058_v22  ;;  %v3180_v58 = vpop.permute.xlu2 %3179 }
 0xaec   :  { %11012 = vst [vmem:[#allocation90_spill] sm:$0xff] %v9161_v29  ;;  %v9170_v11 = vsel %vm3842_vm14, %v3844_v35, %v3840_v27  ;;  %v9173_v7 = vand.u32 2147483647, %v9161_v29  ;;  %v4223_v24 = vadd.f32 -0.28449672, %v4191_v0  ;;  %v4399_v4 = vmul.f32 %v4367_v44, %v8840_v46 }
 0xaed   :  { %v4239_v55 = vadd.f32 -0.28449672, %v4207_v42  ;;  %v3768_v20 = vand.u32 2147483648, %v9032_v59  ;;  %v4793_v31 = vrot.slane %v4792_v12, 2  ;;  %vm3762_vm15 = vweird.f32 %v9032_v59 }
 0xaee   :  { %v3766_v56 = vand.u32 2147483647, %v9032_v59  ;;  %5495 = vrcp.f32 %v9164_v60  ;;  %v11013_v41 = vrot.slane %v9092_v32, 2  ;;  %v4305_v27 = vadd.f32 0.2548296, %v4273_v19  ;;  %vm9185_vm0 = vmor %vm3762_vm15, %vm3763_vm13 }
 0xaef   :  { %v4074_v46 = vmul.f32 1.0614054, %v9170_v11  ;;  %v3520_v44 = vmul.f32 0.3275911, %v9167_v38  ;;  %v4321_v42 = vmul.f32 %v4289_v30, %v8955_v3  ;;  %v3765_v59 = vsel %vm9185_vm0, %v9088_v36, %v3761_v6 }
 0xaf0   :  { %v4722_v22 = vadd.f32 %v11013_v41, %v9092_v32  ;;  %v4122_v35 = vmul.f32 %v4090_v28, %v9137_v50  ;;  %v3536_v32 = vmul.f32 0.3275911, %v9173_v7  ;;  %v4255_v19 = vmul.f32 %v4223_v24, %v9041_v25 }
 0xaf1   :  { %v4271_v41 = vmul.f32 %v4239_v55, %v9044_v53  ;;  %v3769_v29 = vor.u32 1.1754944e-38, %v3768_v20  ;;  %v9199_v45 = vadd.f32 1.0, %v3520_v44  ;;  %v9202_v34 = vmul.f32 0.5, %v8821_v43 }
 0xaf2   :  { %v4453_v61 = vmul.f32 1.442695, %v4399_v4  ;;  %vm3767_vm1 = vcmp.eq.f32.partialorder %v3766_v56, 8.507059e+37  ;;  %v9204_v3 = vadd.f32 1.0, %v3536_v32  ;;  %v4723_v30 = vrot.slane %v4722_v22, 1  ;;  %v11018_v32 = vld [vmem:[#allocation205_spill] sm:$0xff] }
 0xaf3   :  { %v9206_v36 = vsel %vm3767_vm1, %v3769_v29, %v3765_v59  ;;  %v4106_v6 = vadd.f32 -1.4531521, %v4074_v46  ;;  %5497 = vrcp.f32 %v9199_v45  ;;  %v4337_v24 = vmul.f32 %v4305_v27, %v8966_v62  ;;  %v11016_v29 = vld [vmem:[#allocation114_spill] sm:$0xff]  ;;  %v11017_v27 = vld [vmem:[#allocation141_spill] sm:$0xff] }
 0xaf4   :  { %v9209_v28 = vpop.eup %5495  ;;  %v9213_v20 = vmul.f32 %v9117_v48, %v4321_v42  ;;  %5499 = vpow2.f32 %v9108_v52  ;;  %v4154_v43 = vadd.f32 1.4214138, %v4122_v35  ;;  %v9216_v55 = vadd.f32 %v4793_v31, %v4792_v12  ;;  %v3212_v42 = vpop.permute.xlu2 %3211 }
 0xaf5   :  { %v4287_v56 = vadd.f32 0.2548296, %v4255_v19  ;;  %v4303_v4 = vadd.f32 0.2548296, %v4271_v41  ;;  %5501 = vrcp.f32 %v9204_v3  ;;  %v9221_v0 = vadd.f32 %v8845_v9, %v11016_v29 }
 0xaf6   :  { %5503 = vpow2.f32 %v4453_v61  ;;  %v4069_v46 = vmul.f32 1.0614054, %v9206_v36  ;;  %v4346_v62 = vsub.f32 0.0, %v9026_v15  ;;  %v4724_v48 = vadd.f32 %v4723_v30, %v4722_v22 }
 0xaf7   :  { %v9227_v52 = vadd.f32 %v8870_v63, %v8907_v10  ;;  %v4138_v12 = vmul.f32 %v4106_v6, %v9170_v11  ;;  %v3998_v31 = vmul.f32 %v9209_v28, %v9164_v60  ;;  %v9233_v61 = vmul.f32 %v9120_v40, %v4337_v24 }
 0xaf8   :  { %v10244_v9 = vsub.f32 1.0, %v9213_v20  ;;  %v9237_v44 = vadd.f32 %v3180_v58, %v11017_v27  ;;  %v4186_v22 = vmul.f32 %v4154_v43, %v9137_v50  ;;  %v4319_v10 = vmul.f32 %v4287_v56, %v9041_v25  ;;  %v11020_v25 = vld [vmem:[#allocation181_spill] sm:$0xff] }
 0xaf9   :  { %v9240_v59 = vpop.eup %5497  ;;  %v4335_v35 = vmul.f32 %v4303_v4, %v9044_v53  ;;  %v9247_v40 = vadd.f32 %v8889_v18, %v11018_v32  ;;  %v4101_v41 = vadd.f32 -1.4531521, %v4069_v46  ;;  %v4362_v58 = vsub.f32 0.0, %v9035_v13 }
 0xafa   :  { %v5500_v19 = vpop.eup %5499  ;;  %v4378_v30 = vmul.f32 %v4346_v62, %v9026_v15  ;;  %v3683_v6 = vmul.f32 %v9240_v59, %v9199_v45  ;;  %v9256_v43 = vmul.f32 %v8892_v23, %v4724_v48  ;;  %v9259_v53 = vadd.f32 %v3212_v42, %v11020_v25 }
 0xafb   :  { %v9253_v24 = vpop.eup %5501  ;;  %v4170_v56 = vadd.f32 1.4214138, %v4138_v12  ;;  %v3999_v18 = vsub.f32 1.0, %v3998_v31  ;;  %v9264_v46 = vsub.f32 0.0, %v10244_v9  ;;  %v4218_v15 = vadd.f32 -0.28449672, %v4186_v22 }
 0xafc   :  { %11019 = vst [vmem:[#allocation152_spill] sm:$0xff] %v9256_v43  ;;  %v5504_v4 = vpop.eup %5503  ;;  %v3684_v62 = vsub.f32 1.0, %v3683_v6  ;;  %v9266_v27 = vmul.f32 %v5500_v19, %v4319_v10  ;;  %v3923_v42 = vmul.f32 %v9253_v24, %v9204_v3  ;;  %v4133_v12 = vmul.f32 %v4101_v41, %v9206_v36  ;;  %v3345_v19 = vpop.permute.xlu1 %3344 }
 0xafd   :  { %11021 = vst [vmem:[#allocation255_spill] sm:$0xff] %v9259_v53  ;;  %v9268_v32 = vmul.f32 %v5504_v4, %v4335_v35  ;;  %v4394_v31 = vmul.f32 %v4362_v58, %v9035_v13  ;;  %v4411_v25 = vmul.f32 1.442695, %v4378_v30  ;;  %v4202_v9 = vmul.f32 %v4170_v56, %v9170_v11 }
 0xafe   :  { %v3685_v63 = vmul.f32 %v9240_v59, %v3684_v62  ;;  %v4000_v22 = vmul.f32 %v9209_v28, %v3999_v18  ;;  %v4008_v10 = vand.u32 2147483648, %v9164_v60  ;;  %v3924_v35 = vsub.f32 1.0, %v3923_v42  ;;  %v11022_v18 = vld [vmem:[#allocation81_spill] sm:$0xff] }
 0xaff   :  { %v4250_v6 = vmul.f32 %v4218_v15, %v9137_v50  ;;  %vm3687_vm2 = vweird.f32 %v9199_v45  ;;  %vm3688_vm3 = vweird.f32 %v9240_v59  ;;  %v3691_v41 = vand.u32 2147483647, %v9199_v45  ;;  %v3182_v15 = vpop.permute.xlu2 %3181 }
 0xb00   :  { %vm4003_vm4 = vweird.f32 %v9209_v28  ;;  %v3686_v13 = vadd.f32 %v9240_v59, %v3685_v63  ;;  %v3925_v58 = vmul.f32 %v9253_v24, %v3924_v35  ;;  %vm3928_vm5 = vweird.f32 %v9253_v24  ;;  %vm9295_vm8 = vmor %vm3687_vm2, %vm3688_vm3  ;;  %v11025_v35 = vld [vmem:[#allocation165_spill] sm:$0xff] }
 0xb01   :  { %v3693_v30 = vand.u32 2147483648, %v9199_v45  ;;  %vm3927_vm6 = vweird.f32 %v9204_v3  ;;  %v3933_v56 = vand.u32 2147483648, %v9204_v3  ;;  %v9291_v4 = vmul.f32 %v3345_v19, %v11022_v18 }
 0xb02   :  { %vm4545_vm7 = vcmp.ge.f32.partialorder %v8740_v51, 0.0  ;;  %v4001_v62 = vadd.f32 %v9209_v28, %v4000_v22  ;;  %v3926_v42 = vadd.f32 %v9253_v24, %v3925_v58  ;;  %v3931_v45 = vand.u32 2147483647, %v9204_v3  ;;  %vm9308_vm10 = vmor %vm3927_vm6, %vm3928_vm5 }
 0xb03   :  { %v9302_v48 = vmul.f32 %v3345_v19, %v11025_v35  ;;  %v4234_v29 = vadd.f32 -0.28449672, %v4202_v9  ;;  %5505 = vpow2.f32 %v4411_v25  ;;  %vm4002_vm9 = vweird.f32 %v9164_v60 }
 0xb04   :  { %v4006_v18 = vand.u32 2147483647, %v9164_v60  ;;  %v4282_v43 = vadd.f32 0.2548296, %v4250_v6  ;;  %v3690_v3 = vsel %vm9295_vm8, %v9240_v59, %v3686_v13  ;;  %v3930_v9 = vsel %vm9308_vm10, %v9253_v24, %v3926_v42  ;;  %vm9323_vm11 = vmor %vm4002_vm9, %vm4003_vm4 }
 0xb05   :  { %v9319_v25 = vmul.f32 0.70710677, %v9291_v4  ;;  %v4165_v19 = vadd.f32 1.4214138, %v4133_v12  ;;  %v4009_v58 = vor.u32 1.1754944e-38, %v4008_v10  ;;  %v3694_v6 = vor.u32 1.1754944e-38, %v3693_v30 }
 0xb06   :  { %v3934_v35 = vor.u32 1.1754944e-38, %v3933_v56  ;;  %v4005_v59 = vsel %vm9323_vm11, %v9209_v28, %v4001_v62  ;;  %vm3692_vm13 = vcmp.eq.f32.partialorder %v3691_v41, 8.507059e+37  ;;  %vm3932_vm14 = vcmp.eq.f32.partialorder %v3931_v45, 8.507059e+37 }
 0xb07   :  { %v9331_v24 = vmul.f32 0.70710677, %v9302_v48  ;;  %vm4561_vm15 = vcmp.ge.f32.partialorder %v8749_v33, 0.0  ;;  %v4266_v12 = vmul.f32 %v4234_v29, %v9170_v11  ;;  %v9335_v13 = vsel %vm3692_vm13, %v3694_v6, %v3690_v3  ;;  %v9367_v6 = vpop.permute.xlu2 %3213 }
 0xb08   :  { %v9337_v63 = vsel %vm3932_vm14, %v3934_v35, %v3930_v9  ;;  %v9340_v10 = vand.u32 2147483647, %v9319_v25  ;;  %vm4543_vm0 = vcmp.ge.f32.partialorder %v8824_v2, 0.0  ;;  %v4314_v28 = vmul.f32 %v4282_v43, %v9137_v50 }
 0xb09   :  { %v4443_v41 = vmul.f32 1.442695, %v4394_v31  ;;  %vm4007_vm1 = vcmp.eq.f32.partialorder %v4006_v18, 8.507059e+37  ;;  %v9345_v30 = vand.u32 2147483647, %v9331_v24  ;;  %v5506_v56 = vpop.eup %5505  ;;  %v4511_v62 = vsub.f32 1.0, %v9266_v27 }
 0xb0a   :  { %v4527_v29 = vsub.f32 1.0, %v9268_v32  ;;  %vm4559_vm2 = vcmp.ge.f32.partialorder %v8833_v49, 0.0  ;;  %v9350_v42 = vsel %vm4007_vm1, %v4009_v58, %v4005_v59  ;;  %v3522_v45 = vmul.f32 0.3275911, %v9340_v10 }
 0xb0b   :  { %v4197_v22 = vmul.f32 %v4165_v19, %v9206_v36  ;;  %v4064_v50 = vmul.f32 1.0614054, %v9335_v13  ;;  %v4080_v43 = vmul.f32 1.0614054, %v9337_v63  ;;  %v3538_v31 = vmul.f32 0.3275911, %v9345_v30 }
 0xb0c   :  { %v11030_v18 = vsub.f32 1.0, %v9233_v61  ;;  %v11031_v27 = vsub.f32 1.0, %v9213_v20  ;;  %v4298_v9 = vadd.f32 0.2548296, %v4266_v12  ;;  %v9364_v60 = vadd.f32 1.0, %v3522_v45  ;;  %v11035_v45 = vld [vmem:[#allocation14_spill] sm:$0xff] }
 0xb0d   :  { %5507 = vpow2.f32 %v4443_v41  ;;  %v4474_v19 = vmul.f32 %v5506_v56, %v4314_v28  ;;  %v4085_v58 = vmul.f32 1.0614054, %v9350_v42  ;;  %v9369_v35 = vadd.f32 1.0, %v3538_v31 }
 0xb0e   :  { %v4593_v3 = vsub.f32 0.0, %v11030_v18  ;;  %v4609_v32 = vsel %vm4545_vm7, %v11031_v27, %v9264_v46  ;;  %v4575_v59 = vsub.f32 0.0, %v4511_v62  ;;  %v4591_v23 = vsub.f32 0.0, %v4527_v29 }
 0xb0f   :  { %v11032_v18 = vsub.f32 0.0, %v8999_v26  ;;  %5509 = vrcp.f32 %v9364_v60  ;;  %v11033_v51 = vrot.slane %v9216_v55, 1  ;;  %v4229_v12 = vadd.f32 -0.28449672, %v4197_v22 }
 0xb10   :  { %v4096_v28 = vadd.f32 -1.4531521, %v4064_v50  ;;  %v4112_v41 = vadd.f32 -1.4531521, %v4080_v43  ;;  %v4641_v56 = vadd.f32 1.0, %v4609_v32  ;;  %v9381_v31 = vadd.f32 %v3182_v15, %v11035_v45 }
 0xb11   :  { %v4389_v20 = vmul.f32 %v11032_v18, %v8999_v26  ;;  %v9378_v46 = vadd.f32 %v11033_v51, %v9216_v55  ;;  %v4330_v27 = vmul.f32 %v4298_v9, %v9170_v11  ;;  %5511 = vrcp.f32 %v9369_v35 }
 0xb12   :  { %v11036_v26 = vsub.f32 1.0, %v9233_v61  ;;  %v9390_v53 = vmul.f32 0.5, %v8971_v37  ;;  %v4506_v55 = vsub.f32 1.0, %v4474_v19  ;;  %v4117_v22 = vadd.f32 -1.4531521, %v4085_v58 }
 0xb13   :  { %11034 = vst [vmem:[#allocation19_spill] sm:$0xff] %v9378_v46  ;;  %v4607_v50 = vsel %vm4543_vm0, %v4511_v62, %v4575_v59  ;;  %v4433_v43 = vmul.f32 1.442695, %v4389_v20  ;;  %v9395_v15 = vmul.f32 0.5, %v8981_v5  ;;  %v9398_v11 = vmul.f32 0.5, %v8994_v57  ;;  %v5508_v32 = vpop.eup %5507 }
 0xb14   :  { %v4625_v18 = vsel %vm4561_vm15, %v11036_v26, %v4593_v3  ;;  %v4623_v33 = vsel %vm4559_vm2, %v4527_v29, %v4591_v23  ;;  %v4261_v61 = vmul.f32 %v4229_v12, %v9206_v36  ;;  %v4128_v37 = vmul.f32 %v4096_v28, %v9335_v13 }
 0xb15   :  { %v4144_v3 = vmul.f32 %v4112_v41, %v9337_v63  ;;  %v5510_v9 = vpop.eup %5509  ;;  %v9405_v2 = vadd.f32 1.0, %v4625_v18  ;;  %v9408_v62 = vmul.f32 %v4641_v56, %v9095_v14  ;;  %v9410_v5 = vmul.f32 %v5508_v32, %v4330_v27  ;;  %v3358_v41 = vpop.permute.xlu2 %3357 }
 0xb16   :  { %v4352_v57 = vsub.f32 0.0, %v9167_v38  ;;  %vm4538_vm3 = vcmp.ge.f32.partialorder %v9004_v39, 0.0  ;;  %v4570_v49 = vsub.f32 0.0, %v4506_v55  ;;  %v4149_v23 = vmul.f32 %v4117_v22, %v9350_v42 }
 0xb17   :  { %11037 = vst [vmem:[#allocation30_spill] sm:$0xff] %v9408_v62  ;;  %v3713_v29 = vmul.f32 %v5510_v9, %v9364_v60  ;;  %v5512_v19 = vpop.eup %5511  ;;  %v4639_v58 = vadd.f32 1.0, %v4607_v50  ;;  %v9416_v59 = vadd.f32 1.0, %v4623_v33  ;;  %v4373_v20 = vsub.f32 0.0, %v9141_v16 }
 0xb18   :  { %v4368_v14 = vsub.f32 0.0, %v9173_v7  ;;  %v4293_v51 = vadd.f32 0.2548296, %v4261_v61  ;;  %5513 = vpow2.f32 %v4433_v43  ;;  %v4160_v12 = vadd.f32 1.4214138, %v4128_v37 }
 0xb19   :  { %v4176_v28 = vadd.f32 1.4214138, %v4144_v3  ;;  %v4522_v56 = vsub.f32 1.0, %v9410_v5  ;;  %v4384_v45 = vmul.f32 %v4352_v57, %v9167_v38  ;;  %v3714_v27 = vsub.f32 1.0, %v3713_v29 }
 0xb1a   :  { %v3953_v26 = vmul.f32 %v5512_v19, %v9369_v35  ;;  %v4602_v18 = vsel %vm4538_vm3, %v4506_v55, %v4570_v49  ;;  %v4181_v22 = vadd.f32 1.4214138, %v4149_v23  ;;  %v3721_v50 = vand.u32 2147483647, %v9364_v60 }
 0xb1b   :  { %v3723_v32 = vand.u32 2147483648, %v9364_v60  ;;  %v3715_v33 = vmul.f32 %v5510_v9, %v3714_v27  ;;  %vm3718_vm4 = vweird.f32 %v5510_v9  ;;  %v9428_v61 = vmul.f32 %v3358_v41, %v9070_v17 }
 0xb1c   :  { %v3954_v43 = vsub.f32 1.0, %v3953_v26  ;;  %vm4554_vm5 = vcmp.ge.f32.partialorder %v9023_v8, 0.0  ;;  %v4192_v38 = vmul.f32 %v4160_v12, %v9335_v13  ;;  %v4208_v37 = vmul.f32 %v4176_v28, %v9337_v63 }
 0xb1d   :  { %vm3717_vm6 = vweird.f32 %v9364_v60  ;;  %v3963_v39 = vand.u32 2147483648, %v9369_v35  ;;  %v3716_v55 = vadd.f32 %v5510_v9, %v3715_v33  ;;  %vm3958_vm7 = vweird.f32 %v5512_v19 }
 0xb1e   :  { %v3955_v3 = vmul.f32 %v5512_v19, %v3954_v43  ;;  %v3961_v5 = vand.u32 2147483647, %v9369_v35  ;;  %v5514_v57 = vpop.eup %5513  ;;  %v4213_v49 = vmul.f32 %v4181_v22, %v9350_v42  ;;  %vm3719_vm8 = vmor %vm3717_vm6, %vm3718_vm4  ;;  %vm3722_vm9 = vcmp.eq.f32.partialorder %v3721_v50, 8.507059e+37 }
 0xb1f   :  { %v3724_v17 = vor.u32 1.1754944e-38, %v3723_v32  ;;  %v9438_v23 = vmul.f32 %v3358_v41, %v9247_v40  ;;  %v3720_v29 = vsel %vm3719_vm8, %v5510_v9, %v3716_v55  ;;  %vm3957_vm10 = vweird.f32 %v9369_v35 }
 0xb20   :  { %v3956_v12 = vadd.f32 %v5512_v19, %v3955_v3  ;;  %v9442_v60 = vmul.f32 0.70710677, %v9428_v61  ;;  %v4586_v28 = vsub.f32 0.0, %v4522_v56  ;;  %vm3959_vm11 = vmor %vm3957_vm10, %vm3958_vm7  ;;  %v3964_v26 = vor.u32 1.1754944e-38, %v3963_v39 }
 0xb21   :  { %v9444_v27 = vsel %vm3722_vm9, %v3724_v17, %v3720_v29  ;;  %v9447_v22 = vmul.f32 0.70710677, %v9438_v23  ;;  %v4224_v50 = vadd.f32 -0.28449672, %v4192_v38  ;;  %v4240_v32 = vadd.f32 -0.28449672, %v4208_v37 }
 0xb22   :  { %v3960_v33 = vsel %vm3959_vm11, %v5512_v19, %v3956_v12  ;;  %vm3962_vm13 = vcmp.eq.f32.partialorder %v3961_v5, 8.507059e+37  ;;  %v4066_v9 = vmul.f32 1.0614054, %v9444_v27  ;;  %v9453_v35 = vand.u32 2147483647, %v9442_v60 }
 0xb23   :  { %v9449_v40 = vsel %vm3962_vm13, %v3964_v26, %v3960_v33  ;;  %v9456_v41 = vand.u32 2147483647, %v9447_v22  ;;  %v4325_v43 = vmul.f32 %v4293_v51, %v9206_v36  ;;  %v4634_v39 = vadd.f32 1.0, %v4602_v18 }
 0xb24   :  { %v4245_v55 = vadd.f32 -0.28449672, %v4213_v49  ;;  %v4400_v3 = vmul.f32 %v4368_v14, %v9173_v7  ;;  %v9462_v19 = vmul.f32 %v9405_v2, %v9098_v47  ;;  %v4082_v38 = vmul.f32 1.0614054, %v9449_v40 }
 0xb25   :  { %v3524_v37 = vmul.f32 0.3275911, %v9453_v35  ;;  %v3540_v5 = vmul.f32 0.3275911, %v9456_v41  ;;  %v9468_v17 = vmul.f32 %v4639_v58, %v9102_v21  ;;  %v4618_v36 = vsel %vm4554_vm5, %v4522_v56, %v4586_v28 }
 0xb26   :  { %11038 = vst [vmem:[#allocation75_spill] sm:$0xff] %v9462_v19  ;;  %v4256_v51 = vmul.f32 %v4224_v50, %v9335_v13  ;;  %v4423_v18 = vmul.f32 1.442695, %v4384_v45  ;;  %v4272_v7 = vmul.f32 %v4240_v32, %v9337_v63  ;;  %v4098_v14 = vadd.f32 -1.4531521, %v4066_v9 }
 0xb27   :  { %11039 = vst [vmem:[#allocation112_spill] sm:$0xff] %v9468_v17  ;;  %v9474_v47 = vadd.f32 1.0, %v3524_v37  ;;  %v9476_v2 = vadd.f32 1.0, %v3540_v5  ;;  %v9478_v49 = vmul.f32 %v5514_v57, %v4325_v43  ;;  %v9481_v29 = vmul.f32 %v4634_v39, %v9395_v15  ;;  %v11044_v37 = vld [vmem:[#allocation229_spill] sm:$0xff] }
 0xb28   :  { %v4405_v8 = vmul.f32 %v4373_v20, %v9141_v16  ;;  %v4455_v21 = vmul.f32 1.442695, %v4400_v3  ;;  %v4650_v58 = vadd.f32 1.0, %v4618_v36  ;;  %v4277_v56 = vmul.f32 %v4245_v55, %v9350_v42 }
 0xb29   :  { %11040 = vst [vmem:[#allocation184_spill] sm:$0xff] %v9481_v29  ;;  %v4114_v45 = vadd.f32 -1.4531521, %v4082_v38  ;;  %5515 = vrcp.f32 %v9474_v47  ;;  %v9490_v12 = vsel %vm4697_vm12, %v9408_v62, 0.0  ;;  %v9494_v57 = vmul.f32 %v9416_v59, %v9202_v34 }
 0xb2a   :  { %v4288_v15 = vadd.f32 0.2548296, %v4256_v51  ;;  %5517 = vpow2.f32 %v4423_v18  ;;  %v9498_v16 = vsel %vm4697_vm12, %v9462_v19, 0.0  ;;  %v4304_v20 = vadd.f32 0.2548296, %v4272_v7 }
 0xb2b   :  { %11041 = vst [vmem:[#allocation291_spill] sm:$0xff] %v9494_v57  ;;  %v4130_v28 = vmul.f32 %v4098_v14, %v9444_v27  ;;  %5519 = vrcp.f32 %v9476_v2  ;;  %v9504_v26 = vsel %vm4697_vm12, %v9468_v17, 0.0  ;;  %v10247_v50 = vsub.f32 1.0, %v9478_v49 }
 0xb2c   :  { %v4465_v32 = vmul.f32 1.442695, %v4405_v8  ;;  %5521 = vpow2.f32 %v4455_v21  ;;  %v9508_v34 = vmul.f32 %v4650_v58, %v9398_v11  ;;  %v4699_v59 = vsel %vm4697_vm12, %v9481_v29, 0.0 }
 0xb2d   :  { %v4309_v33 = vadd.f32 0.2548296, %v4277_v56  ;;  %v4146_v9 = vmul.f32 %v4114_v45, %v9449_v40  ;;  %v9515_v43 = vsel %vm4697_vm12, %v9494_v57, 0.0  ;;  %v9519_v39 = vadd.f32 %v9367_v6, %v8911_v54  ;;  %v11045_v54 = vld [vmem:[#allocation5_spill] sm:$0xff] }
 0xb2e   :  { %11042 = vst [vmem:[#allocation39_spill] sm:$0xff] %v9508_v34  ;;  %v4320_v55 = vmul.f32 %v4288_v15, %v9335_v13  ;;  %v4354_v3 = vsub.f32 0.0, %v9340_v10  ;;  %v9524_v38 = vmul.f32 0.5, %v9124_v1  ;;  %v9527_v5 = vmul.f32 0.5, %v11044_v37 }
 0xb2f   :  { %v5516_v11 = vpop.eup %5515  ;;  %v4336_v36 = vmul.f32 %v4304_v20, %v9337_v63  ;;  %v4162_v51 = vadd.f32 1.4214138, %v4130_v28  ;;  %v9532_v7 = vsub.f32 0.0, %v10247_v50  ;;  %v9535_v6 = vadd.f32 %v4699_v59, %v11045_v54  ;;  %v3384_v28 = vpop.permute.xlu0 %3383 }
 0xb30   :  { %11043 = vst [vmem:[#allocation54_spill] sm:$0xff] %v9524_v38  ;;  %v5518_v18 = vpop.eup %5517  ;;  %5523 = vpow2.f32 %v4465_v32  ;;  %v3743_v13 = vmul.f32 %v5516_v11, %v9474_v47  ;;  %v4771_v1 = vsel %vm4697_vm12, %v9508_v34, 0.0  ;;  %v4341_v8 = vmul.f32 %v4309_v33, %v9350_v42  ;;  %v3184_v32 = vpop.permute.xlu1 %3183 }
 0xb31   :  { %v5520_v14 = vpop.eup %5519  ;;  %v4178_v21 = vadd.f32 1.4214138, %v4146_v9  ;;  %v4370_v63 = vsub.f32 0.0, %v9345_v30  ;;  %v9542_v56 = vmul.f32 %v5518_v18, %v4320_v55  ;;  %v4386_v45 = vmul.f32 %v4354_v3, %v9340_v10 }
 0xb32   :  { %v5522_v58 = vpop.eup %5521  ;;  %v3744_v15 = vsub.f32 1.0, %v3743_v13  ;;  %v3983_v20 = vmul.f32 %v5520_v14, %v9476_v2  ;;  %v4194_v37 = vmul.f32 %v4162_v51, %v9444_v27  ;;  %vm3747_vm14 = vweird.f32 %v9474_v47 }
 0xb33   :  { %v9546_v59 = vmul.f32 %v5522_v58, %v4336_v36  ;;  %v3753_v42 = vand.u32 2147483648, %v9474_v47  ;;  %vm3748_vm15 = vweird.f32 %v5516_v11  ;;  %v3751_v9 = vand.u32 2147483647, %v9474_v47  ;;  %v11046_v36 = vld [vmem:[#allocation304_spill] sm:$0xff] }
 0xb34   :  { %v3745_v33 = vmul.f32 %v5516_v11, %v3744_v15  ;;  %v3984_v55 = vsub.f32 1.0, %v3983_v20  ;;  %v4210_v10 = vmul.f32 %v4178_v21, %v9449_v40  ;;  %v3993_v3 = vand.u32 2147483648, %v9476_v2  ;;  %v11047_v15 = vld [vmem:[#allocation29_spill] sm:$0xff]  ;;  %vm3749_vm2 = vmor %vm3747_vm14, %vm3748_vm15 }
 0xb35   :  { %v9555_v18 = vmul.f32 %v3384_v28, %v9227_v52  ;;  %v3264_v54 = vadd.f32 %v3184_v32, %v11046_v36  ;;  %vm3988_vm0 = vweird.f32 %v5520_v14  ;;  %v3991_v50 = vand.u32 2147483647, %v9476_v2 }
 0xb36   :  { %v5524_v13 = vpop.eup %5523  ;;  %v3746_v51 = vadd.f32 %v5516_v11, %v3745_v33  ;;  %v3985_v58 = vmul.f32 %v5520_v14, %v3984_v55  ;;  %vm4549_vm1 = vcmp.ge.f32.partialorder %v11047_v15, 0.0  ;;  %v4512_v34 = vsub.f32 1.0, %v9542_v56 }
 0xb37   :  { %v3754_v21 = vor.u32 1.1754944e-38, %v3753_v42  ;;  %vm3987_vm3 = vweird.f32 %v9476_v2  ;;  %v9565_v52 = vmul.f32 0.70710677, %v9555_v18  ;;  %vm3752_vm4 = vcmp.eq.f32.partialorder %v3751_v9, 8.507059e+37 }
 0xb38   :  { %v3750_v20 = vsel %vm3749_vm2, %v5516_v11, %v3746_v51  ;;  %v3986_v32 = vadd.f32 %v5520_v14, %v3985_v58  ;;  %v9567_v33 = vmul.f32 %v3384_v28, %v3264_v54  ;;  %v4226_v55 = vadd.f32 -0.28449672, %v4194_v37  ;;  %vm3989_vm5 = vmor %vm3987_vm3, %vm3988_vm0  ;;  %v11048_v37 = vld [vmem:[#allocation65_spill] sm:$0xff] }
 0xb39   :  { %v9569_v36 = vsel %vm3752_vm4, %v3754_v21, %v3750_v20  ;;  %v3994_v29 = vor.u32 1.1754944e-38, %v3993_v3  ;;  %v9572_v56 = vand.u32 2147483647, %v9565_v52  ;;  %v4528_v47 = vsub.f32 1.0, %v9546_v59 }
 0xb3a   :  { %v4242_v42 = vadd.f32 -0.28449672, %v4210_v10  ;;  %v3990_v2 = vsel %vm3989_vm5, %v5520_v14, %v3986_v32  ;;  %vm3992_vm6 = vcmp.eq.f32.partialorder %v3991_v50, 8.507059e+37  ;;  %v4701_v57 = vrot.slane %v9535_v6, 4 }
 0xb3b   :  { %v4402_v11 = vmul.f32 %v4370_v63, %v9345_v30  ;;  %v9577_v9 = vsel %vm3992_vm6, %v3994_v29, %v3990_v2  ;;  %v3544_v28 = vmul.f32 0.3275911, %v9572_v56  ;;  %v4772_v54 = vadd.f32 %v4771_v1, %v11048_v37 }
 0xb3c   :  { %v4501_v51 = vmul.f32 %v5524_v13, %v4341_v8  ;;  %v4068_v3 = vmul.f32 1.0614054, %v9569_v36  ;;  %v9583_v58 = vmul.f32 0.70710677, %v9567_v33  ;;  %v4576_v59 = vsub.f32 0.0, %v4512_v34  ;;  %v11049_v8 = vld [vmem:[#allocation52_spill] sm:$0xff] }
 0xb3d   :  { %v4258_v14 = vmul.f32 %v4226_v55, %v9444_v27  ;;  %v4427_v50 = vmul.f32 1.442695, %v4386_v45  ;;  %v9586_v10 = vadd.f32 1.0, %v3544_v28  ;;  %v4592_v21 = vsub.f32 0.0, %v4528_v47  ;;  %v11051_v55 = vld [vmem:[#allocation126_spill] sm:$0xff] }
 0xb3e   :  { %v4274_v30 = vmul.f32 %v4242_v42, %v9449_v40  ;;  %v4084_v29 = vmul.f32 1.0614054, %v9577_v9  ;;  %v9591_v63 = vand.u32 2147483647, %v9583_v58  ;;  %v4702_v1 = vadd.f32 %v4701_v57, %v9535_v6  ;;  %v11052_v42 = vld [vmem:[#allocation90_spill] sm:$0xff] }
 0xb3f   :  { %vm4544_vm7 = vcmp.ge.f32.partialorder %v11049_v8, 0.0  ;;  %v4459_v13 = vmul.f32 1.442695, %v4402_v11  ;;  %5525 = vrcp.f32 %v9586_v10  ;;  %v11050_v45 = vsub.f32 1.0, %v9478_v49  ;;  %v11053_v49 = vld [vmem:[#allocation314_spill] sm:$0xff] }
 0xb40   :  { %v4773_v32 = vrot.slane %v4772_v54, 4  ;;  %vm4565_vm8 = vcmp.ge.f32.partialorder %v11051_v55, 0.0  ;;  %vm4560_vm9 = vcmp.ge.f32.partialorder %v11052_v42, 0.0  ;;  %v4100_v2 = vadd.f32 -1.4531521, %v4068_v3 }
 0xb41   :  { %v4613_v20 = vsel %vm4549_vm1, %v11050_v45, %v9532_v7  ;;  %v4533_v28 = vsub.f32 1.0, %v4501_v51  ;;  %v4608_v37 = vsel %vm4544_vm7, %v4512_v34, %v4576_v59  ;;  %v4290_v57 = vadd.f32 0.2548296, %v4258_v14  ;;  %v3352_v51 = vpop.permute.xlu1 %3351 }
 0xb42   :  { %v3528_v6 = vmul.f32 0.3275911, %v9591_v63  ;;  %v4624_v11 = vsel %vm4560_vm9, %v4528_v47, %v4592_v21  ;;  %v4306_v8 = vadd.f32 0.2548296, %v4274_v30  ;;  %5527 = vpow2.f32 %v4427_v50 }
 0xb43   :  { %v4116_v19 = vadd.f32 -1.4531521, %v4084_v29  ;;  %v4703_v17 = vrot.slane %v4702_v1, 2  ;;  %v3440_v62 = vmul.f32 0.5, %v11053_v49  ;;  %5529 = vpow2.f32 %v4459_v13 }
 0xb44   :  { %v9605_v7 = vadd.f32 1.0, %v3528_v6  ;;  %v9607_v15 = vadd.f32 1.0, %v4613_v20  ;;  %v9609_v45 = vadd.f32 %v4773_v32, %v4772_v54  ;;  %v4640_v3 = vadd.f32 1.0, %v4608_v37 }
 0xb45   :  { %v4132_v34 = vmul.f32 %v4100_v2, %v9569_v36  ;;  %v5526_v59 = vpop.eup %5525  ;;  %v4597_v14 = vsub.f32 0.0, %v4533_v28  ;;  %v4656_v47 = vadd.f32 1.0, %v4624_v11  ;;  %v4322_v50 = vmul.f32 %v4290_v57, %v9444_v27  ;;  %v11056_v27 = vld [vmem:[#allocation288_spill] sm:$0xff] }
 0xb46   :  { %11054 = vst [vmem:[#allocation111_spill] sm:$0xff] %v9607_v15  ;;  %5531 = vrcp.f32 %v9605_v7  ;;  %v9615_v21 = vmul.f32 0.5, %v9291_v4  ;;  %v9618_v30 = vmul.f32 0.5, %v9302_v48  ;;  %v4338_v54 = vmul.f32 %v4306_v8, %v9449_v40 }
 0xb47   :  { %v4148_v29 = vmul.f32 %v4116_v19, %v9577_v9  ;;  %v9622_v13 = vadd.f32 %v4703_v17, %v4702_v1  ;;  %v4043_v20 = vmul.f32 %v5526_v59, %v9586_v10  ;;  %v9626_v32 = vmul.f32 %v3352_v51, %v9221_v0 }
 0xb48   :  { %v9629_v42 = vmul.f32 %v3352_v51, %v11056_v27  ;;  %v5528_v2 = vpop.eup %5527  ;;  %v9633_v48 = vmul.f32 %v4640_v3, %v9527_v5  ;;  %v4164_v37 = vadd.f32 1.4214138, %v4132_v34  ;;  %v4356_v40 = vsub.f32 0.0, %v9453_v35 }
 0xb49   :  { %11055 = vst [vmem:[#allocation150_spill] sm:$0xff] %v9622_v13  ;;  %v5530_v19 = vpop.eup %5529  ;;  %v9638_v17 = vsel %vm4565_vm8, %v4533_v28, %v4597_v14  ;;  %v9640_v1 = vmul.f32 %v4656_v47, %v3440_v62  ;;  %v9642_v0 = vmul.f32 %v5528_v2, %v4322_v50  ;;  %v4044_v57 = vsub.f32 1.0, %v4043_v20 }
 0xb4a   :  { %11057 = vst [vmem:[#allocation213_spill] sm:$0xff] %v9633_v48  ;;  %v9644_v6 = vmul.f32 %v5530_v19, %v4338_v54  ;;  %v4180_v11 = vadd.f32 1.4214138, %v4148_v29  ;;  %v4051_v8 = vand.u32 2147483647, %v9586_v10  ;;  %v4053_v5 = vand.u32 2147483648, %v9586_v10 }
 0xb4b   :  { %11058 = vst [vmem:[#allocation73_spill] sm:$0xff] %v9640_v1  ;;  %v4045_v3 = vmul.f32 %v5526_v59, %v4044_v57  ;;  %vm4048_vm10 = vweird.f32 %v5526_v59  ;;  %v9649_v34 = vmul.f32 0.70710677, %v9626_v32  ;;  %v9652_v55 = vmul.f32 0.70710677, %v9629_v42 }
 0xb4c   :  { %v5532_v49 = vpop.eup %5531  ;;  %v4726_v62 = vsel %vm4697_vm12, %v9633_v48, 0.0  ;;  %v4196_v28 = vmul.f32 %v4164_v37, %v9569_v36  ;;  %v4372_v51 = vsub.f32 0.0, %v9456_v41  ;;  %v4388_v14 = vmul.f32 %v4356_v40, %v9453_v35 }
 0xb4d   :  { %v4514_v47 = vsub.f32 1.0, %v9642_v0  ;;  %v4046_v50 = vadd.f32 %v5526_v59, %v4045_v3  ;;  %vm4047_vm11 = vweird.f32 %v9586_v10  ;;  %v3803_v54 = vmul.f32 %v5532_v49, %v9605_v7 }
 0xb4e   :  { %v4530_v29 = vsub.f32 1.0, %v9644_v6  ;;  %vm4049_vm13 = vmor %vm4047_vm11, %vm4048_vm10  ;;  %vm4052_vm14 = vcmp.eq.f32.partialorder %v4051_v8, 8.507059e+37  ;;  %v4054_v20 = vor.u32 1.1754944e-38, %v4053_v5  ;;  %v9664_v27 = vand.u32 2147483647, %v9649_v34 }
 0xb4f   :  { %vm4546_vm15 = vcmp.ge.f32.partialorder %v9319_v25, 0.0  ;;  %vm4562_vm0 = vcmp.ge.f32.partialorder %v9331_v24, 0.0  ;;  %v4212_v35 = vmul.f32 %v4180_v11, %v9577_v9  ;;  %v4050_v2 = vsel %vm4049_vm13, %v5526_v59, %v4046_v50 }
 0xb50   :  { %v3804_v37 = vsub.f32 1.0, %v3803_v54  ;;  %v9670_v10 = vand.u32 2147483647, %v9652_v55  ;;  %v4228_v40 = vadd.f32 -0.28449672, %v4196_v28  ;;  %v9672_v19 = vsel %vm4052_vm14, %v4054_v20, %v4050_v2 }
 0xb51   :  { %v3813_v0 = vand.u32 2147483648, %v9605_v7  ;;  %v3523_v57 = vmul.f32 0.3275911, %v9664_v27  ;;  %vm3808_vm1 = vweird.f32 %v5532_v49  ;;  %v3811_v8 = vand.u32 2147483647, %v9605_v7 }
 0xb52   :  { %v3805_v6 = vmul.f32 %v5532_v49, %v3804_v37  ;;  %v3539_v5 = vmul.f32 0.3275911, %v9670_v10  ;;  %v9679_v11 = vadd.f32 %v4726_v62, %v9504_v26  ;;  %v4404_v59 = vmul.f32 %v4372_v51, %v9456_v41 }
 0xb53   :  { %v4088_v3 = vmul.f32 1.0614054, %v9672_v19  ;;  %v9683_v28 = vadd.f32 1.0, %v3523_v57  ;;  %v4578_v50 = vsub.f32 0.0, %v4514_v47  ;;  %vm3807_vm2 = vweird.f32 %v9605_v7 }
 0xb54   :  { %v3806_v54 = vadd.f32 %v5532_v49, %v3805_v6  ;;  %v9686_v20 = vadd.f32 1.0, %v3539_v5  ;;  %v4594_v2 = vsub.f32 0.0, %v4530_v29  ;;  %v4244_v37 = vadd.f32 -0.28449672, %v4212_v35  ;;  %vm3809_vm3 = vmor %vm3807_vm2, %vm3808_vm1 }
 0xb55   :  { %v3814_v4 = vor.u32 1.1754944e-38, %v3813_v0  ;;  %5533 = vrcp.f32 %v9683_v28  ;;  %v4260_v26 = vmul.f32 %v4228_v40, %v9569_v36  ;;  %v4431_v62 = vmul.f32 1.442695, %v4388_v14 }
 0xb56   :  { %v3810_v41 = vsel %vm3809_vm3, %v5532_v49, %v3806_v54  ;;  %vm3812_vm4 = vcmp.eq.f32.partialorder %v3811_v8, 8.507059e+37  ;;  %v4463_v51 = vmul.f32 1.442695, %v4404_v59  ;;  %v4120_v57 = vadd.f32 -1.4531521, %v4088_v3  ;;  %v3378_v59 = vpop.permute.xlu2 %3377 }
 0xb57   :  { %v9690_v48 = vsel %vm3812_vm4, %v3814_v4, %v3810_v41  ;;  %5535 = vrcp.f32 %v9686_v20  ;;  %v4798_v7 = vsel %vm4697_vm12, %v9640_v1, 0.0  ;;  %v9696_v35 = vmul.f32 0.5, %v9428_v61 }
 0xb58   :  { %v4376_v0 = vsub.f32 0.0, %v9572_v56  ;;  %v4072_v6 = vmul.f32 1.0614054, %v9690_v48  ;;  %v4610_v49 = vsel %vm4546_vm15, %v4514_v47, %v4578_v50  ;;  %v4626_v14 = vsel %vm4562_vm0, %v4530_v29, %v4594_v2 }
 0xb59   :  { %v9705_v4 = vmul.f32 0.5, %v9438_v23  ;;  %v4276_v40 = vmul.f32 %v4244_v37, %v9577_v9  ;;  %v4292_v5 = vadd.f32 0.2548296, %v4260_v26  ;;  %5537 = vpow2.f32 %v4431_v62 }
 0xb5a   :  { %v4104_v61 = vadd.f32 -1.4531521, %v4072_v6  ;;  %v9710_v54 = vadd.f32 %v4798_v7, %v9515_v43  ;;  %5539 = vpow2.f32 %v4463_v51  ;;  %v4152_v25 = vmul.f32 %v4120_v57, %v9672_v19 }
 0xb5b   :  { %v5534_v3 = vpop.eup %5533  ;;  %v3736_v24 = vand.u32 2147483647, %v9683_v28  ;;  %v4642_v47 = vadd.f32 1.0, %v4610_v49  ;;  %v4658_v23 = vadd.f32 1.0, %v4626_v14  ;;  %v4408_v29 = vmul.f32 %v4376_v0, %v9572_v56 }
 0xb5c   :  { %v3728_v50 = vmul.f32 %v5534_v3, %v9683_v28  ;;  %v4308_v37 = vadd.f32 0.2548296, %v4276_v40  ;;  %v4136_v26 = vmul.f32 %v4104_v61, %v9690_v48  ;;  %v4360_v62 = vsub.f32 0.0, %v9591_v63 }
 0xb5d   :  { %v5536_v2 = vpop.eup %5535  ;;  %v9719_v43 = vmul.f32 %v3378_v59, %v9381_v31  ;;  %v4324_v41 = vmul.f32 %v4292_v5, %v9569_v36  ;;  %v4355_v7 = vsub.f32 0.0, %v9664_v27  ;;  %v4184_v6 = vadd.f32 1.4214138, %v4152_v25 }
 0xb5e   :  { %v3729_v51 = vsub.f32 1.0, %v3728_v50  ;;  %v3968_v57 = vmul.f32 %v5536_v2, %v9686_v20  ;;  %vm9724_vm5 = vcmp.eq.f32.partialorder %v3736_v24, 8.507059e+37  ;;  %v3738_v0 = vand.u32 2147483648, %v9683_v28 }
 0xb5f   :  { %v9730_v49 = vmul.f32 %v3378_v59, %v9519_v39  ;;  %v5538_v14 = vpop.eup %5537  ;;  %vm3733_vm6 = vweird.f32 %v5534_v3  ;;  %v3978_v36 = vand.u32 2147483648, %v9686_v20  ;;  %v4168_v61 = vadd.f32 1.4214138, %v4136_v26 }
 0xb60   :  { %v3730_v31 = vmul.f32 %v5534_v3, %v3729_v51  ;;  %v3969_v40 = vsub.f32 1.0, %v3968_v57  ;;  %v5540_v5 = vpop.eup %5539  ;;  %vm3732_vm7 = vweird.f32 %v9683_v28  ;;  %v9735_v25 = vmul.f32 0.70710677, %v9719_v43 }
 0xb61   :  { %v9738_v24 = vmul.f32 0.70710677, %v9730_v49  ;;  %vm3973_vm8 = vweird.f32 %v5536_v2  ;;  %v3976_v39 = vand.u32 2147483647, %v9686_v20  ;;  %vm3734_vm9 = vmor %vm3732_vm7, %vm3733_vm6  ;;  %v3739_v59 = vor.u32 1.1754944e-38, %v3738_v0 }
 0xb62   :  { %v3731_v50 = vadd.f32 %v5534_v3, %v3730_v31  ;;  %v3970_v8 = vmul.f32 %v5536_v2, %v3969_v40  ;;  %vm3972_vm10 = vweird.f32 %v9686_v20  ;;  %v9743_v51 = vand.u32 2147483647, %v9735_v25 }
 0xb63   :  { %v9746_v28 = vand.u32 2147483647, %v9738_v24  ;;  %v4216_v26 = vmul.f32 %v4184_v6, %v9672_v19  ;;  %v3979_v46 = vor.u32 1.1754944e-38, %v3978_v36  ;;  %v4200_v31 = vmul.f32 %v4168_v61, %v9690_v48  ;;  %vm3974_vm11 = vmor %vm3972_vm10, %vm3973_vm8 }
 0xb64   :  { %v3735_v57 = vsel %vm3734_vm9, %v5534_v3, %v3731_v50  ;;  %v3971_v1 = vadd.f32 %v5536_v2, %v3970_v8  ;;  %v3527_v20 = vmul.f32 0.3275911, %v9743_v51  ;;  %v4392_v38 = vmul.f32 %v4360_v62, %v9591_v63 }
 0xb65   :  { %v9752_v40 = vsel %vm9724_vm5, %v3739_v59, %v3735_v57  ;;  %v3543_v0 = vmul.f32 0.3275911, %v9746_v28  ;;  %vm3977_vm13 = vcmp.eq.f32.partialorder %v3976_v39, 8.507059e+37  ;;  %v4371_v8 = vsub.f32 0.0, %v9670_v10 }
 0xb66   :  { %v3975_v13 = vsel %vm3974_vm11, %v5536_v2, %v3971_v1  ;;  %v4067_v6 = vmul.f32 1.0614054, %v9752_v40  ;;  %v9761_v36 = vadd.f32 1.0, %v3527_v20  ;;  %v9766_v61 = vmul.f32 %v4642_v47, %v9615_v21 }
 0xb67   :  { %v9758_v3 = vsel %vm3977_vm13, %v3979_v46, %v3975_v13  ;;  %v9763_v56 = vadd.f32 1.0, %v3543_v0  ;;  %v9769_v50 = vmul.f32 %v4658_v23, %v9618_v30  ;;  %v4248_v2 = vadd.f32 -0.28449672, %v4216_v26  ;;  %v11063_v23 = vld [vmem:[#allocation255_spill] sm:$0xff] }
 0xb68   :  { %11061 = vst [vmem:[#allocation87_spill] sm:$0xff] %v9766_v61  ;;  %v4083_v63 = vmul.f32 1.0614054, %v9758_v3  ;;  %v4099_v1 = vadd.f32 -1.4531521, %v4067_v6  ;;  %v4387_v46 = vmul.f32 %v4355_v7, %v9664_v27  ;;  %5541 = vrcp.f32 %v9761_v36 }
 0xb69   :  { %11062 = vst [vmem:[#allocation319_spill] sm:$0xff] %v9769_v50  ;;  %v4232_v62 = vadd.f32 -0.28449672, %v4200_v31  ;;  %v4340_v13 = vmul.f32 %v4308_v37, %v9577_v9  ;;  %v4471_v39 = vmul.f32 1.442695, %v4408_v29  ;;  %v9776_v21 = vmul.f32 %v5538_v14, %v4324_v41 }
 0xb6a   :  { %v4115_v59 = vadd.f32 -1.4531521, %v4083_v63  ;;  %v4131_v57 = vmul.f32 %v4099_v1, %v9752_v40  ;;  %v4439_v47 = vmul.f32 1.442695, %v4392_v38  ;;  %v4403_v30 = vmul.f32 %v4371_v8, %v9670_v10 }
 0xb6b   :  { %5543 = vrcp.f32 %v9763_v56  ;;  %v9782_v26 = vmul.f32 0.5, %v9555_v18  ;;  %v9787_v9 = vsel %vm4697_vm12, %v9766_v61, 0.0  ;;  %v4280_v29 = vmul.f32 %v4248_v2, %v9672_v19  ;;  %v3371_v2 = vpop.permute.xlu1 %3370 }
 0xb6c   :  { %v4147_v27 = vmul.f32 %v4115_v59, %v9758_v3  ;;  %v4163_v7 = vadd.f32 1.4214138, %v4131_v57  ;;  %v4264_v38 = vmul.f32 %v4232_v62, %v9690_v48  ;;  %v4429_v37 = vmul.f32 1.442695, %v4387_v46 }
 0xb6d   :  { %v9793_v10 = vsel %vm4697_vm12, %v9769_v50, 0.0  ;;  %5545 = vpow2.f32 %v4471_v39  ;;  %v9796_v31 = vmul.f32 %v5540_v5, %v4340_v13  ;;  %v4461_v0 = vmul.f32 1.442695, %v4403_v30 }
 0xb6e   :  { %v4179_v41 = vadd.f32 1.4214138, %v4147_v27  ;;  %v4195_v18 = vmul.f32 %v4163_v7, %v9752_v40  ;;  %v5542_v14 = vpop.eup %5541  ;;  %5547 = vpow2.f32 %v4439_v47  ;;  %v3798_v1 = vand.u32 2147483648, %v9761_v36 }
 0xb6f   :  { %v3788_v63 = vmul.f32 %v5542_v14, %v9761_v36  ;;  %v4312_v46 = vadd.f32 0.2548296, %v4280_v29  ;;  %v4296_v39 = vadd.f32 0.2548296, %v4264_v38  ;;  %5549 = vpow2.f32 %v4429_v37 }
 0xb70   :  { %v4211_v6 = vmul.f32 %v4179_v41, %v9758_v3  ;;  %v4227_v8 = vadd.f32 -0.28449672, %v4195_v18  ;;  %v4359_v59 = vsub.f32 0.0, %v9743_v51  ;;  %v4375_v47 = vsub.f32 0.0, %v9746_v28 }
 0xb71   :  { %v5544_v62 = vpop.eup %5543  ;;  %v3789_v13 = vsub.f32 1.0, %v3788_v63  ;;  %vm3792_vm14 = vweird.f32 %v9761_v36  ;;  %v3796_v27 = vand.u32 2147483647, %v9761_v36  ;;  %v9809_v7 = vmul.f32 %v3371_v2, %v9237_v44 }
 0xb72   :  { %v4243_v5 = vadd.f32 -0.28449672, %v4211_v6  ;;  %v4028_v57 = vmul.f32 %v5544_v62, %v9763_v56  ;;  %v4259_v30 = vmul.f32 %v4227_v8, %v9752_v40  ;;  %vm3793_vm15 = vweird.f32 %v5542_v14 }
 0xb73   :  { %v9811_v29 = vpop.eup %5545  ;;  %v3790_v38 = vmul.f32 %v5542_v14, %v3789_v13  ;;  %v3799_v37 = vor.u32 1.1754944e-38, %v3798_v1  ;;  %v4036_v6 = vand.u32 2147483647, %v9763_v56  ;;  %v4038_v63 = vand.u32 2147483648, %v9763_v56  ;;  %vm3794_vm1 = vmor %vm3792_vm14, %vm3793_vm15 }
 0xb74   :  { %v4029_v41 = vsub.f32 1.0, %v4028_v57  ;;  %v5548_v18 = vpop.eup %5547  ;;  %v9816_v8 = vmul.f32 %v3371_v2, %v11063_v23  ;;  %v9819_v20 = vmul.f32 0.70710677, %v9809_v7  ;;  %v4275_v44 = vmul.f32 %v4243_v5, %v9758_v3 }
 0xb75   :  { %v3791_v50 = vadd.f32 %v5542_v14, %v3790_v38  ;;  %vm4033_vm0 = vweird.f32 %v5544_v62  ;;  %v5550_v13 = vpop.eup %5549  ;;  %v4291_v15 = vadd.f32 0.2548296, %v4259_v30  ;;  %5551 = vpow2.f32 %v4461_v0 }
 0xb76   :  { %11064 = vst [vmem:[#allocation138_spill] sm:$0xff] %v9819_v20  ;;  %v4030_v61 = vmul.f32 %v5544_v62, %v4029_v41  ;;  %v9826_v1 = vmul.f32 0.70710677, %v9816_v8  ;;  %v9829_v23 = vand.u32 2147483647, %v9819_v20  ;;  %vm4548_vm2 = vcmp.ge.f32.partialorder %v9442_v60, 0.0 }
 0xb77   :  { %v3795_v2 = vsel %vm3794_vm1, %v5542_v14, %v3791_v50  ;;  %vm3797_vm3 = vcmp.eq.f32.partialorder %v3796_v27, 8.507059e+37  ;;  %vm4032_vm4 = vweird.f32 %v9763_v56  ;;  %v4039_v0 = vor.u32 1.1754944e-38, %v4038_v63 }
 0xb78   :  { %v4031_v5 = vadd.f32 %v5544_v62, %v4030_v61  ;;  %v9833_v57 = vsel %vm3797_vm3, %v3799_v37, %v3795_v2  ;;  %vm4034_vm5 = vmor %vm4032_vm4, %vm4033_vm0  ;;  %v9836_v36 = vand.u32 2147483647, %v9826_v1  ;;  %v3526_v30 = vmul.f32 0.3275911, %v9829_v23 }
 0xb79   :  { %v4307_v38 = vadd.f32 0.2548296, %v4275_v44  ;;  %vm4037_vm6 = vcmp.eq.f32.partialorder %v4036_v6, 8.507059e+37  ;;  %v4071_v20 = vmul.f32 1.0614054, %v9833_v57  ;;  %v4323_v50 = vmul.f32 %v4291_v15, %v9752_v40 }
 0xb7a   :  { %v4035_v41 = vsel %vm4034_vm5, %v5544_v62, %v4031_v5  ;;  %v3542_v56 = vmul.f32 0.3275911, %v9836_v36  ;;  %v9844_v61 = vadd.f32 1.0, %v3526_v30  ;;  %v4532_v27 = vsub.f32 1.0, %v9796_v31 }
 0xb7b   :  { %v9841_v14 = vsel %vm4037_vm6, %v4039_v0, %v4035_v41  ;;  %vm4564_vm7 = vcmp.ge.f32.partialorder %v9447_v22, 0.0  ;;  %v11065_v37 = vsub.f32 1.0, %v9776_v21  ;;  %v4103_v6 = vadd.f32 -1.4531521, %v4071_v20  ;;  %v5552_v44 = vpop.eup %5551 }
 0xb7c   :  { %v4087_v62 = vmul.f32 1.0614054, %v9841_v14  ;;  %v4344_v2 = vmul.f32 %v4312_v46, %v9672_v19  ;;  %v4391_v15 = vmul.f32 %v4359_v59, %v9743_v51  ;;  %v9853_v40 = vadd.f32 1.0, %v3542_v56 }
 0xb7d   :  { %v4580_v63 = vsub.f32 0.0, %v11065_v37  ;;  %5553 = vrcp.f32 %v9844_v61  ;;  %v4328_v5 = vmul.f32 %v4296_v39, %v9690_v48  ;;  %v4339_v31 = vmul.f32 %v4307_v38, %v9758_v3 }
 0xb7e   :  { %v4119_v0 = vadd.f32 -1.4531521, %v4087_v62  ;;  %v4135_v30 = vmul.f32 %v4103_v6, %v9833_v57  ;;  %v9860_v41 = vmul.f32 0.5, %v9567_v33  ;;  %v4483_v20 = vmul.f32 %v5550_v13, %v4323_v50 }
 0xb7f   :  { %v4407_v37 = vmul.f32 %v4375_v47, %v9746_v28  ;;  %5555 = vrcp.f32 %v9853_v40  ;;  %v9866_v19 = vadd.f32 %v9787_v9, %v9490_v12  ;;  %v9870_v48 = vadd.f32 %v9793_v10, %v9498_v16 }
 0xb80   :  { %v4151_v51 = vmul.f32 %v4119_v0, %v9841_v14  ;;  %v4167_v3 = vadd.f32 1.4214138, %v4135_v30  ;;  %v4596_v46 = vsub.f32 0.0, %v4532_v27  ;;  %v11066_v33 = vsub.f32 1.0, %v9776_v21 }
 0xb81   :  { %v9878_v28 = vmul.f32 %v9811_v29, %v4344_v2  ;;  %v4437_v59 = vmul.f32 1.442695, %v4391_v15  ;;  %v9880_v47 = vmul.f32 %v5548_v18, %v4328_v5  ;;  %v4499_v12 = vmul.f32 %v5552_v44, %v4339_v31 }
 0xb82   :  { %v4612_v39 = vsel %vm4548_vm2, %v11066_v33, %v4580_v63  ;;  %v4183_v9 = vadd.f32 1.4214138, %v4151_v51  ;;  %v4199_v16 = vmul.f32 %v4167_v3, %v9833_v57  ;;  %v9884_v13 = vmul.f32 0.5, %v9626_v32 }
 0xb83   :  { %v5554_v10 = vpop.eup %5553  ;;  %v9887_v38 = vmul.f32 0.5, %v9629_v42  ;;  %v4515_v21 = vsub.f32 1.0, %v4483_v20  ;;  %v4469_v60 = vmul.f32 1.442695, %v4407_v37  ;;  %v9889_v50 = vadd.f32 1.0, %v4612_v39 }
 0xb84   :  { %v4215_v29 = vmul.f32 %v4183_v9, %v9841_v14  ;;  %v4231_v56 = vadd.f32 -0.28449672, %v4199_v16  ;;  %v3773_v18 = vmul.f32 %v5554_v10, %v9844_v61  ;;  %v9895_v62 = vsel %vm4564_vm7, %v4532_v27, %v4596_v46 }
 0xb85   :  { %v5556_v63 = vpop.eup %5555  ;;  %v4536_v32 = vsub.f32 1.0, %v9878_v28  ;;  %vm4547_vm8 = vcmp.ge.f32.partialorder %v9649_v34, 0.0  ;;  %5557 = vpow2.f32 %v4437_v59  ;;  %v4520_v42 = vsub.f32 1.0, %v9880_v47 }
 0xb86   :  { %v4531_v6 = vsub.f32 1.0, %v4499_v12  ;;  %vm4563_vm9 = vcmp.ge.f32.partialorder %v9652_v55, 0.0  ;;  %v4247_v44 = vadd.f32 -0.28449672, %v4215_v29  ;;  %v4263_v2 = vmul.f32 %v4231_v56, %v9833_v57 }
 0xb87   :  { %v4579_v15 = vsub.f32 0.0, %v4515_v21  ;;  %5559 = vpow2.f32 %v4469_v60  ;;  %v3774_v5 = vsub.f32 1.0, %v3773_v18  ;;  %v4013_v22 = vmul.f32 %v5556_v63, %v9853_v40 }
 0xb88   :  { %v4279_v27 = vmul.f32 %v4247_v44, %v9841_v14  ;;  %v4295_v31 = vadd.f32 0.2548296, %v4263_v2  ;;  %vm3777_vm10 = vweird.f32 %v9844_v61  ;;  %v3781_v0 = vand.u32 2147483647, %v9844_v61 }
 0xb89   :  { %v3775_v30 = vmul.f32 %v5554_v10, %v3774_v5  ;;  %vm3778_vm11 = vweird.f32 %v5554_v10  ;;  %v3783_v20 = vand.u32 2147483648, %v9844_v61  ;;  %v4014_v37 = vsub.f32 1.0, %v4013_v22 }
 0xb8a   :  { %v4595_v51 = vsub.f32 0.0, %v4531_v6  ;;  %v4311_v3 = vadd.f32 0.2548296, %v4279_v27  ;;  %v4327_v46 = vmul.f32 %v4295_v31, %v9833_v57  ;;  %v4023_v33 = vand.u32 2147483648, %v9853_v40  ;;  %vm3779_vm0 = vmor %vm3777_vm10, %vm3778_vm11 }
 0xb8b   :  { %v5558_v39 = vpop.eup %5557  ;;  %v3776_v59 = vadd.f32 %v5554_v10, %v3775_v30  ;;  %v4015_v12 = vmul.f32 %v5556_v63, %v4014_v37  ;;  %vm4018_vm13 = vweird.f32 %v5556_v63  ;;  %v4021_v9 = vand.u32 2147483647, %v9853_v40 }
 0xb8c   :  { %vm4568_vm14 = vcmp.ge.f32.partialorder %v9565_v52, 0.0  ;;  %vm4552_vm15 = vcmp.ge.f32.partialorder %v9583_v58, 0.0  ;;  %v4611_v16 = vsel %vm4547_vm8, %v4515_v21, %v4579_v15  ;;  %v4343_v60 = vmul.f32 %v4311_v3, %v9841_v14 }
 0xb8d   :  { %v4487_v29 = vmul.f32 %v5558_v39, %v4327_v46  ;;  %v4358_v57 = vsub.f32 0.0, %v9829_v23  ;;  %v5560_v56 = vpop.eup %5559  ;;  %v3780_v18 = vsel %vm3779_vm0, %v5554_v10, %v3776_v59  ;;  %v3784_v44 = vor.u32 1.1754944e-38, %v3783_v20 }
 0xb8e   :  { %v4016_v2 = vadd.f32 %v5556_v63, %v4015_v12  ;;  %vm4017_vm1 = vweird.f32 %v9853_v40  ;;  %v4503_v5 = vmul.f32 %v5560_v56, %v4343_v60  ;;  %vm3782_vm2 = vcmp.eq.f32.partialorder %v3781_v0, 8.507059e+37 }
 0xb8f   :  { %v4519_v22 = vsub.f32 1.0, %v4487_v29  ;;  %vm4019_vm3 = vmor %vm4017_vm1, %vm4018_vm13  ;;  %v4024_v34 = vor.u32 1.1754944e-38, %v4023_v33  ;;  %v4627_v14 = vsel %vm4563_vm9, %v4531_v6, %v4595_v51  ;;  %v9923_v21 = vsel %vm3782_vm2, %v3784_v44, %v3780_v18 }
 0xb90   :  { %v4020_v61 = vsel %vm4019_vm3, %v5556_v63, %v4016_v2  ;;  %vm4022_vm4 = vcmp.eq.f32.partialorder %v4021_v9, 8.507059e+37  ;;  %v4535_v15 = vsub.f32 1.0, %v4503_v5  ;;  %v4374_v31 = vsub.f32 0.0, %v9836_v36 }
 0xb91   :  { %v4583_v27 = vsub.f32 0.0, %v4519_v22  ;;  %v9925_v10 = vsel %vm4022_vm4, %v4024_v34, %v4020_v61  ;;  %v4600_v40 = vsub.f32 0.0, %v4536_v32  ;;  %v4584_v0 = vsub.f32 0.0, %v4520_v42 }
 0xb92   :  { %v4070_v30 = vmul.f32 1.0614054, %v9923_v21  ;;  %v4086_v55 = vmul.f32 1.0614054, %v9925_v10  ;;  %v4643_v6 = vadd.f32 1.0, %v4611_v16  ;;  %v4659_v20 = vadd.f32 1.0, %v4627_v14 }
 0xb93   :  { %v4599_v63 = vsub.f32 0.0, %v4535_v15  ;;  %v4390_v37 = vmul.f32 %v4358_v57, %v9829_v23  ;;  %vm4551_vm5 = vcmp.ge.f32.partialorder %v9735_v25, 0.0  ;;  %vm4567_vm6 = vcmp.ge.f32.partialorder %v9738_v24, 0.0 }
 0xb94   :  { %v4102_v51 = vadd.f32 -1.4531521, %v4070_v30  ;;  %v4118_v3 = vadd.f32 -1.4531521, %v4086_v55  ;;  %v4660_v46 = vadd.f32 1.0, %v9895_v62  ;;  %v4615_v33 = vsel %vm4551_vm5, %v4519_v22, %v4583_v27 }
 0xb95   :  { %v4631_v39 = vsel %vm4567_vm6, %v4535_v15, %v4599_v63  ;;  %v4406_v59 = vmul.f32 %v4374_v31, %v9836_v36  ;;  %v4632_v12 = vsel %vm4568_vm14, %v4536_v32, %v4600_v40  ;;  %v4616_v25 = vsel %vm4552_vm15, %v4520_v42, %v4584_v0 }
 0xb96   :  { %v4134_v24 = vmul.f32 %v4102_v51, %v9923_v21  ;;  %v4150_v23 = vmul.f32 %v4118_v3, %v9925_v10  ;;  %v9951_v62 = vmul.f32 %v9889_v50, %v9696_v35  ;;  %v9954_v36 = vmul.f32 %v4643_v6, %v9884_v13  ;;  %v9965_v35 = vld [vmem:[%s10191_s3] ss:$0 sm:$0xff]  ;;  %s5651_s3 = smov 3  }
 0xb97   :  { %v9957_v28 = vmul.f32 %v4659_v20, %v9887_v38  ;;  %v4435_v52 = vmul.f32 1.442695, %v4390_v37  ;;  %v4647_v32 = vadd.f32 1.0, %v4615_v33  ;;  %v4663_v47 = vadd.f32 1.0, %v4631_v39  ;;  %4963 = vperm.xlu0 %5424, %v9965_v35  }
 0xb98   :  { %v4166_v9 = vadd.f32 1.4214138, %v4134_v24  ;;  %v4182_v58 = vadd.f32 1.4214138, %v4150_v23  ;;  %v9960_v42 = vmul.f32 %v4660_v46, %v9705_v4  ;;  %v4664_v16 = vadd.f32 1.0, %v4632_v12 }
 0xb99   :  { %v4648_v60 = vadd.f32 1.0, %v4616_v25  ;;  %v4467_v29 = vmul.f32 1.442695, %v4406_v59  ;;  %v3431_v13 = vmul.f32 0.5, %v9719_v43  ;;  %v3447_v38 = vmul.f32 0.5, %v9730_v49 }
 0xb9a   :  { %v4198_v50 = vmul.f32 %v4166_v9, %v9923_v21  ;;  %v4214_v57 = vmul.f32 %v4182_v58, %v9925_v10  ;;  %v4744_v4 = vsel %vm4697_vm12, %v9951_v62, 0.0  ;;  %v4743_v56 = vsel %vm4697_vm12, %v9954_v36, 0.0 }
 0xb9b   :  { %v4815_v18 = vsel %vm4697_vm12, %v9957_v28, 0.0  ;;  %5561 = vpow2.f32 %v4435_v52  ;;  %v9978_v44 = vmul.f32 %v4647_v32, %v3431_v13  ;;  %v9980_v43 = vmul.f32 %v4663_v47, %v3447_v38  ;;  %v11073_v13 = vld [vmem:[#allocation54_spill] sm:$0xff] }
 0xb9c   :  { %v4230_v49 = vadd.f32 -0.28449672, %v4198_v50  ;;  %v4246_v2 = vadd.f32 -0.28449672, %v4214_v57  ;;  %v4816_v5 = vsel %vm4697_vm12, %v9960_v42, 0.0  ;;  %v9985_v22 = vmul.f32 %v4664_v16, %v9782_v26  ;;  %v11071_v16 = vld [vmem:[#allocation111_spill] sm:$0xff] }
 0xb9d   :  { %v9988_v34 = vmul.f32 %v4648_v60, %v9860_v41  ;;  %5563 = vpow2.f32 %v4467_v29  ;;  %v4745_v14 = vadd.f32 %v4744_v4, %v4743_v56  ;;  %v4817_v61 = vadd.f32 %v4816_v5, %v4815_v18 }
 0xb9e   :  { %v4262_v15 = vmul.f32 %v4230_v49, %v9923_v21  ;;  %v4278_v27 = vmul.f32 %v4246_v2, %v9925_v10  ;;  %v11067_v31 = vrot.slane %v9679_v11, 4  ;;  %v11068_v0 = vrot.slane %v9710_v54, 4 }
 0xb9f   :  { %v4737_v26 = vrot.slane %v9866_v19, 4  ;;  %v4809_v41 = vrot.slane %v9870_v48, 4  ;;  %v4761_v55 = vsel %vm4697_vm12, %v9978_v44, 0.0  ;;  %v4833_v6 = vsel %vm4697_vm12, %v9980_v43, 0.0 }
 0xba0   :  { %v4729_v40 = vadd.f32 %v11067_v31, %v9679_v11  ;;  %v4801_v30 = vadd.f32 %v11068_v0, %v9710_v54  ;;  %v4294_v20 = vadd.f32 0.2548296, %v4262_v15  ;;  %v4310_v63 = vadd.f32 0.2548296, %v4278_v27  ;;  %v11074_v0 = vld [vmem:[#allocation138_spill] sm:$0xff] }
 0xba1   :  { %v5562_v37 = vpop.eup %5561  ;;  %v11069_v11 = vrot.slane %v9609_v45, 2  ;;  %v4661_v3 = vadd.f32 1.0, %v9638_v17  ;;  %v4834_v54 = vsel %vm4697_vm12, %v9985_v22, 0.0  ;;  %v4762_v46 = vsel %vm4697_vm12, %v9988_v34, 0.0 }
 0xba2   :  { %v4746_v33 = vrot.slane %v4745_v14, 4  ;;  %v4818_v39 = vrot.slane %v4817_v61, 4  ;;  %v4326_v59 = vmul.f32 %v4294_v20, %v9923_v21  ;;  %v4342_v12 = vmul.f32 %v4310_v63, %v9925_v10  ;;  %v11072_v10 = vld [vmem:[#allocation150_spill] sm:$0xff] }
 0xba3   :  { %v4776_v51 = vadd.f32 %v11069_v11, %v9609_v45  ;;  %v5564_v25 = vpop.eup %5563  ;;  %v4730_v24 = vrot.slane %v4729_v40, 2  ;;  %v4802_v23 = vrot.slane %v4801_v30, 2  ;;  %v4763_v52 = vadd.f32 %v4762_v46, %v4761_v55 }
 0xba4   :  { %v4835_v32 = vadd.f32 %v4834_v54, %v4833_v6  ;;  %v11070_v45 = vmov 7   ;;  %v4738_v17 = vadd.f32 %v4737_v26, %v9866_v19  ;;  %v4810_v47 = vadd.f32 %v4809_v41, %v9870_v48 }
 0xba5   :  { %5429 = vset.pattern.permute.xlu0 %v11070_v45  ;;  %v4486_v9 = vmul.f32 %v5562_v37, %v4326_v59  ;;  %v4502_v58 = vmul.f32 %v5564_v25, %v4342_v12  ;;  %v10020_v21 = vmul.f32 %v11071_v16, %v9390_v53  ;;  %v4705_v60 = vrot.slane %v11072_v10, 1 }
 0xba6   :  { %4918 = vperm.xlu0 %5429, %v9965_v35   ;;  %v4777_v29 = vrot.slane %v4776_v51, 1  ;;  %v10024_v38 = vmul.f32 %v4661_v3, %v11073_v13  ;;  %v4747_v50 = vadd.f32 %v4746_v33, %v4745_v14  ;;  %v4819_v57 = vadd.f32 %v4818_v39, %v4817_v61 }
 0xba7   :  { %v4518_v4 = vsub.f32 1.0, %v4486_v9  ;;  %v4534_v19 = vsub.f32 1.0, %v4502_v58  ;;  %v4731_v56 = vadd.f32 %v4730_v24, %v4729_v40  ;;  %v4803_v48 = vadd.f32 %v4802_v23, %v4801_v30  ;;  %v11077_v9 = vld [vmem:[#allocation168_spill] sm:$0xff] }
 0xba8   :  { %v4764_v18 = vrot.slane %v4763_v52, 4  ;;  %v4836_v49 = vrot.slane %v4835_v32, 4  ;;  %v4739_v2 = vrot.slane %v4738_v17, 2  ;;  %v4811_v5 = vrot.slane %v4810_v47, 2 }
 0xba9   :  { %v4582_v15 = vsub.f32 0.0, %v4518_v4  ;;  %v4598_v27 = vsub.f32 0.0, %v4534_v19  ;;  %v3430_v53 = vmul.f32 0.5, %v9809_v7  ;;  %v3446_v31 = vmul.f32 0.5, %v9816_v8 }
 0xbaa   :  { %vm4550_vm7 = vcmp.ge.f32.partialorder %v11074_v0, 0.0  ;;  %vm4566_vm8 = vcmp.ge.f32.partialorder %v9826_v1, 0.0  ;;  %v4748_v14 = vrot.slane %v4747_v50, 2  ;;  %v4820_v61 = vrot.slane %v4819_v57, 2  ;;  %v11079_v0 = vld [vmem:[#allocation11_spill] sm:$0xff] }
 0xbab   :  { %v4614_v26 = vsel %vm4550_vm7, %v4518_v4, %v4582_v15  ;;  %v4630_v41 = vsel %vm4566_vm8, %v4534_v19, %v4598_v27  ;;  %v4765_v40 = vadd.f32 %v4764_v18, %v4763_v52  ;;  %v4837_v30 = vadd.f32 %v4836_v49, %v4835_v32 }
 0xbac   :  { %v4646_v55 = vadd.f32 1.0, %v4614_v26  ;;  %v4662_v6 = vadd.f32 1.0, %v4630_v41  ;;  %v4752_v20 = vsel %vm4697_vm12, %v10020_v21, 0.0  ;;  %v4706_v63 = vadd.f32 %v4705_v60, %v11072_v10 }
 0xbad   :  { %v4732_v7 = vrot.slane %v4731_v56, 1  ;;  %v4812_v37 = vadd.f32 %v4811_v5, %v4810_v47  ;;  %v11075_v8 = vmov 0   ;;  %v4804_v11 = vrot.slane %v4803_v48, 1  ;;  %v11076_v47 = vld [vmem:[#allocation19_spill] sm:$0xff] }
 0xbae   :  { %5431 = vset.pattern.permute.xlu0 %v11075_v8  ;;  %v4740_v3 = vadd.f32 %v4739_v2, %v4738_v17  ;;  %v10034_v1 = vmul.f32 %v4646_v55, %v3430_v53  ;;  %v10036_v54 = vmul.f32 %v4662_v6, %v3446_v31  ;;  %v4778_v46 = vadd.f32 %v4777_v29, %v4776_v51  ;;  %v11078_v53 = vld [vmem:[#allocation63_spill] sm:$0xff] }
 0xbaf   :  { %v4824_v33 = vsel %vm4697_vm12, %v10024_v38, 0.0  ;;  %v4749_v39 = vadd.f32 %v4748_v14, %v4747_v50  ;;  %v4821_v59 = vadd.f32 %v4820_v61, %v4819_v57  ;;  %v4766_v12 = vrot.slane %v4765_v40, 2 }
 0xbb0   :  { %v4838_v25 = vrot.slane %v4837_v30, 2  ;;  %v4753_v24 = vsel %vm4697_vm12, %v10034_v1, 0.0  ;;  %v4825_v23 = vsel %vm4697_vm12, %v10036_v54, 0.0  ;;  %v4733_v52 = vadd.f32 %v4732_v7, %v4731_v56  ;;  %v11080_v7 = vld [vmem:[#allocation152_spill] sm:$0xff] }
 0xbb1   :  { %v4813_v32 = vrot.slane %v4812_v37, 1  ;;  %v4754_v45 = vadd.f32 %v4753_v24, %v4752_v20  ;;  %v4826_v17 = vadd.f32 %v4825_v23, %v4824_v33  ;;  %v4859_v51 = vmul.f32 %v11077_v9, %v11076_v47 }
 0xbb2   :  { %v4849_v58 = vmul.f32 %v11077_v9, %v4706_v63  ;;  %v4805_v16 = vadd.f32 %v4804_v11, %v4803_v48  ;;  %v4741_v10 = vrot.slane %v4740_v3, 1  ;;  %v4857_v60 = vmul.f32 %v11077_v9, %v4778_v46 }
 0xbb3   :  { %v4755_v29 = vrot.slane %v4754_v45, 4  ;;  %v4827_v13 = vrot.slane %v4826_v17, 4  ;;  %vm4881_vm9 = vcmask 1041409   ;;  %v4750_v50 = vrot.slane %v4749_v39, 1 }
 0xbb4   :  { %v4822_v57 = vrot.slane %v4821_v59, 1  ;;  %v4839_v4 = vadd.f32 %v4838_v25, %v4837_v30  ;;  %v4767_v19 = vadd.f32 %v4766_v12, %v4765_v40  ;;  %v4852_v56 = vmul.f32 %v11077_v9, %v4733_v52 }
 0xbb5   :  { %v4814_v18 = vadd.f32 %v4813_v32, %v4812_v37  ;;  %v4756_v49 = vadd.f32 %v4755_v29, %v4754_v45  ;;  %v4828_v2 = vadd.f32 %v4827_v13, %v4826_v17  ;;  %v4860_v5 = vmul.f32 %v11077_v9, %v4805_v16 }
 0xbb6   :  { %v4742_v15 = vadd.f32 %v4741_v10, %v4740_v3  ;;  %vm4883_vm10 = vcmask 1042434   ;;  %vm4885_vm11 = vcmask 1043459   ;;  %v4895_v31 = vsel %vm4881_vm9, %v11078_v53, %v4857_v60 }
 0xbb7   :  { %v4757_v48 = vrot.slane %v4756_v49, 2  ;;  %v4829_v27 = vrot.slane %v4828_v2, 2  ;;  %v4882_v14 = vsel %vm4881_vm9, %v11079_v0, %v4849_v58  ;;  %v4823_v61 = vadd.f32 %v4822_v57, %v4821_v59 }
 0xbb8   :  { %v4840_v26 = vrot.slane %v4839_v4, 1  ;;  %v4751_v41 = vadd.f32 %v4750_v50, %v4749_v39  ;;  %v4768_v40 = vrot.slane %v4767_v19, 1  ;;  %v4861_v6 = vmul.f32 %v11077_v9, %v4814_v18 }
 0xbb9   :  { %v4758_v30 = vadd.f32 %v4757_v48, %v4756_v49  ;;  %v4830_v55 = vadd.f32 %v4829_v27, %v4828_v2  ;;  %vm4887_vm13 = vcmask 1044484   ;;  %v4896_v20 = vsel %vm4883_vm10, %v4859_v51, %v4895_v31 }
 0xbba   :  { %v4853_v63 = vmul.f32 %v11077_v9, %v4742_v15  ;;  %v4884_v37 = vsel %vm4883_vm10, %v11080_v7, %v4882_v14  ;;  %v4897_v3 = vsel %vm4885_vm11, %v4860_v5, %v4896_v20  ;;  %v4841_v39 = vadd.f32 %v4840_v26, %v4839_v4  ;;  %v11084_v4 = vld [vmem:[#allocation329_spill] sm:$0xff] }
 0xbbb   :  { %v4831_v11 = vrot.slane %v4830_v55, 1  ;;  %v4759_v46 = vrot.slane %v4758_v30, 1  ;;  %v4886_v33 = vsel %vm4885_vm11, %v4852_v56, %v4884_v37  ;;  %v4862_v59 = vmul.f32 %v11077_v9, %v4823_v61 }
 0xbbc   :  { %v4769_v12 = vadd.f32 %v4768_v40, %v4767_v19  ;;  %v4854_v25 = vmul.f32 %v11077_v9, %v4751_v41  ;;  %vm4889_vm14 = vcmask 1045509   ;;  %vm4891_vm15 = vcmask 1046534  }
 0xbbd   :  { %v4832_v24 = vadd.f32 %v4831_v11, %v4830_v55  ;;  %v4760_v23 = vadd.f32 %v4759_v46, %v4758_v30  ;;  %v4898_v52 = vsel %vm4887_vm13, %v4861_v6, %v4897_v3  ;;  %vm4893_vm0 = vcmask 1047559  }
 0xbbe   :  { %v4888_v17 = vsel %vm4887_vm13, %v4853_v63, %v4886_v33  ;;  %v4864_v47 = vmul.f32 %v11077_v9, %v4841_v39  ;;  %v4899_v51 = vsel %vm4889_vm14, %v4862_v59, %v4898_v52  ;;  %v4856_v58 = vmul.f32 %v11077_v9, %v4769_v12 }
 0xbbf   :  { %v4863_v32 = vmul.f32 %v11077_v9, %v4832_v24  ;;  %v4855_v45 = vmul.f32 %v11077_v9, %v4760_v23  ;;  %v4890_v16 = vsel %vm4889_vm14, %v4854_v25, %v4888_v17  ;;  %v11081_v50 = vmov 5  }
 0xbc0   :  { %v11082_v57 = vmov 4   ;;  %v11083_v9 = vmov 6   ;;  %vm4908_vm1 = vcmask 23552   ;;  %vm4911_vm2 = vcmask 433152  }
 0xbc1   :  { %v4900_v10 = vsel %vm4891_vm15, %v4863_v32, %v4899_v51  ;;  %v4892_v60 = vsel %vm4891_vm15, %v4855_v45, %v4890_v16  ;;  %vm5283_vm15 = vcmask 58368  }
 0xbc2   :  { %v4901_v29 = vsel %vm4893_vm0, %v4864_v47, %v4900_v10  ;;  %v4894_v13 = vsel %vm4893_vm0, %v4856_v58, %v4892_v60 }
 0xbc3   :  { %4904 = vrot.lane.b32.xlu2 %v4901_v29, %s5651_s3  ;;  %4902 = vrot.lane.b32.xlu1 %v4894_v13, %s5651_s3 }
 0xbcb   :  { %4947 = vperm.xlu2 %5423, %v9965_v35   ;;  %4931 = vperm.xlu1 %5422, %v9965_v35  }
 0xbd3   :  { %5426 = vset.pattern.permute.xlu2 %v11081_v50  ;;  %5425 = vset.pattern.permute.xlu1 %v11082_v57 }
 0xbd4   :  { %4995 = vperm.xlu2 %5426, %v9965_v35   ;;  %4979 = vperm.xlu1 %5425, %v9965_v35  }
 0xbdc   :  { %5428 = vset.pattern.permute.xlu2 %v11075_v8  ;;  %5427 = vset.pattern.permute.xlu1 %v11083_v9 }
 0xbdd   :  { %4923 = vperm.xlu2 %5428, %v9965_v35   ;;  %5011 = vperm.xlu1 %5427, %v9965_v35  }
 0xbe5   :  { %5430 = vset.pattern.permute.xlu2 %v11084_v4  ;;  %5432 = vset.pattern.permute.xlu1 %v11075_v8 }
 0xc09   :  { %v4964_v49 = vpop.permute.xlu0 %4963 }
 0xc18   :  { %v4919_v37 = vpop.permute.xlu0 %4918 }
 0xc1d   :  { %v4905_v18 = vpop.permute.xlu2 %4904 }
 0xc1e   :  { %v4910_v15 = vsel %vm4908_vm1, 0.0, %v4905_v18 }
 0xc1f   :  { %v4913_v48 = vsel %vm4911_vm2, %v4910_v15, 0.0 }
 0xc20   :  { %v4967_v26 = vmul.f32 %v4964_v49, %v4913_v48 }
 0xc25   :  { %v4948_v35 = vpop.permute.xlu2 %4947 }
 0xc26   :  { %v4951_v8 = vmul.f32 %v4948_v35, %v4913_v48 }
 0xc2e   :  { %v4996_v55 = vpop.permute.xlu2 %4995 }
 0xc2f   :  { %v4999_v6 = vmul.f32 %v4996_v55, %v4913_v48 }
 0xc35   :  { %v4903_v19 = vpop.permute.xlu1 %4902 }
 0xc36   :  { %v4909_v56 = vsel %vm4908_vm1, 0.0, %v4903_v19 }
 0xc37   :  { %v4912_v2 = vsel %vm4911_vm2, %v4909_v56, 0.0  ;;  %v4924_v7 = vpop.permute.xlu2 %4923 }
 0xc38   :  { %v4966_v5 = vmul.f32 %v4964_v49, %v4912_v2  ;;  %v4950_v14 = vmul.f32 %v4948_v35, %v4912_v2  ;;  %v4998_v20 = vmul.f32 %v4996_v55, %v4912_v2  ;;  %v4926_v46 = vmul.f32 %v4924_v7, %v4912_v2 }
 0xc39   :  { %v4927_v25 = vmul.f32 %v4924_v7, %v4913_v48 }
 0xc3a   :  { %4970 = vrot.lane.b32.xlu0 %v4966_v5, %s5627_s12  ;;  %v4928_v12 = vadd.f32 %v4926_v46, %v4919_v37 }
 0xc3b   :  { %v4929_v45 = vadd.f32 %v4927_v25, %v4919_v37 }
 0xc3d   :  { %v4932_v27 = vpop.permute.xlu1 %4931 }
 0xc3e   :  { %v4934_v53 = vmul.f32 %v4932_v27, %v4912_v2  ;;  %v4935_v31 = vmul.f32 %v4932_v27, %v4913_v48 }
 0xc40   :  { %4940 = vrot.lane.b32.xlu2 %v4935_v31, %s5623_s8  ;;  %4938 = vrot.lane.b32.xlu1 %v4934_v53, %s5623_s8 }
 0xc46   :  { %v4980_v0 = vpop.permute.xlu1 %4979 }
 0xc47   :  { %v4983_v61 = vmul.f32 %v4980_v0, %v4913_v48  ;;  %v4982_v41 = vmul.f32 %v4980_v0, %v4912_v2 }
 0xc48   :  { %4956 = vrot.lane.b32.xlu2 %v4951_v8, %s5625_s11  ;;  %4954 = vrot.lane.b32.xlu1 %v4950_v14, %s5625_s11 }
 0xc49   :  { %4988 = vrot.lane.b32.xlu0 %v4983_v61, %s5629_s13 }
 0xc4f   :  { %v5012_v40 = vpop.permute.xlu1 %5011 }
 0xc50   :  { %v5014_v30 = vmul.f32 %v5012_v40, %v4912_v2  ;;  %4972 = vrot.lane.b32.xlu1 %v4967_v26, %s5627_s12  ;;  %4986 = vrot.lane.b32.xlu2 %v4982_v41, %s5629_s13  ;;  %v5015_v63 = vmul.f32 %v5012_v40, %v4913_v48 }
 0xc52   :  { %5018 = vrot.lane.b32.xlu0 %v5014_v30, %s5633_s23 }
 0xc58   :  { %5002 = vrot.lane.b32.xlu1 %v4998_v20, %s5631_s14  ;;  %5004 = vrot.lane.b32.xlu2 %v4999_v6, %s5631_s14 }
 0xc60   :  { %5020 = vrot.lane.b32.xlu1 %v5015_v63, %s5633_s23 }
 0xc9a   :  { %v4941_v11 = vpop.permute.xlu2 %4940 }
 0xc9b   :  { %v4945_v17 = vadd.f32 %v4941_v11, %v4929_v45 }
 0xca2   :  { %v4957_v59 = vpop.permute.xlu2 %4956 }
 0xca3   :  { %v4961_v58 = vadd.f32 %v4957_v59, %v4945_v17 }
 0xcaa   :  { %v4987_v51 = vpop.permute.xlu2 %4986 }
 0xcac   :  { %v4971_v33 = vpop.permute.xlu0 %4970 }
 0xcb2   :  { %v4939_v3 = vpop.permute.xlu1 %4938  ;;  %v5005_v4 = vpop.permute.xlu2 %5004 }
 0xcb3   :  { %v4944_v24 = vadd.f32 %v4939_v3, %v4928_v12 }
 0xcba   :  { %v4955_v39 = vpop.permute.xlu1 %4954 }
 0xcbb   :  { %v4960_v23 = vadd.f32 %v4955_v39, %v4944_v24  ;;  %v4989_v52 = vpop.permute.xlu0 %4988 }
 0xcbd   :  { %v4976_v47 = vadd.f32 %v4971_v33, %v4960_v23 }
 0xcbf   :  { %v4992_v10 = vadd.f32 %v4987_v51, %v4976_v47 }
 0xcc2   :  { %v4973_v32 = vpop.permute.xlu1 %4972 }
 0xcc3   :  { %v4977_v16 = vadd.f32 %v4973_v32, %v4961_v58  ;;  %v11085_v58 = vld [vmem:[#allocation87_spill] sm:$0xff] }
 0xcc4   :  { %v5019_v13 = vpop.permute.xlu0 %5018 }
 0xcc5   :  { %v4993_v50 = vadd.f32 %v4989_v52, %v4977_v16 }
 0xcc7   :  { %v5009_v19 = vadd.f32 %v5005_v4, %v4993_v50  ;;  %v11087_v50 = vld [vmem:[#allocation213_spill] sm:$0xff] }
 0xcca   :  { %v5003_v60 = vpop.permute.xlu1 %5002 }
 0xccb   :  { %v5008_v29 = vadd.f32 %v5003_v60, %v4992_v10  ;;  %v11086_v60 = vld [vmem:[#allocation30_spill] sm:$0xff] }
 0xccd   :  { %v5024_v57 = vadd.f32 %v5019_v13, %v5008_v29 }
 0xccf   :  { %v5026_v9 = vsel %vm4697_vm12, %v5024_v57, -inf }
 0xcd0   :  { %5027 = vmax.xlane.f32.xlu2 %v5026_v9 }
 0xcd2   :  { %v5021_v56 = vpop.permute.xlu1 %5020 }
 0xcd3   :  { %v5025_v18 = vadd.f32 %v5021_v56, %v5009_v19  ;;  %v11088_v19 = vld [vmem:[#allocation112_spill] sm:$0xff] }
 0xcd5   :  { %v5029_v49 = vsel %vm4697_vm12, %v5025_v18, -inf }
 0xcd6   :  { %5030 = vmax.xlane.f32.xlu0 %v5029_v49 }
 0xd43   :  { %v5028_v2 = vpop.xlane.xlu2 %5027 }
 0xd44   :  { %v5032_v5 = vsub.f32 %v5024_v57, %v5028_v2 }
 0xd46   :  { %v5034_v15 = vmul.f32 1.442695, %v5032_v5  ;;  %v11090_v5 = vld [vmem:[#allocation268_spill] sm:$0xff] }
 0xd48   :  { %5565 = vpow2.f32 %v5034_v15 }
 0xd49   :  { %v5031_v48 = vpop.xlane.xlu0 %5030 }
 0xd4a   :  { %v5033_v27 = vsub.f32 %v5025_v18, %v5031_v48  ;;  %v11089_v18 = vld [vmem:[#allocation319_spill] sm:$0xff] }
 0xd4b   :  { %v11091_v48 = vld [vmem:[#allocation75_spill] sm:$0xff] }
 0xd4c   :  { %v5036_v53 = vmul.f32 1.442695, %v5033_v27 }
 0xd4e   :  { %v5566_v31 = vpop.eup %5565  ;;  %5567 = vpow2.f32 %v5036_v53 }
 0xd4f   :  { %v5038_v35 = vsel %vm4697_vm12, %v5566_v31, 0.0 }
 0xd50   :  { %5039 = vadd.xlane.f32.xlu1 %v5038_v35  ;;  %v11093_v35 = vld [vmem:[#allocation73_spill] sm:$0xff] }
 0xd54   :  { %v5568_v8 = vpop.eup %5567 }
 0xd55   :  { %v5041_v0 = vsel %vm4697_vm12, %v5568_v8, 0.0 }
 0xd56   :  { %5042 = vadd.xlane.f32.xlu2 %v5041_v0 }
 0xdc3   :  { %v5040_v14 = vpop.xlane.xlu1 %5039 }
 0xdc4   :  { %5569 = vrcp.f32 %v5040_v14 }
 0xdc9   :  { %v5043_v61 = vpop.xlane.xlu2 %5042 }
 0xdca   :  { %v5570_v26 = vpop.eup %5569  ;;  %5571 = vrcp.f32 %v5043_v61  ;;  %v11094_v61 = vld [vmem:[#allocation218_spill] sm:$0xff] }
 0xdcb   :  { %v5046_v41 = vmul.f32 %v5570_v26, %v5566_v31 }
 0xdcd   :  { %v10097_v40 = vmul.f32 8.0, %v5046_v41  ;;  %v11095_v41 = vld [vmem:[#allocation291_spill] sm:$0xff] }
 0xdcf   :  { %v5058_v30 = vrot.slane %v10097_v40, 7  ;;  %v5057_v55 = vrot.slane %v10097_v40, 6  ;;  %v5056_v3 = vrot.slane %v10097_v40, 5  ;;  %v5055_v24 = vrot.slane %v10097_v40, 4 }
 0xdd0   :  { %v5572_v6 = vpop.eup %5571 }
 0xdd1   :  { %v5047_v20 = vmul.f32 %v5572_v6, %v5568_v8  ;;  %v5073_v63 = vperm.slane %v5058_v30, 0  ;;  %v5072_v11 = vperm.slane %v5057_v55, 0  ;;  %v5071_v25 = vperm.slane %v5056_v3, 0  ;;  %v11096_v6 = vld [vmem:[#allocation292_spill] sm:$0xff] }
 0xdd2   :  { %v5070_v17 = vperm.slane %v5055_v24, 0  ;;  %v5066_v55 = vperm.slane %v10097_v40, 0  ;;  %v11098_v3 = vld [vmem:[#allocation184_spill] sm:$0xff] }
 0xdd3   :  { %v10101_v7 = vmul.f32 8.0, %v5047_v20  ;;  %v5113_v37 = vmul.f32 %v5073_v63, %v9988_v34  ;;  %v5112_v46 = vmul.f32 %v5073_v63, %v9978_v44  ;;  %v5111_v59 = vmul.f32 %v5072_v11, %v10034_v1  ;;  %v11097_v63 = vld [vmem:[#allocation97_spill] sm:$0xff] }
 0xdd4   :  { %v5110_v34 = vmul.f32 %v5072_v11, %v10020_v21  ;;  %v5109_v44 = vmul.f32 %v5071_v25, %v9951_v62  ;;  %v5054_v1 = vrot.slane %v10097_v40, 3  ;;  %v5108_v47 = vmul.f32 %v5071_v25, %v9954_v36  ;;  %v11101_v25 = vld [vmem:[#allocation40_spill] sm:$0xff] }
 0xdd5   :  { %5131 = vmatpush.msra.mxu0 %v5113_v37  ;;  %v5065_v33 = vrot.slane %v10101_v7, 7  ;;  %v5064_v39 = vrot.slane %v10101_v7, 6  ;;  %v5063_v32 = vrot.slane %v10101_v7, 5  ;;  %v5107_v16 = vmul.f32 %v5070_v17, %v11085_v58 }
 0xdd6   :  { %v5069_v10 = vperm.slane %v5054_v1, 0  ;;  %v5106_v29 = vmul.f32 %v5070_v17, %v11086_v60  ;;  %v5059_v14 = vrot.slane %v10101_v7, 1 }
 0xdd7   :  { %5132 = vmatpush.msra.mxu0 %v5112_v46  ;;  %v5081_v12 = vperm.slane %v5065_v33, 0  ;;  %v5080_v52 = vperm.slane %v5064_v39, 0  ;;  %v5079_v51 = vperm.slane %v5063_v32, 0  ;;  %v5099_v46 = vmul.f32 %v5066_v55, %v11098_v3  ;;  %v11099_v33 = vld [vmem:[#allocation204_spill] sm:$0xff]  ;;  %v11103_v32 = vld [vmem:[#allocation39_spill] sm:$0xff] }
 0xdd8   :  { %v5105_v57 = vmul.f32 %v5069_v10, %v11087_v50  ;;  %v5104_v56 = vmul.f32 %v5069_v10, %v11088_v19  ;;  %v5075_v11 = vperm.slane %v5059_v14, 0 }
 0xdd9   :  { %5133 = vmatpush.msra.mxu0 %v5111_v59  ;;  %v5129_v23 = vmul.f32 %v5081_v12, %v9985_v22  ;;  %v5128_v45 = vmul.f32 %v5081_v12, %v9980_v43  ;;  %v5127_v21 = vmul.f32 %v5080_v52, %v10036_v54  ;;  %v5062_v22 = vrot.slane %v10101_v7, 4  ;;  %v11100_v59 = vld [vmem:[#allocation228_spill] sm:$0xff] }
 0xdda   :  { %v5126_v62 = vmul.f32 %v5080_v52, %v10024_v38  ;;  %v5053_v43 = vrot.slane %v10097_v40, 2  ;;  %v5125_v36 = vmul.f32 %v5079_v51, %v9960_v42  ;;  %v5061_v54 = vrot.slane %v10101_v7, 3 }
 0xddb   :  { %5134 = vmatpush.msra.mxu0 %v5110_v34  ;;  %5191 = vmatpush.msra.mxu1 %v5129_v23  ;;  %v5078_v13 = vperm.slane %v5062_v22, 0  ;;  %v5124_v9 = vmul.f32 %v5079_v51, %v9957_v28  ;;  %v5052_v38 = vrot.slane %v10097_v40, 1  ;;  %v5060_v42 = vrot.slane %v10101_v7, 2  ;;  %v11092_v28 = vld [vmem:[#allocation252_spill] sm:$0xff]  ;;  %v11102_v23 = vld [vmem:[#allocation143_spill] sm:$0xff] }
 0xddc   :  { %v5068_v4 = vperm.slane %v5053_v43, 0  ;;  %v5077_v2 = vperm.slane %v5061_v54, 0  ;;  %v5098_v12 = vmul.f32 %v5066_v55, %v11100_v59  ;;  %v5117_v24 = vmul.f32 %v5075_v11, %v11101_v25  ;;  %v5130_v40 = vld [vmem:[%s10192_s4] sm:$0xff] }
 0xddd   :  { %5135 = vmatpush.msra.mxu0 %v5109_v44  ;;  %5192 = vmatpush.msra.mxu1 %v5128_v45  ;;  %v5123_v49 = vmul.f32 %v5078_v13, %v11089_v18  ;;  %v5122_v27 = vmul.f32 %v5078_v13, %v11091_v48  ;;  %v5067_v53 = vperm.slane %v5052_v38, 0  ;;  %v5076_v0 = vperm.slane %v5060_v42, 0  ;;  %v11104_v45 = vld [vmem:[#allocation245_spill] sm:$0xff] }
 0xdde   :  { %v5103_v15 = vmul.f32 %v5068_v4, %v11090_v5  ;;  %v5102_v31 = vmul.f32 %v5068_v4, %v11092_v28  ;;  %v5121_v8 = vmul.f32 %v5077_v2, %v11093_v35  ;;  %v5120_v30 = vmul.f32 %v5077_v2, %v11095_v41 }
 0xddf   :  { %5136 = vmatpush.msra.mxu0 %v5108_v47  ;;  %5193 = vmatpush.msra.mxu1 %v5127_v21  ;;  %v5101_v26 = vmul.f32 %v5067_v53, %v11094_v61  ;;  %v5100_v20 = vmul.f32 %v5067_v53, %v11096_v6  ;;  %v5119_v37 = vmul.f32 %v5076_v0, %v11097_v63  ;;  %v5074_v34 = vperm.slane %v10101_v7, 0 }
 0xde0   :  { %v5118_v39 = vmul.f32 %v5076_v0, %v11099_v33  ;;  %v5116_v52 = vmul.f32 %v5075_v11, %v11102_v23 }
 0xde1   :  { %5137 = vmatpush.msra.mxu0 %v5107_v16  ;;  %5194 = vmatpush.msra.mxu1 %v5126_v62  ;;  %v5115_v44 = vmul.f32 %v5074_v34, %v11103_v32  ;;  %v5114_v17 = vmul.f32 %v5074_v34, %v11104_v45 }
 0xde3   :  { %5138 = vmatpush.msra.mxu0 %v5106_v29  ;;  %5195 = vmatpush.msra.mxu1 %v5125_v36 }
 0xde5   :  { %5139 = vmatpush.msra.mxu0 %v5105_v57  ;;  %5196 = vmatpush.msra.mxu1 %v5124_v9 }
 0xde7   :  { %5140 = vmatpush.msra.mxu0 %v5104_v56  ;;  %5197 = vmatpush.msra.mxu1 %v5123_v49 }
 0xde9   :  { %5141 = vmatpush.msra.mxu0 %v5103_v15  ;;  %5198 = vmatpush.msra.mxu1 %v5122_v27 }
 0xdeb   :  { %5142 = vmatpush.msra.mxu0 %v5102_v31  ;;  %5199 = vmatpush.msra.mxu1 %v5121_v8 }
 0xded   :  { %5143 = vmatpush.msra.mxu0 %v5101_v26  ;;  %5200 = vmatpush.msra.mxu1 %v5120_v30 }
 0xdef   :  { %5144 = vmatpush.msra.mxu0 %v5100_v20  ;;  %5201 = vmatpush.msra.mxu1 %v5119_v37 }
 0xdf1   :  { %5145 = vmatpush.msra.mxu0 %v5099_v46  ;;  %5202 = vmatpush.msra.mxu1 %v5118_v39 }
 0xdf3   :  { %5146 = vmatpush.msra.mxu0 %v5098_v12  ;;  %5203 = vmatpush.msra.mxu1 %v5117_v24 }
 0xdf4   :  { %5147 = vmatmul.f32.vlgmr.msra.gmra.mxu0 %v5130_v40 }
 0xdf5   :  { %5204 = vmatpush.msra.mxu1 %v5116_v52 }
 0xdf7   :  { %5205 = vmatpush.msra.mxu1 %v5115_v44 }
 0xdf9   :  { %5206 = vmatpush.msra.mxu1 %v5114_v17  ;;  %v5252_v17 = vld [vmem:[%s10193_s5 + $0x8] sm:$0xff] }
 0xdfa   :  { %5207 = vmatmul.f32.vlgmr.msra.gmra.mxu1 %v5130_v40 }
 0xe71   :  { %v10152_v1 = vpop.f32.mrf.mxu0 }
 0xe72   :  { %v10155_v47 = vmul.f32 0.70710677, %v10152_v1  ;;  %v5151_v32 = vmul.f32 0.5, %v10152_v1 }
 0xe74   :  { %v5153_v7 = vand.u32 2147483647, %v10155_v47  ;;  %vm5186_vm13 = vcmp.ge.f32.partialorder %v10155_v47, 0.0 }
 0xe76   :  { %v5154_v21 = vmul.f32 0.3275911, %v5153_v7  ;;  %v5180_v56 = vsub.f32 0.0, %v5153_v7 }
 0xe77   :  { %v10158_v51 = vpop.f32.mrf.mxu1 }
 0xe78   :  { %v5155_v22 = vadd.f32 1.0, %v5154_v21  ;;  %v10161_v58 = vmul.f32 0.70710677, %v10158_v51  ;;  %v5181_v48 = vmul.f32 %v5180_v56, %v5153_v7  ;;  %v5251_v7 = vld [vmem:[%s10193_s5] sm:$0xff] }
 0xe7a   :  { %5573 = vrcp.f32 %v5155_v22  ;;  %v5213_v16 = vand.u32 2147483647, %v10161_v58  ;;  %v5167_v36 = vand.u32 2147483648, %v5155_v22  ;;  %v5165_v54 = vand.u32 2147483647, %v5155_v22 }
 0xe7b   :  { %vm5161_vm4 = vweird.f32 %v5155_v22  ;;  %v5182_v14 = vmul.f32 1.442695, %v5181_v48  ;;  %vm5246_vm14 = vcmp.ge.f32.partialorder %v10161_v58, 0.0  ;;  %v5434_v58 = vld [vmem:[%s10194_s6] ss:$0 sm:$0xff]  ;;  %s5652_s6 = smov [#allocation2]  }
 0xe7c   :  { %v5214_v62 = vmul.f32 0.3275911, %v5213_v16  ;;  %v5168_v9 = vor.u32 1.1754944e-38, %v5167_v36  ;;  %vm5166_vm6 = vcmp.eq.f32.partialorder %v5165_v54, 8.507059e+37  ;;  %v5240_v0 = vsub.f32 0.0, %v5213_v16  ;;  %s5321_s17 = sshll.u32 %s5652_s6, 4  ;;  %s5322_s17 = int_to_ptr.vmem [resolvable:$true] %s5321_s17 }
 0xe7e   :  { %v5215_v10 = vadd.f32 1.0, %v5214_v62  ;;  %v5241_v55 = vmul.f32 %v5240_v0, %v5213_v16 }
 0xe80   :  { %v5574_v43 = vpop.eup %5573  ;;  %5575 = vrcp.f32 %v5215_v10  ;;  %v5227_v2 = vand.u32 2147483648, %v5215_v10  ;;  %v5225_v5 = vand.u32 2147483647, %v5215_v10  ;;  %vm5221_vm8 = vweird.f32 %v5215_v10 }
 0xe81   :  { %v5157_v60 = vmul.f32 %v5574_v43, %v5155_v22  ;;  %vm5162_vm3 = vweird.f32 %v5574_v43  ;;  %5577 = vpow2.f32 %v5182_v14  ;;  %v5242_v11 = vmul.f32 1.442695, %v5241_v55 }
 0xe82   :  { %vm5163_vm5 = vmor %vm5161_vm4, %vm5162_vm3  ;;  %v5228_v28 = vor.u32 1.1754944e-38, %v5227_v2  ;;  %vm5226_vm11 = vcmp.eq.f32.partialorder %v5225_v5, 8.507059e+37 }
 0xe83   :  { %v5158_v29 = vsub.f32 1.0, %v5157_v60  ;;  %5579 = vpow2.f32 %v5242_v11  ;;  %v5211_v60 = vmul.f32 0.5, %v10158_v51 }
 0xe85   :  { %v5159_v13 = vmul.f32 %v5574_v43, %v5158_v29 }
 0xe86   :  { %v5576_v50 = vpop.eup %5575 }
 0xe87   :  { %v5160_v57 = vadd.f32 %v5574_v43, %v5159_v13  ;;  %v5217_v4 = vmul.f32 %v5576_v50, %v5215_v10  ;;  %vm5222_vm7 = vweird.f32 %v5576_v50  ;;  %v5578_v33 = vpop.eup %5577 }
 0xe88   :  { %vm5223_vm10 = vmor %vm5221_vm8, %vm5222_vm7 }
 0xe89   :  { %v5164_v38 = vsel %vm5163_vm5, %v5574_v43, %v5160_v57  ;;  %v5218_v18 = vsub.f32 1.0, %v5217_v4  ;;  %v5580_v23 = vpop.eup %5579 }
 0xe8a   :  { %v5169_v19 = vsel %vm5166_vm6, %v5168_v9, %v5164_v38  ;;  %v11105_v9 = vlaneseq }
 0xe8b   :  { %v5171_v49 = vmul.f32 1.0614054, %v5169_v19  ;;  %v5219_v42 = vmul.f32 %v5576_v50, %v5218_v18 }
 0xe8c   :  { %v5274_v4 = vand.u32 127, %v11105_v9 }
 0xe8d   :  { %v5172_v15 = vadd.f32 -1.4531521, %v5171_v49  ;;  %v5220_v27 = vadd.f32 %v5576_v50, %v5219_v42 }
 0xe8f   :  { %v5173_v53 = vmul.f32 %v5172_v15, %v5169_v19  ;;  %v5224_v31 = vsel %vm5223_vm10, %v5576_v50, %v5220_v27 }
 0xe90   :  { %v5229_v8 = vsel %vm5226_vm11, %v5228_v28, %v5224_v31 }
 0xe91   :  { %v5174_v35 = vadd.f32 1.4214138, %v5173_v53  ;;  %v5231_v61 = vmul.f32 1.0614054, %v5229_v8 }
 0xe93   :  { %v5175_v26 = vmul.f32 %v5174_v35, %v5169_v19  ;;  %v5232_v41 = vadd.f32 -1.4531521, %v5231_v61 }
 0xe95   :  { %v5176_v30 = vadd.f32 -0.28449672, %v5175_v26  ;;  %v5233_v6 = vmul.f32 %v5232_v41, %v5229_v8 }
 0xe97   :  { %v5177_v20 = vmul.f32 %v5176_v30, %v5169_v19  ;;  %v5234_v63 = vadd.f32 1.4214138, %v5233_v6 }
 0xe99   :  { %v5178_v37 = vadd.f32 0.2548296, %v5177_v20  ;;  %v5235_v3 = vmul.f32 %v5234_v63, %v5229_v8 }
 0xe9b   :  { %v5179_v46 = vmul.f32 %v5178_v37, %v5169_v19  ;;  %v5236_v39 = vadd.f32 -0.28449672, %v5235_v3 }
 0xe9d   :  { %v5184_v59 = vmul.f32 %v5578_v33, %v5179_v46  ;;  %v5237_v12 = vmul.f32 %v5236_v39, %v5229_v8 }
 0xe9f   :  { %v5185_v25 = vsub.f32 1.0, %v5184_v59  ;;  %v5238_v24 = vadd.f32 0.2548296, %v5237_v12 }
 0xea1   :  { %v5187_v40 = vsub.f32 0.0, %v5185_v25  ;;  %v5239_v34 = vmul.f32 %v5238_v24, %v5229_v8 }
 0xea3   :  { %v5188_v52 = vsel %vm5186_vm13, %v5185_v25, %v5187_v40  ;;  %v5244_v45 = vmul.f32 %v5580_v23, %v5239_v34 }
 0xea4   :  { %v5189_v44 = vadd.f32 1.0, %v5188_v52 }
 0xea5   :  { %v5245_v22 = vsub.f32 1.0, %v5244_v45 }
 0xea6   :  { %v5190_v21 = vmul.f32 %v5189_v44, %v5151_v32 }
 0xea7   :  { %v5247_v16 = vsub.f32 0.0, %v5245_v22 }
 0xea8   :  { %v5254_v62 = vmul.f32 %v5252_v17, %v5190_v21  ;;  %v5253_v47 = vmul.f32 %v5251_v7, %v5190_v21 }
 0xea9   :  { %v5248_v10 = vsel %vm5246_vm14, %v5245_v22, %v5247_v16 }
 0xeaa   :  { %v5260_v1 = vsel %vm4697_vm12, %v5254_v62, 0.0  ;;  %v5257_v43 = vsel %vm4697_vm12, %v5253_v47, 0.0  ;;  %v5249_v29 = vadd.f32 1.0, %v5248_v10 }
 0xeab   :  { %5261 = vadd.xlane.f32.xlu0 %v5260_v1  ;;  %5258 = vadd.xlane.f32.xlu2 %v5257_v43 }
 0xeac   :  { %v5250_v36 = vmul.f32 %v5249_v29, %v5211_v60 }
 0xeae   :  { %v5255_v13 = vmul.f32 %v5251_v7, %v5250_v36  ;;  %v5256_v54 = vmul.f32 %v5252_v17, %v5250_v36 }
 0xeb0   :  { %v5263_v50 = vsel %vm4697_vm12, %v5255_v13, 0.0  ;;  %v5266_v57 = vsel %vm4697_vm12, %v5256_v54, 0.0  ;;  %vm5314_vm12 = vcmask 9216  }
 0xeb1   :  { %5264 = vadd.xlane.f32.xlu1 %v5263_v50 }
 0xeb3   :  { %5267 = vadd.xlane.f32.xlu2 %v5266_v57 }
 0xecb   :  { %5297 = vperm.xlu2 %5430, %v5434_v58  }
 0xf1e   :  { %v5262_v51 = vpop.xlane.xlu0 %5261  ;;  %v5259_v38 = vpop.xlane.xlu2 %5258 }
 0xf1f   :  { %v5276_v19 = vperm.slane %v5262_v51, %v5274_v4  ;;  %v5275_v56 = vperm.slane %v5259_v38, %v5274_v4 }
 0xf21   :  { %v5279_v18 = vsel %vm4881_vm9, %v5276_v19, %v5275_v56 }
 0xf22   :  { %v5284_v49 = vsel %vm5283_vm15, %v5279_v18, 0.0 }
 0xf23   :  { %5285 = vadd.xlane.f32.xlu0 %v5284_v49 }
 0xf24   :  { %v5265_v2 = vpop.xlane.xlu1 %5264 }
 0xf25   :  { %v5277_v5 = vperm.slane %v5265_v2, %v5274_v4 }
 0xf26   :  { %v5268_v42 = vpop.xlane.xlu2 %5267 }
 0xf27   :  { %v5278_v15 = vperm.slane %v5268_v42, %v5274_v4 }
 0xf29   :  { %v5280_v48 = vsel %vm4881_vm9, %v5278_v15, %v5277_v5 }
 0xf2a   :  { %v5287_v27 = vsel %vm5283_vm15, %v5280_v48, 0.0 }
 0xf2b   :  { %5288 = vadd.xlane.f32.xlu1 %v5287_v27 }
 0xf2e   :  { %v5298_v53 = vpop.permute.xlu2 %5297 }
 0xf96   :  { %v5286_v28 = vpop.xlane.xlu0 %5285 }
 0xf97   :  { %v5300_v31 = vadd.f32 %v5298_v53, %v5286_v28 }
 0xf99   :  { %5305 = vperm.xlu0 %5431, %v5300_v31  }
 0xf9e   :  { %v5289_v35 = vpop.xlane.xlu1 %5288 }
 0xf9f   :  { %v5301_v8 = vadd.f32 %v5298_v53, %v5289_v35 }
 0xfa1   :  { %5308 = vperm.xlu1 %5432, %v5301_v8  }
0x100b   :  { %v5306_v0 = vpop.permute.xlu0 %5305 }
0x100c   :  { %v5310_v61 = vperm.slane %v5306_v0, %v5274_v4 }
0x1013   :  { %v5309_v14 = vpop.permute.xlu1 %5308 }
0x1014   :  { %v5311_v26 = vperm.slane %v5309_v14, %v5274_v4 }
0x1016   :  { %v5312_v41 = vsel %vm4881_vm9, %v5311_v26, %v5310_v61 }
0x1017   :  { %5315 = vst.msk [vmem:[#allocation2] sm:$0x3] %vm5314_vm12, %v5312_v41 }
0x1018   :  { %5326 = dma.vmem_to_hbm [thread:$0]  %s5322_s17, 32, %s5324_s20, [#allocation3]  }
0x1019   :  { %5619 = dma.done.wait [#allocation3], 32  }
0x101a   :  { %5620 = vsyncadd [#allocation3], 4294967264 }
0x101b   :  { %5331 = vsyncpa [#allocation3], 1 }

</bundles_post_ra>
